<compile_context>
chip_gen: v7x
topology: tpu7x:2x2x1
jax: 0.10.0
libtpu: 0.0.40
codegen_flags: <defaults>
</compile_context>

<pallas_src>
import jax
import jax.numpy as jnp
from jax import lax
from jax.experimental import pallas as pl
from jax.experimental.pallas import tpu as pltpu

BN_EPS = 1e-5      # torch.nn.BatchNorm1d default eps
NORM_EPS = 1e-12   # torch.nn.functional.normalize default eps
LANE = 128


def _round_up(x, m):
    return (x + m - 1) // m * m


def _mmb(a, b):
    """bf16 MXU matmul with f32 accumulation (dense head layers)."""
    return jnp.dot(a.astype(jnp.bfloat16), b.astype(jnp.bfloat16),
                   preferred_element_type=jnp.float32)


def _mm_nt(a, b):  # a (M,K), b (N,K) -> a @ b.T  (M,N), f32 (tiny prototype matmuls)
    return lax.dot_general(a, b, (((1,), (1,)), ((), ())),
                           preferred_element_type=jnp.float32)


def _mm_tn(a, b):  # a (K,M), b (K,N) -> a.T @ b  (M,N), f32
    return lax.dot_general(a, b, (((0,), (0,)), ((), ())),
                           preferred_element_type=jnp.float32)


# --------------------------------------------------------------------------- #
# Kernel 1: encoder (in-kernel im2col conv + bias + ReLU + global average pool)
# --------------------------------------------------------------------------- #
def encoder_kernel(xpad_ref, cw_ref, cb_ref, feat_ref):
    """3x3 conv (stride 1, pad 1) as 9 shifted sub-matmuls.

    xpad_ref: (tb, H+2, W+2, C) bf16 -- spatially zero-padded NHWC sample tile
    cw_ref:   (9, C, Ep) bf16        -- per-tap weights, out-channels padded to Ep
    cb_ref:   (1, Ep) f32            -- bias (zero-padded)
    feat_ref: (tb, Ep) bf16          -- globally average-pooled features
    """
    tb, ep = feat_ref.shape
    hp2, wp2, c = xpad_ref.shape[1], xpad_ref.shape[2], xpad_ref.shape[3]
    h_dim, w_dim = hp2 - 2, wp2 - 2
    m = tb * h_dim * w_dim

    cw = cw_ref[...]                                    # (9, C, Ep), resident in VMEM
    acc = jnp.zeros((m, ep), jnp.float32)
    for t in range(9):                                  # static unroll over the 3x3 taps
        di, dj = divmod(t, 3)
        # Shifted window of the padded tile; HBM is touched exactly once per tile,
        # the 9 overlapping reads below are VMEM-local.
        tap = xpad_ref[:, di:di + h_dim, dj:dj + w_dim, :].reshape(m, c)
        acc = acc + jnp.dot(tap, cw[t], preferred_element_type=jnp.float32)

    acc = jnp.maximum(acc + cb_ref[...], 0.0)
    # Global average pool: sum over the HW spatial rows, then multiply by 1/HW.
    # (h_dim * w_dim is a multiple of 8 in the demo so the reshape stays a view.)
    pooled = jnp.sum(acc.reshape(tb, h_dim * w_dim, ep), axis=1) * (1.0 / (h_dim * w_dim))
    feat_ref[...] = pooled.astype(feat_ref.dtype)


# --------------------------------------------------------------------------- #
# Kernel 2: heads + prototypes (small, single invocation)
# --------------------------------------------------------------------------- #
def head_kernel(scalars_ref,                                  # SMEM (2,) f32
                feat_ref,                                     # (2B, Ep) bf16
                pw1_ref, pg1_ref, pb1_ref, pw2_ref,
                qw1_ref, qg1_ref, qb1_ref, qw2_ref, qb2_ref,
                gf_ref,
                logits_ref, assign_ref, enc1_ref, gf_new_ref):
    inv_temperature = scalars_ref[0]
    beta = scalars_ref[1]

    feats = feat_ref[...]                 # (2B, Ep) bf16
    b = feats.shape[0] // 2

    def bn(x, gamma=None, bias=None):
        # BatchNorm1d in training mode: batch statistics, biased variance.
        mu = jnp.mean(x, axis=0, keepdims=True)
        var = jnp.mean((x - mu) * (x - mu), axis=0, keepdims=True)
        out = (x - mu) * lax.rsqrt(var + BN_EPS)
        if gamma is not None:
            out = out * gamma + bias
        return out

    def bn_per_view(x, gamma=None, bias=None):
        # Per-half (per-view) statistics == the two independent PyTorch forwards.
        return jnp.concatenate([bn(x[:b], gamma, bias), bn(x[b:], gamma, bias)], axis=0)

    def l2_normalize(x):
        # x / max(||x||, eps) via rsqrt (EUP slot, frees the VALU)
        ss = jnp.sum(x * x, axis=-1, keepdims=True)
        return x * lax.rsqrt(jnp.maximum(ss, NORM_EPS * NORM_EPS))

    def argmax_rows(x):
        # first-occurrence argmax along the last axis, kept 2-D: (B, G) -> (B, 1)
        col = lax.broadcasted_iota(jnp.int32, x.shape, 1)
        m = jnp.max(x, axis=-1, keepdims=True)
        idx = jnp.where(x >= m, col, x.shape[1])
        return jnp.minimum(jnp.min(idx, axis=-1, keepdims=True), x.shape[1] - 1)

    # Projection head (Linear -> BN(affine) -> ReLU -> Linear -> BN(no affine)).
    # Shared weights (momentum head is an identical deepcopy at init), so the
    # matmuls run once over all 2B rows; only the BN statistics stay per view.
    h = jnp.maximum(bn_per_view(_mmb(feats, pw1_ref[...]),
                                pg1_ref[...], pb1_ref[...]), 0.0)
    z = bn_per_view(_mmb(h, pw2_ref[...]))                    # (2B, P) f32
    z1 = z[:b]                                                # samples1_encoded
    z2 = z[b:]                                                # samples2_encoded (momentum)

    # Prediction head on view 1 only: Linear -> BN(affine) -> ReLU -> Linear(bias)
    g = jnp.maximum(bn(_mmb(z1, qw1_ref[...]), qg1_ref[...], qb1_ref[...]), 0.0)
    pr1 = _mmb(g, qw2_ref[...]) + qb2_ref[...]                # samples1_predicted

    # --- SMoGPrototypes: assignments use the *current* group features.
    gf = gf_ref[...]                                          # (G, P) f32
    gf_n = l2_normalize(gf)
    assign2 = argmax_rows(_mm_nt(l2_normalize(z2), gf_n))     # returned assignments
    assign1 = argmax_rows(_mm_nt(l2_normalize(z1), gf_n))     # drives the EMA update

    n_groups = gf.shape[0]
    onehot = (assign1 == lax.broadcasted_iota(
        jnp.int32, (b, n_groups), 1)).astype(jnp.float32)     # (B, G)
    sums = _mm_tn(onehot, z1)                                 # (G, P) group sums (raw z1)
    # Counts via a second tiny MXU matmul -- avoids an XLU lane->sublane transpose.
    counts = _mm_tn(onehot, jnp.ones((b, 1), jnp.float32))    # (G, 1)
    means = sums / jnp.maximum(counts, 1.0)
    # TODO(synk): lightly's reference yields NaN rows for empty groups; we keep the
    #             previous group features for empty groups instead.
    gf_new = jnp.where(counts > 0.0, beta * gf + (1.0 - beta) * means, gf)

    logits_ref[...] = _mm_nt(l2_normalize(pr1), l2_normalize(gf_new)) * inv_temperature
    assign_ref[...] = assign2
    enc1_ref[...] = z1
    gf_new_ref[...] = gf_new


# ------------------------------------------------------------------- glue ---
def _samples_per_tile(total, hw, target_rows=1024):
    """Samples per grid tile: a multiple of 8 (or the whole batch) that divides
    the batch, targets ~target_rows matmul rows per tile, and prefers an even
    grid length so both v7x TensorCores get balanced work."""
    cands = sorted({t for t in range(8, total + 1, 8) if total % t == 0} | {total})
    best = cands[0]
    for t in cands:
        if t * hw <= max(target_rows, hw):
            best = t
    if (total // best) % 2 == 1:
        for t in reversed(cands):
            if t < best and (total // t) % 2 == 0 and t * hw * 2 >= best * hw:
                best = t
                break
    # TODO(synk): very large spatial sizes need an additional spatial grid axis;
    #             this heuristic only tiles over samples.
    return best


def init_params(key, c_in, enc_dim, proj_hidden, proj_out,
                pred_hidden, pred_out, n_groups):
    """PyTorch-layout parameters for the synthetic encoder + SMoG heads."""
    ks = jax.random.split(key, 6)

    def dense(k, shape, scale=0.1):
        return jax.random.normal(k, shape, jnp.float32) * scale

    return dict(
        conv_w4=dense(ks[0], (enc_dim, c_in, 3, 3)),          # PyTorch (F, C, kh, kw)
        conv_b=jnp.zeros((enc_dim,), jnp.float32),
        proj_w1=dense(ks[1], (enc_dim, proj_hidden)),
        proj_g1=jnp.ones((1, proj_hidden), jnp.float32),
        proj_b1=jnp.zeros((1, proj_hidden), jnp.float32),
        proj_w2=dense(ks[2], (proj_hidden, proj_out)),
        pred_w1=dense(ks[3], (proj_out, pred_hidden)),
        pred_g1=jnp.ones((1, pred_hidden), jnp.float32),
        pred_b1=jnp.zeros((1, pred_hidden), jnp.float32),
        pred_w2=dense(ks[4], (pred_hidden, pred_out)),
        pred_b2=jnp.zeros((1, pred_out), jnp.float32),
        # SMoGPrototypes: torch.rand(n_groups, n_prototypes)
        group_features=jax.random.uniform(ks[5], (n_groups, pred_out), jnp.float32),
    )


def prepare_params(raw):
    """One-time (outside the jitted forward) conversion to kernel-ready layout:
    per-tap conv weights, enc_dim zero-padded to a lane-dense multiple of 128,
    dense-layer weights cast to bf16."""
    conv_w4 = raw['conv_w4']                                  # (E, C, 3, 3)
    e, c = conv_w4.shape[0], conv_w4.shape[1]
    ep = _round_up(e, LANE)
    # tap t = ky*3 + kx: w_taps[t, c, f] = conv_w4[f, c, ky, kx]
    w_taps = jnp.transpose(conv_w4, (2, 3, 1, 0)).reshape(9, c, e)
    w_taps = jnp.pad(w_taps, ((0, 0), (0, 0), (0, ep - e))).astype(jnp.bfloat16)
    conv_b = jnp.pad(raw['conv_b'].reshape(1, e), ((0, 0), (0, ep - e))).astype(jnp.float32)
    proj_w1 = jnp.pad(raw['proj_w1'], ((0, ep - e), (0, 0))).astype(jnp.bfloat16)
    return dict(
        conv_w_taps=w_taps, conv_b=conv_b,
        proj_w1=proj_w1,
        proj_g1=raw['proj_g1'], proj_b1=raw['proj_b1'],
        proj_w2=raw['proj_w2'].astype(jnp.bfloat16),
        pred_w1=raw['pred_w1'].astype(jnp.bfloat16),
        pred_g1=raw['pred_g1'], pred_b1=raw['pred_b1'],
        pred_w2=raw['pred_w2'].astype(jnp.bfloat16),
        pred_b2=raw['pred_b2'],
        group_features=raw['group_features'],
    )


@jax.jit
def smog_forward(samples1, samples2, params, temperature, beta):
    """Returns (logits, assignments, samples1_encoded, updated_group_features)."""
    B, C, H, W = samples1.shape
    HW = H * W

    conv_w = params['conv_w_taps']                            # (9, C, Ep) bf16
    ep = conv_w.shape[-1]

    # Stack both views (encoder has no batch-statistic coupling), lay out NHWC
    # with a 1-pixel zero halo.  This is the only full wrapper pass over the
    # image data (no im2col patch matrix is ever materialized in HBM).
    x = jnp.concatenate([samples1, samples2], axis=0)         # (2B, C, H, W)
    x = jnp.transpose(x, (0, 2, 3, 1))                        # (2B, H, W, C)
    xpad = jnp.pad(x, ((0, 0), (1, 1), (1, 1), (0, 0))).astype(jnp.bfloat16)

    total = 2 * B
    hp2, wp2 = H + 2, W + 2
    tb = _samples_per_tile(total, HW)
    grid = (total // tb,)

    # VMEM budget: 2x double-buffered input tiles + f32 conv intermediate +
    # resident weights + double-buffered output; cap below v7x's 64 MiB physical.
    tile_in = tb * hp2 * _round_up(wp2, 8) * LANE * 2
    acc_b = tb * HW * ep * 4
    w_b = 9 * _round_up(C, 8) * ep * 2
    vmem_est = 2 * tile_in + 2 * acc_b + w_b + 2 * tb * ep * 2
    vmem_limit = int(min(48 << 20, max(16 << 20, 2 * vmem_est)))

    feats = pl.pallas_call(
        encoder_kernel,
        out_shape=jax.ShapeDtypeStruct((total, ep), jnp.bfloat16),
        grid_spec=pltpu.PrefetchScalarGridSpec(
            num_scalar_prefetch=0,
            grid=grid,
            in_specs=[
                pl.BlockSpec((tb, hp2, wp2, C), lambda i: (i, 0, 0, 0)),  # image tile
                pl.BlockSpec((9, C, ep), lambda i: (0, 0, 0)),            # weights (resident)
                pl.BlockSpec((1, ep), lambda i: (0, 0)),                  # bias (resident)
            ],
            out_specs=pl.BlockSpec((tb, ep), lambda i: (i, 0)),
        ),
        compiler_params=pltpu.CompilerParams(
            dimension_semantics=("parallel",),                # independent tiles -> megacore
            vmem_limit_bytes=vmem_limit),
    )(xpad, conv_w, params['conv_b'])

    # SMEM scalars: 1/temperature (divide -> multiply) and beta; values can
    # change without recompiling.
    scalars = jnp.stack([1.0 / temperature, beta]).astype(jnp.float32)

    proj_out = params['proj_w2'].shape[1]
    n_groups = params['group_features'].shape[0]

    vmem = pl.BlockSpec(memory_space=pltpu.MemorySpace.VMEM)
    smem = pl.BlockSpec(memory_space=pltpu.MemorySpace.SMEM)

    out_shape = (
        jax.ShapeDtypeStruct((B, n_groups), jnp.float32),          # logits
        jax.ShapeDtypeStruct((B, 1), jnp.int32),                   # assignments
        jax.ShapeDtypeStruct((B, proj_out), jnp.float32),          # samples1_encoded
        jax.ShapeDtypeStruct((n_groups, proj_out), jnp.float32),   # updated group feats
    )
    inputs = (scalars, feats,
              params['proj_w1'], params['proj_g1'], params['proj_b1'], params['proj_w2'],
              params['pred_w1'], params['pred_g1'], params['pred_b1'],
              params['pred_w2'], params['pred_b2'],
              params['group_features'])

    # TODO(synk): single-shot head kernel; production-size B / hidden dims need
    #             batch tiling with two-pass BN to stay inside v7x's 64 MiB VMEM.
    logits, assign, enc1, gf_new = pl.pallas_call(
        head_kernel,
        out_shape=out_shape,
        in_specs=[smem] + [vmem] * (len(inputs) - 1),
        out_specs=(vmem, vmem, vmem, vmem),
    )(*inputs)
    return logits, assign[:, 0], enc1, gf_new


if __name__ == "__main__":
    key = jax.random.PRNGKey(0)
    k1, k2, kp = jax.random.split(key, 3)

    B, C, H, W = 8, 3, 8, 8
    enc_dim, proj_hidden, proj_out = 32, 64, 32
    pred_hidden, pred_out, n_groups = 64, 32, 4

    samples1 = jax.random.normal(k1, (B, C, H, W), jnp.float32)
    samples2 = jax.random.normal(k2, (B, C, H, W), jnp.float32)
    raw_params = init_params(kp, C, enc_dim, proj_hidden, proj_out,
                             pred_hidden, pred_out, n_groups)
    params = prepare_params(raw_params)

    logits, assignments, enc1, gf_new = smog_forward(
        samples1, samples2, params, jnp.float32(0.1), jnp.float32(0.99))
    jax.block_until_ready((logits, assignments, enc1, gf_new))

    assert logits.shape == (B, n_groups)
    assert assignments.shape == (B,)
    assert enc1.shape == (B, proj_out)
    assert gf_new.shape == (n_groups, pred_out)
    assert bool(jnp.all(jnp.isfinite(logits)))
    assert bool(jnp.all(jnp.isfinite(enc1)))
    assert bool(jnp.all(jnp.isfinite(gf_new)))
    assert bool(jnp.all((assignments >= 0) & (assignments < n_groups)))
    print("KERNEL_OK")
</pallas_src>

<mosaic_0001>
module attributes {stable_mosaic.version = 11 : i64} {
  func.func @encoder_kernel(%arg0: i32, %arg1: memref<8x10x10x3xbf16, #tpu.memory_space<vmem>>, %arg2: memref<9x3x128xbf16, #tpu.memory_space<vmem>>, %arg3: memref<1x128xf32, #tpu.memory_space<vmem>>, %arg4: memref<8x128xbf16, #tpu.memory_space<vmem>>) attributes {dimension_semantics = [#tpu.dimension_semantics<parallel>], iteration_bounds = array<i64: 2>, scalar_prefetch = 0 : i64, scratch_operands = 0 : i64, tpu.core_type = #tpu.core_type<tc>, window_params = [{transform_indices = @transform_0, window_bounds = array<i64: 8, 10, 10, 3>}, {pipeline_mode = #tpu.pipeline_mode<synchronous>, transform_indices = @transform_1, window_bounds = array<i64: 9, 3, 128>}, {pipeline_mode = #tpu.pipeline_mode<synchronous>, transform_indices = @transform_2, window_bounds = array<i64: 1, 128>}, {transform_indices = @transform_3, window_bounds = array<i64: 8, 128>}]} {
    %c0 = arith.constant 0 : index
    %c0_0 = arith.constant 0 : index
    %c0_1 = arith.constant 0 : index
    %0 = vector.load %arg2[%c0, %c0_0, %c0_1] : memref<9x3x128xbf16, #tpu.memory_space<vmem>>, vector<9x3x128xbf16>
    %cst = arith.constant 0.000000e+00 : f32
    %1 = vector.broadcast %cst : f32 to vector<512x128xf32>
    %c0_2 = arith.constant 0 : index
    %c0_3 = arith.constant 0 : index
    %c0_4 = arith.constant 0 : index
    %c0_5 = arith.constant 0 : index
    %2 = vector.load %arg1[%c0_2, %c0_3, %c0_4, %c0_5] : memref<8x10x10x3xbf16, #tpu.memory_space<vmem>>, vector<8x8x8x3xbf16>
    %3 = vector.shape_cast %2 : vector<8x8x8x3xbf16> to vector<512x3xbf16>
    %4 = vector.extract_strided_slice %0 {offsets = [0, 0, 0], sizes = [1, 3, 128], strides = [1, 1, 1]} : vector<9x3x128xbf16> to vector<1x3x128xbf16>
    %5 = vector.shape_cast %4 : vector<1x3x128xbf16> to vector<3x128xbf16>
    %cst_6 = arith.constant dense<0.000000e+00> : vector<512x128xf32>
    %6 = tpu.matmul %3, %5, %cst_6 {dimension_numbers = #tpu.dot_dimension_numbers<[1], [0], [0], [1], [0, 0, 1, 1], [], []>} : vector<512x3xbf16>, vector<3x128xbf16>, vector<512x128xf32> -> vector<512x128xf32>
    %7 = arith.addf %1, %6 : vector<512x128xf32>
    %c0_7 = arith.constant 0 : index
    %c0_8 = arith.constant 0 : index
    %c1 = arith.constant 1 : index
    %c0_9 = arith.constant 0 : index
    %8 = vector.load %arg1[%c0_7, %c0_8, %c1, %c0_9] : memref<8x10x10x3xbf16, #tpu.memory_space<vmem>>, vector<8x8x8x3xbf16>
    %9 = vector.shape_cast %8 : vector<8x8x8x3xbf16> to vector<512x3xbf16>
    %10 = vector.extract_strided_slice %0 {offsets = [1, 0, 0], sizes = [1, 3, 128], strides = [1, 1, 1]} : vector<9x3x128xbf16> to vector<1x3x128xbf16>
    %11 = vector.shape_cast %10 : vector<1x3x128xbf16> to vector<3x128xbf16>
    %cst_10 = arith.constant dense<0.000000e+00> : vector<512x128xf32>
    %12 = tpu.matmul %9, %11, %cst_10 {dimension_numbers = #tpu.dot_dimension_numbers<[1], [0], [0], [1], [0, 0, 1, 1], [], []>} : vector<512x3xbf16>, vector<3x128xbf16>, vector<512x128xf32> -> vector<512x128xf32>
    %13 = arith.addf %7, %12 : vector<512x128xf32>
    %c0_11 = arith.constant 0 : index
    %c0_12 = arith.constant 0 : index
    %c2 = arith.constant 2 : index
    %c0_13 = arith.constant 0 : index
    %14 = vector.load %arg1[%c0_11, %c0_12, %c2, %c0_13] : memref<8x10x10x3xbf16, #tpu.memory_space<vmem>>, vector<8x8x8x3xbf16>
    %15 = vector.shape_cast %14 : vector<8x8x8x3xbf16> to vector<512x3xbf16>
    %16 = vector.extract_strided_slice %0 {offsets = [2, 0, 0], sizes = [1, 3, 128], strides = [1, 1, 1]} : vector<9x3x128xbf16> to vector<1x3x128xbf16>
    %17 = vector.shape_cast %16 : vector<1x3x128xbf16> to vector<3x128xbf16>
    %cst_14 = arith.constant dense<0.000000e+00> : vector<512x128xf32>
    %18 = tpu.matmul %15, %17, %cst_14 {dimension_numbers = #tpu.dot_dimension_numbers<[1], [0], [0], [1], [0, 0, 1, 1], [], []>} : vector<512x3xbf16>, vector<3x128xbf16>, vector<512x128xf32> -> vector<512x128xf32>
    %19 = arith.addf %13, %18 : vector<512x128xf32>
    %c0_15 = arith.constant 0 : index
    %c1_16 = arith.constant 1 : index
    %c0_17 = arith.constant 0 : index
    %c0_18 = arith.constant 0 : index
    %20 = vector.load %arg1[%c0_15, %c1_16, %c0_17, %c0_18] : memref<8x10x10x3xbf16, #tpu.memory_space<vmem>>, vector<8x8x8x3xbf16>
    %21 = vector.shape_cast %20 : vector<8x8x8x3xbf16> to vector<512x3xbf16>
    %22 = vector.extract_strided_slice %0 {offsets = [3, 0, 0], sizes = [1, 3, 128], strides = [1, 1, 1]} : vector<9x3x128xbf16> to vector<1x3x128xbf16>
    %23 = vector.shape_cast %22 : vector<1x3x128xbf16> to vector<3x128xbf16>
    %cst_19 = arith.constant dense<0.000000e+00> : vector<512x128xf32>
    %24 = tpu.matmul %21, %23, %cst_19 {dimension_numbers = #tpu.dot_dimension_numbers<[1], [0], [0], [1], [0, 0, 1, 1], [], []>} : vector<512x3xbf16>, vector<3x128xbf16>, vector<512x128xf32> -> vector<512x128xf32>
    %25 = arith.addf %19, %24 : vector<512x128xf32>
    %c0_20 = arith.constant 0 : index
    %c1_21 = arith.constant 1 : index
    %c1_22 = arith.constant 1 : index
    %c0_23 = arith.constant 0 : index
    %26 = vector.load %arg1[%c0_20, %c1_21, %c1_22, %c0_23] : memref<8x10x10x3xbf16, #tpu.memory_space<vmem>>, vector<8x8x8x3xbf16>
    %27 = vector.shape_cast %26 : vector<8x8x8x3xbf16> to vector<512x3xbf16>
    %28 = vector.extract_strided_slice %0 {offsets = [4, 0, 0], sizes = [1, 3, 128], strides = [1, 1, 1]} : vector<9x3x128xbf16> to vector<1x3x128xbf16>
    %29 = vector.shape_cast %28 : vector<1x3x128xbf16> to vector<3x128xbf16>
    %cst_24 = arith.constant dense<0.000000e+00> : vector<512x128xf32>
    %30 = tpu.matmul %27, %29, %cst_24 {dimension_numbers = #tpu.dot_dimension_numbers<[1], [0], [0], [1], [0, 0, 1, 1], [], []>} : vector<512x3xbf16>, vector<3x128xbf16>, vector<512x128xf32> -> vector<512x128xf32>
    %31 = arith.addf %25, %30 : vector<512x128xf32>
    %c0_25 = arith.constant 0 : index
    %c1_26 = arith.constant 1 : index
    %c2_27 = arith.constant 2 : index
    %c0_28 = arith.constant 0 : index
    %32 = vector.load %arg1[%c0_25, %c1_26, %c2_27, %c0_28] : memref<8x10x10x3xbf16, #tpu.memory_space<vmem>>, vector<8x8x8x3xbf16>
    %33 = vector.shape_cast %32 : vector<8x8x8x3xbf16> to vector<512x3xbf16>
    %34 = vector.extract_strided_slice %0 {offsets = [5, 0, 0], sizes = [1, 3, 128], strides = [1, 1, 1]} : vector<9x3x128xbf16> to vector<1x3x128xbf16>
    %35 = vector.shape_cast %34 : vector<1x3x128xbf16> to vector<3x128xbf16>
    %cst_29 = arith.constant dense<0.000000e+00> : vector<512x128xf32>
    %36 = tpu.matmul %33, %35, %cst_29 {dimension_numbers = #tpu.dot_dimension_numbers<[1], [0], [0], [1], [0, 0, 1, 1], [], []>} : vector<512x3xbf16>, vector<3x128xbf16>, vector<512x128xf32> -> vector<512x128xf32>
    %37 = arith.addf %31, %36 : vector<512x128xf32>
    %c0_30 = arith.constant 0 : index
    %c2_31 = arith.constant 2 : index
    %c0_32 = arith.constant 0 : index
    %c0_33 = arith.constant 0 : index
    %38 = vector.load %arg1[%c0_30, %c2_31, %c0_32, %c0_33] : memref<8x10x10x3xbf16, #tpu.memory_space<vmem>>, vector<8x8x8x3xbf16>
    %39 = vector.shape_cast %38 : vector<8x8x8x3xbf16> to vector<512x3xbf16>
    %40 = vector.extract_strided_slice %0 {offsets = [6, 0, 0], sizes = [1, 3, 128], strides = [1, 1, 1]} : vector<9x3x128xbf16> to vector<1x3x128xbf16>
    %41 = vector.shape_cast %40 : vector<1x3x128xbf16> to vector<3x128xbf16>
    %cst_34 = arith.constant dense<0.000000e+00> : vector<512x128xf32>
    %42 = tpu.matmul %39, %41, %cst_34 {dimension_numbers = #tpu.dot_dimension_numbers<[1], [0], [0], [1], [0, 0, 1, 1], [], []>} : vector<512x3xbf16>, vector<3x128xbf16>, vector<512x128xf32> -> vector<512x128xf32>
    %43 = arith.addf %37, %42 : vector<512x128xf32>
    %c0_35 = arith.constant 0 : index
    %c2_36 = arith.constant 2 : index
    %c1_37 = arith.constant 1 : index
    %c0_38 = arith.constant 0 : index
    %44 = vector.load %arg1[%c0_35, %c2_36, %c1_37, %c0_38] : memref<8x10x10x3xbf16, #tpu.memory_space<vmem>>, vector<8x8x8x3xbf16>
    %45 = vector.shape_cast %44 : vector<8x8x8x3xbf16> to vector<512x3xbf16>
    %46 = vector.extract_strided_slice %0 {offsets = [7, 0, 0], sizes = [1, 3, 128], strides = [1, 1, 1]} : vector<9x3x128xbf16> to vector<1x3x128xbf16>
    %47 = vector.shape_cast %46 : vector<1x3x128xbf16> to vector<3x128xbf16>
    %cst_39 = arith.constant dense<0.000000e+00> : vector<512x128xf32>
    %48 = tpu.matmul %45, %47, %cst_39 {dimension_numbers = #tpu.dot_dimension_numbers<[1], [0], [0], [1], [0, 0, 1, 1], [], []>} : vector<512x3xbf16>, vector<3x128xbf16>, vector<512x128xf32> -> vector<512x128xf32>
    %49 = arith.addf %43, %48 : vector<512x128xf32>
    %c0_40 = arith.constant 0 : index
    %c2_41 = arith.constant 2 : index
    %c2_42 = arith.constant 2 : index
    %c0_43 = arith.constant 0 : index
    %50 = vector.load %arg1[%c0_40, %c2_41, %c2_42, %c0_43] : memref<8x10x10x3xbf16, #tpu.memory_space<vmem>>, vector<8x8x8x3xbf16>
    %51 = vector.shape_cast %50 : vector<8x8x8x3xbf16> to vector<512x3xbf16>
    %52 = vector.extract_strided_slice %0 {offsets = [8, 0, 0], sizes = [1, 3, 128], strides = [1, 1, 1]} : vector<9x3x128xbf16> to vector<1x3x128xbf16>
    %53 = vector.shape_cast %52 : vector<1x3x128xbf16> to vector<3x128xbf16>
    %cst_44 = arith.constant dense<0.000000e+00> : vector<512x128xf32>
    %54 = tpu.matmul %51, %53, %cst_44 {dimension_numbers = #tpu.dot_dimension_numbers<[1], [0], [0], [1], [0, 0, 1, 1], [], []>} : vector<512x3xbf16>, vector<3x128xbf16>, vector<512x128xf32> -> vector<512x128xf32>
    %55 = arith.addf %49, %54 : vector<512x128xf32>
    %c0_45 = arith.constant 0 : index
    %c0_46 = arith.constant 0 : index
    %56 = vector.load %arg3[%c0_45, %c0_46] : memref<1x128xf32, #tpu.memory_space<vmem>>, vector<1x128xf32>
    %57 = vector.broadcast %56 : vector<1x128xf32> to vector<512x128xf32>
    %58 = arith.addf %55, %57 : vector<512x128xf32>
    %cst_47 = arith.constant 0.000000e+00 : f32
    %59 = vector.broadcast %cst_47 : f32 to vector<512x128xf32>
    %60 = arith.maximumf %58, %59 : vector<512x128xf32>
    %61 = vector.shape_cast %60 : vector<512x128xf32> to vector<8x64x128xf32>
    %cst_48 = arith.constant dense<0.000000e+00> : vector<8x128xf32>
    %62 = vector.multi_reduction <add>, %61, %cst_48 [1] : vector<8x64x128xf32> to vector<8x128xf32>
    %cst_49 = arith.constant 1.562500e-02 : f32
    %63 = vector.broadcast %cst_49 : f32 to vector<8x128xf32>
    %64 = arith.mulf %62, %63 : vector<8x128xf32>
    %65 = arith.truncf %64 : vector<8x128xf32> to vector<8x128xbf16>
    %c0_50 = arith.constant 0 : index
    %c0_51 = arith.constant 0 : index
    %66 = vector.load %arg4[%c0_50, %c0_51] : memref<8x128xbf16, #tpu.memory_space<vmem>>, vector<8x128xbf16>
    tpu.vector_store %arg4[%c0_50, %c0_51], %65 {strides = array<i32>} : memref<8x128xbf16, #tpu.memory_space<vmem>>, vector<8x128xbf16>,
    return
  }
  func.func @transform_0(%arg0: i32) -> (i32, i32, i32, i32) {
    %c0_i32 = arith.constant 0 : i32
    %c0_i32_0 = arith.constant 0 : i32
    %c0_i32_1 = arith.constant 0 : i32
    %c0_i32_2 = arith.constant 0 : i32
    return %arg0, %c0_i32, %c0_i32_0, %c0_i32_1 : i32, i32, i32, i32
  }
  func.func @transform_1(%arg0: i32) -> (i32, i32, i32) {
    %c0_i32 = arith.constant 0 : i32
    %c0_i32_0 = arith.constant 0 : i32
    %c0_i32_1 = arith.constant 0 : i32
    %c0_i32_2 = arith.constant 0 : i32
    return %c0_i32, %c0_i32_0, %c0_i32_1 : i32, i32, i32
  }
  func.func @transform_2(%arg0: i32) -> (i32, i32) {
    %c0_i32 = arith.constant 0 : i32
    %c0_i32_0 = arith.constant 0 : i32
    %c0_i32_1 = arith.constant 0 : i32
    return %c0_i32, %c0_i32_0 : i32, i32
  }
  func.func @transform_3(%arg0: i32) -> (i32, i32) {
    %c0_i32 = arith.constant 0 : i32
    %c0_i32_0 = arith.constant 0 : i32
    return %arg0, %c0_i32 : i32, i32
  }
}

module attributes {stable_mosaic.version = 11 : i64} {
  func.func @head_kernel(%arg0: memref<2xf32, #tpu.memory_space<smem>>, %arg1: memref<16x128xbf16, #tpu.memory_space<vmem>>, %arg2: memref<128x64xbf16, #tpu.memory_space<vmem>>, %arg3: memref<1x64xf32, #tpu.memory_space<vmem>>, %arg4: memref<1x64xf32, #tpu.memory_space<vmem>>, %arg5: memref<64x32xbf16, #tpu.memory_space<vmem>>, %arg6: memref<32x64xbf16, #tpu.memory_space<vmem>>, %arg7: memref<1x64xf32, #tpu.memory_space<vmem>>, %arg8: memref<1x64xf32, #tpu.memory_space<vmem>>, %arg9: memref<64x32xbf16, #tpu.memory_space<vmem>>, %arg10: memref<1x32xf32, #tpu.memory_space<vmem>>, %arg11: memref<4x32xf32, #tpu.memory_space<vmem>>, %arg12: memref<8x4xf32, #tpu.memory_space<vmem>>, %arg13: memref<8x1xi32, #tpu.memory_space<vmem>>, %arg14: memref<8x32xf32, #tpu.memory_space<vmem>>, %arg15: memref<4x32xf32, #tpu.memory_space<vmem>>) attributes {dimension_semantics = [], scalar_prefetch = 0 : i64, scratch_operands = 0 : i64, tpu.core_type = #tpu.core_type<tc>} {
    %c0 = arith.constant 0 : index
    %0 = memref.load %arg0[%c0] : memref<2xf32, #tpu.memory_space<smem>>
    %c1 = arith.constant 1 : index
    %1 = memref.load %arg0[%c1] : memref<2xf32, #tpu.memory_space<smem>>
    %c0_0 = arith.constant 0 : index
    %c0_1 = arith.constant 0 : index
    %2 = vector.load %arg1[%c0_0, %c0_1] : memref<16x128xbf16, #tpu.memory_space<vmem>>, vector<16x128xbf16>
    %c0_2 = arith.constant 0 : index
    %c0_3 = arith.constant 0 : index
    %3 = vector.load %arg2[%c0_2, %c0_3] : memref<128x64xbf16, #tpu.memory_space<vmem>>, vector<128x64xbf16>
    %cst = arith.constant dense<0.000000e+00> : vector<16x64xf32>
    %4 = tpu.matmul %2, %3, %cst {dimension_numbers = #tpu.dot_dimension_numbers<[1], [0], [0], [1], [0, 0, 1, 1], [], []>} : vector<16x128xbf16>, vector<128x64xbf16>, vector<16x64xf32> -> vector<16x64xf32>
    %c0_4 = arith.constant 0 : index
    %c0_5 = arith.constant 0 : index
    %5 = vector.load %arg3[%c0_4, %c0_5] : memref<1x64xf32, #tpu.memory_space<vmem>>, vector<1x64xf32>
    %c0_6 = arith.constant 0 : index
    %c0_7 = arith.constant 0 : index
    %6 = vector.load %arg4[%c0_6, %c0_7] : memref<1x64xf32, #tpu.memory_space<vmem>>, vector<1x64xf32>
    %7 = vector.extract_strided_slice %4 {offsets = [0, 0], sizes = [8, 64], strides = [1, 1]} : vector<16x64xf32> to vector<8x64xf32>
    %cst_8 = arith.constant dense<0.000000e+00> : vector<64xf32>
    %8 = vector.multi_reduction <add>, %7, %cst_8 [0] : vector<8x64xf32> to vector<64xf32>
    %9 = vector.shape_cast %8 : vector<64xf32> to vector<1x64xf32>
    %cst_9 = arith.constant 8.000000e+00 : f32
    %10 = vector.broadcast %cst_9 : f32 to vector<1x64xf32>
    %11 = arith.divf %9, %10 : vector<1x64xf32>
    %12 = vector.broadcast %11 : vector<1x64xf32> to vector<8x64xf32>
    %13 = arith.subf %7, %12 : vector<8x64xf32>
    %14 = vector.broadcast %11 : vector<1x64xf32> to vector<8x64xf32>
    %15 = arith.subf %7, %14 : vector<8x64xf32>
    %16 = arith.mulf %13, %15 : vector<8x64xf32>
    %cst_10 = arith.constant dense<0.000000e+00> : vector<64xf32>
    %17 = vector.multi_reduction <add>, %16, %cst_10 [0] : vector<8x64xf32> to vector<64xf32>
    %18 = vector.shape_cast %17 : vector<64xf32> to vector<1x64xf32>
    %cst_11 = arith.constant 8.000000e+00 : f32
    %19 = vector.broadcast %cst_11 : f32 to vector<1x64xf32>
    %20 = arith.divf %18, %19 : vector<1x64xf32>
    %21 = vector.broadcast %11 : vector<1x64xf32> to vector<8x64xf32>
    %22 = arith.subf %7, %21 : vector<8x64xf32>
    %cst_12 = arith.constant 9.99999974E-6 : f32
    %23 = vector.broadcast %cst_12 : f32 to vector<1x64xf32>
    %24 = arith.addf %20, %23 : vector<1x64xf32>
    %25 = math.rsqrt %24 : vector<1x64xf32>
    %26 = vector.broadcast %25 : vector<1x64xf32> to vector<8x64xf32>
    %27 = arith.mulf %22, %26 : vector<8x64xf32>
    %28 = vector.broadcast %5 : vector<1x64xf32> to vector<8x64xf32>
    %29 = arith.mulf %27, %28 : vector<8x64xf32>
    %30 = vector.broadcast %6 : vector<1x64xf32> to vector<8x64xf32>
    %31 = arith.addf %29, %30 : vector<8x64xf32>
    %32 = vector.extract_strided_slice %4 {offsets = [8, 0], sizes = [8, 64], strides = [1, 1]} : vector<16x64xf32> to vector<8x64xf32>
    %cst_13 = arith.constant dense<0.000000e+00> : vector<64xf32>
    %33 = vector.multi_reduction <add>, %32, %cst_13 [0] : vector<8x64xf32> to vector<64xf32>
    %34 = vector.shape_cast %33 : vector<64xf32> to vector<1x64xf32>
    %cst_14 = arith.constant 8.000000e+00 : f32
    %35 = vector.broadcast %cst_14 : f32 to vector<1x64xf32>
    %36 = arith.divf %34, %35 : vector<1x64xf32>
    %37 = vector.broadcast %36 : vector<1x64xf32> to vector<8x64xf32>
    %38 = arith.subf %32, %37 : vector<8x64xf32>
    %39 = vector.broadcast %36 : vector<1x64xf32> to vector<8x64xf32>
    %40 = arith.subf %32, %39 : vector<8x64xf32>
    %41 = arith.mulf %38, %40 : vector<8x64xf32>
    %cst_15 = arith.constant dense<0.000000e+00> : vector<64xf32>
    %42 = vector.multi_reduction <add>, %41, %cst_15 [0] : vector<8x64xf32> to vector<64xf32>
    %43 = vector.shape_cast %42 : vector<64xf32> to vector<1x64xf32>
    %cst_16 = arith.constant 8.000000e+00 : f32
    %44 = vector.broadcast %cst_16 : f32 to vector<1x64xf32>
    %45 = arith.divf %43, %44 : vector<1x64xf32>
    %46 = vector.broadcast %36 : vector<1x64xf32> to vector<8x64xf32>
    %47 = arith.subf %32, %46 : vector<8x64xf32>
    %cst_17 = arith.constant 9.99999974E-6 : f32
    %48 = vector.broadcast %cst_17 : f32 to vector<1x64xf32>
    %49 = arith.addf %45, %48 : vector<1x64xf32>
    %50 = math.rsqrt %49 : vector<1x64xf32>
    %51 = vector.broadcast %50 : vector<1x64xf32> to vector<8x64xf32>
    %52 = arith.mulf %47, %51 : vector<8x64xf32>
    %53 = vector.broadcast %5 : vector<1x64xf32> to vector<8x64xf32>
    %54 = arith.mulf %52, %53 : vector<8x64xf32>
    %55 = vector.broadcast %6 : vector<1x64xf32> to vector<8x64xf32>
    %56 = arith.addf %54, %55 : vector<8x64xf32>
    %57 = tpu.concatenate %31, %56 in 0 : vector<8x64xf32>, vector<8x64xf32> -> vector<16x64xf32>
    %cst_18 = arith.constant 0.000000e+00 : f32
    %58 = vector.broadcast %cst_18 : f32 to vector<16x64xf32>
    %59 = arith.maximumf %57, %58 : vector<16x64xf32>
    %c0_19 = arith.constant 0 : index
    %c0_20 = arith.constant 0 : index
    %60 = vector.load %arg5[%c0_19, %c0_20] : memref<64x32xbf16, #tpu.memory_space<vmem>>, vector<64x32xbf16>
    %61 = arith.truncf %59 : vector<16x64xf32> to vector<16x64xbf16>
    %cst_21 = arith.constant dense<0.000000e+00> : vector<16x32xf32>
    %62 = tpu.matmul %61, %60, %cst_21 {dimension_numbers = #tpu.dot_dimension_numbers<[1], [0], [0], [1], [0, 0, 1, 1], [], []>} : vector<16x64xbf16>, vector<64x32xbf16>, vector<16x32xf32> -> vector<16x32xf32>
    %63 = vector.extract_strided_slice %62 {offsets = [0, 0], sizes = [8, 32], strides = [1, 1]} : vector<16x32xf32> to vector<8x32xf32>
    %cst_22 = arith.constant dense<0.000000e+00> : vector<32xf32>
    %64 = vector.multi_reduction <add>, %63, %cst_22 [0] : vector<8x32xf32> to vector<32xf32>
    %65 = vector.shape_cast %64 : vector<32xf32> to vector<1x32xf32>
    %cst_23 = arith.constant 8.000000e+00 : f32
    %66 = vector.broadcast %cst_23 : f32 to vector<1x32xf32>
    %67 = arith.divf %65, %66 : vector<1x32xf32>
    %68 = vector.broadcast %67 : vector<1x32xf32> to vector<8x32xf32>
    %69 = arith.subf %63, %68 : vector<8x32xf32>
    %70 = vector.broadcast %67 : vector<1x32xf32> to vector<8x32xf32>
    %71 = arith.subf %63, %70 : vector<8x32xf32>
    %72 = arith.mulf %69, %71 : vector<8x32xf32>
    %cst_24 = arith.constant dense<0.000000e+00> : vector<32xf32>
    %73 = vector.multi_reduction <add>, %72, %cst_24 [0] : vector<8x32xf32> to vector<32xf32>
    %74 = vector.shape_cast %73 : vector<32xf32> to vector<1x32xf32>
    %cst_25 = arith.constant 8.000000e+00 : f32
    %75 = vector.broadcast %cst_25 : f32 to vector<1x32xf32>
    %76 = arith.divf %74, %75 : vector<1x32xf32>
    %77 = vector.broadcast %67 : vector<1x32xf32> to vector<8x32xf32>
    %78 = arith.subf %63, %77 : vector<8x32xf32>
    %cst_26 = arith.constant 9.99999974E-6 : f32
    %79 = vector.broadcast %cst_26 : f32 to vector<1x32xf32>
    %80 = arith.addf %76, %79 : vector<1x32xf32>
    %81 = math.rsqrt %80 : vector<1x32xf32>
    %82 = vector.broadcast %81 : vector<1x32xf32> to vector<8x32xf32>
    %83 = arith.mulf %78, %82 : vector<8x32xf32>
    %84 = vector.extract_strided_slice %62 {offsets = [8, 0], sizes = [8, 32], strides = [1, 1]} : vector<16x32xf32> to vector<8x32xf32>
    %cst_27 = arith.constant dense<0.000000e+00> : vector<32xf32>
    %85 = vector.multi_reduction <add>, %84, %cst_27 [0] : vector<8x32xf32> to vector<32xf32>
    %86 = vector.shape_cast %85 : vector<32xf32> to vector<1x32xf32>
    %cst_28 = arith.constant 8.000000e+00 : f32
    %87 = vector.broadcast %cst_28 : f32 to vector<1x32xf32>
    %88 = arith.divf %86, %87 : vector<1x32xf32>
    %89 = vector.broadcast %88 : vector<1x32xf32> to vector<8x32xf32>
    %90 = arith.subf %84, %89 : vector<8x32xf32>
    %91 = vector.broadcast %88 : vector<1x32xf32> to vector<8x32xf32>
    %92 = arith.subf %84, %91 : vector<8x32xf32>
    %93 = arith.mulf %90, %92 : vector<8x32xf32>
    %cst_29 = arith.constant dense<0.000000e+00> : vector<32xf32>
    %94 = vector.multi_reduction <add>, %93, %cst_29 [0] : vector<8x32xf32> to vector<32xf32>
    %95 = vector.shape_cast %94 : vector<32xf32> to vector<1x32xf32>
    %cst_30 = arith.constant 8.000000e+00 : f32
    %96 = vector.broadcast %cst_30 : f32 to vector<1x32xf32>
    %97 = arith.divf %95, %96 : vector<1x32xf32>
    %98 = vector.broadcast %88 : vector<1x32xf32> to vector<8x32xf32>
    %99 = arith.subf %84, %98 : vector<8x32xf32>
    %cst_31 = arith.constant 9.99999974E-6 : f32
    %100 = vector.broadcast %cst_31 : f32 to vector<1x32xf32>
    %101 = arith.addf %97, %100 : vector<1x32xf32>
    %102 = math.rsqrt %101 : vector<1x32xf32>
    %103 = vector.broadcast %102 : vector<1x32xf32> to vector<8x32xf32>
    %104 = arith.mulf %99, %103 : vector<8x32xf32>
    %105 = tpu.concatenate %83, %104 in 0 : vector<8x32xf32>, vector<8x32xf32> -> vector<16x32xf32>
    %106 = vector.extract_strided_slice %105 {offsets = [0, 0], sizes = [8, 32], strides = [1, 1]} : vector<16x32xf32> to vector<8x32xf32>
    %107 = vector.extract_strided_slice %105 {offsets = [8, 0], sizes = [8, 32], strides = [1, 1]} : vector<16x32xf32> to vector<8x32xf32>
    %c0_32 = arith.constant 0 : index
    %c0_33 = arith.constant 0 : index
    %108 = vector.load %arg6[%c0_32, %c0_33] : memref<32x64xbf16, #tpu.memory_space<vmem>>, vector<32x64xbf16>
    %109 = arith.truncf %106 : vector<8x32xf32> to vector<8x32xbf16>
    %cst_34 = arith.constant dense<0.000000e+00> : vector<8x64xf32>
    %110 = tpu.matmul %109, %108, %cst_34 {dimension_numbers = #tpu.dot_dimension_numbers<[1], [0], [0], [1], [0, 0, 1, 1], [], []>} : vector<8x32xbf16>, vector<32x64xbf16>, vector<8x64xf32> -> vector<8x64xf32>
    %c0_35 = arith.constant 0 : index
    %c0_36 = arith.constant 0 : index
    %111 = vector.load %arg7[%c0_35, %c0_36] : memref<1x64xf32, #tpu.memory_space<vmem>>, vector<1x64xf32>
    %c0_37 = arith.constant 0 : index
    %c0_38 = arith.constant 0 : index
    %112 = vector.load %arg8[%c0_37, %c0_38] : memref<1x64xf32, #tpu.memory_space<vmem>>, vector<1x64xf32>
    %cst_39 = arith.constant dense<0.000000e+00> : vector<64xf32>
    %113 = vector.multi_reduction <add>, %110, %cst_39 [0] : vector<8x64xf32> to vector<64xf32>
    %114 = vector.shape_cast %113 : vector<64xf32> to vector<1x64xf32>
    %cst_40 = arith.constant 8.000000e+00 : f32
    %115 = vector.broadcast %cst_40 : f32 to vector<1x64xf32>
    %116 = arith.divf %114, %115 : vector<1x64xf32>
    %117 = vector.broadcast %116 : vector<1x64xf32> to vector<8x64xf32>
    %118 = arith.subf %110, %117 : vector<8x64xf32>
    %119 = vector.broadcast %116 : vector<1x64xf32> to vector<8x64xf32>
    %120 = arith.subf %110, %119 : vector<8x64xf32>
    %121 = arith.mulf %118, %120 : vector<8x64xf32>
    %cst_41 = arith.constant dense<0.000000e+00> : vector<64xf32>
    %122 = vector.multi_reduction <add>, %121, %cst_41 [0] : vector<8x64xf32> to vector<64xf32>
    %123 = vector.shape_cast %122 : vector<64xf32> to vector<1x64xf32>
    %cst_42 = arith.constant 8.000000e+00 : f32
    %124 = vector.broadcast %cst_42 : f32 to vector<1x64xf32>
    %125 = arith.divf %123, %124 : vector<1x64xf32>
    %126 = vector.broadcast %116 : vector<1x64xf32> to vector<8x64xf32>
    %127 = arith.subf %110, %126 : vector<8x64xf32>
    %cst_43 = arith.constant 9.99999974E-6 : f32
    %128 = vector.broadcast %cst_43 : f32 to vector<1x64xf32>
    %129 = arith.addf %125, %128 : vector<1x64xf32>
    %130 = math.rsqrt %129 : vector<1x64xf32>
    %131 = vector.broadcast %130 : vector<1x64xf32> to vector<8x64xf32>
    %132 = arith.mulf %127, %131 : vector<8x64xf32>
    %133 = vector.broadcast %111 : vector<1x64xf32> to vector<8x64xf32>
    %134 = arith.mulf %132, %133 : vector<8x64xf32>
    %135 = vector.broadcast %112 : vector<1x64xf32> to vector<8x64xf32>
    %136 = arith.addf %134, %135 : vector<8x64xf32>
    %cst_44 = arith.constant 0.000000e+00 : f32
    %137 = vector.broadcast %cst_44 : f32 to vector<8x64xf32>
    %138 = arith.maximumf %136, %137 : vector<8x64xf32>
    %c0_45 = arith.constant 0 : index
    %c0_46 = arith.constant 0 : index
    %139 = vector.load %arg9[%c0_45, %c0_46] : memref<64x32xbf16, #tpu.memory_space<vmem>>, vector<64x32xbf16>
    %140 = arith.truncf %138 : vector<8x64xf32> to vector<8x64xbf16>
    %cst_47 = arith.constant dense<0.000000e+00> : vector<8x32xf32>
    %141 = tpu.matmul %140, %139, %cst_47 {dimension_numbers = #tpu.dot_dimension_numbers<[1], [0], [0], [1], [0, 0, 1, 1], [], []>} : vector<8x64xbf16>, vector<64x32xbf16>, vector<8x32xf32> -> vector<8x32xf32>
    %c0_48 = arith.constant 0 : index
    %c0_49 = arith.constant 0 : index
    %142 = vector.load %arg10[%c0_48, %c0_49] : memref<1x32xf32, #tpu.memory_space<vmem>>, vector<1x32xf32>
    %143 = vector.broadcast %142 : vector<1x32xf32> to vector<8x32xf32>
    %144 = arith.addf %141, %143 : vector<8x32xf32>
    %c0_50 = arith.constant 0 : index
    %c0_51 = arith.constant 0 : index
    %145 = vector.load %arg11[%c0_50, %c0_51] : memref<4x32xf32, #tpu.memory_space<vmem>>, vector<4x32xf32>
    %146 = arith.mulf %145, %145 : vector<4x32xf32>
    %cst_52 = arith.constant dense<0.000000e+00> : vector<4xf32>
    %147 = vector.multi_reduction <add>, %146, %cst_52 [1] : vector<4x32xf32> to vector<4xf32>
    %148 = vector.shape_cast %147 : vector<4xf32> to vector<4x1xf32>
    %cst_53 = arith.constant 1.000000e-24 : f32
    %149 = vector.broadcast %cst_53 : f32 to vector<4x1xf32>
    %150 = arith.maximumf %148, %149 : vector<4x1xf32>
    %151 = math.rsqrt %150 : vector<4x1xf32>
    %152 = vector.broadcast %151 : vector<4x1xf32> to vector<4x32xf32>
    %153 = arith.mulf %145, %152 : vector<4x32xf32>
    %154 = arith.mulf %107, %107 : vector<8x32xf32>
    %cst_54 = arith.constant dense<0.000000e+00> : vector<8xf32>
    %155 = vector.multi_reduction <add>, %154, %cst_54 [1] : vector<8x32xf32> to vector<8xf32>
    %156 = vector.shape_cast %155 : vector<8xf32> to vector<8x1xf32>
    %cst_55 = arith.constant 1.000000e-24 : f32
    %157 = vector.broadcast %cst_55 : f32 to vector<8x1xf32>
    %158 = arith.maximumf %156, %157 : vector<8x1xf32>
    %159 = math.rsqrt %158 : vector<8x1xf32>
    %160 = vector.broadcast %159 : vector<8x1xf32> to vector<8x32xf32>
    %161 = arith.mulf %107, %160 : vector<8x32xf32>
    %cst_56 = arith.constant dense<0.000000e+00> : vector<8x4xf32>
    %162 = tpu.matmul %161, %153, %cst_56 {dimension_numbers = #tpu.dot_dimension_numbers<[1], [1], [0], [0], [0, 0, 1, 0], [], []>} : vector<8x32xf32>, vector<4x32xf32>, vector<8x4xf32> -> vector<8x4xf32>
    %163 = tpu.iota {dimensions = array<i32: 1>} : vector<8x4xi32>
    %cst_57 = arith.constant dense<0xFF800000> : vector<8xf32>
    %164 = vector.multi_reduction <maximumf>, %162, %cst_57 [1] : vector<8x4xf32> to vector<8xf32>
    %165 = vector.shape_cast %164 : vector<8xf32> to vector<8x1xf32>
    %166 = vector.broadcast %165 : vector<8x1xf32> to vector<8x4xf32>
    %167 = arith.cmpf oge, %162, %166 : vector<8x4xf32>
    %c4_i32 = arith.constant 4 : i32
    %168 = vector.broadcast %c4_i32 : i32 to vector<8x4xi32>
    %169 = arith.select %167, %163, %168 : vector<8x4xi1>, vector<8x4xi32>
    %cst_58 = arith.constant dense<2147483647> : vector<8xi32>
    %170 = vector.multi_reduction <minsi>, %169, %cst_58 [1] : vector<8x4xi32> to vector<8xi32>
    %171 = vector.shape_cast %170 : vector<8xi32> to vector<8x1xi32>
    %c3_i32 = arith.constant 3 : i32
    %172 = vector.broadcast %c3_i32 : i32 to vector<8x1xi32>
    %173 = arith.minsi %171, %172 : vector<8x1xi32>
    %174 = arith.mulf %106, %106 : vector<8x32xf32>
    %cst_59 = arith.constant dense<0.000000e+00> : vector<8xf32>
    %175 = vector.multi_reduction <add>, %174, %cst_59 [1] : vector<8x32xf32> to vector<8xf32>
    %176 = vector.shape_cast %175 : vector<8xf32> to vector<8x1xf32>
    %cst_60 = arith.constant 1.000000e-24 : f32
    %177 = vector.broadcast %cst_60 : f32 to vector<8x1xf32>
    %178 = arith.maximumf %176, %177 : vector<8x1xf32>
    %179 = math.rsqrt %178 : vector<8x1xf32>
    %180 = vector.broadcast %179 : vector<8x1xf32> to vector<8x32xf32>
    %181 = arith.mulf %106, %180 : vector<8x32xf32>
    %cst_61 = arith.constant dense<0.000000e+00> : vector<8x4xf32>
    %182 = tpu.matmul %181, %153, %cst_61 {dimension_numbers = #tpu.dot_dimension_numbers<[1], [1], [0], [0], [0, 0, 1, 0], [], []>} : vector<8x32xf32>, vector<4x32xf32>, vector<8x4xf32> -> vector<8x4xf32>
    %183 = tpu.iota {dimensions = array<i32: 1>} : vector<8x4xi32>
    %cst_62 = arith.constant dense<0xFF800000> : vector<8xf32>
    %184 = vector.multi_reduction <maximumf>, %182, %cst_62 [1] : vector<8x4xf32> to vector<8xf32>
    %185 = vector.shape_cast %184 : vector<8xf32> to vector<8x1xf32>
    %186 = vector.broadcast %185 : vector<8x1xf32> to vector<8x4xf32>
    %187 = arith.cmpf oge, %182, %186 : vector<8x4xf32>
    %c4_i32_63 = arith.constant 4 : i32
    %188 = vector.broadcast %c4_i32_63 : i32 to vector<8x4xi32>
    %189 = arith.select %187, %183, %188 : vector<8x4xi1>, vector<8x4xi32>
    %cst_64 = arith.constant dense<2147483647> : vector<8xi32>
    %190 = vector.multi_reduction <minsi>, %189, %cst_64 [1] : vector<8x4xi32> to vector<8xi32>
    %191 = vector.shape_cast %190 : vector<8xi32> to vector<8x1xi32>
    %c3_i32_65 = arith.constant 3 : i32
    %192 = vector.broadcast %c3_i32_65 : i32 to vector<8x1xi32>
    %193 = arith.minsi %191, %192 : vector<8x1xi32>
    %194 = tpu.iota {dimensions = array<i32: 1>} : vector<8x4xi32>
    %195 = vector.broadcast %193 : vector<8x1xi32> to vector<8x4xi32>
    %196 = arith.cmpi eq, %195, %194 : vector<8x4xi32>
    %197 = arith.extui %196 : vector<8x4xi1> to vector<8x4xi32>
    %198 = arith.sitofp %197 : vector<8x4xi32> to vector<8x4xf32>
    %cst_66 = arith.constant dense<0.000000e+00> : vector<4x32xf32>
    %199 = tpu.matmul %198, %106, %cst_66 {dimension_numbers = #tpu.dot_dimension_numbers<[0], [0], [1], [1], [0, 1, 1, 1], [], []>} : vector<8x4xf32>, vector<8x32xf32>, vector<4x32xf32> -> vector<4x32xf32>
    %cst_67 = arith.constant 1.000000e+00 : f32
    %200 = vector.broadcast %cst_67 : f32 to vector<8x1xf32>
    %cst_68 = arith.constant dense<0.000000e+00> : vector<4x1xf32>
    %201 = tpu.matmul %198, %200, %cst_68 {dimension_numbers = #tpu.dot_dimension_numbers<[0], [0], [1], [1], [0, 1, 1, 1], [], []>} : vector<8x4xf32>, vector<8x1xf32>, vector<4x1xf32> -> vector<4x1xf32>
    %cst_69 = arith.constant 1.000000e+00 : f32
    %202 = vector.broadcast %cst_69 : f32 to vector<4x1xf32>
    %203 = arith.maximumf %201, %202 : vector<4x1xf32>
    %204 = vector.broadcast %203 : vector<4x1xf32> to vector<4x32xf32>
    %205 = arith.divf %199, %204 : vector<4x32xf32>
    %cst_70 = arith.constant 0.000000e+00 : f32
    %206 = vector.broadcast %cst_70 : f32 to vector<4x1xf32>
    %207 = arith.cmpf ogt, %201, %206 : vector<4x1xf32>
    %208 = vector.broadcast %1 : f32 to vector<4x32xf32>
    %209 = arith.mulf %208, %145 : vector<4x32xf32>
    %cst_71 = arith.constant 1.000000e+00 : f32
    %210 = arith.subf %cst_71, %1 : f32
    %211 = vector.broadcast %210 : f32 to vector<4x32xf32>
    %212 = arith.mulf %211, %205 : vector<4x32xf32>
    %213 = arith.addf %209, %212 : vector<4x32xf32>
    %214 = vector.shape_cast %207 : vector<4x1xi1> to vector<4x1xi1>
    %215 = vector.broadcast %214 : vector<4x1xi1> to vector<4x32xi1>
    %216 = arith.select %215, %213, %145 : vector<4x32xi1>, vector<4x32xf32>
    %217 = arith.mulf %144, %144 : vector<8x32xf32>
    %cst_72 = arith.constant dense<0.000000e+00> : vector<8xf32>
    %218 = vector.multi_reduction <add>, %217, %cst_72 [1] : vector<8x32xf32> to vector<8xf32>
    %219 = vector.shape_cast %218 : vector<8xf32> to vector<8x1xf32>
    %cst_73 = arith.constant 1.000000e-24 : f32
    %220 = vector.broadcast %cst_73 : f32 to vector<8x1xf32>
    %221 = arith.maximumf %219, %220 : vector<8x1xf32>
    %222 = math.rsqrt %221 : vector<8x1xf32>
    %223 = vector.broadcast %222 : vector<8x1xf32> to vector<8x32xf32>
    %224 = arith.mulf %144, %223 : vector<8x32xf32>
    %225 = arith.mulf %216, %216 : vector<4x32xf32>
    %cst_74 = arith.constant dense<0.000000e+00> : vector<4xf32>
    %226 = vector.multi_reduction <add>, %225, %cst_74 [1] : vector<4x32xf32> to vector<4xf32>
    %227 = vector.shape_cast %226 : vector<4xf32> to vector<4x1xf32>
    %cst_75 = arith.constant 1.000000e-24 : f32
    %228 = vector.broadcast %cst_75 : f32 to vector<4x1xf32>
    %229 = arith.maximumf %227, %228 : vector<4x1xf32>
    %230 = math.rsqrt %229 : vector<4x1xf32>
    %231 = vector.broadcast %230 : vector<4x1xf32> to vector<4x32xf32>
    %232 = arith.mulf %216, %231 : vector<4x32xf32>
    %cst_76 = arith.constant dense<0.000000e+00> : vector<8x4xf32>
    %233 = tpu.matmul %224, %232, %cst_76 {dimension_numbers = #tpu.dot_dimension_numbers<[1], [1], [0], [0], [0, 0, 1, 0], [], []>} : vector<8x32xf32>, vector<4x32xf32>, vector<8x4xf32> -> vector<8x4xf32>
    %234 = vector.broadcast %0 : f32 to vector<8x4xf32>
    %235 = arith.mulf %233, %234 : vector<8x4xf32>
    %c0_77 = arith.constant 0 : index
    %c0_78 = arith.constant 0 : index
    %236 = vector.load %arg12[%c0_77, %c0_78] : memref<8x4xf32, #tpu.memory_space<vmem>>, vector<8x4xf32>
    tpu.vector_store %arg12[%c0_77, %c0_78], %235 {strides = array<i32>} : memref<8x4xf32, #tpu.memory_space<vmem>>, vector<8x4xf32>,
    %c0_79 = arith.constant 0 : index
    %c0_80 = arith.constant 0 : index
    %237 = vector.load %arg13[%c0_79, %c0_80] : memref<8x1xi32, #tpu.memory_space<vmem>>, vector<8x1xi32>
    tpu.vector_store %arg13[%c0_79, %c0_80], %173 {strides = array<i32>} : memref<8x1xi32, #tpu.memory_space<vmem>>, vector<8x1xi32>,
    %c0_81 = arith.constant 0 : index
    %c0_82 = arith.constant 0 : index
    %238 = vector.load %arg14[%c0_81, %c0_82] : memref<8x32xf32, #tpu.memory_space<vmem>>, vector<8x32xf32>
    tpu.vector_store %arg14[%c0_81, %c0_82], %106 {strides = array<i32>} : memref<8x32xf32, #tpu.memory_space<vmem>>, vector<8x32xf32>,
    %c0_83 = arith.constant 0 : index
    %c0_84 = arith.constant 0 : index
    %239 = vector.load %arg15[%c0_83, %c0_84] : memref<4x32xf32, #tpu.memory_space<vmem>>, vector<4x32xf32>
    tpu.vector_store %arg15[%c0_83, %c0_84], %216 {strides = array<i32>} : memref<4x32xf32, #tpu.memory_space<vmem>>, vector<4x32xf32>,
    return
  }
}

</mosaic_0001>

<bundles_post_ra>
// kernel: smog_forward.3
= control target key start
LH: loop header
LB: loop body
LE: loop exit
PB: predicated region body
PF: predicated region fallthrough
CT: control target
= control target key end

     0   :  { %21 = vsyncpa [#allocation4], 0  ;;  %s1636_s0 = inlined_call_operand.vmem [shape: f32[2], index: 0, kind: input, shape index: {}]   ;;  %s1637_s1 = inlined_call_operand.vmem [shape: bf16[16,128], index: 1, kind: input, shape index: {}]   ;;  %s1638_s2 = inlined_call_operand.vmem [shape: bf16[128,64], index: 2, kind: input, shape index: {}]   ;;  %s1639_s3 = inlined_call_operand.vmem [shape: f32[1,64], index: 3, kind: input, shape index: {}]   ;;  %s1640_s4 = inlined_call_operand.vmem [shape: f32[1,64], index: 4, kind: input, shape index: {}]   ;;  %s1641_s5 = inlined_call_operand.vmem [shape: bf16[64,32], index: 5, kind: input, shape index: {}]   ;;  %s1642_s6 = inlined_call_operand.vmem [shape: bf16[32,64], index: 6, kind: input, shape index: {}]   ;;  %s1643_s7 = inlined_call_operand.vmem [shape: f32[1,64], index: 7, kind: input, shape index: {}]   ;;  %s1644_s8 = inlined_call_operand.vmem [shape: f32[1,64], index: 8, kind: input, shape index: {}]   ;;  %s1645_s9 = inlined_call_operand.vmem [shape: bf16[64,32], index: 9, kind: input, shape index: {}]   ;;  %s1646_s10 = inlined_call_operand.vmem [shape: f32[1,32], index: 10, kind: input, shape index: {}]   ;;  %s1647_s11 = inlined_call_operand.vmem [shape: f32[4,32], index: 11, kind: input, shape index: {}]   ;;  %s1648_s12 = inlined_call_operand.vmem [shape: f32[8,4], index: 12, kind: output, shape index: {0}]   ;;  %s1649_s13 = inlined_call_operand.vmem [shape: s32[8,1], index: 13, kind: output, shape index: {1}]   ;;  %s1650_s14 = inlined_call_operand.hbm [shape: f32[8,32], index: 14, kind: output, shape index: {2}]   ;;  %s1651_s15 = inlined_call_operand.hbm [shape: f32[4,32], index: 15, kind: output, shape index: {3}]  }
   0x1   :  { %22 = vsyncpa [#allocation3], 0 }
   0x2   :  { %23 = vsyncpa [#allocation7], 0  ;;  %s30_s20 = sshll.u32 %s1636_s0, 4  ;;  %s31_s20 = int_to_ptr.vmem [resolvable:$true] %s30_s20 }
   0x3   :  { %s1290_s21 = scalar_lea.vmem %s31_s20, 16  ;;  %p1295_p1 = scmp.lt.s32.totalorder %s31_s20, %s31_s20 }
   0x4   :  { %p1291_p0 = scmp.ne.s32.totalorder %s31_s20, %s1290_s21  ;;  %p1296_p2 = scmp.lt.s32.totalorder %s1290_s21, %s1290_s21 }
   0x6   :  { %p1297_p3 = por %p1296_p2, %p1295_p1 }
   0x8   :  { %p1298_p4 = pnand %p1297_p3, %p1291_p0 }
   0xa   :  { %1301 = shalt.err (!%p1298_p4)
}
   0xb   :  { %s1352_s22 = smov [#allocation2]  }
   0xc   :  { %33 = dma.vmem_to_smem %s31_s20, 16, %s1352_s22, [#allocation4]  }
   0xd   :  { %1346 = dma.done.wait [#allocation4], 16  }
   0xe   :  { %1347 = vsyncadd [#allocation4], 4294967280 }
   0xf   :  { %59 = sfence }
  0x10   :  { %v1249_v0 = vld [vmem:[%s1638_s2] sm:$0xff]   ;;  %v1353_v1 = vmov 0.0   ;;  %v1250_v2 = vld [vmem:[%s1638_s2 + $0x8] sm:$0xff]   ;;  %vm1354_vm0 = vmmov 0   ;;  %v1251_v3 = vld [vmem:[%s1638_s2 + $0x10] sm:$0xff]   ;;  %vm178_vm1 = vcmask 523264  }
  0x11   :  { %1163 = vmatprep.subr.bf16.mxu0 %v1353_v1  ;;  %1183 = vmatprep.subr.bf16.mxu1 %v1353_v1  ;;  %v1252_v4 = vld [vmem:[%s1638_s2 + $0x18] sm:$0xff]   ;;  %v1253_v5 = vld [vmem:[%s1638_s2 + $0x20] sm:$0xff]   ;;  %v1254_v6 = vld [vmem:[%s1638_s2 + $0x28] sm:$0xff]   ;;  %vm543_vm2 = vcmask 257024   ;;  %vm317_vm3 = vcmask 261120   ;;  %vm635_vm4 = vcmask 31744  }
  0x12   :  { %1164 = vmatpush3.bf16.msra.mxu0 %v1249_v0  ;;  %1179 = vmatprep.mubr.msk.bf16.mxu0 %vm1354_vm0, %v1353_v1  ;;  %v1255_v7 = vld [vmem:[%s1638_s2 + $0x30] sm:$0xff]   ;;  %v1256_v8 = vld [vmem:[%s1638_s2 + $0x38] sm:$0xff]   ;;  %v1257_v9 = vld [vmem:[%s1637_s1] sm:$0xff]   ;;  %vm795_vm9 = vcmask 64512   ;;  %s1357_s29 = smov [#allocation5]   ;;  %s1358_s30 = smov [#allocation6]  }
  0x13   :  { %1165 = vmatprep.subr.bf16.mxu0 %v1353_v1  ;;  %1191 = vmatprep.mubr.msk.bf16.mxu1 %vm1354_vm0, %v1353_v1  ;;  %v1258_v10 = vld [vmem:[%s1641_s5] sm:$0xff]   ;;  %v1259_v11 = vld [vmem:[%s1641_s5 + $0x8] sm:$0xff]   ;;  %v1260_v12 = vld [vmem:[%s1641_s5 + $0x10] sm:$0xff]   ;;  %s1077_s16 = sshll.u32 %s1358_s30, 4  ;;  %s1078_s16 = int_to_ptr.vmem [resolvable:$true] %s1077_s16 }
  0x14   :  { %1184 = vmatpush3.bf16.msra.mxu1 %v1258_v10  ;;  %v1261_v13 = vld [vmem:[%s1641_s5 + $0x18] sm:$0xff]   ;;  %v1104_v57 = vld [vmem:[%s1639_s3] ss:$0 sm:$0xff]  ;;  %s1067_s5 = sshll.u32 %s1357_s29, 4  ;;  %s1068_s5 = int_to_ptr.vmem [resolvable:$true] %s1067_s5 }
  0x15   :  { %1185 = vmatprep.subr.bf16.mxu1 %v1353_v1  ;;  %v1105_v60 = vld [vmem:[%s1640_s4] ss:$0 sm:$0xff]  ;;  %s1302_s17 = scalar_lea.vmem %s1068_s5, 128  ;;  %p1307_p6 = scmp.lt.s32.totalorder %s1068_s5, %s1068_s5 }
  0x16   :  { %1166 = vmatpush3.bf16.msra.mxu0 %v1250_v2  ;;  %p1303_p5 = scmp.ne.s32.totalorder %s1068_s5, %s1302_s17  ;;  %p1308_p7 = scmp.lt.s32.totalorder %s1302_s17, %s1302_s17 }
  0x17   :  { %1167 = vmatprep.subr.bf16.mxu0 %v1353_v1 }
  0x18   :  { %1186 = vmatpush3.bf16.msra.mxu1 %v1259_v11  ;;  %p1309_p8 = por %p1308_p7, %p1307_p6 }
  0x19   :  { %1187 = vmatprep.subr.bf16.mxu1 %v1353_v1 }
  0x1a   :  { %1168 = vmatpush3.bf16.msra.mxu0 %v1251_v3  ;;  %p1310_p9 = pnand %p1309_p8, %p1303_p5 }
  0x1b   :  { %1169 = vmatprep.subr.bf16.mxu0 %v1353_v1 }
  0x1c   :  { %1188 = vmatpush3.bf16.msra.mxu1 %v1260_v12 }
  0x1d   :  { %1189 = vmatprep.subr.bf16.mxu1 %v1353_v1 }
  0x1e   :  { %1170 = vmatpush3.bf16.msra.mxu0 %v1252_v4 }
  0x1f   :  { %1171 = vmatprep.subr.bf16.mxu0 %v1353_v1 }
  0x20   :  { %1190 = vmatpush3.bf16.msra.mxu1 %v1261_v13 }
  0x21   :  { %1195 = vmatprep.subr.bf16.mxu1 %v1353_v1 }
  0x22   :  { %1172 = vmatpush3.bf16.msra.mxu0 %v1253_v5 }
  0x23   :  { %1173 = vmatprep.subr.bf16.mxu0 %v1353_v1 }
  0x26   :  { %1174 = vmatpush3.bf16.msra.mxu0 %v1254_v6  ;;  %v1262_v6 = vld [vmem:[%s1642_s6] sm:$0xff]  }
  0x27   :  { %1175 = vmatprep.subr.bf16.mxu0 %v1353_v1 }
  0x2a   :  { %1176 = vmatpush3.bf16.msra.mxu0 %v1255_v7  ;;  %v1521_v7 = vld [vmem:[%s1647_s11] sm:$0xf] }
  0x2b   :  { %1177 = vmatprep.subr.bf16.mxu0 %v1353_v1 }
  0x2e   :  { %1178 = vmatpush3.bf16.msra.mxu0 %v1256_v8  ;;  %v1263_v8 = vld [vmem:[%s1642_s6 + $0x8] sm:$0xff]  }
  0x2f   :  { %1215 = vmatprep.subr.mxu0 %v1353_v1 }
  0x31   :  { %1180 = vmatmul.mubr.bf16.vlgmr.msra.gmra.mrb[0].mxu0 %v1257_v9  ;;  %v542_v9 = vmul.f32 %v1521_v7, %v1521_v7 }
  0x32   :  { %1217 = vmatprep.mubr.msk.f32.mxu0 %vm1354_vm0, %v1353_v1 }
  0x33   :  { %v544_v10 = vsel %vm543_vm2, %v542_v9, 0.0 }
  0x34   :  { %545 = vadd.xlane.f32.xlu0 %v544_v10 }
 0x104   :  { %v169_v14 = vpop.f32.mrb[0].mxu0 }
 0x105   :  { %v179_v15 = vsel %vm178_vm1, %v169_v14, 0.0  ;;  %v1181_v16 = vpop.f32.mrb[1].mxu0 }
 0x106   :  { %v180_v17 = vrot.slane %v179_v15, 4  ;;  %v172_v18 = vpop.f32.mrb[2].mxu0 }
 0x107   :  { %v215_v19 = vsel %vm178_vm1, %v172_v18, 0.0  ;;  %v1182_v20 = vpop.f32.mrb[3].mxu0 }
 0x108   :  { %v181_v21 = vadd.f32 %v180_v17, %v179_v15  ;;  %v216_v22 = vrot.slane %v215_v19, 4 }
 0x10a   :  { %v182_v23 = vrot.slane %v181_v21, 2  ;;  %v217_v24 = vadd.f32 %v216_v22, %v215_v19 }
 0x10c   :  { %v183_v25 = vadd.f32 %v182_v23, %v181_v21  ;;  %v218_v26 = vrot.slane %v217_v24, 2 }
 0x10e   :  { %v184_v27 = vrot.slane %v183_v25, 1  ;;  %v219_v28 = vadd.f32 %v218_v26, %v217_v24 }
 0x110   :  { %v185_v29 = vadd.f32 %v184_v27, %v183_v25  ;;  %v220_v30 = vrot.slane %v219_v28, 1 }
 0x112   :  { %v187_v31 = vmul.f32 0.125, %v185_v29  ;;  %v221_v32 = vadd.f32 %v220_v30, %v219_v28 }
 0x114   :  { %v188_v33 = vsub.f32 %v169_v14, %v187_v31  ;;  %v222_v34 = vmul.f32 0.125, %v221_v32 }
 0x116   :  { %v189_v35 = vmul.f32 %v188_v33, %v188_v33  ;;  %v223_v36 = vsub.f32 %v172_v18, %v222_v34 }
 0x118   :  { %v190_v37 = vsel %vm178_vm1, %v189_v35, 0.0  ;;  %v224_v38 = vmul.f32 %v223_v36, %v223_v36 }
 0x119   :  { %v191_v39 = vrot.slane %v190_v37, 4 }
 0x11a   :  { %v225_v40 = vsel %vm178_vm1, %v224_v38, 0.0 }
 0x11b   :  { %v192_v41 = vadd.f32 %v191_v39, %v190_v37  ;;  %v226_v42 = vrot.slane %v225_v40, 4 }
 0x11d   :  { %v193_v43 = vrot.slane %v192_v41, 2  ;;  %v227_v44 = vadd.f32 %v226_v42, %v225_v40 }
 0x11f   :  { %v194_v45 = vadd.f32 %v193_v43, %v192_v41  ;;  %v228_v46 = vrot.slane %v227_v44, 2 }
 0x121   :  { %v195_v47 = vrot.slane %v194_v45, 1  ;;  %v229_v48 = vadd.f32 %v228_v46, %v227_v44 }
 0x123   :  { %v196_v49 = vadd.f32 %v195_v47, %v194_v45  ;;  %v230_v50 = vrot.slane %v229_v48, 1 }
 0x125   :  { %v197_v51 = vmul.f32 0.125, %v196_v49  ;;  %v231_v52 = vadd.f32 %v230_v50, %v229_v48 }
 0x127   :  { %v198_v53 = vadd.f32 1e-05, %v197_v51  ;;  %v232_v54 = vmul.f32 0.125, %v231_v52 }
 0x129   :  { %1268 = vrsqrt.f32 %v198_v53  ;;  %v233_v55 = vadd.f32 1e-05, %v232_v54 }
 0x12b   :  { %1270 = vrsqrt.f32 %v233_v55 }
 0x133   :  { %v1269_v56 = vpop.eup %1268 }
 0x134   :  { %v200_v58 = vmul.f32 %v1269_v56, %v188_v33 }
 0x135   :  { %v1271_v59 = vpop.eup %1270 }
 0x136   :  { %v207_v61 = vmul.f32 %v1104_v57, %v200_v58  ;;  %v235_v62 = vmul.f32 %v1271_v59, %v223_v36 }
 0x138   :  { %v214_v63 = vadd.f32 %v1105_v60, %v207_v61  ;;  %v236_v0 = vmul.f32 %v1104_v57, %v235_v62  ;;  %v546_v62 = vpop.xlane.xlu0 %545 }
 0x13a   :  { %v237_v2 = vadd.f32 %v1105_v60, %v236_v0  ;;  %v238_v3 = vmax.f32 %v214_v63, 0.0  ;;  %v547_v63 = vmax.f32 %v546_v62, 1e-24 }
 0x13c   :  { %v239_v4 = vmax.f32 %v237_v2, 0.0 }
 0x13e   :  { %v248_v5 = vpack.c.bf16 %v239_v4, %v238_v3  ;;  %v1264_v3 = vld [vmem:[%s1645_s9] sm:$0xff]   ;;  %v1265_v4 = vld [vmem:[%s1645_s9 + $0x8] sm:$0xff]  }
 0x140   :  { %1192 = vmatmul.mubr.msk.bf16.vlgmr.msra.gmra.mrb[0].mxu1 %vm178_vm1, %v248_v5  ;;  %v1266_v5 = vld [vmem:[%s1645_s9 + $0x10] sm:$0xff]  }
 0x141   :  { %1199 = vmatprep.mubr.msk.bf16.mxu1 %vm1354_vm0, %v1353_v1  ;;  %1196 = vmatpush3.bf16.msra.mxu1 %v1262_v6  ;;  %v1267_v6 = vld [vmem:[%s1645_s9 + $0x18] sm:$0xff]  }
 0x142   :  { %1197 = vmatprep.subr.bf16.mxu1 %v1353_v1 }
 0x145   :  { %1198 = vmatpush3.bf16.msra.mxu1 %v1263_v8 }
 0x146   :  { %1203 = vmatprep.subr.bf16.mxu1 %v1353_v1 }
 0x213   :  { %v310_v11 = vpop.f32.mrb[0].mxu1 }
 0x214   :  { %v318_v12 = vsel %vm317_vm3, %v310_v11, 0.0  ;;  %v1193_v13 = vpop.f32.mrb[1].mxu1 }
 0x215   :  { %v319_v14 = vrot.slane %v318_v12, 4  ;;  %v313_v15 = vpop.f32.mrb[2].mxu1 }
 0x216   :  { %v339_v16 = vsel %vm317_vm3, %v313_v15, 0.0  ;;  %v1194_v17 = vpop.f32.mrb[3].mxu1 }
 0x217   :  { %v320_v18 = vadd.f32 %v319_v14, %v318_v12  ;;  %v340_v19 = vrot.slane %v339_v16, 4 }
 0x219   :  { %v321_v20 = vrot.slane %v320_v18, 2  ;;  %v341_v21 = vadd.f32 %v340_v19, %v339_v16 }
 0x21b   :  { %v322_v22 = vadd.f32 %v321_v20, %v320_v18  ;;  %v342_v23 = vrot.slane %v341_v21, 2 }
 0x21d   :  { %v323_v24 = vrot.slane %v322_v22, 1  ;;  %v343_v25 = vadd.f32 %v342_v23, %v341_v21 }
 0x21f   :  { %v324_v26 = vadd.f32 %v323_v24, %v322_v22  ;;  %v344_v27 = vrot.slane %v343_v25, 1 }
 0x221   :  { %v325_v28 = vmul.f32 0.125, %v324_v26  ;;  %v345_v29 = vadd.f32 %v344_v27, %v343_v25 }
 0x223   :  { %v326_v30 = vsub.f32 %v310_v11, %v325_v28  ;;  %v346_v31 = vmul.f32 0.125, %v345_v29 }
 0x225   :  { %v327_v32 = vmul.f32 %v326_v30, %v326_v30  ;;  %v347_v33 = vsub.f32 %v313_v15, %v346_v31 }
 0x227   :  { %v328_v34 = vsel %vm317_vm3, %v327_v32, 0.0  ;;  %v348_v35 = vmul.f32 %v347_v33, %v347_v33 }
 0x228   :  { %v329_v36 = vrot.slane %v328_v34, 4 }
 0x229   :  { %v349_v37 = vsel %vm317_vm3, %v348_v35, 0.0 }
 0x22a   :  { %v330_v38 = vadd.f32 %v329_v36, %v328_v34  ;;  %v350_v39 = vrot.slane %v349_v37, 4 }
 0x22c   :  { %v331_v40 = vrot.slane %v330_v38, 2  ;;  %v351_v41 = vadd.f32 %v350_v39, %v349_v37 }
 0x22e   :  { %v332_v42 = vadd.f32 %v331_v40, %v330_v38  ;;  %v352_v43 = vrot.slane %v351_v41, 2  ;;  %v1114_v40 = vld [vmem:[%s1643_s7] ss:$0 sm:$0xff] }
 0x230   :  { %v333_v44 = vrot.slane %v332_v42, 1  ;;  %v353_v45 = vadd.f32 %v352_v43, %v351_v41 }
 0x232   :  { %v334_v46 = vadd.f32 %v333_v44, %v332_v42  ;;  %v354_v47 = vrot.slane %v353_v45, 1  ;;  %v1115_v42 = vld [vmem:[%s1644_s8] ss:$0 sm:$0xff] }
 0x234   :  { %v335_v48 = vmul.f32 0.125, %v334_v46  ;;  %v355_v49 = vadd.f32 %v354_v47, %v353_v45 }
 0x236   :  { %v336_v50 = vadd.f32 1e-05, %v335_v48  ;;  %v356_v51 = vmul.f32 0.125, %v355_v49 }
 0x238   :  { %1272 = vrsqrt.f32 %v336_v50  ;;  %v357_v52 = vadd.f32 1e-05, %v356_v51 }
 0x23a   :  { %1274 = vrsqrt.f32 %v357_v52 }
 0x23b   :  { %1276 = vrsqrt.f32 %v547_v63 }
 0x242   :  { %v1273_v53 = vpop.eup %1272 }
 0x243   :  { %v338_v54 = vmul.f32 %v1273_v53, %v326_v30 }
 0x244   :  { %v1275_v55 = vpop.eup %1274 }
 0x245   :  { %1055 = vst.msk [vmem:[#allocation5] sm:$0xff] %vm317_vm3, %v338_v54  ;;  %v359_v56 = vmul.f32 %v1275_v55, %v347_v33  ;;  %v364_v57 = vpack.c.bf16 %v338_v54, %v338_v54  ;;  %v658_v58 = vmul.f32 %v338_v54, %v338_v54  ;;  %v1277_v0 = vpop.eup %1276 }
 0x246   :  { %v549_v2 = vmul.f32 %v1277_v0, %v1521_v7 }
 0x247   :  { %1200 = vmatmul.mubr.msk.bf16.vlgmr.msra.gmra.mrb[4].mxu1 %vm317_vm3, %v364_v57  ;;  %v659_v59 = vsel %vm317_vm3, %v658_v58, 0.0  ;;  %v550_v60 = vmul.f32 %v359_v56, %v359_v56 }
 0x248   :  { %660 = vadd.xlane.f32.xlu1 %v659_v59  ;;  %1211 = vmatprep.mubr.msk.bf16.mxu1 %vm1354_vm0, %v1353_v1 }
 0x249   :  { %v551_v61 = vsel %vm317_vm3, %v550_v60, 0.0  ;;  %1216 = vmatpush3.xpose.msk.msra.mxu0 %vm317_vm3, %v549_v2  ;;  %1204 = vmatpush3.bf16.msra.mxu1 %v1264_v3 }
 0x24a   :  { %552 = vadd.xlane.f32.xlu0 %v551_v61  ;;  %1220 = vmatprep.subr.mxu0 %v1353_v1 }
 0x24b   :  { %1205 = vmatprep.subr.bf16.mxu1 %v1353_v1 }
 0x24d   :  { %1206 = vmatpush3.bf16.msra.mxu1 %v1265_v4  ;;  %v1355_v4 = vmov 1.0  }
 0x24e   :  { %1207 = vmatprep.subr.bf16.mxu1 %v1353_v1 }
 0x251   :  { %1208 = vmatpush3.bf16.msra.mxu1 %v1266_v5 }
 0x252   :  { %1209 = vmatprep.subr.bf16.mxu1 %v1353_v1 }
 0x255   :  { %1210 = vmatpush3.bf16.msra.mxu1 %v1267_v6 }
 0x256   :  { %1230 = vmatprep.subr.mxu1 %v1353_v1 }
 0x2d5   :  { %v661_v8 = vpop.xlane.xlu1 %660 }
 0x2d6   :  { %v662_v10 = vmax.f32 %v661_v8, 1e-24 }
 0x2d7   :  { %v553_v9 = vpop.xlane.xlu0 %552 }
 0x2d8   :  { %v554_v11 = vmax.f32 %v553_v9, 1e-24 }
 0x2da   :  { %1278 = vrsqrt.f32 %v554_v11 }
 0x2db   :  { %1280 = vrsqrt.f32 %v662_v10 }
 0x2e4   :  { %v1279_v12 = vpop.eup %1278 }
 0x2e5   :  { %v556_v13 = vmul.f32 %v1279_v12, %v359_v56  ;;  %v1281_v14 = vpop.eup %1280  ;;  %v633_v56 = vlaneseq }
 0x2e6   :  { %v664_v15 = vmul.f32 %v1281_v14, %v338_v54 }
 0x2e7   :  { %1218 = vmatmul.mubr.msk.f32.vlgmr.msra.gmra.mrb[4].mxu0 %vm317_vm3, %v556_v13  ;;  %v1582_v57 = vand.u32 127, %v633_v56  ;;  %v1116_v13 = vld [vmem:[%s1646_s10] ss:$0 sm:$0xff]  ;;  %s1094_s10 = sld [smem:[#allocation2 + $0x1]] }
 0x2e8   :  { %1221 = vmatpush3.xpose.msk.msra.mxu0 %vm317_vm3, %v549_v2  ;;  %1222 = vmatprep.mubr.msk.f32.mxu0 %vm1354_vm0, %v1353_v1 }
 0x2e9   :  { %1225 = vmatprep.subr.mxu0 %v1353_v1 }
 0x2eb   :  { %1223 = vmatmul.mubr.msk.f32.vlgmr.msra.gmra.mrb[6].mxu0 %vm317_vm3, %v664_v15 }
 0x2ec   :  { %1226 = vmatpush3.msra.mxu0 %v338_v54  ;;  %1227 = vmatprep.mubr.msk.f32.mxu0 %vm1354_vm0, %v1353_v1 }
 0x2ed   :  { %1235 = vmatprep.subr.mxu0 %v1353_v1  ;;  %s950_s28 = ssub.f32 1.0, %s1094_s10 }
 0x31a   :  { %v414_v16 = vpop.f32.mrb[4].mxu1 }
 0x31b   :  { %v422_v17 = vsel %vm178_vm1, %v414_v16, 0.0  ;;  %v1201_v18 = vpop.f32.mrb[5].mxu1 }
 0x31c   :  { %v423_v19 = vrot.slane %v422_v17, 4  ;;  %v417_v20 = vpop.f32.mrb[6].mxu1  ;;  %v1356_v18 = vmov 0  }
 0x31d   :  { %v1202_v21 = vpop.f32.mrb[7].mxu1  ;;  %1247 = vset.pattern.permute.xlu1 %v1356_v18 }
 0x31e   :  { %v424_v22 = vadd.f32 %v423_v19, %v422_v17 }
 0x320   :  { %v425_v23 = vrot.slane %v424_v22, 2 }
 0x322   :  { %v426_v24 = vadd.f32 %v425_v23, %v424_v22 }
 0x324   :  { %v427_v25 = vrot.slane %v426_v24, 1 }
 0x326   :  { %v428_v26 = vadd.f32 %v427_v25, %v426_v24 }
 0x328   :  { %v429_v27 = vmul.f32 0.125, %v428_v26  ;;  %v948_v26 = vstv %s1094_s10 }
 0x32a   :  { %v430_v28 = vsub.f32 %v414_v16, %v429_v27 }
 0x32c   :  { %v431_v29 = vmul.f32 %v430_v28, %v430_v28 }
 0x32e   :  { %v432_v30 = vsel %vm178_vm1, %v431_v29, 0.0  ;;  %v949_v29 = vmul.f32 %v948_v26, %v1521_v7 }
 0x32f   :  { %v433_v31 = vrot.slane %v432_v30, 4 }
 0x331   :  { %v434_v32 = vadd.f32 %v433_v31, %v432_v30 }
 0x333   :  { %v435_v33 = vrot.slane %v434_v32, 2 }
 0x335   :  { %v436_v34 = vadd.f32 %v435_v33, %v434_v32 }
 0x337   :  { %v437_v35 = vrot.slane %v436_v34, 1 }
 0x339   :  { %v438_v36 = vadd.f32 %v437_v35, %v436_v34 }
 0x33b   :  { %v439_v37 = vmul.f32 0.125, %v438_v36 }
 0x33d   :  { %v440_v38 = vadd.f32 1e-05, %v439_v37 }
 0x33f   :  { %1282 = vrsqrt.f32 %v440_v38 }
 0x349   :  { %v1283_v39 = vpop.eup %1282 }
 0x34a   :  { %v442_v41 = vmul.f32 %v1283_v39, %v430_v28  ;;  %v951_v28 = vstv %s950_s28 }
 0x34c   :  { %v449_v43 = vmul.f32 %v1114_v40, %v442_v41 }
 0x34e   :  { %v456_v44 = vadd.f32 %v1115_v42, %v449_v43 }
 0x350   :  { %v457_v45 = vmax.f32 %v456_v44, 0.0 }
 0x352   :  { %v466_v46 = vpack.c.bf16 %v457_v45, %v457_v45 }
 0x354   :  { %1212 = vmatmul.mubr.msk.bf16.vlgmr.msra.gmra.mrb[8].mxu1 %vm178_vm1, %v466_v46 }
 0x355   :  { %1232 = vmatprep.mubr.msk.f32.mxu1 %vm1354_vm0, %v1353_v1  ;;  %1231 = vmatpush3.msra.mxu1 %v1355_v4 }
 0x3ba   :  { %v1579_v47 = vpop.f32.mrb[4].mxu0 }
 0x3bb   :  { %v1219_v48 = vpop.f32.mrb[5].mxu0  ;;  %v636_v36 = vsel %vm635_vm4, %v1579_v47, -inf }
 0x3be   :  { %v734_v49 = vpop.f32.mrb[6].mxu0 }
 0x3bf   :  { %v1224_v50 = vpop.f32.mrb[7].mxu0  ;;  %v738_v51 = vsel %vm635_vm4, %v734_v49, -inf }
 0x3c0   :  { %739 = vmax.xlane.f32.xlu1 %v738_v51 }
 0x427   :  { %v535_v52 = vpop.f32.mrb[8].mxu1 }
 0x428   :  { %v1213_v53 = vpop.f32.mrb[9].mxu1  ;;  %v536_v14 = vadd.f32 %v1116_v13, %v535_v52 }
 0x429   :  { %v538_v54 = vpop.f32.mrb[10].mxu1 }
 0x42a   :  { %v1214_v55 = vpop.f32.mrb[11].mxu1  ;;  %v960_v15 = vmul.f32 %v536_v14, %v536_v14 }
 0x42c   :  { %v961_v16 = vsel %vm317_vm3, %v960_v15, 0.0 }
 0x44d   :  { %v740_v58 = vpop.xlane.xlu1 %739 }
 0x44e   :  { %vm741_vm5 = vcmp.ge.f32.partialorder %v734_v49, %v740_v58 }
 0x44f   :  { %v742_v59 = vsel %vm741_vm5, %v1582_v57, 4 }
 0x450   :  { %v743_v60 = vsel %vm635_vm4, %v742_v59, 2147483647 }
 0x451   :  { %v745_v61 = vshra.s32 %v743_v60, 16  ;;  %v744_v63 = vand.u32 65535, %v743_v60 }
 0x453   :  { %v747_v62 = vcvt.s32.f32 %v745_v61  ;;  %v746_v2 = vcvt.s32.f32 %v744_v63 }
 0x455   :  { %748 = vmin.xlane.f32.xlu0 %v747_v62 }
 0x4e2   :  { %v749_v0 = vpop.xlane.xlu0 %748 }
 0x4e3   :  { %vm750_vm6 = vcmp.eq.f32.partialorder %v747_v62, %v749_v0  ;;  %v755_v5 = vcvt.f32.s32 %v749_v0 }
 0x4e4   :  { %v751_v3 = vsel %vm750_vm6, %v746_v2, inf }
 0x4e5   :  { %752 = vmin.xlane.f32.xlu1 %v751_v3  ;;  %v756_v8 = vshll.u32 %v755_v5, 16 }
 0x572   :  { %v753_v6 = vpop.xlane.xlu1 %752 }
 0x573   :  { %v754_v9 = vcvt.f32.s32 %v753_v6 }
 0x575   :  { %v757_v10 = vadd.s32 %v756_v8, %v754_v9 }
 0x577   :  { %vm758_vm7 = vcmp.lt.s32.totalorder %v757_v10, 3 }
 0x578   :  { %v759_v11 = vsel %vm758_vm7, %v757_v10, 3 }
 0x579   :  { %vm760_vm8 = vcmp.eq.s32.totalorder %v759_v11, %v1582_v57 }
 0x57a   :  { %v1126_v12 = vsel %vm760_vm8, 1.0, %v1353_v1 }
 0x57b   :  { %763 = vxpose.xlu0.b32.start.end [1/1] (short) (narrow) %v1126_v12, 8 }
 0x5a4   :  { %1248 = vset.pattern.permute.xlu0 %v1356_v18 }
 0x5a8   :  { %962 = vadd.xlane.f32.xlu0 %v961_v16 }
 0x5fb   :  { %v779_v17 = vpop.trf.xlu0 }
 0x5fc   :  { %1228 = vmatmul.mubr.msk.f32.vlgmr.msra.gmra.mrb[8].mxu0 %vm795_vm9, %v779_v17  ;;  %1233 = vmatmul.mubr.msk.f32.vlgmr.msra.gmra.mrb[12].mxu1 %vm795_vm9, %v779_v17 }
 0x5fd   :  { %1237 = vmatprep.mubr.msk.f32.mxu0 %vm1354_vm0, %v1353_v1 }
 0x635   :  { %v963_v37 = vpop.xlane.xlu0 %962 }
 0x636   :  { %v964_v38 = vmax.f32 %v963_v37, 1e-24 }
 0x6cf   :  { %v865_v19 = vpop.f32.mrb[8].mxu0  ;;  %v935_v20 = vpop.f32.mrb[12].mxu1 }
 0x6d0   :  { %v939_v21 = vmax.f32 %v935_v20, 1.0  ;;  %v1229_v22 = vpop.f32.mrb[9].mxu0  ;;  %v1234_v23 = vpop.f32.mrb[13].mxu1  ;;  %vm947_vm10 = vcmp.gt.f32.partialorder %v935_v20, 0.0 }
 0x6d1   :  { %v954_v24 = vsel %vm947_vm10, 1, %v1356_v18 }
 0x6d2   :  { %942 = vperm.xlu1 %1247, %v939_v21  }
 0x6d6   :  { %956 = vperm.xlu1 %1247, %v954_v24  }
 0x751   :  { %v943_v25 = vpop.permute.xlu1 %942 }
 0x752   :  { %1284 = vrcp.f32 %v943_v25 }
 0x755   :  { %v957_v30 = vpop.permute.xlu1 %956 }
 0x756   :  { %vm958_vm11 = vcmp.eq.s32.totalorder %v957_v30, 1 }
 0x75c   :  { %v1285_v27 = vpop.eup %1284 }
 0x75d   :  { %v946_v1 = vmul.f32 %v1285_v27, %v865_v19 }
 0x75f   :  { %v952_v31 = vmul.f32 %v951_v28, %v946_v1 }
 0x761   :  { %v953_v32 = vadd.f32 %v952_v31, %v949_v29 }
 0x763   :  { %v959_v33 = vsel %vm958_vm11, %v953_v32, %v1521_v7 }
 0x764   :  { %1056 = vst.msk [vmem:[#allocation6] sm:$0xf] %vm543_vm2, %v959_v33  ;;  %v967_v34 = vmul.f32 %v959_v33, %v959_v33 }
 0x766   :  { %v968_v35 = vsel %vm543_vm2, %v967_v34, 0.0 }
 0x767   :  { %969 = vadd.xlane.f32.xlu1 %v968_v35 }
 0x76b   :  { %637 = vmax.xlane.f32.xlu1 %v636_v36 }
 0x7f4   :  { %v970_v39 = vpop.xlane.xlu1 %969 }
 0x7f5   :  { %v971_v40 = vmax.f32 %v970_v39, 1e-24 }
 0x7f7   :  { %1286 = vrsqrt.f32 %v971_v40 }
 0x7f8   :  { %1288 = vrsqrt.f32 %v964_v38  ;;  %v638_v41 = vpop.xlane.xlu1 %637 }
 0x7f9   :  { %vm639_vm12 = vcmp.ge.f32.partialorder %v1579_v47, %v638_v41 }
 0x7fa   :  { %v640_v7 = vsel %vm639_vm12, %v1582_v57, 4 }
 0x7fb   :  { %v641_v42 = vsel %vm635_vm4, %v640_v7, 2147483647 }
 0x7fc   :  { %v643_v43 = vshra.s32 %v641_v42, 16  ;;  %v642_v50 = vand.u32 65535, %v641_v42 }
 0x7fe   :  { %v645_v44 = vcvt.s32.f32 %v643_v43  ;;  %v644_v52 = vcvt.s32.f32 %v642_v50 }
 0x800   :  { %646 = vmin.xlane.f32.xlu1 %v645_v44 }
 0x801   :  { %v1287_v45 = vpop.eup %1286 }
 0x802   :  { %v1289_v46 = vpop.eup %1288  ;;  %v973_v48 = vmul.f32 %v1287_v45, %v959_v33 }
 0x803   :  { %v966_v49 = vmul.f32 %v1289_v46, %v536_v14 }
 0x804   :  { %1236 = vmatpush3.xpose.msk.msra.mxu0 %vm317_vm3, %v973_v48 }
 0x807   :  { %1238 = vmatmul.mubr.msk.f32.vlgmr.msra.gmra.mrb[10].mxu0 %vm317_vm3, %v966_v49 }
 0x88d   :  { %v647_v51 = vpop.xlane.xlu1 %646 }
 0x88e   :  { %vm648_vm13 = vcmp.eq.f32.partialorder %v645_v44, %v647_v51 }
 0x88f   :  { %v649_v47 = vsel %vm648_vm13, %v644_v52, inf }
 0x890   :  { %650 = vmin.xlane.f32.xlu1 %v649_v47 }
 0x891   :  { %1313 = shalt.err (!%p1310_p9)
}
 0x892   :  { %s1314_s4 = scalar_lea.hbm %s1650_s14, 128 }
 0x893   :  { %p1315_p10 = scmp.ne.s32.totalorder %s1650_s14, %s1314_s4  ;;  %p1318_p11 = scmp.lt.u32.totalorder %s1314_s4, %s1650_s14 }
 0x895   :  { %p1320_p12 = pnand %p1318_p11, %p1315_p10 }
 0x897   :  { %1323 = shalt.err (!%p1320_p12)
}
 0x898   :  { %1070 = dma.vmem_to_hbm [thread:$0]  %s1068_s5, 128, %s1650_s14, [#allocation3]  }
 0x899   :  { %s1324_s23 = scalar_lea.vmem %s1078_s16, 64  ;;  %p1329_p0 = scmp.lt.s32.totalorder %s1078_s16, %s1078_s16 }
 0x89a   :  { %p1325_p13 = scmp.ne.s32.totalorder %s1078_s16, %s1324_s23  ;;  %p1330_p1 = scmp.lt.s32.totalorder %s1324_s23, %s1324_s23 }
 0x89c   :  { %p1331_p2 = por %p1330_p1, %p1329_p0 }
 0x89e   :  { %p1332_p3 = pnand %p1331_p2, %p1325_p13 }
 0x8a0   :  { %1335 = shalt.err (!%p1332_p3)
}
 0x8a1   :  { %s1336_s25 = scalar_lea.hbm %s1651_s15, 64 }
 0x8a2   :  { %p1337_p4 = scmp.ne.s32.totalorder %s1651_s15, %s1336_s25  ;;  %p1340_p5 = scmp.lt.u32.totalorder %s1336_s25, %s1651_s15 }
 0x8a4   :  { %p1342_p6 = pnand %p1340_p5, %p1337_p4 }
 0x8a6   :  { %1345 = shalt.err (!%p1342_p6)
}
 0x8a7   :  { %1080 = dma.vmem_to_hbm [thread:$0]  %s1078_s16, 64, %s1651_s15, [#allocation7]   ;;  %v653_v57 = vcvt.f32.s32 %v647_v51  ;;  %vm1053_vm14 = vcmask 7168  }
 0x8a8   :  { %s61_s7 = sld [smem:[#allocation2]] }
 0x8a9   :  { %v654_v59 = vshll.u32 %v653_v57, 16 }
 0x8ae   :  { %v1050_v53 = vstv %s61_s7 }
 0x8da   :  { %v1046_v54 = vpop.f32.mrb[10].mxu0 }
 0x8db   :  { %v1051_v55 = vmul.f32 %v1050_v53, %v1046_v54  ;;  %v1239_v56 = vpop.f32.mrb[11].mxu0 }
 0x8dd   :  { %1052 = vst.msk [vmem:[%s1648_s12] sm:$0xff] %vm635_vm4, %v1051_v55 }
 0x91d   :  { %v651_v58 = vpop.xlane.xlu1 %650 }
 0x91e   :  { %v652_v60 = vcvt.f32.s32 %v651_v58 }
 0x920   :  { %v655_v61 = vadd.s32 %v654_v59, %v652_v60 }
 0x922   :  { %vm656_vm15 = vcmp.lt.s32.totalorder %v655_v61, 3 }
 0x923   :  { %v657_v62 = vsel %vm656_vm15, %v655_v61, 3 }
 0x924   :  { %1054 = vst.msk [vmem:[%s1649_s13] sm:$0xff] %vm1053_vm14, %v657_v62 }
 0x925   :  { %1348 = dma.done.wait [#allocation3], 128  }
 0x926   :  { %1349 = vsyncadd [#allocation3], 4294967168 }
 0x927   :  { %1350 = dma.done.wait [#allocation7], 64  }
 0x928   :  { %1351 = vsyncadd [#allocation7], 4294967232 }
 0x929   :  { %1091 = vsyncpa [#allocation3], 1 }
 0x92a   :  { %1092 = vsyncpa [#allocation7], 1 }
 0x92b   :  { %1093 = vsyncpa [#allocation4], 1 }

// kernel: smog_forward.2
= control target key start
LH: loop header
LB: loop body
LE: loop exit
PB: predicated region body
PF: predicated region fallthrough
CT: control target
= control target key end

     0   :  { %s13185_s12 = smov 0   ;;  %s16463_s0 = inlined_call_operand.vmem [shape: bf16[16,10,10,3], index: 0, kind: input, shape index: {}]   ;;  %s16464_s1 = inlined_call_operand.vmem [shape: bf16[9,3,128], index: 1, kind: input, shape index: {}]   ;;  %s16465_s2 = inlined_call_operand.vmem [shape: f32[1,128], index: 2, kind: input, shape index: {}]   ;;  %s16466_s3 = inlined_call_operand.vmem [shape: bf16[16,128], index: 3, kind: output, shape index: {}]  }
   0x1 LB: > { %s13191_s13 = sadd.s32 4294967295, %s13162_s12   ;;  %p10098_p0 = scmp.ge.s32.totalorder %s13162_s12, 1  ;;  %s13162_s12 = sphi %s13185_s12, %s13_s12  }
   0x2   : > { %p139_p1 = scmp.lt.s32.totalorder %s13162_s12, 3 }
   0x4   : > { %p140_p2 = pnand %p10098_p0, %p139_p1 }
   0x6   : > { %143 = sbr.rel (%p140_p2) target bundleno = 986 (0x3da), region = 32 }
   0xd   : > { %v176_v0 = vld [vmem:[%s16464_s1 + $0x2] sm:$0x3]  ;;  %vm1404_vm0 = vcmask 1040384   ;;  %vm1405_vm1 = vcmask 1041408   ;;  %s10099_s16 = sshll.u32 %s13191_s13, 3  ;;  %v13164_v1 = vmov 65535  }
   0xe   : > { %v1406_v2 = vsel %vm1404_vm0, 4294967295, %v13164_v1  ;;  %v179_v3 = vld [vmem:[%s16464_s1 + $0x8] sm:$0x3]  ;;  %p164_p3 = scmp.lt.s32.totalorder %s10099_s16, 15  ;;  %v175_v5 = vld [vmem:[%s16464_s1] sm:$0x3] }
   0xf   : > { %v13202_v4 = vsel %vm1405_vm1, %v1406_v2, 0  ;;  %v180_v9 = vld [vmem:[%s16464_s1 + $0xa] sm:$0x3]  ;;  %vm312_vm2 = vsmask.f32 3328  ;;  %vm1307_vm5 = vcmask 23552  }
  0x10   : > { %v1409_v6 = vand.u32 %v13202_v4, %v176_v0  ;;  %v13209_v7 = vand.u32 %v13202_v4, %v179_v3  ;;  %s16565_s16 = smov (!%p164_p3, %s10099_s16), 15  ;;  %v13212_v8 = vand.u32 %v13202_v4, %v175_v5  ;;  %v13218_v10 = vand.u32 %v13202_v4, %v180_v9  ;;  %p170_p4 = scmp.lt.s32.totalorder %s13191_s13, 1 }
  0x11   : > { %s12806_s23 = smul.u32 80, %s16565_s16  ;;  %vm313_vm3 = vsmask.f32 7440  ;;  %vm2440_vm6 = vcmask 1042432   ;;  %vm2441_vm7 = vcmask 1046532   ;;  %vm10024_vm9 = vcmask 1041409  }
  0x12   : > { %16485 = vst [vmem:[#allocation2_spill] sm:$0xff] %v13209_v7  ;;  %11698 = vmatprep.subr.bf16.mxu1 %v1409_v6  ;;  %11962 = vmatprep.subr.bf16.mxu0 %v13209_v7  ;;  %vm13244_vm4 = vmor %vm312_vm2, %vm313_vm3  ;;  %vm10026_vm10 = vcmask 1042434   ;;  %vm10028_vm11 = vcmask 1043459   ;;  %vm10030_vm12 = vcmask 1044484   ;;  %vm10032_vm13 = vcmask 1045509   ;;  %s16567_s13 = smov (!%p170_p4, %s13191_s13), 1 }
  0x13   : > { %11699 = vmatpush3.bf16.msra.mxu1 %v1409_v6  ;;  %11963 = vmatpush3.bf16.msra.mxu0 %v13209_v7  ;;  %s13225_s26 = scalar_lea.vmem %s16463_s0, %s12806_s23  ;;  %vm13548_vm8 = vmor %vm2440_vm6, %vm2441_vm7  ;;  %vm10034_vm14 = vcmask 1046534   ;;  %s10101_s14 = sshll.u32 %s16567_s13, 2  ;;  %vm10036_vm15 = vcmask 1047559  }
  0x14   : > { %11764 = vmatprep.subr.bf16.mxu1 %v13212_v8  ;;  %12028 = vmatprep.subr.bf16.mxu0 %v13218_v10  ;;  %v184_v11 = vld [vmem:[%s13225_s26] sm:$0xf]  ;;  %v185_v12 = vld [vmem:[%s13225_s26 + $0x8] sm:$0xf]  ;;  %v248_v13 = vld [vmem:[%s13225_s26 + $0x4] sm:$0x1]  ;;  %s173_s17 = scalar_lea.vmem %s16466_s3, %s10101_s14 }
  0x15   : > { %v249_v14 = vld [vmem:[%s13225_s26 + $0xc] sm:$0x1]  ;;  %v316_v15 = vshrl.u32 %v184_v11, 16  ;;  %v319_v16 = vshll.u32 %v184_v11, 16  ;;  %v325_v17 = vshll.u32 %v248_v13, 16  ;;  %v330_v18 = vshrl.u32 %v185_v12, 16 }
  0x16   : > { %v333_v19 = vshll.u32 %v185_v12, 16  ;;  %v339_v20 = vshll.u32 %v249_v14, 16  ;;  %v10486_v21 = vld [vmem:[%s13225_s26 + $0x8] sm:$0xf]  ;;  %v13235_v26 = vld [vmem:[%s13225_s26 + $0xc] sm:$0x1] }
  0x17   : > { %v318_v22 = vrot.slane %v316_v15, 4  ;;  %v321_v23 = vrot.slane %v319_v16, 5  ;;  %v327_v24 = vrot.slane %v325_v17, 5  ;;  %v332_v25 = vrot.slane %v330_v18, 4  ;;  %v10488_v29 = vld [vmem:[%s13225_s26 + $0x10] sm:$0xf] }
  0x18   : > { %v335_v27 = vrot.slane %v333_v19, 5  ;;  %v341_v28 = vrot.slane %v339_v20, 5  ;;  %v13239_v30 = vld [vmem:[%s13225_s26 + $0x14] sm:$0x1]  ;;  %v4053_v32 = vshrl.u32 %v10486_v21, 16  ;;  %v4056_v33 = vshll.u32 %v10486_v21, 16 }
  0x19   : > { %v322_v31 = vor.u32 %v321_v23, %v318_v22  ;;  %v4062_v34 = vshll.u32 %v13235_v26, 16  ;;  %v4067_v37 = vshrl.u32 %v10488_v29, 16  ;;  %v4070_v38 = vshll.u32 %v10488_v29, 16  ;;  %v186_v40 = vld [vmem:[%s13225_s26 + $0x10] sm:$0xf] }
  0x1a   : > { %v336_v36 = vor.u32 %v335_v27, %v332_v25  ;;  %v4076_v39 = vshll.u32 %v13239_v30, 16  ;;  %v4055_v42 = vrot.slane %v4053_v32, 4  ;;  %v4058_v43 = vrot.slane %v4056_v33, 5  ;;  %v187_v44 = vld [vmem:[%s13225_s26 + $0x18] sm:$0xf] }
  0x1b   : > { %v323_v41 = vrot.slane %v322_v31, 4  ;;  %v4069_v46 = vrot.slane %v4067_v37, 4  ;;  %v4072_v47 = vrot.slane %v4070_v38, 5  ;;  %v250_v48 = vld [vmem:[%s13225_s26 + $0x14] sm:$0x1]  ;;  %v4064_v51 = vrot.slane %v4062_v34, 5 }
  0x1c   : > { %v337_v45 = vrot.slane %v336_v36, 4  ;;  %v4059_v50 = vor.u32 %v4058_v43, %v4055_v42  ;;  %v4078_v52 = vrot.slane %v4076_v39, 5  ;;  %v251_v55 = vld [vmem:[%s13225_s26 + $0x1c] sm:$0x1]  ;;  %v344_v56 = vshrl.u32 %v186_v40, 16 }
  0x1d   : > { %v328_v49 = vsel %vm13244_vm4, %v323_v41, %v327_v24  ;;  %v4073_v54 = vor.u32 %v4072_v47, %v4069_v46  ;;  %v347_v57 = vshll.u32 %v186_v40, 16  ;;  %v353_v60 = vshll.u32 %v250_v48, 16  ;;  %v10490_v2 = vld [vmem:[%s13225_s26 + $0x18] sm:$0xf]  ;;  %v13263_v11 = vld [vmem:[%s13225_s26 + $0x1c] sm:$0x1] }
  0x1e   : > { %v342_v53 = vsel %vm13244_vm4, %v337_v45, %v341_v28  ;;  %v4060_v59 = vrot.slane %v4059_v50, 4  ;;  %v358_v61 = vshrl.u32 %v187_v44, 16  ;;  %v346_v63 = vrot.slane %v344_v56, 4  ;;  %v10492_v16 = vld [vmem:[%s13225_s26 + $0x20] sm:$0xf] }
  0x1f   : > { %v10102_v58 = vcombine.low %v328_v49, %v342_v53  ;;  %v4074_v62 = vrot.slane %v4073_v54, 4  ;;  %v349_v0 = vrot.slane %v347_v57, 5  ;;  %v361_v1 = vshll.u32 %v187_v44, 16  ;;  %v13269_v17 = vld [vmem:[%s13225_s26 + $0x24] sm:$0x1] }
  0x20   : > { %v4065_v3 = vsel %vm13244_vm4, %v4060_v59, %v4064_v51  ;;  %v5690_v5 = vrot.slane %v13235_v26, 5  ;;  %v360_v6 = vrot.slane %v358_v61, 4  ;;  %v367_v9 = vshll.u32 %v251_v55, 16  ;;  %v188_v32 = vld [vmem:[%s13225_s26 + $0x20] sm:$0xf] }
  0x21   : > { %11700 = vmatprep.mubr.msk.bf16.mxu1 %vm1307_vm5, %v10102_v58  ;;  %v4079_v12 = vsel %vm13244_vm4, %v4074_v62, %v4078_v52  ;;  %v350_v13 = vor.u32 %v349_v0, %v346_v63  ;;  %v355_v14 = vrot.slane %v353_v60, 5  ;;  %v363_v15 = vrot.slane %v361_v1, 5  ;;  %v252_v38 = vld [vmem:[%s13225_s26 + $0x24] sm:$0x1]  ;;  %v189_v43 = vld [vmem:[%s13225_s26 + $0x28] sm:$0xf] }
  0x22   : > { %v10614_v18 = vcombine.low %v4065_v3, %v4079_v12  ;;  %v5694_v19 = vrot.slane %v13239_v30, 5  ;;  %v369_v20 = vrot.slane %v367_v9, 5  ;;  %v4081_v21 = vshrl.u32 %v10490_v2, 16  ;;  %v253_v47 = vld [vmem:[%s13225_s26 + $0x2c] sm:$0x1] }
  0x23   : > { %v351_v22 = vrot.slane %v350_v13, 4  ;;  %v364_v23 = vor.u32 %v363_v15, %v360_v6  ;;  %v4084_v24 = vshll.u32 %v10490_v2, 16  ;;  %v4090_v25 = vshll.u32 %v13263_v11, 16  ;;  %v10494_v53 = vld [vmem:[%s13225_s26 + $0x28] sm:$0xf] }
  0x24   : > { %11964 = vmatprep.mubr.msk.bf16.mxu0 %vm1307_vm5, %v10614_v18  ;;  %v4083_v27 = vrot.slane %v4081_v21, 4  ;;  %v4095_v28 = vshrl.u32 %v10492_v16, 16  ;;  %v4098_v29 = vshll.u32 %v10492_v16, 16  ;;  %v4104_v31 = vshll.u32 %v13269_v17, 16  ;;  %v10495_v62 = vld [vmem:[%s13225_s26 + $0x2c] sm:$0x1] }
  0x25   : > { %v356_v33 = vsel %vm13244_vm4, %v351_v22, %v355_v14  ;;  %v365_v34 = vrot.slane %v364_v23, 4  ;;  %v4086_v36 = vrot.slane %v4084_v24, 5  ;;  %v4092_v37 = vrot.slane %v4090_v25, 5  ;;  %v10496_v2 = vld [vmem:[%s13225_s26 + $0x30] sm:$0xf] }
  0x26   : > { %v4097_v39 = vrot.slane %v4095_v28, 4  ;;  %v4100_v40 = vrot.slane %v4098_v29, 5  ;;  %v4106_v41 = vrot.slane %v4104_v31, 5  ;;  %v5698_v42 = vrot.slane %v13263_v11, 5  ;;  %v10497_v13 = vld [vmem:[%s13225_s26 + $0x34] sm:$0x1] }
  0x27   : > { %v370_v44 = vsel %vm13244_vm4, %v365_v34, %v369_v20  ;;  %v4087_v45 = vor.u32 %v4086_v36, %v4083_v27  ;;  %v5702_v46 = vrot.slane %v13269_v17, 5  ;;  %v372_v48 = vshrl.u32 %v188_v32, 16  ;;  %v190_v15 = vld [vmem:[%s13225_s26 + $0x30] sm:$0xf]  ;;  %v254_v29 = vld [vmem:[%s13225_s26 + $0x34] sm:$0x1] }
  0x28   : > { %v10103_v49 = vcombine.low %v356_v33, %v370_v44  ;;  %v4101_v50 = vor.u32 %v4100_v40, %v4097_v39  ;;  %v375_v51 = vshll.u32 %v188_v32, 16  ;;  %v381_v52 = vshll.u32 %v252_v38, 16  ;;  %v255_v38 = vld [vmem:[%s13225_s26 + $0x3c] sm:$0x1]  ;;  %v10498_v44 = vld [vmem:[%s13225_s26 + $0x38] sm:$0xf] }
  0x29   : > { %v4088_v54 = vrot.slane %v4087_v45, 4  ;;  %v374_v55 = vrot.slane %v372_v48, 4  ;;  %v386_v56 = vshrl.u32 %v189_v43, 16  ;;  %v389_v57 = vshll.u32 %v189_v43, 16 }
  0x2a   : > { %11701 = vmatmul.mubr.msk.bf16.vlgmr.msra.gmra.mrb[0].mxu1 %vm1307_vm5, %v10103_v49  ;;  %v4102_v58 = vrot.slane %v4101_v50, 4  ;;  %v377_v59 = vrot.slane %v375_v51, 5  ;;  %v383_v60 = vrot.slane %v381_v52, 5  ;;  %v395_v61 = vshll.u32 %v253_v47, 16 }
  0x2b   : > { %11765 = vmatpush3.bf16.msra.mxu1 %v13212_v8  ;;  %v4093_v63 = vsel %vm13244_vm4, %v4088_v54, %v4092_v37  ;;  %v388_v0 = vrot.slane %v386_v56, 4  ;;  %v391_v1 = vrot.slane %v389_v57, 5  ;;  %v4109_v3 = vshrl.u32 %v10494_v53, 16  ;;  %v191_v37 = vld [vmem:[%s13225_s26 + $0x38] sm:$0xf] }
  0x2c   : > { %v4107_v6 = vsel %vm13244_vm4, %v4102_v58, %v4106_v41  ;;  %v378_v9 = vor.u32 %v377_v59, %v374_v55  ;;  %v397_v12 = vrot.slane %v395_v61, 5  ;;  %v4112_v14 = vshll.u32 %v10494_v53, 16  ;;  %v10499_v53 = vld [vmem:[%s13225_s26 + $0x3c] sm:$0x1]  ;;  %v10500_v57 = vld [vmem:[%s13225_s26 + $0x40] sm:$0xf] }
  0x2d   : > { %v10615_v16 = vcombine.low %v4093_v63, %v4107_v6  ;;  %v392_v18 = vor.u32 %v391_v1, %v388_v0  ;;  %v4111_v20 = vrot.slane %v4109_v3, 4  ;;  %v4118_v8 = vshll.u32 %v10495_v62, 16  ;;  %v10501_v63 = vld [vmem:[%s13225_s26 + $0x44] sm:$0x1]  ;;  %v192_v6 = vld [vmem:[%s13225_s26 + $0x50] sm:$0xf] }
  0x2e   : > { %v379_v21 = vrot.slane %v378_v9, 4  ;;  %v4114_v22 = vrot.slane %v4112_v14, 5  ;;  %v4123_v23 = vshrl.u32 %v10496_v2, 16  ;;  %v4126_v24 = vshll.u32 %v10496_v2, 16 }
  0x2f   : > { %11965 = vmatmul.mubr.msk.bf16.vlgmr.msra.gmra.mrb[0].mxu0 %vm1307_vm5, %v10615_v16  ;;  %v393_v25 = vrot.slane %v392_v18, 4  ;;  %v4120_v27 = vrot.slane %v4118_v8, 5  ;;  %v4132_v28 = vshll.u32 %v10497_v13, 16  ;;  %v400_v31 = vshrl.u32 %v190_v15, 16 }
  0x30   : > { %12029 = vmatpush3.bf16.msra.mxu0 %v13218_v10  ;;  %v384_v32 = vsel %vm13244_vm4, %v379_v21, %v383_v60  ;;  %v4115_v33 = vor.u32 %v4114_v22, %v4111_v20  ;;  %v4125_v34 = vrot.slane %v4123_v23, 4  ;;  %v4128_v36 = vrot.slane %v4126_v24, 5  ;;  %v256_v21 = vld [vmem:[%s13225_s26 + $0x54] sm:$0x1] }
  0x31   : > { %v398_v39 = vsel %vm13244_vm4, %v393_v25, %v397_v12  ;;  %v4134_v40 = vrot.slane %v4132_v28, 5  ;;  %v402_v41 = vrot.slane %v400_v31, 4  ;;  %v403_v43 = vshll.u32 %v190_v15, 16  ;;  %v193_v15 = vld [vmem:[%s13225_s26 + $0x58] sm:$0xf] }
  0x32   : > { %v10104_v45 = vcombine.low %v384_v32, %v398_v39  ;;  %v4116_v47 = vrot.slane %v4115_v33, 4  ;;  %v4129_v10 = vor.u32 %v4128_v36, %v4125_v34  ;;  %v409_v48 = vshll.u32 %v254_v29, 16  ;;  %v257_v31 = vld [vmem:[%s13225_s26 + $0x5c] sm:$0x1] }
  0x33   : > { %v405_v49 = vrot.slane %v403_v43, 5  ;;  %v414_v50 = vshrl.u32 %v191_v37, 16  ;;  %v417_v51 = vshll.u32 %v191_v37, 16  ;;  %v423_v52 = vshll.u32 %v255_v38, 16  ;;  %v10502_v38 = vld [vmem:[%s13225_s26 + $0x58] sm:$0xf] }
  0x34   : > { %11704 = vmatprep.mubr.msk.bf16.mxu1 %vm1307_vm5, %v10104_v45  ;;  %v4121_v54 = vsel %vm13244_vm4, %v4116_v47, %v4120_v27  ;;  %v4130_v55 = vrot.slane %v4129_v10, 4  ;;  %v411_v56 = vrot.slane %v409_v48, 5  ;;  %v4137_v58 = vshrl.u32 %v10498_v44, 16 }
  0x35   : > { %v406_v59 = vor.u32 %v405_v49, %v402_v41  ;;  %v416_v60 = vrot.slane %v414_v50, 4  ;;  %v419_v61 = vrot.slane %v417_v51, 5  ;;  %v425_v62 = vrot.slane %v423_v52, 5  ;;  %v10504_v49 = vld [vmem:[%s13225_s26 + $0x60] sm:$0xf] }
  0x36   : > { %v4135_v0 = vsel %vm13244_vm4, %v4130_v55, %v4134_v40  ;;  %v4139_v1 = vrot.slane %v4137_v58, 4  ;;  %v4140_v2 = vshll.u32 %v10498_v44, 16  ;;  %v4146_v3 = vshll.u32 %v10499_v53, 16  ;;  %v10503_v44 = vld [vmem:[%s13225_s26 + $0x5c] sm:$0x1] }
  0x37   : > { %v10616_v9 = vcombine.low %v4121_v54, %v4135_v0  ;;  %v407_v12 = vrot.slane %v406_v59, 4  ;;  %v420_v13 = vor.u32 %v419_v61, %v416_v60  ;;  %v4151_v14 = vshrl.u32 %v10500_v57, 16 }
  0x38   : > { %v4142_v16 = vrot.slane %v4140_v2, 5  ;;  %v4148_v18 = vrot.slane %v4146_v3, 5  ;;  %v4154_v20 = vshll.u32 %v10500_v57, 16  ;;  %v4160_v8 = vshll.u32 %v10501_v63, 16  ;;  %v194_v63 = vld [vmem:[%s13225_s26 + $0x60] sm:$0xf] }
  0x39   : > { %11968 = vmatprep.mubr.msk.bf16.mxu0 %vm1307_vm5, %v10616_v9  ;;  %v412_v22 = vsel %vm13244_vm4, %v407_v12, %v411_v56  ;;  %v421_v23 = vrot.slane %v420_v13, 4  ;;  %v4153_v24 = vrot.slane %v4151_v14, 4  ;;  %v428_v25 = vshrl.u32 %v192_v6, 16  ;;  %v10505_v56 = vld [vmem:[%s13225_s26 + $0x64] sm:$0x1] }
  0x3a   : > { %v4143_v27 = vor.u32 %v4142_v16, %v4139_v1  ;;  %v4156_v28 = vrot.slane %v4154_v20, 5  ;;  %v4162_v29 = vrot.slane %v4160_v8, 5  ;;  %v431_v32 = vshll.u32 %v192_v6, 16  ;;  %v195_v6 = vld [vmem:[%s13225_s26 + $0x68] sm:$0xf] }
  0x3b   : > { %v426_v33 = vsel %vm13244_vm4, %v421_v23, %v425_v62  ;;  %v430_v34 = vrot.slane %v428_v25, 4  ;;  %v437_v36 = vshll.u32 %v256_v21, 16  ;;  %v442_v37 = vshrl.u32 %v193_v15, 16  ;;  %v258_v9 = vld [vmem:[%s13225_s26 + $0x64] sm:$0x1] }
  0x3c   : > { %v10105_v39 = vcombine.low %v412_v22, %v426_v33  ;;  %v4144_v40 = vrot.slane %v4143_v27, 4  ;;  %v4157_v41 = vor.u32 %v4156_v28, %v4153_v24  ;;  %v433_v43 = vrot.slane %v431_v32, 5  ;;  %v259_v20 = vld [vmem:[%s13225_s26 + $0x6c] sm:$0x1]  ;;  %v10506_v27 = vld [vmem:[%s13225_s26 + $0x68] sm:$0xf] }
  0x3d   : > { %v439_v45 = vrot.slane %v437_v36, 5  ;;  %v444_v47 = vrot.slane %v442_v37, 4  ;;  %v445_v10 = vshll.u32 %v193_v15, 16  ;;  %v451_v48 = vshll.u32 %v257_v31, 16  ;;  %v10507_v33 = vld [vmem:[%s13225_s26 + $0x6c] sm:$0x1] }
  0x3e   : > { %11705 = vmatmul.mubr.msk.bf16.gmra.mrb[4].mxu1 %vm1307_vm5, %v10105_v39  ;;  %v4149_v50 = vsel %vm13244_vm4, %v4144_v40, %v4148_v18  ;;  %v4158_v51 = vrot.slane %v4157_v41, 4  ;;  %v434_v52 = vor.u32 %v433_v43, %v430_v34  ;;  %v4165_v53 = vshrl.u32 %v10502_v38, 16  ;;  %v10508_v39 = vld [vmem:[%s13225_s26 + $0x70] sm:$0xf] }
  0x3f   : > { %v447_v54 = vrot.slane %v445_v10, 5  ;;  %v453_v55 = vrot.slane %v451_v48, 5  ;;  %v4168_v57 = vshll.u32 %v10502_v38, 16  ;;  %v4174_v58 = vshll.u32 %v10503_v44, 16 }
  0x40   : > { %v4163_v59 = vsel %vm13244_vm4, %v4158_v51, %v4162_v29  ;;  %v435_v60 = vrot.slane %v434_v52, 4  ;;  %v4167_v61 = vrot.slane %v4165_v53, 4  ;;  %v4179_v62 = vshrl.u32 %v10504_v49, 16 }
  0x41   : > { %v10617_v0 = vcombine.low %v4149_v50, %v4163_v59  ;;  %v448_v1 = vor.u32 %v447_v54, %v444_v47  ;;  %v4170_v2 = vrot.slane %v4168_v57, 5  ;;  %v4176_v3 = vrot.slane %v4174_v58, 5  ;;  %v196_v50 = vld [vmem:[%s13225_s26 + $0x70] sm:$0xf] }
  0x42   : > { %v440_v12 = vsel %vm13244_vm4, %v435_v60, %v439_v45  ;;  %v4181_v13 = vrot.slane %v4179_v62, 4  ;;  %v4182_v14 = vshll.u32 %v10504_v49, 16  ;;  %v4188_v15 = vshll.u32 %v10505_v56, 16  ;;  %v10509_v45 = vld [vmem:[%s13225_s26 + $0x74] sm:$0x1] }
  0x43   : > { %11969 = vmatmul.mubr.msk.bf16.gmra.mrb[4].mxu0 %vm1307_vm5, %v10617_v0  ;;  %v449_v16 = vrot.slane %v448_v1, 4  ;;  %v4171_v18 = vor.u32 %v4170_v2, %v4167_v61  ;;  %v456_v8 = vshrl.u32 %v194_v63, 16  ;;  %v459_v21 = vshll.u32 %v194_v63, 16  ;;  %v260_v60 = vld [vmem:[%s13225_s26 + $0x74] sm:$0x1] }
  0x44   : > { %v4184_v22 = vrot.slane %v4182_v14, 5  ;;  %v4190_v23 = vrot.slane %v4188_v15, 5  ;;  %v465_v24 = vshll.u32 %v258_v9, 16  ;;  %v470_v25 = vshrl.u32 %v195_v6, 16 }
  0x45   : > { %v454_v28 = vsel %vm13244_vm4, %v449_v16, %v453_v55  ;;  %v4172_v29 = vrot.slane %v4171_v18, 4  ;;  %v458_v31 = vrot.slane %v456_v8, 4  ;;  %v461_v32 = vrot.slane %v459_v21, 5  ;;  %v197_v55 = vld [vmem:[%s13225_s26 + $0x78] sm:$0xf] }
  0x46   : > { %v10106_v34 = vcombine.low %v440_v12, %v454_v28  ;;  %v4185_v36 = vor.u32 %v4184_v22, %v4181_v13  ;;  %v467_v37 = vrot.slane %v465_v24, 5  ;;  %v472_v38 = vrot.slane %v470_v25, 4  ;;  %v10510_v16 = vld [vmem:[%s13225_s26 + $0x78] sm:$0xf]  ;;  %v10511_v22 = vld [vmem:[%s13225_s26 + $0x7c] sm:$0x1] }
  0x47   : > { %v4177_v40 = vsel %vm13244_vm4, %v4172_v29, %v4176_v3  ;;  %v462_v41 = vor.u32 %v461_v32, %v458_v31  ;;  %v473_v43 = vshll.u32 %v195_v6, 16  ;;  %v479_v44 = vshll.u32 %v259_v20, 16  ;;  %v261_v6 = vld [vmem:[%s13225_s26 + $0x7c] sm:$0x1]  ;;  %v10512_v28 = vld [vmem:[%s13225_s26 + $0x80] sm:$0xf] }
  0x48   : > { %11708 = vmatprep.mubr.msk.bf16.mxu1 %vm1307_vm5, %v10106_v34  ;;  %v4186_v47 = vrot.slane %v4185_v36, 4  ;;  %v4193_v10 = vshrl.u32 %v10506_v27, 16  ;;  %v4196_v48 = vshll.u32 %v10506_v27, 16  ;;  %v4202_v49 = vshll.u32 %v10507_v33, 16 }
  0x49   : > { %v463_v51 = vrot.slane %v462_v41, 4  ;;  %v475_v52 = vrot.slane %v473_v43, 5  ;;  %v481_v53 = vrot.slane %v479_v44, 5  ;;  %v4207_v54 = vshrl.u32 %v10508_v39, 16  ;;  %v10513_v41 = vld [vmem:[%s13225_s26 + $0x84] sm:$0x1] }
  0x4a   : > { %v4191_v56 = vsel %vm13244_vm4, %v4186_v47, %v4190_v23  ;;  %v4195_v57 = vrot.slane %v4193_v10, 4  ;;  %v4198_v58 = vrot.slane %v4196_v48, 5  ;;  %v4204_v59 = vrot.slane %v4202_v49, 5  ;;  %v198_v49 = vld [vmem:[%s13225_s26 + $0x80] sm:$0xf] }
  0x4b   : > { %v10618_v61 = vcombine.low %v4177_v40, %v4191_v56  ;;  %v468_v62 = vsel %vm13244_vm4, %v463_v51, %v467_v37  ;;  %v476_v63 = vor.u32 %v475_v52, %v472_v38  ;;  %v4209_v0 = vrot.slane %v4207_v54, 4  ;;  %v199_v54 = vld [vmem:[%s13225_s26 + $0x88] sm:$0xf] }
  0x4c   : > { %v4199_v1 = vor.u32 %v4198_v58, %v4195_v57  ;;  %v4210_v2 = vshll.u32 %v10508_v39, 16  ;;  %v4216_v3 = vshll.u32 %v10509_v45, 16  ;;  %v484_v9 = vshrl.u32 %v196_v50, 16 }
  0x4d   : > { %11972 = vmatprep.mubr.msk.bf16.mxu0 %vm1307_vm5, %v10618_v61  ;;  %v477_v12 = vrot.slane %v476_v63, 4  ;;  %v487_v13 = vshll.u32 %v196_v50, 16  ;;  %v493_v14 = vshll.u32 %v260_v60, 16  ;;  %v498_v15 = vshrl.u32 %v197_v55, 16 }
  0x4e   : > { %v4200_v18 = vrot.slane %v4199_v1, 4  ;;  %v4212_v20 = vrot.slane %v4210_v2, 5  ;;  %v4218_v8 = vrot.slane %v4216_v3, 5  ;;  %v486_v21 = vrot.slane %v484_v9, 4  ;;  %v10514_v9 = vld [vmem:[%s13225_s26 + $0x88] sm:$0xf] }
  0x4f   : > { %v482_v23 = vsel %vm13244_vm4, %v477_v12, %v481_v53  ;;  %v489_v24 = vrot.slane %v487_v13, 5  ;;  %v495_v25 = vrot.slane %v493_v14, 5  ;;  %v500_v27 = vrot.slane %v498_v15, 4 }
  0x50   : > { %v10107_v29 = vcombine.low %v468_v62, %v482_v23  ;;  %v4205_v31 = vsel %vm13244_vm4, %v4200_v18, %v4204_v59  ;;  %v4213_v32 = vor.u32 %v4212_v20, %v4209_v0  ;;  %v501_v33 = vshll.u32 %v197_v55, 16  ;;  %v262_v55 = vld [vmem:[%s13225_s26 + $0x84] sm:$0x1]  ;;  %v263_v62 = vld [vmem:[%s13225_s26 + $0x8c] sm:$0x1] }
  0x51   : > { %v490_v34 = vor.u32 %v489_v24, %v486_v21  ;;  %v507_v36 = vshll.u32 %v261_v6, 16  ;;  %v4221_v37 = vshrl.u32 %v10510_v16, 16  ;;  %v4224_v38 = vshll.u32 %v10510_v16, 16  ;;  %v10515_v16 = vld [vmem:[%s13225_s26 + $0x8c] sm:$0x1] }
  0x52   : > { %11709 = vmatmul.mubr.msk.bf16.gmra.mrb[8].mxu1 %vm1307_vm5, %v10107_v29  ;;  %v4214_v39 = vrot.slane %v4213_v32, 4  ;;  %v503_v40 = vrot.slane %v501_v33, 5  ;;  %v4230_v43 = vshll.u32 %v10511_v22, 16  ;;  %v4235_v44 = vshrl.u32 %v10512_v28, 16  ;;  %v10516_v22 = vld [vmem:[%s13225_s26 + $0x90] sm:$0xf] }
  0x53   : > { %v491_v45 = vrot.slane %v490_v34, 4  ;;  %v509_v47 = vrot.slane %v507_v36, 5  ;;  %v4223_v10 = vrot.slane %v4221_v37, 4  ;;  %v4226_v48 = vrot.slane %v4224_v38, 5  ;;  %v200_v34 = vld [vmem:[%s13225_s26 + $0xa0] sm:$0xf] }
  0x54   : > { %v4219_v50 = vsel %vm13244_vm4, %v4214_v39, %v4218_v8  ;;  %v504_v51 = vor.u32 %v503_v40, %v500_v27  ;;  %v4232_v52 = vrot.slane %v4230_v43, 5  ;;  %v4237_v53 = vrot.slane %v4235_v44, 4  ;;  %v201_v40 = vld [vmem:[%s13225_s26 + $0xa8] sm:$0xf] }
  0x55   : > { %v10619_v56 = vcombine.low %v4205_v31, %v4219_v50  ;;  %v496_v57 = vsel %vm13244_vm4, %v491_v45, %v495_v25  ;;  %v4227_v58 = vor.u32 %v4226_v48, %v4223_v10  ;;  %v4238_v59 = vshll.u32 %v10512_v28, 16  ;;  %v10517_v28 = vld [vmem:[%s13225_s26 + $0x94] sm:$0x1] }
  0x56   : > { %v505_v60 = vrot.slane %v504_v51, 4  ;;  %v4244_v61 = vshll.u32 %v10513_v41, 16  ;;  %v512_v63 = vshrl.u32 %v198_v49, 16  ;;  %v515_v0 = vshll.u32 %v198_v49, 16 }
  0x57   : > { %11973 = vmatmul.mubr.msk.bf16.gmra.mrb[8].mxu0 %vm1307_vm5, %v10619_v56  ;;  %v4228_v1 = vrot.slane %v4227_v58, 4  ;;  %v4240_v2 = vrot.slane %v4238_v59, 5  ;;  %v521_v3 = vshll.u32 %v262_v55, 16  ;;  %v526_v6 = vshrl.u32 %v199_v54, 16 }
  0x58   : > { %v510_v12 = vsel %vm13244_vm4, %v505_v60, %v509_v47  ;;  %v4246_v13 = vrot.slane %v4244_v61, 5  ;;  %v514_v14 = vrot.slane %v512_v63, 4  ;;  %v517_v15 = vrot.slane %v515_v0, 5  ;;  %v264_v47 = vld [vmem:[%s13225_s26 + $0xa4] sm:$0x1] }
  0x59   : > { %v10108_v18 = vcombine.low %v496_v57, %v510_v12  ;;  %v4233_v20 = vsel %vm13244_vm4, %v4228_v1, %v4232_v52  ;;  %v4241_v8 = vor.u32 %v4240_v2, %v4237_v53  ;;  %v523_v21 = vrot.slane %v521_v3, 5  ;;  %v10518_v60 = vld [vmem:[%s13225_s26 + $0xa8] sm:$0xf]  ;;  %v10519_v1 = vld [vmem:[%s13225_s26 + $0xac] sm:$0x1] }
  0x5a   : > { %v518_v23 = vor.u32 %v517_v15, %v514_v14  ;;  %v528_v24 = vrot.slane %v526_v6, 4  ;;  %v529_v25 = vshll.u32 %v199_v54, 16  ;;  %v535_v27 = vshll.u32 %v263_v62, 16  ;;  %v265_v54 = vld [vmem:[%s13225_s26 + $0xac] sm:$0x1] }
  0x5b   : > { %11712 = vmatprep.mubr.msk.bf16.mxu1 %vm1307_vm5, %v10108_v18  ;;  %v4242_v29 = vrot.slane %v4241_v8, 4  ;;  %v4249_v31 = vshrl.u32 %v10514_v9, 16  ;;  %v4252_v32 = vshll.u32 %v10514_v9, 16  ;;  %v4258_v33 = vshll.u32 %v10515_v16, 16  ;;  %v10520_v12 = vld [vmem:[%s13225_s26 + $0xb0] sm:$0xf] }
  0x5c   : > { %v519_v36 = vrot.slane %v518_v23, 4  ;;  %v531_v37 = vrot.slane %v529_v25, 5  ;;  %v537_v38 = vrot.slane %v535_v27, 5  ;;  %v4263_v39 = vshrl.u32 %v10516_v22, 16 }
  0x5d   : > { %v4247_v41 = vsel %vm13244_vm4, %v4242_v29, %v4246_v13  ;;  %v4251_v43 = vrot.slane %v4249_v31, 4  ;;  %v4254_v44 = vrot.slane %v4252_v32, 5  ;;  %v4260_v45 = vrot.slane %v4258_v33, 5  ;;  %v202_v33 = vld [vmem:[%s13225_s26 + $0xb0] sm:$0xf] }
  0x5e   : > { %v10620_v10 = vcombine.low %v4233_v20, %v4247_v41  ;;  %v524_v48 = vsel %vm13244_vm4, %v519_v36, %v523_v21  ;;  %v532_v49 = vor.u32 %v531_v37, %v528_v24  ;;  %v4265_v50 = vrot.slane %v4263_v39, 4  ;;  %v10521_v24 = vld [vmem:[%s13225_s26 + $0xb4] sm:$0x1]  ;;  %v203_v39 = vld [vmem:[%s13225_s26 + $0xb8] sm:$0xf] }
  0x5f   : > { %v4255_v51 = vor.u32 %v4254_v44, %v4251_v43  ;;  %v4266_v52 = vshll.u32 %v10516_v22, 16  ;;  %v4272_v53 = vshll.u32 %v10517_v28, 16  ;;  %v540_v55 = vshrl.u32 %v200_v34, 16 }
  0x60   : > { %11976 = vmatprep.mubr.msk.bf16.mxu0 %vm1307_vm5, %v10620_v10  ;;  %v533_v56 = vrot.slane %v532_v49, 4  ;;  %v543_v57 = vshll.u32 %v200_v34, 16  ;;  %v549_v58 = vshll.u32 %v264_v47, 16  ;;  %v554_v59 = vshrl.u32 %v201_v40, 16 }
  0x61   : > { %v4256_v61 = vrot.slane %v4255_v51, 4  ;;  %v4268_v62 = vrot.slane %v4266_v52, 5  ;;  %v4274_v63 = vrot.slane %v4272_v53, 5  ;;  %v542_v0 = vrot.slane %v540_v55, 4  ;;  %v10522_v55 = vld [vmem:[%s13225_s26 + $0xb8] sm:$0xf] }
  0x62   : > { %v538_v2 = vsel %vm13244_vm4, %v533_v56, %v537_v38  ;;  %v545_v3 = vrot.slane %v543_v57, 5  ;;  %v551_v6 = vrot.slane %v549_v58, 5  ;;  %v556_v9 = vrot.slane %v554_v59, 4 }
  0x63   : > { %v10109_v13 = vcombine.low %v524_v48, %v538_v2  ;;  %v4261_v14 = vsel %vm13244_vm4, %v4256_v61, %v4260_v45  ;;  %v4269_v15 = vor.u32 %v4268_v62, %v4265_v50  ;;  %v557_v16 = vshll.u32 %v201_v40, 16  ;;  %v266_v40 = vld [vmem:[%s13225_s26 + $0xb4] sm:$0x1]  ;;  %v267_v48 = vld [vmem:[%s13225_s26 + $0xbc] sm:$0x1] }
  0x64   : > { %v546_v18 = vor.u32 %v545_v3, %v542_v0  ;;  %v563_v20 = vshll.u32 %v265_v54, 16  ;;  %v4277_v8 = vshrl.u32 %v10518_v60, 16  ;;  %v4280_v21 = vshll.u32 %v10518_v60, 16  ;;  %v10523_v60 = vld [vmem:[%s13225_s26 + $0xbc] sm:$0x1] }
  0x65   : > { %11713 = vmatmul.mubr.msk.bf16.gmra.mrb[12].mxu1 %vm1307_vm5, %v10109_v13  ;;  %v4270_v22 = vrot.slane %v4269_v15, 4  ;;  %v559_v23 = vrot.slane %v557_v16, 5  ;;  %v4286_v25 = vshll.u32 %v10519_v1, 16  ;;  %v4291_v27 = vshrl.u32 %v10520_v12, 16  ;;  %v10524_v1 = vld [vmem:[%s13225_s26 + $0xc0] sm:$0xf] }
  0x66   : > { %v547_v28 = vrot.slane %v546_v18, 4  ;;  %v565_v29 = vrot.slane %v563_v20, 5  ;;  %v4279_v31 = vrot.slane %v4277_v8, 4  ;;  %v4282_v32 = vrot.slane %v4280_v21, 5  ;;  %v204_v18 = vld [vmem:[%s13225_s26 + $0xc0] sm:$0xf] }
  0x67   : > { %v4275_v34 = vsel %vm13244_vm4, %v4270_v22, %v4274_v63  ;;  %v560_v36 = vor.u32 %v559_v23, %v556_v9  ;;  %v4288_v37 = vrot.slane %v4286_v25, 5  ;;  %v4293_v38 = vrot.slane %v4291_v27, 4  ;;  %v205_v23 = vld [vmem:[%s13225_s26 + $0xc8] sm:$0xf] }
  0x68   : > { %v10621_v41 = vcombine.low %v4261_v14, %v4275_v34  ;;  %v552_v43 = vsel %vm13244_vm4, %v547_v28, %v551_v6  ;;  %v4283_v44 = vor.u32 %v4282_v32, %v4279_v31  ;;  %v4294_v45 = vshll.u32 %v10520_v12, 16  ;;  %v10525_v12 = vld [vmem:[%s13225_s26 + $0xc4] sm:$0x1] }
  0x69   : > { %v561_v47 = vrot.slane %v560_v36, 4  ;;  %v4300_v10 = vshll.u32 %v10521_v24, 16  ;;  %v568_v49 = vshrl.u32 %v202_v33, 16  ;;  %v571_v50 = vshll.u32 %v202_v33, 16 }
  0x6a   : > { %11977 = vmatmul.mubr.msk.bf16.gmra.mrb[12].mxu0 %vm1307_vm5, %v10621_v41  ;;  %v4284_v51 = vrot.slane %v4283_v44, 4  ;;  %v4296_v52 = vrot.slane %v4294_v45, 5  ;;  %v577_v53 = vshll.u32 %v266_v40, 16  ;;  %v582_v54 = vshrl.u32 %v203_v39, 16 }
  0x6b   : > { %v566_v56 = vsel %vm13244_vm4, %v561_v47, %v565_v29  ;;  %v4302_v57 = vrot.slane %v4300_v10, 5  ;;  %v570_v58 = vrot.slane %v568_v49, 4  ;;  %v573_v59 = vrot.slane %v571_v50, 5  ;;  %v268_v29 = vld [vmem:[%s13225_s26 + $0xc4] sm:$0x1] }
  0x6c   : > { %v10110_v61 = vcombine.low %v552_v43, %v566_v56  ;;  %v4289_v62 = vsel %vm13244_vm4, %v4284_v51, %v4288_v37  ;;  %v4297_v63 = vor.u32 %v4296_v52, %v4293_v38  ;;  %v579_v0 = vrot.slane %v577_v53, 5  ;;  %v10526_v47 = vld [vmem:[%s13225_s26 + $0xc8] sm:$0xf]  ;;  %v10527_v51 = vld [vmem:[%s13225_s26 + $0xcc] sm:$0x1] }
  0x6d   : > { %v574_v2 = vor.u32 %v573_v59, %v570_v58  ;;  %v584_v3 = vrot.slane %v582_v54, 4  ;;  %v585_v6 = vshll.u32 %v203_v39, 16  ;;  %v591_v9 = vshll.u32 %v267_v48, 16  ;;  %v269_v39 = vld [vmem:[%s13225_s26 + $0xcc] sm:$0x1] }
  0x6e   : > { %11716 = vmatprep.mubr.msk.bf16.mxu1 %vm1307_vm5, %v10110_v61  ;;  %v4298_v13 = vrot.slane %v4297_v63, 4  ;;  %v4305_v14 = vshrl.u32 %v10522_v55, 16  ;;  %v4308_v15 = vshll.u32 %v10522_v55, 16  ;;  %v4314_v16 = vshll.u32 %v10523_v60, 16  ;;  %v10528_v56 = vld [vmem:[%s13225_s26 + $0xd0] sm:$0xf] }
  0x6f   : > { %v575_v20 = vrot.slane %v574_v2, 4  ;;  %v587_v8 = vrot.slane %v585_v6, 5  ;;  %v593_v21 = vrot.slane %v591_v9, 5  ;;  %v4319_v22 = vshrl.u32 %v10524_v1, 16 }
  0x70   : > { %v4303_v24 = vsel %vm13244_vm4, %v4298_v13, %v4302_v57  ;;  %v4307_v25 = vrot.slane %v4305_v14, 4  ;;  %v4310_v27 = vrot.slane %v4308_v15, 5  ;;  %v4316_v28 = vrot.slane %v4314_v16, 5  ;;  %v206_v16 = vld [vmem:[%s13225_s26 + $0xd0] sm:$0xf] }
  0x71   : > { %v10622_v31 = vcombine.low %v4289_v62, %v4303_v24  ;;  %v580_v32 = vsel %vm13244_vm4, %v575_v20, %v579_v0  ;;  %v588_v33 = vor.u32 %v587_v8, %v584_v3  ;;  %v4321_v34 = vrot.slane %v4319_v22, 4  ;;  %v10529_v3 = vld [vmem:[%s13225_s26 + $0xd4] sm:$0x1]  ;;  %v207_v22 = vld [vmem:[%s13225_s26 + $0xd8] sm:$0xf] }
  0x72   : > { %v4311_v36 = vor.u32 %v4310_v27, %v4307_v25  ;;  %v4322_v37 = vshll.u32 %v10524_v1, 16  ;;  %v4328_v38 = vshll.u32 %v10525_v12, 16  ;;  %v596_v40 = vshrl.u32 %v204_v18, 16 }
  0x73   : > { %11980 = vmatprep.mubr.msk.bf16.mxu0 %vm1307_vm5, %v10622_v31  ;;  %v589_v41 = vrot.slane %v588_v33, 4  ;;  %v599_v43 = vshll.u32 %v204_v18, 16  ;;  %v605_v44 = vshll.u32 %v268_v29, 16  ;;  %v610_v45 = vshrl.u32 %v205_v23, 16 }
  0x74   : > { %v4312_v10 = vrot.slane %v4311_v36, 4  ;;  %v4324_v48 = vrot.slane %v4322_v37, 5  ;;  %v4330_v49 = vrot.slane %v4328_v38, 5  ;;  %v598_v50 = vrot.slane %v596_v40, 4  ;;  %v10530_v40 = vld [vmem:[%s13225_s26 + $0xd8] sm:$0xf] }
  0x75   : > { %v594_v52 = vsel %vm13244_vm4, %v589_v41, %v593_v21  ;;  %v601_v53 = vrot.slane %v599_v43, 5  ;;  %v607_v54 = vrot.slane %v605_v44, 5  ;;  %v612_v55 = vrot.slane %v610_v45, 4 }
  0x76   : > { %v10111_v57 = vcombine.low %v580_v32, %v594_v52  ;;  %v4317_v58 = vsel %vm13244_vm4, %v4312_v10, %v4316_v28  ;;  %v4325_v59 = vor.u32 %v4324_v48, %v4321_v34  ;;  %v613_v60 = vshll.u32 %v205_v23, 16  ;;  %v270_v23 = vld [vmem:[%s13225_s26 + $0xd4] sm:$0x1]  ;;  %v271_v32 = vld [vmem:[%s13225_s26 + $0xdc] sm:$0x1] }
  0x77   : > { %v602_v61 = vor.u32 %v601_v53, %v598_v50  ;;  %v619_v62 = vshll.u32 %v269_v39, 16  ;;  %v4333_v63 = vshrl.u32 %v10526_v47, 16  ;;  %v4336_v0 = vshll.u32 %v10526_v47, 16  ;;  %v10531_v47 = vld [vmem:[%s13225_s26 + $0xdc] sm:$0x1] }
  0x78   : > { %11717 = vmatmul.mubr.msk.bf16.gmra.mrb[16].mxu1 %vm1307_vm5, %v10111_v57  ;;  %v4326_v1 = vrot.slane %v4325_v59, 4  ;;  %v615_v2 = vrot.slane %v613_v60, 5  ;;  %v4342_v6 = vshll.u32 %v10527_v51, 16  ;;  %v4347_v9 = vshrl.u32 %v10528_v56, 16  ;;  %v10532_v51 = vld [vmem:[%s13225_s26 + $0xe0] sm:$0xf] }
  0x79   : > { %v603_v12 = vrot.slane %v602_v61, 4  ;;  %v621_v13 = vrot.slane %v619_v62, 5  ;;  %v4335_v14 = vrot.slane %v4333_v63, 4  ;;  %v4338_v15 = vrot.slane %v4336_v0, 5  ;;  %v208_v61 = vld [vmem:[%s13225_s26 + $0xf0] sm:$0xf] }
  0x7a   : > { %v4331_v18 = vsel %vm13244_vm4, %v4326_v1, %v4330_v49  ;;  %v616_v20 = vor.u32 %v615_v2, %v612_v55  ;;  %v4344_v8 = vrot.slane %v4342_v6, 5  ;;  %v4349_v21 = vrot.slane %v4347_v9, 4  ;;  %v209_v2 = vld [vmem:[%s13225_s26 + $0xf8] sm:$0xf] }
  0x7b   : > { %v10623_v24 = vcombine.low %v4317_v58, %v4331_v18  ;;  %v608_v25 = vsel %vm13244_vm4, %v603_v12, %v607_v54  ;;  %v4339_v27 = vor.u32 %v4338_v15, %v4335_v14  ;;  %v4350_v28 = vshll.u32 %v10528_v56, 16  ;;  %v10533_v56 = vld [vmem:[%s13225_s26 + $0xe4] sm:$0x1] }
  0x7c   : > { %v617_v29 = vrot.slane %v616_v20, 4  ;;  %v4356_v31 = vshll.u32 %v10529_v3, 16  ;;  %v624_v33 = vshrl.u32 %v206_v16, 16  ;;  %v627_v34 = vshll.u32 %v206_v16, 16 }
  0x7d   : > { %11981 = vmatmul.mubr.msk.bf16.gmra.mrb[16].mxu0 %vm1307_vm5, %v10623_v24  ;;  %v4340_v36 = vrot.slane %v4339_v27, 4  ;;  %v4352_v37 = vrot.slane %v4350_v28, 5  ;;  %v633_v38 = vshll.u32 %v270_v23, 16  ;;  %v638_v39 = vshrl.u32 %v207_v22, 16 }
  0x7e   : > { %v622_v41 = vsel %vm13244_vm4, %v617_v29, %v621_v13  ;;  %v4358_v43 = vrot.slane %v4356_v31, 5  ;;  %v626_v44 = vrot.slane %v624_v33, 4  ;;  %v629_v45 = vrot.slane %v627_v34, 5  ;;  %v272_v13 = vld [vmem:[%s13225_s26 + $0xf4] sm:$0x1] }
  0x7f   : > { %v10112_v10 = vcombine.low %v608_v25, %v622_v41  ;;  %v4345_v48 = vsel %vm13244_vm4, %v4340_v36, %v4344_v8  ;;  %v4353_v49 = vor.u32 %v4352_v37, %v4349_v21  ;;  %v635_v50 = vrot.slane %v633_v38, 5  ;;  %v10534_v29 = vld [vmem:[%s13225_s26 + $0xf8] sm:$0xf]  ;;  %v10535_v36 = vld [vmem:[%s13225_s26 + $0xfc] sm:$0x1] }
  0x80   : > { %v630_v52 = vor.u32 %v629_v45, %v626_v44  ;;  %v640_v53 = vrot.slane %v638_v39, 4  ;;  %v641_v54 = vshll.u32 %v207_v22, 16  ;;  %v647_v55 = vshll.u32 %v271_v32, 16  ;;  %v273_v22 = vld [vmem:[%s13225_s26 + $0xfc] sm:$0x1] }
  0x81   : > { %11720 = vmatprep.mubr.msk.bf16.mxu1 %vm1307_vm5, %v10112_v10  ;;  %v4354_v57 = vrot.slane %v4353_v49, 4  ;;  %v4361_v58 = vshrl.u32 %v10530_v40, 16  ;;  %v4364_v59 = vshll.u32 %v10530_v40, 16  ;;  %v4370_v60 = vshll.u32 %v10531_v47, 16  ;;  %v10536_v41 = vld [vmem:[%s13225_s26 + $0x100] sm:$0xf] }
  0x82   : > { %v631_v62 = vrot.slane %v630_v52, 4  ;;  %v643_v63 = vrot.slane %v641_v54, 5  ;;  %v649_v0 = vrot.slane %v647_v55, 5  ;;  %v4375_v1 = vshrl.u32 %v10532_v51, 16 }
  0x83   : > { %v4359_v3 = vsel %vm13244_vm4, %v4354_v57, %v4358_v43  ;;  %v4363_v6 = vrot.slane %v4361_v58, 4  ;;  %v4366_v9 = vrot.slane %v4364_v59, 5  ;;  %v4372_v12 = vrot.slane %v4370_v60, 5  ;;  %v210_v60 = vld [vmem:[%s13225_s26 + $0x100] sm:$0xf] }
  0x84   : > { %v10624_v14 = vcombine.low %v4345_v48, %v4359_v3  ;;  %v636_v15 = vsel %vm13244_vm4, %v631_v62, %v635_v50  ;;  %v644_v16 = vor.u32 %v643_v63, %v640_v53  ;;  %v4377_v18 = vrot.slane %v4375_v1, 4  ;;  %v10537_v53 = vld [vmem:[%s13225_s26 + $0x104] sm:$0x1]  ;;  %v211_v1 = vld [vmem:[%s13225_s26 + $0x108] sm:$0xf] }
  0x85   : > { %v4367_v20 = vor.u32 %v4366_v9, %v4363_v6  ;;  %v4378_v8 = vshll.u32 %v10532_v51, 16  ;;  %v4384_v21 = vshll.u32 %v10533_v56, 16  ;;  %v652_v23 = vshrl.u32 %v208_v61, 16 }
  0x86   : > { %11984 = vmatprep.mubr.msk.bf16.mxu0 %vm1307_vm5, %v10624_v14  ;;  %v645_v24 = vrot.slane %v644_v16, 4  ;;  %v655_v25 = vshll.u32 %v208_v61, 16  ;;  %v661_v27 = vshll.u32 %v272_v13, 16  ;;  %v666_v28 = vshrl.u32 %v209_v2, 16 }
  0x87   : > { %v4368_v31 = vrot.slane %v4367_v20, 4  ;;  %v4380_v32 = vrot.slane %v4378_v8, 5  ;;  %v4386_v33 = vrot.slane %v4384_v21, 5  ;;  %v654_v34 = vrot.slane %v652_v23, 4  ;;  %v10538_v23 = vld [vmem:[%s13225_s26 + $0x108] sm:$0xf] }
  0x88   : > { %v650_v37 = vsel %vm13244_vm4, %v645_v24, %v649_v0  ;;  %v657_v38 = vrot.slane %v655_v25, 5  ;;  %v663_v39 = vrot.slane %v661_v27, 5  ;;  %v668_v40 = vrot.slane %v666_v28, 4 }
  0x89   : > { %v10113_v43 = vcombine.low %v636_v15, %v650_v37  ;;  %v4373_v44 = vsel %vm13244_vm4, %v4368_v31, %v4372_v12  ;;  %v4381_v45 = vor.u32 %v4380_v32, %v4377_v18  ;;  %v669_v47 = vshll.u32 %v209_v2, 16  ;;  %v274_v2 = vld [vmem:[%s13225_s26 + $0x104] sm:$0x1]  ;;  %v275_v15 = vld [vmem:[%s13225_s26 + $0x10c] sm:$0x1] }
  0x8a   : > { %v658_v10 = vor.u32 %v657_v38, %v654_v34  ;;  %v675_v48 = vshll.u32 %v273_v22, 16  ;;  %v4389_v49 = vshrl.u32 %v10534_v29, 16  ;;  %v4392_v50 = vshll.u32 %v10534_v29, 16  ;;  %v10539_v29 = vld [vmem:[%s13225_s26 + $0x10c] sm:$0x1] }
  0x8b   : > { %11721 = vmatmul.mubr.msk.bf16.gmra.mrb[20].mxu1 %vm1307_vm5, %v10113_v43  ;;  %v4382_v51 = vrot.slane %v4381_v45, 4  ;;  %v671_v52 = vrot.slane %v669_v47, 5  ;;  %v4398_v54 = vshll.u32 %v10535_v36, 16  ;;  %v4403_v55 = vshrl.u32 %v10536_v41, 16  ;;  %v10540_v36 = vld [vmem:[%s13225_s26 + $0x110] sm:$0xf] }
  0x8c   : > { %v659_v56 = vrot.slane %v658_v10, 4  ;;  %v677_v57 = vrot.slane %v675_v48, 5  ;;  %v4391_v58 = vrot.slane %v4389_v49, 4  ;;  %v4394_v59 = vrot.slane %v4392_v50, 5  ;;  %v212_v10 = vld [vmem:[%s13225_s26 + $0x110] sm:$0xf] }
  0x8d   : > { %v4387_v61 = vsel %vm13244_vm4, %v4382_v51, %v4386_v33  ;;  %v672_v62 = vor.u32 %v671_v52, %v668_v40  ;;  %v4400_v63 = vrot.slane %v4398_v54, 5  ;;  %v4405_v0 = vrot.slane %v4403_v55, 4  ;;  %v213_v52 = vld [vmem:[%s13225_s26 + $0x118] sm:$0xf] }
  0x8e   : > { %v10625_v3 = vcombine.low %v4373_v44, %v4387_v61  ;;  %v664_v6 = vsel %vm13244_vm4, %v659_v56, %v663_v39  ;;  %v4395_v9 = vor.u32 %v4394_v59, %v4391_v58  ;;  %v4406_v12 = vshll.u32 %v10536_v41, 16  ;;  %v10541_v41 = vld [vmem:[%s13225_s26 + $0x114] sm:$0x1] }
  0x8f   : > { %v673_v13 = vrot.slane %v672_v62, 4  ;;  %v4412_v14 = vshll.u32 %v10537_v53, 16  ;;  %v680_v16 = vshrl.u32 %v210_v60, 16  ;;  %v683_v18 = vshll.u32 %v210_v60, 16 }
  0x90   : > { %11985 = vmatmul.mubr.msk.bf16.gmra.mrb[20].mxu0 %vm1307_vm5, %v10625_v3  ;;  %v4396_v20 = vrot.slane %v4395_v9, 4  ;;  %v4408_v8 = vrot.slane %v4406_v12, 5  ;;  %v689_v21 = vshll.u32 %v274_v2, 16  ;;  %v694_v22 = vshrl.u32 %v211_v1, 16 }
  0x91   : > { %v678_v24 = vsel %vm13244_vm4, %v673_v13, %v677_v57  ;;  %v4414_v25 = vrot.slane %v4412_v14, 5  ;;  %v682_v27 = vrot.slane %v680_v16, 4  ;;  %v685_v28 = vrot.slane %v683_v18, 5  ;;  %v276_v57 = vld [vmem:[%s13225_s26 + $0x114] sm:$0x1] }
  0x92   : > { %v10114_v31 = vcombine.low %v664_v6, %v678_v24  ;;  %v4401_v32 = vsel %vm13244_vm4, %v4396_v20, %v4400_v63  ;;  %v4409_v33 = vor.u32 %v4408_v8, %v4405_v0  ;;  %v691_v34 = vrot.slane %v689_v21, 5  ;;  %v10542_v13 = vld [vmem:[%s13225_s26 + $0x118] sm:$0xf]  ;;  %v10543_v20 = vld [vmem:[%s13225_s26 + $0x11c] sm:$0x1] }
  0x93   : > { %v686_v37 = vor.u32 %v685_v28, %v682_v27  ;;  %v696_v38 = vrot.slane %v694_v22, 4  ;;  %v697_v39 = vshll.u32 %v211_v1, 16  ;;  %v703_v40 = vshll.u32 %v275_v15, 16  ;;  %v277_v1 = vld [vmem:[%s13225_s26 + $0x11c] sm:$0x1] }
  0x94   : > { %11724 = vmatprep.mubr.msk.bf16.mxu1 %vm1307_vm5, %v10114_v31  ;;  %v4410_v43 = vrot.slane %v4409_v33, 4  ;;  %v4417_v44 = vshrl.u32 %v10538_v23, 16  ;;  %v4420_v45 = vshll.u32 %v10538_v23, 16  ;;  %v4426_v47 = vshll.u32 %v10539_v29, 16  ;;  %v10544_v24 = vld [vmem:[%s13225_s26 + $0x120] sm:$0xf] }
  0x95   : > { %v687_v48 = vrot.slane %v686_v37, 4  ;;  %v699_v49 = vrot.slane %v697_v39, 5  ;;  %v705_v50 = vrot.slane %v703_v40, 5  ;;  %v4431_v51 = vshrl.u32 %v10540_v36, 16 }
  0x96   : > { %v4415_v53 = vsel %vm13244_vm4, %v4410_v43, %v4414_v25  ;;  %v4419_v54 = vrot.slane %v4417_v44, 4  ;;  %v4422_v55 = vrot.slane %v4420_v45, 5  ;;  %v4428_v56 = vrot.slane %v4426_v47, 5  ;;  %v214_v47 = vld [vmem:[%s13225_s26 + $0x120] sm:$0xf] }
  0x97   : > { %v10626_v58 = vcombine.low %v4401_v32, %v4415_v53  ;;  %v692_v59 = vsel %vm13244_vm4, %v687_v48, %v691_v34  ;;  %v700_v60 = vor.u32 %v699_v49, %v696_v38  ;;  %v4433_v61 = vrot.slane %v4431_v51, 4  ;;  %v10545_v38 = vld [vmem:[%s13225_s26 + $0x124] sm:$0x1]  ;;  %v215_v51 = vld [vmem:[%s13225_s26 + $0x128] sm:$0xf] }
  0x98   : > { %v4423_v62 = vor.u32 %v4422_v55, %v4419_v54  ;;  %v4434_v63 = vshll.u32 %v10540_v36, 16  ;;  %v4440_v0 = vshll.u32 %v10541_v41, 16  ;;  %v708_v2 = vshrl.u32 %v212_v10, 16 }
  0x99   : > { %11988 = vmatprep.mubr.msk.bf16.mxu0 %vm1307_vm5, %v10626_v58  ;;  %v701_v3 = vrot.slane %v700_v60, 4  ;;  %v711_v6 = vshll.u32 %v212_v10, 16  ;;  %v717_v9 = vshll.u32 %v276_v57, 16  ;;  %v722_v12 = vshrl.u32 %v213_v52, 16 }
  0x9a   : > { %v4424_v14 = vrot.slane %v4423_v62, 4  ;;  %v4436_v15 = vrot.slane %v4434_v63, 5  ;;  %v4442_v16 = vrot.slane %v4440_v0, 5  ;;  %v710_v18 = vrot.slane %v708_v2, 4  ;;  %v10546_v2 = vld [vmem:[%s13225_s26 + $0x128] sm:$0xf] }
  0x9b   : > { %v706_v8 = vsel %vm13244_vm4, %v701_v3, %v705_v50  ;;  %v713_v21 = vrot.slane %v711_v6, 5  ;;  %v719_v22 = vrot.slane %v717_v9, 5  ;;  %v724_v23 = vrot.slane %v722_v12, 4 }
  0x9c   : > { %v10115_v25 = vcombine.low %v692_v59, %v706_v8  ;;  %v4429_v27 = vsel %vm13244_vm4, %v4424_v14, %v4428_v56  ;;  %v4437_v28 = vor.u32 %v4436_v15, %v4433_v61  ;;  %v725_v29 = vshll.u32 %v213_v52, 16  ;;  %v278_v52 = vld [vmem:[%s13225_s26 + $0x124] sm:$0x1]  ;;  %v279_v59 = vld [vmem:[%s13225_s26 + $0x12c] sm:$0x1] }
  0x9d   : > { %v714_v31 = vor.u32 %v713_v21, %v710_v18  ;;  %v731_v32 = vshll.u32 %v277_v1, 16  ;;  %v4445_v33 = vshrl.u32 %v10542_v13, 16  ;;  %v4448_v34 = vshll.u32 %v10542_v13, 16  ;;  %v10547_v13 = vld [vmem:[%s13225_s26 + $0x12c] sm:$0x1] }
  0x9e   : > { %11725 = vmatmul.mubr.msk.bf16.gmra.mrb[24].mxu1 %vm1307_vm5, %v10115_v25  ;;  %v4438_v36 = vrot.slane %v4437_v28, 4  ;;  %v727_v37 = vrot.slane %v725_v29, 5  ;;  %v4454_v39 = vshll.u32 %v10543_v20, 16  ;;  %v4459_v40 = vshrl.u32 %v10544_v24, 16  ;;  %v10548_v20 = vld [vmem:[%s13225_s26 + $0x130] sm:$0xf] }
  0x9f   : > { %v715_v41 = vrot.slane %v714_v31, 4  ;;  %v733_v43 = vrot.slane %v731_v32, 5  ;;  %v4447_v44 = vrot.slane %v4445_v33, 4  ;;  %v4450_v45 = vrot.slane %v4448_v34, 5  ;;  %v216_v31 = vld [vmem:[%s13225_s26 + $0x140] sm:$0xf] }
  0xa0   : > { %v4443_v10 = vsel %vm13244_vm4, %v4438_v36, %v4442_v16  ;;  %v728_v48 = vor.u32 %v727_v37, %v724_v23  ;;  %v4456_v49 = vrot.slane %v4454_v39, 5  ;;  %v4461_v50 = vrot.slane %v4459_v40, 4  ;;  %v217_v37 = vld [vmem:[%s13225_s26 + $0x148] sm:$0xf] }
  0xa1   : > { %v10627_v53 = vcombine.low %v4429_v27, %v4443_v10  ;;  %v720_v54 = vsel %vm13244_vm4, %v715_v41, %v719_v22  ;;  %v4451_v55 = vor.u32 %v4450_v45, %v4447_v44  ;;  %v4462_v56 = vshll.u32 %v10544_v24, 16  ;;  %v10549_v24 = vld [vmem:[%s13225_s26 + $0x134] sm:$0x1] }
  0xa2   : > { %v729_v57 = vrot.slane %v728_v48, 4  ;;  %v4468_v58 = vshll.u32 %v10545_v38, 16  ;;  %v736_v60 = vshrl.u32 %v214_v47, 16  ;;  %v739_v61 = vshll.u32 %v214_v47, 16 }
  0xa3   : > { %11989 = vmatmul.mubr.msk.bf16.gmra.mrb[24].mxu0 %vm1307_vm5, %v10627_v53  ;;  %v4452_v62 = vrot.slane %v4451_v55, 4  ;;  %v4464_v63 = vrot.slane %v4462_v56, 5  ;;  %v745_v0 = vshll.u32 %v278_v52, 16  ;;  %v750_v1 = vshrl.u32 %v215_v51, 16  ;;  %v281_v53 = vld [vmem:[%s13225_s26 + $0x14c] sm:$0x1] }
  0xa4   : > { %v734_v3 = vsel %vm13244_vm4, %v729_v57, %v733_v43  ;;  %v4470_v6 = vrot.slane %v4468_v58, 5  ;;  %v738_v9 = vrot.slane %v736_v60, 4  ;;  %v741_v12 = vrot.slane %v739_v61, 5  ;;  %v280_v43 = vld [vmem:[%s13225_s26 + $0x144] sm:$0x1] }
  0xa5   : > { %v10116_v14 = vcombine.low %v720_v54, %v734_v3  ;;  %v4457_v15 = vsel %vm13244_vm4, %v4452_v62, %v4456_v49  ;;  %v4465_v16 = vor.u32 %v4464_v63, %v4461_v50  ;;  %v747_v18 = vrot.slane %v745_v0, 5  ;;  %v10678_v61 = vld [vmem:[%s13225_s26 + $0x8] sm:$0xe] }
  0xa6   : > { %v742_v8 = vor.u32 %v741_v12, %v738_v9  ;;  %v752_v21 = vrot.slane %v750_v1, 4  ;;  %v753_v22 = vshll.u32 %v215_v51, 16  ;;  %v759_v23 = vshll.u32 %v279_v59, 16 }
  0xa7   : > { %11728 = vmatprep.mubr.msk.bf16.mxu1 %vm1307_vm5, %v10116_v14  ;;  %v4466_v25 = vrot.slane %v4465_v16, 4  ;;  %v4473_v27 = vshrl.u32 %v10546_v2, 16  ;;  %v4476_v28 = vshll.u32 %v10546_v2, 16  ;;  %v4482_v29 = vshll.u32 %v10547_v13, 16  ;;  %v10679_v2 = vld [vmem:[%s13225_s26 + $0x10] sm:$0xe] }
  0xa8   : > { %v743_v32 = vrot.slane %v742_v8, 4  ;;  %v755_v33 = vrot.slane %v753_v22, 5  ;;  %v761_v34 = vrot.slane %v759_v23, 5  ;;  %v4487_v36 = vshrl.u32 %v10548_v20, 16  ;;  %v181_v13 = vld [vmem:[%s16464_s1 + $0xc] sm:$0x3] }
  0xa9   : > { %v4471_v38 = vsel %vm13244_vm4, %v4466_v25, %v4470_v6  ;;  %v4475_v39 = vrot.slane %v4473_v27, 4  ;;  %v4478_v40 = vrot.slane %v4476_v28, 5  ;;  %v4484_v41 = vrot.slane %v4482_v29, 5  ;;  %v218_v14 = vld [vmem:[%s13225_s26 + $0x150] sm:$0xf] }
  0xaa   : > { %v10628_v44 = vcombine.low %v4457_v15, %v4471_v38  ;;  %v748_v45 = vsel %vm13244_vm4, %v743_v32, %v747_v18  ;;  %v756_v47 = vor.u32 %v755_v33, %v752_v21  ;;  %v4489_v10 = vrot.slane %v4487_v36, 4  ;;  %v219_v23 = vld [vmem:[%s13225_s26 + $0x158] sm:$0xf]  ;;  %v282_v28 = vld [vmem:[%s13225_s26 + $0x154] sm:$0x1] }
  0xab   : > { %v4479_v48 = vor.u32 %v4478_v40, %v4475_v39  ;;  %v4490_v49 = vshll.u32 %v10548_v20, 16  ;;  %v4496_v50 = vshll.u32 %v10549_v24, 16  ;;  %v764_v51 = vshrl.u32 %v216_v31, 16  ;;  %v283_v36 = vld [vmem:[%s13225_s26 + $0x15c] sm:$0x1] }
  0xac   : > { %11992 = vmatprep.mubr.msk.bf16.mxu0 %vm1307_vm5, %v10628_v44  ;;  %v757_v52 = vrot.slane %v756_v47, 4  ;;  %v767_v54 = vshll.u32 %v216_v31, 16  ;;  %v773_v55 = vshll.u32 %v280_v43, 16  ;;  %v778_v56 = vshrl.u32 %v217_v37, 16  ;;  %v10681_v38 = vld [vmem:[%s13225_s26 + $0x20] sm:$0xe] }
  0xad   : > { %v4480_v57 = vrot.slane %v4479_v48, 4  ;;  %v4492_v58 = vrot.slane %v4490_v49, 5  ;;  %v4498_v59 = vrot.slane %v4496_v50, 5  ;;  %v766_v60 = vrot.slane %v764_v51, 4  ;;  %v221_v49 = vld [vmem:[%s13225_s26 + $0x168] sm:$0xf] }
  0xae   : > { %v762_v62 = vsel %vm13244_vm4, %v757_v52, %v761_v34  ;;  %v769_v63 = vrot.slane %v767_v54, 5  ;;  %v775_v0 = vrot.slane %v773_v55, 5  ;;  %v780_v1 = vrot.slane %v778_v56, 4  ;;  %v284_v54 = vld [vmem:[%s13225_s26 + $0x164] sm:$0x1] }
  0xaf   : > { %v10117_v3 = vcombine.low %v748_v45, %v762_v62  ;;  %v4485_v6 = vsel %vm13244_vm4, %v4480_v57, %v4484_v41  ;;  %v4493_v9 = vor.u32 %v4492_v58, %v4489_v10  ;;  %v781_v12 = vshll.u32 %v217_v37, 16  ;;  %v10680_v37 = vld [vmem:[%s13225_s26 + $0x18] sm:$0xe]  ;;  %v220_v45 = vld [vmem:[%s13225_s26 + $0x160] sm:$0xf] }
  0xb0   : > { %v770_v15 = vor.u32 %v769_v63, %v766_v60  ;;  %v787_v16 = vshll.u32 %v281_v53, 16  ;;  %v10742_v21 = vrot.slane %v10678_v61, 9  ;;  %v10743_v22 = vrot.slane %v10679_v2, 9  ;;  %v285_v61 = vld [vmem:[%s13225_s26 + $0x16c] sm:$0x1] }
  0xb1   : > { %11729 = vmatmul.mubr.msk.bf16.gmra.mrb[28].mxu1 %vm1307_vm5, %v10117_v3  ;;  %v4494_v18 = vrot.slane %v4493_v9, 4  ;;  %v783_v20 = vrot.slane %v781_v12, 5  ;;  %v13554_v27 = vand.u32 %v13202_v4, %v181_v13  ;;  %v792_v29 = vshrl.u32 %v218_v14, 16  ;;  %v10682_v3 = vld [vmem:[%s13225_s26 + $0x28] sm:$0xe] }
  0xb2   : > { %v771_v24 = vrot.slane %v770_v15, 4  ;;  %v789_v25 = vrot.slane %v787_v16, 5  ;;  %v5691_v33 = vsel %vm13548_vm8, %v10742_v21, %v5690_v5  ;;  %v5695_v34 = vsel %vm13548_vm8, %v10743_v22, %v5694_v19  ;;  %v10683_v12 = vld [vmem:[%s13225_s26 + $0x30] sm:$0xe] }
  0xb3   : > { %v4499_v31 = vsel %vm13244_vm4, %v4494_v18, %v4498_v59  ;;  %v784_v32 = vor.u32 %v783_v20, %v780_v1  ;;  %v10806_v41 = vcombine.low %v5691_v33, %v5695_v34  ;;  %12094 = vmatprep.subr.bf16.mxu0 %v13554_v27  ;;  %v794_v26 = vrot.slane %v792_v29, 4  ;;  %v222_v22 = vld [vmem:[%s13225_s26 + $0x170] sm:$0xf] }
  0xb4   : > { %v10629_v39 = vcombine.low %v4485_v6, %v4499_v31  ;;  %v776_v40 = vsel %vm13244_vm4, %v771_v24, %v775_v0  ;;  %v795_v5 = vshll.u32 %v218_v14, 16  ;;  %v801_v44 = vshll.u32 %v282_v28, 16  ;;  %v12912_v28 = vld [vmem:[%s13225_s26 + $0x2c] sm:$0x1] }
  0xb5   : > { %v785_v43 = vrot.slane %v784_v32, 4  ;;  %v806_v30 = vshrl.u32 %v219_v23, 16  ;;  %v809_v19 = vshll.u32 %v219_v23, 16  ;;  %v815_v47 = vshll.u32 %v283_v36, 16  ;;  %v286_v23 = vld [vmem:[%s13225_s26 + $0x174] sm:$0x1] }
  0xb6   : > { %11993 = vmatmul.mubr.msk.bf16.gmra.mrb[28].mxu0 %vm1307_vm5, %v10629_v39  ;;  %v10744_v10 = vrot.slane %v10680_v37, 9  ;;  %v10745_v48 = vrot.slane %v10681_v38, 9  ;;  %v797_v51 = vrot.slane %v795_v5, 5  ;;  %v803_v52 = vrot.slane %v801_v44, 5  ;;  %v223_v32 = vld [vmem:[%s13225_s26 + $0x178] sm:$0xf] }
  0xb7   : > { %v790_v50 = vsel %vm13244_vm4, %v785_v43, %v789_v25  ;;  %12030 = vmatprep.mubr.msk.bf16.mxu0 %vm1307_vm5, %v10806_v41  ;;  %v808_v53 = vrot.slane %v806_v30, 4  ;;  %v811_v56 = vrot.slane %v809_v19, 5  ;;  %v817_v57 = vrot.slane %v815_v47, 5  ;;  %v12913_v37 = vld [vmem:[%s13225_s26 + $0x34] sm:$0x1] }
  0xb8   : > { %v10118_v55 = vcombine.low %v776_v40, %v790_v50  ;;  %v5699_v58 = vsel %vm13548_vm8, %v10744_v10, %v5698_v42  ;;  %v798_v59 = vor.u32 %v797_v51, %v794_v26  ;;  %v5703_v60 = vsel %vm13548_vm8, %v10745_v48, %v5702_v46  ;;  %v287_v40 = vld [vmem:[%s13225_s26 + $0x17c] sm:$0x1] }
  0xb9   : > { %v820_v62 = vshrl.u32 %v220_v45, 16  ;;  %v823_v63 = vshll.u32 %v220_v45, 16  ;;  %v812_v0 = vor.u32 %v811_v56, %v808_v53  ;;  %v10807_v1 = vcombine.low %v5699_v58, %v5703_v60  ;;  %v10684_v45 = vld [vmem:[%s13225_s26 + $0x38] sm:$0xe]  ;;  %v12914_v58 = vld [vmem:[%s13225_s26 + $0x3c] sm:$0x1] }
  0xba   : > { %11732 = vmatprep.mubr.msk.bf16.mxu1 %vm1307_vm5, %v10118_v55  ;;  %v829_v2 = vshll.u32 %v284_v54, 16  ;;  %v834_v11 = vshrl.u32 %v221_v49, 16  ;;  %v799_v42 = vrot.slane %v798_v59, 4  ;;  %v837_v17 = vshll.u32 %v221_v49, 16  ;;  %v10685_v49 = vld [vmem:[%s13225_s26 + $0x40] sm:$0xe] }
  0xbb   : > { %v822_v6 = vrot.slane %v820_v62, 4  ;;  %v825_v9 = vrot.slane %v823_v63, 5  ;;  %v813_v13 = vrot.slane %v812_v0, 4  ;;  %v843_v15 = vshll.u32 %v285_v61, 16  ;;  %v224_v54 = vld [vmem:[%s13225_s26 + $0x190] sm:$0xf] }
  0xbc   : > { %v831_v46 = vrot.slane %v829_v2, 5  ;;  %v836_v14 = vrot.slane %v834_v11, 4  ;;  %v804_v16 = vsel %vm13244_vm4, %v799_v42, %v803_v52  ;;  %v839_v20 = vrot.slane %v837_v17, 5  ;;  %v225_v60 = vld [vmem:[%s13225_s26 + $0x198] sm:$0xf] }
  0xbd   : > { %v826_v18 = vor.u32 %v825_v9, %v822_v6  ;;  %v10746_v21 = vrot.slane %v10682_v3, 9  ;;  %v818_v24 = vsel %vm13244_vm4, %v813_v13, %v817_v57  ;;  %v845_v25 = vrot.slane %v843_v15, 5  ;;  %v288_v61 = vld [vmem:[%s13225_s26 + $0x194] sm:$0x1] }
  0xbe   : > { %12031 = vmatmul.mubr.msk.bf16.vlgmr.msra.gmra.mrb[0].mxu0 %vm1307_vm5, %v10807_v1  ;;  %v5706_v29 = vrot.slane %v12912_v28, 5  ;;  %v10747_v31 = vrot.slane %v10683_v12, 9  ;;  %v10119_v33 = vcombine.low %v804_v16, %v818_v24  ;;  %v840_v36 = vor.u32 %v839_v20, %v836_v14  ;;  %v12915_v1 = vld [vmem:[%s13225_s26 + $0x44] sm:$0x1]  ;;  %v289_v12 = vld [vmem:[%s13225_s26 + $0x19c] sm:$0x1] }
  0xbf   : > { %12095 = vmatpush3.bf16.msra.mxu0 %v13554_v27  ;;  %v827_v34 = vrot.slane %v826_v18, 4  ;;  %v5710_v38 = vrot.slane %v12913_v37, 5  ;;  %v848_v41 = vshrl.u32 %v222_v22, 16  ;;  %v851_v26 = vshll.u32 %v222_v22, 16  ;;  %v10686_v14 = vld [vmem:[%s13225_s26 + $0x58] sm:$0xe] }
  0xc0   : > { %v5707_v39 = vsel %vm13548_vm8, %v10746_v21, %v5706_v29  ;;  %v857_v43 = vshll.u32 %v286_v23, 16  ;;  %11733 = vmatmul.mubr.msk.bf16.gmra.mrb[32].mxu1 %vm1307_vm5, %v10119_v33  ;;  %v841_v44 = vrot.slane %v840_v36, 4  ;;  %v862_v30 = vshrl.u32 %v223_v32, 16  ;;  %v10687_v21 = vld [vmem:[%s13225_s26 + $0x60] sm:$0xe] }
  0xc1   : > { %v832_v5 = vsel %vm13244_vm4, %v827_v34, %v831_v46  ;;  %v5711_v27 = vsel %vm13548_vm8, %v10747_v31, %v5710_v38  ;;  %v850_v47 = vrot.slane %v848_v41, 4  ;;  %v853_v10 = vrot.slane %v851_v26, 5  ;;  %v226_v28 = vld [vmem:[%s13225_s26 + $0x1a0] sm:$0xf]  ;;  %v12916_v33 = vld [vmem:[%s13225_s26 + $0x5c] sm:$0x1] }
  0xc2   : > { %v10808_v19 = vcombine.low %v5707_v39, %v5711_v27  ;;  %v859_v48 = vrot.slane %v857_v43, 5  ;;  %v846_v50 = vsel %vm13244_vm4, %v841_v44, %v845_v25  ;;  %v864_v51 = vrot.slane %v862_v30, 4  ;;  %v227_v36 = vld [vmem:[%s13225_s26 + $0x1a8] sm:$0xf]  ;;  %v290_v26 = vld [vmem:[%s13225_s26 + $0x1a4] sm:$0x1] }
  0xc3   : > { %v865_v52 = vshll.u32 %v223_v32, 16  ;;  %v871_v53 = vshll.u32 %v287_v40, 16  ;;  %v10120_v55 = vcombine.low %v832_v5, %v846_v50  ;;  %v854_v56 = vor.u32 %v853_v10, %v850_v47  ;;  %v12917_v40 = vld [vmem:[%s13225_s26 + $0x64] sm:$0x1] }
  0xc4   : > { %12034 = vmatprep.mubr.msk.bf16.mxu0 %vm1307_vm5, %v10808_v19  ;;  %v10748_v57 = vrot.slane %v10684_v45, 9  ;;  %v5714_v59 = vrot.slane %v12914_v58, 5  ;;  %v10749_v0 = vrot.slane %v10685_v49, 9  ;;  %v5718_v2 = vrot.slane %v12915_v1, 5  ;;  %v291_v19 = vld [vmem:[%s13225_s26 + $0x1ac] sm:$0x1] }
  0xc5   : > { %v867_v62 = vrot.slane %v865_v52, 5  ;;  %v873_v63 = vrot.slane %v871_v53, 5  ;;  %11736 = vmatprep.mubr.msk.bf16.mxu1 %vm1307_vm5, %v10120_v55  ;;  %v855_v11 = vrot.slane %v854_v56, 4  ;;  %v876_v42 = vshrl.u32 %v224_v54, 16 }
  0xc6   : > { %v5715_v3 = vsel %vm13548_vm8, %v10748_v57, %v5714_v59  ;;  %v879_v6 = vshll.u32 %v224_v54, 16  ;;  %v5719_v17 = vsel %vm13548_vm8, %v10749_v0, %v5718_v2  ;;  %v885_v13 = vshll.u32 %v288_v61, 16  ;;  %v10689_v57 = vld [vmem:[%s13225_s26 + $0x70] sm:$0xe]  ;;  %v12918_v2 = vld [vmem:[%s13225_s26 + $0x6c] sm:$0x1] }
  0xc7   : > { %v868_v9 = vor.u32 %v867_v62, %v864_v51  ;;  %v890_v46 = vshrl.u32 %v225_v60, 16  ;;  %v860_v15 = vsel %vm13244_vm4, %v855_v11, %v859_v48  ;;  %v10809_v16 = vcombine.low %v5715_v3, %v5719_v17  ;;  %v10688_v48 = vld [vmem:[%s13225_s26 + $0x68] sm:$0xe]  ;;  %v228_v62 = vld [vmem:[%s13225_s26 + $0x1b0] sm:$0xf] }
  0xc8   : > { %v878_v18 = vrot.slane %v876_v42, 4  ;;  %v881_v20 = vrot.slane %v879_v6, 5  ;;  %v887_v23 = vrot.slane %v885_v13, 5  ;;  %v893_v25 = vshll.u32 %v225_v60, 16  ;;  %v229_v3 = vld [vmem:[%s13225_s26 + $0x1b8] sm:$0xf] }
  0xc9   : > { %v869_v22 = vrot.slane %v868_v9, 4  ;;  %v892_v24 = vrot.slane %v890_v46, 4  ;;  %12035 = vmatmul.mubr.msk.bf16.gmra.mrb[4].mxu0 %vm1307_vm5, %v10809_v16  ;;  %v899_v31 = vshll.u32 %v289_v12, 16  ;;  %v10750_v32 = vrot.slane %v10686_v14, 9  ;;  %v292_v42 = vld [vmem:[%s13225_s26 + $0x1b4] sm:$0x1] }
  0xca   : > { %v882_v29 = vor.u32 %v881_v20, %v878_v18  ;;  %v5722_v34 = vrot.slane %v12916_v33, 5  ;;  %v895_v38 = vrot.slane %v893_v25, 5  ;;  %v10751_v39 = vrot.slane %v10687_v21, 9  ;;  %v12919_v12 = vld [vmem:[%s13225_s26 + $0x74] sm:$0x1] }
  0xcb   : > { %v874_v37 = vsel %vm13244_vm4, %v869_v22, %v873_v63  ;;  %v5726_v41 = vrot.slane %v12917_v40, 5  ;;  %v901_v44 = vrot.slane %v899_v31, 5  ;;  %v904_v47 = vshrl.u32 %v226_v28, 16  ;;  %v293_v16 = vld [vmem:[%s13225_s26 + $0x1bc] sm:$0x1] }
  0xcc   : > { %v10121_v43 = vcombine.low %v860_v15, %v874_v37  ;;  %v883_v5 = vrot.slane %v882_v29, 4  ;;  %v5723_v27 = vsel %vm13548_vm8, %v10750_v32, %v5722_v34  ;;  %v896_v30 = vor.u32 %v895_v38, %v892_v24  ;;  %v10690_v24 = vld [vmem:[%s13225_s26 + $0x78] sm:$0xe]  ;;  %v10691_v32 = vld [vmem:[%s13225_s26 + $0x80] sm:$0xe] }
  0xcd   : > { %v5727_v45 = vsel %vm13548_vm8, %v10751_v39, %v5726_v41  ;;  %v907_v10 = vshll.u32 %v226_v28, 16  ;;  %v913_v51 = vshll.u32 %v290_v26, 16  ;;  %v918_v52 = vshrl.u32 %v227_v36, 16  ;;  %v230_v38 = vld [vmem:[%s13225_s26 + $0x1c0] sm:$0xf] }
  0xce   : > { %11737 = vmatmul.mubr.msk.bf16.gmra.mrb[36].mxu1 %vm1307_vm5, %v10121_v43  ;;  %v888_v49 = vsel %vm13244_vm4, %v883_v5, %v887_v23  ;;  %v10810_v50 = vcombine.low %v5723_v27, %v5727_v45  ;;  %v897_v53 = vrot.slane %v896_v30, 4  ;;  %v906_v54 = vrot.slane %v904_v47, 4  ;;  %v12920_v26 = vld [vmem:[%s13225_s26 + $0x7c] sm:$0x1]  ;;  %v294_v5 = vld [vmem:[%s13225_s26 + $0x1c4] sm:$0x1] }
  0xcf   : > { %v909_v55 = vrot.slane %v907_v10, 5  ;;  %v921_v56 = vshll.u32 %v227_v36, 16  ;;  %v915_v58 = vrot.slane %v913_v51, 5  ;;  %v920_v59 = vrot.slane %v918_v52, 4 }
  0xd0   : > { %12038 = vmatprep.mubr.msk.bf16.mxu0 %vm1307_vm5, %v10810_v50  ;;  %v927_v60 = vshll.u32 %v291_v19, 16  ;;  %v10752_v61 = vrot.slane %v10688_v48, 9  ;;  %v902_v63 = vsel %vm13244_vm4, %v897_v53, %v901_v44  ;;  %v5730_v11 = vrot.slane %v12918_v2, 5  ;;  %v231_v19 = vld [vmem:[%s13225_s26 + $0x1c8] sm:$0xf] }
  0xd1   : > { %v910_v0 = vor.u32 %v909_v55, %v906_v54  ;;  %v923_v1 = vrot.slane %v921_v56, 5  ;;  %v10122_v6 = vcombine.low %v888_v49, %v902_v63  ;;  %v10753_v17 = vrot.slane %v10689_v57, 9  ;;  %v12921_v48 = vld [vmem:[%s13225_s26 + $0x84] sm:$0x1]  ;;  %v295_v53 = vld [vmem:[%s13225_s26 + $0x1cc] sm:$0x1] }
  0xd2   : > { %v929_v9 = vrot.slane %v927_v60, 5  ;;  %v5734_v13 = vrot.slane %v12919_v12, 5  ;;  %v5731_v15 = vsel %vm13548_vm8, %v10752_v61, %v5730_v11  ;;  %v932_v18 = vshrl.u32 %v228_v62, 16  ;;  %v10692_v60 = vld [vmem:[%s13225_s26 + $0x88] sm:$0xe] }
  0xd3   : > { %v911_v46 = vrot.slane %v910_v0, 4  ;;  %v924_v14 = vor.u32 %v923_v1, %v920_v59  ;;  %11740 = vmatprep.mubr.msk.bf16.mxu1 %vm1307_vm5, %v10122_v6  ;;  %v935_v21 = vshll.u32 %v228_v62, 16  ;;  %v941_v22 = vshll.u32 %v292_v42, 16  ;;  %v10693_v1 = vld [vmem:[%s13225_s26 + $0x90] sm:$0xe] }
  0xd4   : > { %v5735_v20 = vsel %vm13548_vm8, %v10753_v17, %v5734_v13  ;;  %v946_v23 = vshrl.u32 %v229_v3, 16  ;;  %v934_v31 = vrot.slane %v932_v18, 4  ;;  %v949_v37 = vshll.u32 %v229_v3, 16  ;;  %v232_v6 = vld [vmem:[%s13225_s26 + $0x1e0] sm:$0xf] }
  0xd5   : > { %v916_v25 = vsel %vm13244_vm4, %v911_v46, %v915_v58  ;;  %v925_v28 = vrot.slane %v924_v14, 4  ;;  %v10811_v29 = vcombine.low %v5731_v15, %v5735_v20  ;;  %v937_v33 = vrot.slane %v935_v21, 5  ;;  %v12922_v13 = vld [vmem:[%s13225_s26 + $0x8c] sm:$0x1]  ;;  %v233_v14 = vld [vmem:[%s13225_s26 + $0x1e8] sm:$0xf] }
  0xd6   : > { %v943_v34 = vrot.slane %v941_v22, 5  ;;  %v948_v36 = vrot.slane %v946_v23, 4  ;;  %v955_v40 = vshll.u32 %v293_v16, 16  ;;  %v10754_v41 = vrot.slane %v10690_v24, 9  ;;  %v296_v15 = vld [vmem:[%s13225_s26 + $0x1e4] sm:$0x1] }
  0xd7   : > { %v930_v39 = vsel %vm13244_vm4, %v925_v28, %v929_v9  ;;  %12039 = vmatmul.mubr.msk.bf16.gmra.mrb[8].mxu0 %vm1307_vm5, %v10811_v29  ;;  %v5738_v43 = vrot.slane %v12920_v26, 5  ;;  %v938_v27 = vor.u32 %v937_v33, %v934_v31  ;;  %v951_v30 = vrot.slane %v949_v37, 5  ;;  %v12923_v24 = vld [vmem:[%s13225_s26 + $0x94] sm:$0x1]  ;;  %v297_v31 = vld [vmem:[%s13225_s26 + $0x1ec] sm:$0x1] }
  0xd8   : > { %v10123_v44 = vcombine.low %v916_v25, %v930_v39  ;;  %v10755_v45 = vrot.slane %v10691_v32, 9  ;;  %v957_v47 = vrot.slane %v955_v40, 5  ;;  %v5742_v49 = vrot.slane %v12921_v48, 5  ;;  %v10694_v40 = vld [vmem:[%s13225_s26 + $0xa8] sm:$0xe] }
  0xd9   : > { %v5739_v10 = vsel %vm13548_vm8, %v10754_v41, %v5738_v43  ;;  %v960_v50 = vshrl.u32 %v230_v38, 16  ;;  %v939_v51 = vrot.slane %v938_v27, 4  ;;  %v952_v52 = vor.u32 %v951_v30, %v948_v36  ;;  %v10695_v41 = vld [vmem:[%s13225_s26 + $0xb0] sm:$0xe] }
  0xda   : > { %11741 = vmatmul.mubr.msk.bf16.gmra.mrb[40].mxu1 %vm1307_vm5, %v10123_v44  ;;  %v963_v54 = vshll.u32 %v230_v38, 16  ;;  %v969_v55 = vshll.u32 %v294_v5, 16  ;;  %v5743_v56 = vsel %vm13548_vm8, %v10755_v45, %v5742_v49  ;;  %v974_v58 = vshrl.u32 %v231_v19, 16  ;;  %v234_v27 = vld [vmem:[%s13225_s26 + $0x1f0] sm:$0xf] }
  0xdb   : > { %v962_v57 = vrot.slane %v960_v50, 4  ;;  %v977_v59 = vshll.u32 %v231_v19, 16  ;;  %v944_v61 = vsel %vm13244_vm4, %v939_v51, %v943_v34  ;;  %v953_v62 = vrot.slane %v952_v52, 4  ;;  %v12924_v50 = vld [vmem:[%s13225_s26 + $0xac] sm:$0x1] }
  0xdc   : > { %v10812_v63 = vcombine.low %v5739_v10, %v5743_v56  ;;  %v965_v0 = vrot.slane %v963_v54, 5  ;;  %v971_v2 = vrot.slane %v969_v55, 5  ;;  %v976_v11 = vrot.slane %v974_v58, 4  ;;  %v298_v10 = vld [vmem:[%s13225_s26 + $0x1f4] sm:$0x1] }
  0xdd   : > { %v979_v3 = vrot.slane %v977_v59, 5  ;;  %v983_v42 = vshll.u32 %v295_v53, 16  ;;  %v958_v9 = vsel %vm13244_vm4, %v953_v62, %v957_v47  ;;  %v10756_v12 = vrot.slane %v10692_v60, 9  ;;  %v235_v53 = vld [vmem:[%s13225_s26 + $0x1f8] sm:$0xf] }
  0xde   : > { %12042 = vmatprep.mubr.msk.bf16.mxu0 %vm1307_vm5, %v10812_v63  ;;  %v966_v17 = vor.u32 %v965_v0, %v962_v57  ;;  %v5746_v46 = vrot.slane %v12922_v13, 5  ;;  %v10124_v16 = vcombine.low %v944_v61, %v958_v9  ;;  %v10757_v21 = vrot.slane %v10693_v1, 9  ;;  %v12925_v56 = vld [vmem:[%s13225_s26 + $0xb4] sm:$0x1]  ;;  %v299_v61 = vld [vmem:[%s13225_s26 + $0x1fc] sm:$0x1] }
  0xdf   : > { %v980_v18 = vor.u32 %v979_v3, %v976_v11  ;;  %v985_v20 = vrot.slane %v983_v42, 5  ;;  %v5750_v25 = vrot.slane %v12923_v24, 5  ;;  %v988_v28 = vshrl.u32 %v232_v6, 16  ;;  %v10696_v3 = vld [vmem:[%s13225_s26 + $0xb8] sm:$0xe] }
  0xe0   : > { %v967_v22 = vrot.slane %v966_v17, 4  ;;  %v5747_v23 = vsel %vm13548_vm8, %v10756_v12, %v5746_v46  ;;  %11744 = vmatprep.mubr.msk.bf16.mxu1 %vm1307_vm5, %v10124_v16  ;;  %v991_v32 = vshll.u32 %v232_v6, 16  ;;  %v997_v33 = vshll.u32 %v296_v15, 16  ;;  %v10697_v12 = vld [vmem:[%s13225_s26 + $0xc0] sm:$0xe] }
  0xe1   : > { %v981_v29 = vrot.slane %v980_v18, 4  ;;  %v1002_v34 = vshrl.u32 %v233_v14, 16  ;;  %v5751_v37 = vsel %vm13548_vm8, %v10757_v21, %v5750_v25  ;;  %v990_v38 = vrot.slane %v988_v28, 4  ;;  %v236_v16 = vld [vmem:[%s13225_s26 + $0x200] sm:$0xf] }
  0xe2   : > { %v972_v36 = vsel %vm13244_vm4, %v967_v22, %v971_v2  ;;  %v1005_v39 = vshll.u32 %v233_v14, 16  ;;  %v10813_v43 = vcombine.low %v5747_v23, %v5751_v37  ;;  %v993_v5 = vrot.slane %v991_v32, 5  ;;  %v12926_v22 = vld [vmem:[%s13225_s26 + $0xbc] sm:$0x1]  ;;  %v237_v24 = vld [vmem:[%s13225_s26 + $0x208] sm:$0xf] }
  0xe3   : > { %v986_v26 = vsel %vm13244_vm4, %v981_v29, %v985_v20  ;;  %v999_v44 = vrot.slane %v997_v33, 5  ;;  %v1004_v45 = vrot.slane %v1002_v34, 4  ;;  %v1011_v47 = vshll.u32 %v297_v31, 16  ;;  %v300_v25 = vld [vmem:[%s13225_s26 + $0x204] sm:$0x1] }
  0xe4   : > { %v10125_v30 = vcombine.low %v972_v36, %v986_v26  ;;  %v1007_v19 = vrot.slane %v1005_v39, 5  ;;  %12043 = vmatmul.mubr.msk.bf16.gmra.mrb[12].mxu0 %vm1307_vm5, %v10813_v43  ;;  %v994_v48 = vor.u32 %v993_v5, %v990_v38  ;;  %v10758_v49 = vrot.slane %v10694_v40, 9  ;;  %v12927_v32 = vld [vmem:[%s13225_s26 + $0xc4] sm:$0x1]  ;;  %v301_v34 = vld [vmem:[%s13225_s26 + $0x20c] sm:$0x1] }
  0xe5   : > { %v5754_v51 = vrot.slane %v12924_v50, 5  ;;  %v10759_v52 = vrot.slane %v10695_v41, 9  ;;  %v1013_v55 = vrot.slane %v1011_v47, 5  ;;  %v5758_v57 = vrot.slane %v12925_v56, 5  ;;  %v10698_v40 = vld [vmem:[%s13225_s26 + $0xc8] sm:$0xe] }
  0xe6   : > { %11745 = vmatmul.mubr.msk.bf16.gmra.mrb[44].mxu1 %vm1307_vm5, %v10125_v30  ;;  %v1008_v54 = vor.u32 %v1007_v19, %v1004_v45  ;;  %v1016_v58 = vshrl.u32 %v234_v27, 16  ;;  %v995_v59 = vrot.slane %v994_v48, 4  ;;  %v1019_v62 = vshll.u32 %v234_v27, 16  ;;  %v10699_v19 = vld [vmem:[%s13225_s26 + $0xd0] sm:$0xe] }
  0xe7   : > { %v5755_v60 = vsel %vm13548_vm8, %v10758_v49, %v5754_v51  ;;  %v1025_v63 = vshll.u32 %v298_v10, 16  ;;  %v5759_v1 = vsel %vm13548_vm8, %v10759_v52, %v5758_v57  ;;  %v1030_v11 = vshrl.u32 %v235_v53, 16  ;;  %v238_v47 = vld [vmem:[%s13225_s26 + $0x210] sm:$0xf]  ;;  %v239_v51 = vld [vmem:[%s13225_s26 + $0x218] sm:$0xf] }
  0xe8   : > { %v1009_v0 = vrot.slane %v1008_v54, 4  ;;  %v1018_v2 = vrot.slane %v1016_v58, 4  ;;  %v1000_v42 = vsel %vm13244_vm4, %v995_v59, %v999_v44  ;;  %v10814_v6 = vcombine.low %v5755_v60, %v5759_v1  ;;  %v302_v52 = vld [vmem:[%s13225_s26 + $0x214] sm:$0x1]  ;;  %v12928_v56 = vld [vmem:[%s13225_s26 + $0xcc] sm:$0x1] }
  0xe9   : > { %v1021_v9 = vrot.slane %v1019_v62, 5  ;;  %v1027_v17 = vrot.slane %v1025_v63, 5  ;;  %v1032_v46 = vrot.slane %v1030_v11, 4  ;;  %v1033_v14 = vshll.u32 %v235_v53, 16  ;;  %v303_v63 = vld [vmem:[%s13225_s26 + $0x21c] sm:$0x1] }
  0xea   : > { %v1014_v13 = vsel %vm13244_vm4, %v1009_v0, %v1013_v55  ;;  %v1039_v15 = vshll.u32 %v299_v61, 16  ;;  %12046 = vmatprep.mubr.msk.bf16.mxu0 %vm1307_vm5, %v10814_v6  ;;  %v10760_v21 = vrot.slane %v10696_v3, 9  ;;  %v5762_v23 = vrot.slane %v12926_v22, 5  ;;  %v12929_v61 = vld [vmem:[%s13225_s26 + $0xd4] sm:$0x1] }
  0xeb   : > { %v10126_v18 = vcombine.low %v1000_v42, %v1014_v13  ;;  %v1022_v20 = vor.u32 %v1021_v9, %v1018_v2  ;;  %v1035_v28 = vrot.slane %v1033_v14, 5  ;;  %v10761_v31 = vrot.slane %v10697_v12, 9  ;;  %v10700_v0 = vld [vmem:[%s13225_s26 + $0xd8] sm:$0xe]  ;;  %v10701_v12 = vld [vmem:[%s13225_s26 + $0xe0] sm:$0xe] }
  0xec   : > { %v1041_v29 = vrot.slane %v1039_v15, 5  ;;  %v5766_v33 = vrot.slane %v12927_v32, 5  ;;  %v5763_v37 = vsel %vm13548_vm8, %v10760_v21, %v5762_v23  ;;  %v1044_v38 = vshrl.u32 %v236_v16, 16  ;;  %v241_v23 = vld [vmem:[%s13225_s26 + $0x238] sm:$0xf] }
  0xed   : > { %11748 = vmatprep.mubr.msk.bf16.mxu1 %vm1307_vm5, %v10126_v18  ;;  %v1023_v36 = vrot.slane %v1022_v20, 4  ;;  %v1047_v39 = vshll.u32 %v236_v16, 16  ;;  %v1036_v41 = vor.u32 %v1035_v28, %v1032_v46  ;;  %v1053_v43 = vshll.u32 %v300_v25, 16  ;;  %v240_v16 = vld [vmem:[%s13225_s26 + $0x230] sm:$0xf] }
  0xee   : > { %v5767_v26 = vsel %vm13548_vm8, %v10761_v31, %v5766_v33  ;;  %v1058_v5 = vshrl.u32 %v237_v24, 16  ;;  %v1046_v30 = vrot.slane %v1044_v38, 4  ;;  %v1061_v50 = vshll.u32 %v237_v24, 16 }
  0xef   : > { %v1028_v44 = vsel %vm13244_vm4, %v1023_v36, %v1027_v17  ;;  %v10815_v27 = vcombine.low %v5763_v37, %v5767_v26  ;;  %v1049_v45 = vrot.slane %v1047_v39, 5  ;;  %v1037_v10 = vrot.slane %v1036_v41, 4  ;;  %v304_v37 = vld [vmem:[%s13225_s26 + $0x234] sm:$0x1]  ;;  %v12931_v41 = vld [vmem:[%s13225_s26 + $0xe4] sm:$0x1] }
  0xf0   : > { %v1055_v48 = vrot.slane %v1053_v43, 5  ;;  %v1060_v49 = vrot.slane %v1058_v5, 4  ;;  %v1067_v54 = vshll.u32 %v301_v34, 16  ;;  %v10762_v55 = vrot.slane %v10698_v40, 9  ;;  %v12930_v34 = vld [vmem:[%s13225_s26 + $0xdc] sm:$0x1] }
  0xf1   : > { %12047 = vmatmul.mubr.msk.bf16.gmra.mrb[16].mxu0 %vm1307_vm5, %v10815_v27  ;;  %v1050_v53 = vor.u32 %v1049_v45, %v1046_v30  ;;  %v5770_v57 = vrot.slane %v12928_v56, 5  ;;  %v1042_v58 = vsel %vm13244_vm4, %v1037_v10, %v1041_v29  ;;  %v1063_v59 = vrot.slane %v1061_v50, 5  ;;  %v305_v43 = vld [vmem:[%s13225_s26 + $0x23c] sm:$0x1]  ;;  %v10702_v5 = vld [vmem:[%s13225_s26 + $0xf8] sm:$0xe] }
  0xf2   : > { %v10763_v60 = vrot.slane %v10699_v19, 9  ;;  %v5774_v62 = vrot.slane %v12929_v61, 5  ;;  %v10127_v1 = vcombine.low %v1028_v44, %v1042_v58  ;;  %v1069_v11 = vrot.slane %v1067_v54, 5  ;;  %v10703_v19 = vld [vmem:[%s13225_s26 + $0x100] sm:$0xe] }
  0xf3   : > { %v1051_v2 = vrot.slane %v1050_v53, 4  ;;  %v5771_v3 = vsel %vm13548_vm8, %v10762_v55, %v5770_v57  ;;  %v1064_v42 = vor.u32 %v1063_v59, %v1060_v49  ;;  %v1072_v9 = vshrl.u32 %v238_v47, 16  ;;  %v13776_v54 = vld [vmem:[%s13225_s26 + $0x240] sm:$0xf]  ;;  %v13779_v59 = vld [vmem:[%s13225_s26 + $0x248] sm:$0xf] }
  0xf4   : > { %v5775_v6 = vsel %vm13548_vm8, %v10763_v60, %v5774_v62  ;;  %v1075_v17 = vshll.u32 %v238_v47, 16  ;;  %11749 = vmatmul.mubr.msk.bf16.gmra.mrb[48].mxu1 %vm1307_vm5, %v10127_v1  ;;  %v1081_v14 = vshll.u32 %v302_v52, 16  ;;  %v1086_v15 = vshrl.u32 %v239_v51, 16  ;;  %v306_v1 = vld [vmem:[%s13225_s26 + $0x244] sm:$0x1] }
  0xf5   : > { %v1056_v13 = vsel %vm13244_vm4, %v1051_v2, %v1055_v48  ;;  %v10816_v46 = vcombine.low %v5771_v3, %v5775_v6  ;;  %v1065_v18 = vrot.slane %v1064_v42, 4  ;;  %v1074_v20 = vrot.slane %v1072_v9, 4  ;;  %v307_v6 = vld [vmem:[%s13225_s26 + $0x24c] sm:$0x1] }
  0xf6   : > { %v1077_v21 = vrot.slane %v1075_v17, 5  ;;  %v1089_v22 = vshll.u32 %v239_v51, 16  ;;  %v1083_v24 = vrot.slane %v1081_v14, 5  ;;  %v1088_v25 = vrot.slane %v1086_v15, 4  ;;  %v10704_v14 = vld [vmem:[%s13225_s26 + $0x108] sm:$0xe] }
  0xf7   : > { %12050 = vmatprep.mubr.msk.bf16.mxu0 %vm1307_vm5, %v10816_v46  ;;  %v1095_v28 = vshll.u32 %v303_v63, 16  ;;  %v10764_v29 = vrot.slane %v10700_v0, 9  ;;  %v1070_v31 = vsel %vm13244_vm4, %v1065_v18, %v1069_v11  ;;  %v5778_v36 = vrot.slane %v12930_v34, 5  ;;  %v12932_v63 = vld [vmem:[%s13225_s26 + $0xfc] sm:$0x1] }
  0xf8   : > { %v1078_v32 = vor.u32 %v1077_v21, %v1074_v20  ;;  %v1091_v33 = vrot.slane %v1089_v22, 5  ;;  %v10128_v38 = vcombine.low %v1056_v13, %v1070_v31  ;;  %v10765_v40 = vrot.slane %v10701_v12, 9  ;;  %v12933_v12 = vld [vmem:[%s13225_s26 + $0x104] sm:$0x1]  ;;  %v10705_v21 = vld [vmem:[%s13225_s26 + $0x110] sm:$0xe] }
  0xf9   : > { %v1097_v39 = vrot.slane %v1095_v28, 5  ;;  %v5782_v26 = vrot.slane %v12931_v41, 5  ;;  %v5779_v30 = vsel %vm13548_vm8, %v10764_v29, %v5778_v36  ;;  %v1100_v45 = vshrl.u32 %v240_v16, 16  ;;  %v13800_v28 = vld [vmem:[%s13225_s26 + $0x250] sm:$0xf] }
  0xfa   : > { %v1079_v44 = vrot.slane %v1078_v32, 4  ;;  %v1092_v27 = vor.u32 %v1091_v33, %v1088_v25  ;;  %11752 = vmatprep.mubr.msk.bf16.mxu1 %vm1307_vm5, %v10128_v38  ;;  %v1103_v10 = vshll.u32 %v240_v16, 16  ;;  %v1109_v48 = vshll.u32 %v304_v37, 16  ;;  %v13805_v34 = vld [vmem:[%s13225_s26 + $0x258] sm:$0xf] }
  0xfb   : > { %v5783_v47 = vsel %vm13548_vm8, %v10765_v40, %v5782_v26  ;;  %v1114_v49 = vshrl.u32 %v241_v23, 16  ;;  %v1102_v53 = vrot.slane %v1100_v45, 4  ;;  %v1117_v58 = vshll.u32 %v241_v23, 16 }
  0xfc   : > { %v1084_v50 = vsel %vm13244_vm4, %v1079_v44, %v1083_v24  ;;  %v1093_v51 = vrot.slane %v1092_v27, 4  ;;  %v10817_v52 = vcombine.low %v5779_v30, %v5783_v47  ;;  %v1105_v55 = vrot.slane %v1103_v10, 5  ;;  %v308_v44 = vld [vmem:[%s13225_s26 + $0x254] sm:$0x1]  ;;  %v309_v47 = vld [vmem:[%s13225_s26 + $0x25c] sm:$0x1] }
  0xfd   : > { %v1111_v56 = vrot.slane %v1109_v48, 5  ;;  %v1116_v57 = vrot.slane %v1114_v49, 4  ;;  %v1123_v61 = vshll.u32 %v305_v43, 16  ;;  %v10766_v62 = vrot.slane %v10702_v5, 9  ;;  %v12934_v43 = vld [vmem:[%s13225_s26 + $0x10c] sm:$0x1] }
  0xfe   : > { %v1098_v60 = vsel %vm13244_vm4, %v1093_v51, %v1097_v39  ;;  %12051 = vmatmul.mubr.msk.bf16.gmra.mrb[20].mxu0 %vm1307_vm5, %v10817_v52  ;;  %v5786_v0 = vrot.slane %v12932_v63, 5  ;;  %v1106_v11 = vor.u32 %v1105_v55, %v1102_v53  ;;  %v1119_v3 = vrot.slane %v1117_v58, 5  ;;  %v12935_v49 = vld [vmem:[%s13225_s26 + $0x114] sm:$0x1]  ;;  %v10706_v52 = vld [vmem:[%s13225_s26 + $0x118] sm:$0xe] }
  0xff   : > { %v10129_v2 = vcombine.low %v1084_v50, %v1098_v60  ;;  %v10767_v42 = vrot.slane %v10703_v19, 9  ;;  %v1125_v9 = vrot.slane %v1123_v61, 5  ;;  %v5790_v13 = vrot.slane %v12933_v12, 5  ;;  %v10707_v53 = vld [vmem:[%s13225_s26 + $0x120] sm:$0xe] }
 0x100   : > { %v5787_v17 = vsel %vm13548_vm8, %v10766_v62, %v5786_v0  ;;  %v1128_v46 = vshrl.u32 %v13776_v54, 16  ;;  %v1107_v15 = vrot.slane %v1106_v11, 4  ;;  %v1120_v16 = vor.u32 %v1119_v3, %v1116_v57  ;;  %v13823_v60 = vld [vmem:[%s13225_s26 + $0x260] sm:$0xf] }
 0x101   : > { %11753 = vmatmul.mubr.msk.bf16.gmra.mrb[52].mxu1 %vm1307_vm5, %v10129_v2  ;;  %v1131_v18 = vshll.u32 %v13776_v54, 16  ;;  %v1137_v20 = vshll.u32 %v306_v1, 16  ;;  %v5791_v22 = vsel %vm13548_vm8, %v10767_v42, %v5790_v13  ;;  %v1142_v24 = vshrl.u32 %v13779_v59, 16  ;;  %v13833_v42 = vld [vmem:[%s13225_s26 + $0x268] sm:$0xf] }
 0x102   : > { %v1130_v23 = vrot.slane %v1128_v46, 4  ;;  %v1145_v25 = vshll.u32 %v13779_v59, 16  ;;  %v1112_v29 = vsel %vm13244_vm4, %v1107_v15, %v1111_v56  ;;  %v1121_v31 = vrot.slane %v1120_v16, 4  ;;  %v12936_v15 = vld [vmem:[%s13225_s26 + $0x11c] sm:$0x1] }
 0x103   : > { %v10818_v32 = vcombine.low %v5787_v17, %v5791_v22  ;;  %v1133_v33 = vrot.slane %v1131_v18, 5  ;;  %v1139_v36 = vrot.slane %v1137_v20, 5  ;;  %v1144_v37 = vrot.slane %v1142_v24, 4  ;;  %v311_v20 = vld [vmem:[%s13225_s26 + $0x26c] sm:$0x1] }
 0x104   : > { %v1147_v38 = vrot.slane %v1145_v25, 5  ;;  %v1151_v39 = vshll.u32 %v307_v6, 16  ;;  %v1126_v40 = vsel %vm13244_vm4, %v1121_v31, %v1125_v9  ;;  %v10768_v26 = vrot.slane %v10704_v14, 9  ;;  %v310_v6 = vld [vmem:[%s13225_s26 + $0x264] sm:$0x1] }
 0x105   : > { %12054 = vmatprep.mubr.msk.bf16.mxu0 %vm1307_vm5, %v10818_v32  ;;  %v1134_v41 = vor.u32 %v1133_v33, %v1130_v23  ;;  %v5794_v5 = vrot.slane %v12934_v43, 5  ;;  %v10130_v27 = vcombine.low %v1112_v29, %v1126_v40  ;;  %v10769_v19 = vrot.slane %v10705_v21, 9  ;;  %v12937_v23 = vld [vmem:[%s13225_s26 + $0x124] sm:$0x1]  ;;  %v10708_v29 = vld [vmem:[%s13225_s26 + $0x128] sm:$0xe] }
 0x106   : > { %v1148_v30 = vor.u32 %v1147_v38, %v1144_v37  ;;  %v1153_v45 = vrot.slane %v1151_v39, 5  ;;  %v5798_v50 = vrot.slane %v12935_v49, 5  ;;  %v1156_v51 = vshrl.u32 %v13800_v28, 16  ;;  %v10709_v37 = vld [vmem:[%s13225_s26 + $0x130] sm:$0xe] }
 0x107   : > { %v1135_v10 = vrot.slane %v1134_v41, 4  ;;  %v5795_v48 = vsel %vm13548_vm8, %v10768_v26, %v5794_v5  ;;  %11756 = vmatprep.mubr.msk.bf16.mxu1 %vm1307_vm5, %v10130_v27  ;;  %v1159_v56 = vshll.u32 %v13800_v28, 16  ;;  %v1165_v57 = vshll.u32 %v308_v44, 16  ;;  %v177_v26 = vld [vmem:[%s16464_s1 + $0x4] sm:$0x3] }
 0x108   : > { %v1149_v55 = vrot.slane %v1148_v30, 4  ;;  %v1170_v58 = vshrl.u32 %v13805_v34, 16  ;;  %v5799_v62 = vsel %vm13548_vm8, %v10769_v19, %v5798_v50  ;;  %v1158_v63 = vrot.slane %v1156_v51, 4  ;;  %v10551_v27 = vld [vmem:[%s13225_s26 + $0x14c] sm:$0x1] }
 0x109   : > { %v1140_v61 = vsel %vm13244_vm4, %v1135_v10, %v1139_v36  ;;  %v1173_v0 = vshll.u32 %v13805_v34, 16  ;;  %v10819_v2 = vcombine.low %v5795_v48, %v5799_v62  ;;  %v1161_v11 = vrot.slane %v1159_v56, 5  ;;  %v10710_v30 = vld [vmem:[%s13225_s26 + $0x148] sm:$0xe]  ;;  %v10553_v48 = vld [vmem:[%s13225_s26 + $0x154] sm:$0x1] }
 0x10a   : > { %v1154_v1 = vsel %vm13244_vm4, %v1149_v55, %v1153_v45  ;;  %v1167_v3 = vrot.slane %v1165_v57, 5  ;;  %v1172_v17 = vrot.slane %v1170_v58, 4  ;;  %v1179_v13 = vshll.u32 %v309_v47, 16  ;;  %v10711_v55 = vld [vmem:[%s13225_s26 + $0x150] sm:$0xe] }
 0x10b   : > { %v10131_v9 = vcombine.low %v1140_v61, %v1154_v1  ;;  %v1175_v12 = vrot.slane %v1173_v0, 5  ;;  %12055 = vmatmul.mubr.msk.bf16.gmra.mrb[24].mxu0 %vm1307_vm5, %v10819_v2  ;;  %v1162_v46 = vor.u32 %v1161_v11, %v1158_v63  ;;  %v10770_v14 = vrot.slane %v10706_v52, 9  ;;  %v12938_v52 = vld [vmem:[%s13225_s26 + $0x12c] sm:$0x1]  ;;  %v12939_v61 = vld [vmem:[%s13225_s26 + $0x134] sm:$0x1] }
 0x10c   : > { %v5802_v16 = vrot.slane %v12936_v15, 5  ;;  %v10771_v18 = vrot.slane %v10707_v53, 9  ;;  %v1181_v22 = vrot.slane %v1179_v13, 5  ;;  %v5806_v24 = vrot.slane %v12937_v23, 5  ;;  %v13866_v63 = vld [vmem:[%s13225_s26 + $0x15c] sm:$0x1] }
 0x10d   : > { %11757 = vmatmul.mubr.msk.bf16.gmra.mrb[56].mxu1 %vm1307_vm5, %v10131_v9  ;;  %v1176_v21 = vor.u32 %v1175_v12, %v1172_v17  ;;  %v1184_v25 = vshrl.u32 %v13823_v60, 16  ;;  %v1163_v31 = vrot.slane %v1162_v46, 4  ;;  %v1187_v33 = vshll.u32 %v13823_v60, 16  ;;  %v10712_v0 = vld [vmem:[%s13225_s26 + $0x158] sm:$0xe] }
 0x10e   : > { %v5803_v32 = vsel %vm13548_vm8, %v10770_v14, %v5802_v16  ;;  %v1193_v36 = vshll.u32 %v310_v6, 16  ;;  %v5807_v39 = vsel %vm13548_vm8, %v10771_v18, %v5806_v24  ;;  %v1198_v41 = vshrl.u32 %v13833_v42, 16  ;;  %v13878_v13 = vld [vmem:[%s13225_s26 + $0x164] sm:$0x1]  ;;  %v10713_v46 = vld [vmem:[%s13225_s26 + $0x160] sm:$0xe] }
 0x10f   : > { %v1177_v38 = vrot.slane %v1176_v21, 4  ;;  %v1186_v40 = vrot.slane %v1184_v25, 4  ;;  %v1168_v43 = vsel %vm13244_vm4, %v1163_v31, %v1167_v3  ;;  %v10820_v5 = vcombine.low %v5803_v32, %v5807_v39  ;;  %16490 = vst [vmem:[#allocation3_spill] sm:$0xff] %v13878_v13  ;;  %v10559_v18 = vld [vmem:[%s13225_s26 + $0x16c] sm:$0x1] }
 0x110   : > { %v1189_v44 = vrot.slane %v1187_v33, 5  ;;  %v1200_v19 = vrot.slane %v1198_v41, 4  ;;  %v1201_v47 = vshll.u32 %v13833_v42, 16  ;;  %v1207_v10 = vshll.u32 %v311_v20, 16  ;;  %v10714_v20 = vld [vmem:[%s13225_s26 + $0x168] sm:$0xe] }
 0x111   : > { %v1182_v45 = vsel %vm13244_vm4, %v1177_v38, %v1181_v22  ;;  %12058 = vmatprep.mubr.msk.bf16.mxu0 %vm1307_vm5, %v10820_v5  ;;  %v10772_v51 = vrot.slane %v10708_v29, 9  ;;  %v5810_v53 = vrot.slane %v12938_v52, 5  ;;  %v1195_v56 = vrot.slane %v1193_v36, 5  ;;  %v10715_v21 = vld [vmem:[%s13225_s26 + $0x170] sm:$0xe] }
 0x112   : > { %v10132_v49 = vcombine.low %v1168_v43, %v1182_v45  ;;  %v1190_v50 = vor.u32 %v1189_v44, %v1186_v40  ;;  %v1203_v57 = vrot.slane %v1201_v47, 5  ;;  %v10773_v58 = vrot.slane %v10709_v37, 9  ;;  %v10561_v25 = vld [vmem:[%s13225_s26 + $0x174] sm:$0x1]  ;;  %v10716_v29 = vld [vmem:[%s13225_s26 + $0x178] sm:$0xe] }
 0x113   : > { %v5814_v62 = vrot.slane %v12939_v61, 5  ;;  %v1209_v2 = vrot.slane %v1207_v10, 5  ;;  %v5811_v11 = vsel %vm13548_vm8, %v10772_v51, %v5810_v53  ;;  %v13873_v3 = vand.u32 %v13202_v4, %v177_v26  ;;  %v10563_v36 = vld [vmem:[%s13225_s26 + $0x17c] sm:$0x1]  ;;  %v10717_v37 = vld [vmem:[%s13225_s26 + $0x180] sm:$0xe] }
 0x114   : > { %11760 = vmatprep.mubr.msk.bf16.mxu1 %vm1307_vm5, %v10132_v49  ;;  %v1191_v1 = vrot.slane %v1190_v50, 4  ;;  %v1204_v6 = vor.u32 %v1203_v57, %v1200_v19  ;;  %v10774_v17 = vrot.slane %v10710_v30, 9  ;;  %v5818_v12 = vrot.slane %v10551_v27, 5  ;;  %v12940_v39 = vld [vmem:[%s13225_s26] sm:$0xf] }
 0x115   : > { %v5815_v9 = vsel %vm13548_vm8, %v10773_v58, %v5814_v62  ;;  %11830 = vmatprep.subr.bf16.mxu1 %v13873_v3  ;;  %v10775_v15 = vrot.slane %v10711_v55, 9  ;;  %v5822_v16 = vrot.slane %v10553_v48, 5  ;;  %v10776_v32 = vrot.slane %v10712_v0, 9  ;;  %v12941_v40 = vld [vmem:[%s13225_s26 + $0x8] sm:$0xf] }
 0x116   : > { %v10821_v14 = vcombine.low %v5811_v11, %v5815_v9  ;;  %v1196_v22 = vsel %vm13244_vm4, %v1191_v1, %v1195_v56  ;;  %v1205_v23 = vrot.slane %v1204_v6, 4  ;;  %v5819_v24 = vsel %vm13548_vm8, %v10774_v17, %v5818_v12  ;;  %v10565_v5 = vld [vmem:[%s13225_s26 + $0x184] sm:$0x1]  ;;  %v10718_v45 = vld [vmem:[%s13225_s26 + $0x198] sm:$0xe] }
 0x117   : > { %v5823_v31 = vsel %vm13548_vm8, %v10775_v15, %v5822_v16  ;;  %v5826_v33 = vrot.slane %v13866_v63, 5  ;;  %v10166_v41 = vcombine.low %v12940_v39, %v12941_v40  ;;  %v10777_v43 = vrot.slane %v10713_v46, 9  ;;  %v10567_v51 = vld [vmem:[%s13225_s26 + $0x19c] sm:$0x1]  ;;  %v10719_v52 = vld [vmem:[%s13225_s26 + $0x1a0] sm:$0xe] }
 0x118   : > { %12059 = vmatmul.mubr.msk.bf16.gmra.mrb[28].mxu0 %vm1307_vm5, %v10821_v14  ;;  %v1210_v38 = vsel %vm13244_vm4, %v1205_v23, %v1209_v2  ;;  %v10822_v26 = vcombine.low %v5819_v24, %v5823_v31  ;;  %v5830_v30 = vrot.slane %v13878_v13, 5  ;;  %v10778_v19 = vrot.slane %v10714_v20, 9  ;;  %v10569_v58 = vld [vmem:[%s13225_s26 + $0x1a4] sm:$0x1]  ;;  %v10720_v6 = vld [vmem:[%s13225_s26 + $0x1a8] sm:$0xe] }
 0x119   : > { %v10133_v44 = vcombine.low %v1196_v22, %v1210_v38  ;;  %v5827_v27 = vsel %vm13548_vm8, %v10776_v32, %v5826_v33  ;;  %v5834_v47 = vrot.slane %v10559_v18, 5  ;;  %v10779_v10 = vrot.slane %v10715_v21, 9  ;;  %v12942_v9 = vld [vmem:[%s13225_s26 + $0x10] sm:$0xf]  ;;  %v12943_v17 = vld [vmem:[%s13225_s26 + $0x18] sm:$0xf] }
 0x11a   : > { %12062 = vmatprep.mubr.msk.bf16.mxu0 %vm1307_vm5, %v10822_v26  ;;  %v5831_v48 = vsel %vm13548_vm8, %v10777_v43, %v5830_v30  ;;  %v5838_v49 = vrot.slane %v10561_v25, 5  ;;  %v10780_v50 = vrot.slane %v10716_v29, 9  ;;  %v5842_v56 = vrot.slane %v10563_v36, 5  ;;  %v10571_v14 = vld [vmem:[%s13225_s26 + $0x1ac] sm:$0x1] }
 0x11b   : > { %11761 = vmatmul.mubr.msk.bf16.gmra.mrb[60].mxu1 %vm1307_vm5, %v10133_v44  ;;  %v10823_v53 = vcombine.low %v5827_v27, %v5831_v48  ;;  %v5835_v55 = vsel %vm13548_vm8, %v10778_v19, %v5834_v47  ;;  %v10781_v57 = vrot.slane %v10717_v37, 9  ;;  %v5846_v62 = vrot.slane %v10565_v5, 5  ;;  %v10573_v15 = vld [vmem:[%s13225_s26 + $0x1b4] sm:$0x1]  ;;  %v10721_v16 = vld [vmem:[%s13225_s26 + $0x1b0] sm:$0xe] }
 0x11c   : > { %11766 = vmatprep.mubr.msk.bf16.mxu1 %vm1307_vm5, %v10166_v41  ;;  %v5839_v61 = vsel %vm13548_vm8, %v10779_v10, %v5838_v49  ;;  %v10782_v0 = vrot.slane %v10718_v45, 9  ;;  %v5850_v2 = vrot.slane %v10567_v51, 5  ;;  %v10783_v11 = vrot.slane %v10719_v52, 9  ;;  %v12944_v18 = vld [vmem:[%s13225_s26 + $0x20] sm:$0xf] }
 0x11d   : > { %v10824_v1 = vcombine.low %v5835_v55, %v5839_v61  ;;  %v10167_v12 = vcombine.low %v12942_v9, %v12943_v17  ;;  %v5854_v46 = vrot.slane %v10569_v58, 5  ;;  %v12945_v20 = vld [vmem:[%s13225_s26 + $0x28] sm:$0xf]  ;;  %v5843_v22 = vsel %vm13548_vm8, %v10780_v50, %v5842_v56  ;;  %v10575_v24 = vld [vmem:[%s13225_s26 + $0x1bc] sm:$0x1] }
 0x11e   : > { %v10168_v21 = vcombine.low %v12944_v18, %v12945_v20  ;;  %v5847_v23 = vsel %vm13548_vm8, %v10781_v57, %v5846_v62  ;;  %v5851_v25 = vsel %vm13548_vm8, %v10782_v0, %v5850_v2  ;;  %v10577_v31 = vld [vmem:[%s13225_s26 + $0x1c4] sm:$0x1]  ;;  %v10722_v32 = vld [vmem:[%s13225_s26 + $0x1b8] sm:$0xe]  ;;  %v10723_v33 = vld [vmem:[%s13225_s26 + $0x1c0] sm:$0xe] }
 0x11f   : > { %v5855_v29 = vsel %vm13548_vm8, %v10783_v11, %v5854_v46  ;;  %v10825_v36 = vcombine.low %v5843_v22, %v5847_v23  ;;  %v10784_v37 = vrot.slane %v10720_v6, 9  ;;  %v5858_v39 = vrot.slane %v10571_v14, 5  ;;  %v13944_v27 = vld [vmem:[%s13225_s26 + $0x4] sm:$0x1]  ;;  %v10724_v30 = vld [vmem:[%s13225_s26 + $0x1c8] sm:$0xe] }
 0x120   : > { %12063 = vmatmul.mubr.msk.bf16.gmra.mrb[32].mxu0 %vm1307_vm5, %v10823_v53  ;;  %v10826_v38 = vcombine.low %v5851_v25, %v5855_v29  ;;  %v10785_v40 = vrot.slane %v10721_v16, 9  ;;  %v5862_v41 = vrot.slane %v10573_v15, 5  ;;  %v10786_v26 = vrot.slane %v10722_v32, 9  ;;  %v12947_v45 = vld [vmem:[%s13225_s26 + $0x30] sm:$0xf] }
 0x121   : > { %12066 = vmatprep.mubr.msk.bf16.mxu0 %vm1307_vm5, %v10824_v1  ;;  %v5866_v43 = vrot.slane %v10575_v24, 5  ;;  %v10787_v5 = vrot.slane %v10723_v33, 9  ;;  %v5870_v44 = vrot.slane %v10577_v31, 5  ;;  %v12948_v19 = vld [vmem:[%s13225_s26 + $0x38] sm:$0xf]  ;;  %v5859_v53 = vsel %vm13548_vm8, %v10784_v37, %v5858_v39 }
 0x122   : > { %v10169_v47 = vcombine.low %v12947_v45, %v12948_v19  ;;  %v10579_v10 = vld [vmem:[%s13225_s26 + $0x1cc] sm:$0x1]  ;;  %v10581_v48 = vld [vmem:[%s13225_s26 + $0x1d4] sm:$0x1]  ;;  %v10725_v49 = vld [vmem:[%s13225_s26 + $0x1d0] sm:$0xe]  ;;  %v5863_v55 = vsel %vm13548_vm8, %v10785_v40, %v5862_v41 }
 0x123   : > { %11767 = vmatmul.mubr.msk.bf16.vlgmr.msra.gmra.mrb[0].mxu1 %vm1307_vm5, %v10167_v12  ;;  %v12949_v50 = vld [vmem:[%s13225_s26 + $0x50] sm:$0xf]  ;;  %v12950_v51 = vld [vmem:[%s13225_s26 + $0x58] sm:$0xf]  ;;  %v10583_v56 = vld [vmem:[%s13225_s26 + $0x1ec] sm:$0x1]  ;;  %v5867_v57 = vsel %vm13548_vm8, %v10786_v26, %v5866_v43  ;;  %v5871_v58 = vsel %vm13548_vm8, %v10787_v5, %v5870_v44  ;;  %v10827_v9 = vcombine.low %v5859_v53, %v5863_v55 }
 0x124   : > { %11831 = vmatpush3.bf16.msra.mxu1 %v13873_v3  ;;  %11770 = vmatprep.mubr.msk.bf16.mxu1 %vm1307_vm5, %v10168_v21  ;;  %v2445_v3 = vrot.slane %v13944_v27, 5  ;;  %v10170_v52 = vcombine.low %v12949_v50, %v12950_v51  ;;  %v10585_v61 = vld [vmem:[%s13225_s26 + $0x1f4] sm:$0x1]  ;;  %v10726_v62 = vld [vmem:[%s13225_s26 + $0x1e8] sm:$0xe]  ;;  %v10788_v17 = vrot.slane %v10724_v30, 9  ;;  %v10828_v12 = vcombine.low %v5867_v57, %v5871_v58 }
 0x125   : > { %v10727_v0 = vld [vmem:[%s13225_s26 + $0x1f0] sm:$0xe]  ;;  %v13970_v1 = vld [vmem:[%s13225_s26 + $0xc] sm:$0x1]  ;;  %v13974_v11 = vld [vmem:[%s13225_s26 + $0x14] sm:$0x1] }
 0x126   : > { %v2449_v2 = vrot.slane %v13970_v1, 5  ;;  %v2453_v6 = vrot.slane %v13974_v11, 5  ;;  %v5874_v46 = vrot.slane %v10579_v10, 5  ;;  %v10789_v14 = vrot.slane %v10725_v49, 9  ;;  %v10728_v22 = vld [vmem:[%s13225_s26 + $0x1f8] sm:$0xe] }
 0x127   : > { %v5878_v15 = vrot.slane %v10581_v48, 5  ;;  %v10790_v16 = vrot.slane %v10726_v62, 9  ;;  %v5882_v18 = vrot.slane %v10583_v56, 5  ;;  %v10791_v20 = vrot.slane %v10727_v0, 9  ;;  %v10587_v23 = vld [vmem:[%s13225_s26 + $0x1fc] sm:$0x1] }
 0x128   : > { %12067 = vmatmul.mubr.msk.bf16.gmra.mrb[36].mxu0 %vm1307_vm5, %v10825_v36  ;;  %v5886_v21 = vrot.slane %v10585_v61, 5  ;;  %v10589_v24 = vld [vmem:[%s13225_s26 + $0x204] sm:$0x1]  ;;  %v10729_v25 = vld [vmem:[%s13225_s26 + $0x200] sm:$0xe]  ;;  %v5875_v40 = vsel %vm13548_vm8, %v10788_v17, %v5874_v46  ;;  %v10792_v10 = vrot.slane %v10728_v22, 9 }
 0x129   : > { %12070 = vmatprep.mubr.msk.bf16.mxu0 %vm1307_vm5, %v10826_v38  ;;  %v12953_v29 = vld [vmem:[%s13225_s26 + $0x60] sm:$0xf]  ;;  %v12954_v31 = vld [vmem:[%s13225_s26 + $0x68] sm:$0xf]  ;;  %v10591_v33 = vld [vmem:[%s13225_s26 + $0x20c] sm:$0x1]  ;;  %v5879_v41 = vsel %vm13548_vm8, %v10789_v14, %v5878_v15  ;;  %v5883_v5 = vsel %vm13548_vm8, %v10790_v16, %v5882_v18 }
 0x12a   : > { %v10171_v32 = vcombine.low %v12953_v29, %v12954_v31  ;;  %v10730_v36 = vld [vmem:[%s13225_s26 + $0x208] sm:$0xe]  ;;  %v12955_v37 = vld [vmem:[%s13225_s26 + $0x70] sm:$0xf]  ;;  %v12956_v38 = vld [vmem:[%s13225_s26 + $0x78] sm:$0xf]  ;;  %v5887_v44 = vsel %vm13548_vm8, %v10791_v20, %v5886_v21  ;;  %v10829_v48 = vcombine.low %v5875_v40, %v5879_v41 }
 0x12b   : > { %11771 = vmatmul.mubr.msk.bf16.gmra.mrb[4].mxu1 %vm1307_vm5, %v10169_v47  ;;  %v10172_v39 = vcombine.low %v12955_v37, %v12956_v38  ;;  %v10593_v26 = vld [vmem:[%s13225_s26 + $0x214] sm:$0x1]  ;;  %v10731_v43 = vld [vmem:[%s13225_s26 + $0x210] sm:$0xe]  ;;  %v14002_v30 = vld [vmem:[%s13225_s26 + $0x218] sm:$0xe]  ;;  %v10830_v53 = vcombine.low %v5883_v5, %v5887_v44 }
 0x12c   : > { %11774 = vmatprep.mubr.msk.bf16.mxu1 %vm1307_vm5, %v10170_v52  ;;  %v182_v45 = vld [vmem:[%s16464_s1 + $0xe] sm:$0x3]  ;;  %v14008_v19 = vld [vmem:[%s13225_s26 + $0x1c] sm:$0x1]  ;;  %v5890_v49 = vrot.slane %v10587_v23, 5  ;;  %v10793_v50 = vrot.slane %v10729_v25, 9 }
 0x12d   : > { %v2457_v47 = vrot.slane %v14008_v19, 5  ;;  %v5894_v51 = vrot.slane %v10589_v24, 5  ;;  %v14013_v52 = vld [vmem:[%s13225_s26 + $0x21c] sm:$0x1]  ;;  %v10794_v55 = vrot.slane %v10730_v36, 9  ;;  %v5898_v56 = vrot.slane %v10591_v33, 5 }
 0x12e   : > { %v14017_v57 = vld [vmem:[%s13225_s26 + $0x224] sm:$0x1]  ;;  %v14020_v58 = vld [vmem:[%s13225_s26 + $0x220] sm:$0xe]  ;;  %v10795_v62 = vrot.slane %v10731_v43, 9  ;;  %v5902_v0 = vrot.slane %v10593_v26, 5  ;;  %v14025_v17 = vand.u32 %v13202_v4, %v182_v45  ;;  %v5891_v20 = vsel %vm13548_vm8, %v10792_v10, %v5890_v49 }
 0x12f   : > { %v2248_v61 = vld [vmem:[%s13225_s26] sm:$0xe]  ;;  %v12959_v46 = vld [vmem:[%s13225_s26 + $0x88] sm:$0xf]  ;;  %v178_v16 = vld [vmem:[%s16464_s1 + $0x6] sm:$0x3]  ;;  %v5895_v21 = vsel %vm13548_vm8, %v10793_v50, %v5894_v51  ;;  %v5899_v38 = vsel %vm13548_vm8, %v10794_v55, %v5898_v56 }
 0x130   : > { %12071 = vmatmul.mubr.msk.bf16.gmra.mrb[40].mxu0 %vm1307_vm5, %v10827_v9  ;;  %v10796_v9 = vrot.slane %v14002_v30, 9  ;;  %v2249_v15 = vld [vmem:[%s13225_s26 + $0x8] sm:$0xe]  ;;  %v2250_v18 = vld [vmem:[%s13225_s26 + $0x10] sm:$0xe]  ;;  %v5906_v22 = vrot.slane %v14013_v52, 5  ;;  %12160 = vmatprep.subr.bf16.mxu0 %v14025_v17  ;;  %v10831_v26 = vcombine.low %v5891_v20, %v5895_v21  ;;  %v14069_v10 = vand.u32 %v13202_v4, %v178_v16 }
 0x131   : > { %12074 = vmatprep.mubr.msk.bf16.mxu0 %vm1307_vm5, %v10828_v12  ;;  %v12958_v12 = vld [vmem:[%s13225_s26 + $0x80] sm:$0xf]  ;;  %v10599_v23 = vld [vmem:[%s13225_s26 + $0x23c] sm:$0x1]  ;;  %v10734_v24 = vld [vmem:[%s13225_s26 + $0x238] sm:$0xe] }
 0x132   : > { %v10173_v14 = vcombine.low %v12958_v12, %v12959_v46  ;;  %v10230_v25 = vrot.slane %v2248_v61, 9  ;;  %v2251_v29 = vld [vmem:[%s13225_s26 + $0x18] sm:$0xe]  ;;  %v12960_v31 = vld [vmem:[%s13225_s26 + $0xa0] sm:$0xf]  ;;  %v10797_v40 = vrot.slane %v14020_v58, 9  ;;  %11896 = vmatprep.subr.bf16.mxu1 %v14069_v10 }
 0x133   : > { %11775 = vmatmul.mubr.msk.bf16.gmra.mrb[8].mxu1 %vm1307_vm5, %v10171_v32  ;;  %v12961_v32 = vld [vmem:[%s13225_s26 + $0xa8] sm:$0xf]  ;;  %v10601_v36 = vld [vmem:[%s13225_s26 + $0x244] sm:$0x1]  ;;  %v10735_v37 = vld [vmem:[%s13225_s26 + $0x240] sm:$0xe] }
 0x134   : > { %11778 = vmatprep.mubr.msk.bf16.mxu1 %vm1307_vm5, %v10172_v39  ;;  %v10174_v33 = vcombine.low %v12960_v31, %v12961_v32  ;;  %v5903_v39 = vsel %vm13548_vm8, %v10795_v62, %v5902_v0  ;;  %v5910_v41 = vrot.slane %v14017_v57, 5  ;;  %v14066_v30 = vsel %vm13548_vm8, %v10230_v25, %v2445_v3  ;;  %v12963_v57 = vld [vmem:[%s13225_s26 + $0xb8] sm:$0xf]  ;;  %v10603_v11 = vld [vmem:[%s13225_s26 + $0x24c] sm:$0x1] }
 0x135   : > { %v10231_v45 = vrot.slane %v2249_v15, 9  ;;  %v10832_v49 = vcombine.low %v5899_v38, %v5903_v39  ;;  %v10798_v50 = vrot.slane %v10734_v24, 9  ;;  %v5914_v51 = vrot.slane %v10599_v23, 5  ;;  %v10736_v61 = vld [vmem:[%s13225_s26 + $0x248] sm:$0xe] }
 0x136   : > { %v10233_v27 = vrot.slane %v2251_v29, 9  ;;  %v10799_v52 = vrot.slane %v10735_v37, 9  ;;  %v5918_v3 = vrot.slane %v10601_v36, 5  ;;  %v12964_v62 = vld [vmem:[%s13225_s26 + $0xc0] sm:$0xf]  ;;  %v5911_v46 = vsel %vm13548_vm8, %v10797_v40, %v5910_v41 }
 0x137   : > { %v12965_v0 = vld [vmem:[%s13225_s26 + $0xc8] sm:$0xf]  ;;  %v5915_v15 = vsel %vm13548_vm8, %v10798_v50, %v5914_v51  ;;  %v10609_v20 = vld [vmem:[%s13225_s26 + $0x264] sm:$0x1]  ;;  %v10738_v21 = vld [vmem:[%s13225_s26 + $0x258] sm:$0xe] }
 0x138   : > { %12075 = vmatmul.mubr.msk.bf16.gmra.mrb[44].mxu0 %vm1307_vm5, %v10829_v48  ;;  %v10232_v48 = vrot.slane %v2250_v18, 9  ;;  %v14091_v1 = vsel %vm13548_vm8, %v10233_v27, %v2457_v47  ;;  %v10176_v12 = vcombine.low %v12964_v62, %v12965_v0  ;;  %v5907_v47 = vsel %vm13548_vm8, %v10796_v9, %v5906_v22  ;;  %v10607_v18 = vld [vmem:[%s13225_s26 + $0x25c] sm:$0x1]  ;;  %v10739_v23 = vld [vmem:[%s13225_s26 + $0x260] sm:$0xe] }
 0x139   : > { %12078 = vmatprep.mubr.msk.bf16.mxu0 %vm1307_vm5, %v10830_v53  ;;  %v14076_v53 = vsel %vm13548_vm8, %v10231_v45, %v2449_v2  ;;  %v12962_v2 = vld [vmem:[%s13225_s26 + $0xb0] sm:$0xf]  ;;  %v5919_v16 = vsel %vm13548_vm8, %v10799_v52, %v5918_v3  ;;  %v10833_v9 = vcombine.low %v5907_v47, %v5911_v46  ;;  %v10800_v22 = vrot.slane %v10736_v61, 9  ;;  %v12967_v39 = vld [vmem:[%s13225_s26 + $0xd8] sm:$0xf] }
 0x13a   : > { %v14083_v55 = vsel %vm13548_vm8, %v10232_v48, %v2453_v6  ;;  %v10175_v58 = vcombine.low %v12962_v2, %v12963_v57  ;;  %v10605_v6 = vld [vmem:[%s13225_s26 + $0x254] sm:$0x1]  ;;  %v10834_v24 = vcombine.low %v5915_v15, %v5919_v16  ;;  %v5922_v25 = vrot.slane %v10603_v11, 5  ;;  %v12966_v38 = vld [vmem:[%s13225_s26 + $0xd0] sm:$0xf] }
 0x13b   : > { %11779 = vmatmul.mubr.msk.bf16.gmra.mrb[12].mxu1 %vm1307_vm5, %v10173_v14  ;;  %v10737_v14 = vld [vmem:[%s13225_s26 + $0x250] sm:$0xe]  ;;  %v5926_v31 = vrot.slane %v10605_v6, 5  ;;  %v10802_v32 = vrot.slane %v10738_v21, 9  ;;  %v10803_v36 = vrot.slane %v10739_v23, 9  ;;  %v5934_v37 = vrot.slane %v10609_v20, 5 }
 0x13c   : > { %11782 = vmatprep.mubr.msk.bf16.mxu1 %vm1307_vm5, %v10174_v33  ;;  %v10801_v29 = vrot.slane %v10737_v14, 9  ;;  %v5930_v33 = vrot.slane %v10607_v18, 5  ;;  %v10177_v40 = vcombine.low %v12966_v38, %v12967_v39  ;;  %v12968_v41 = vld [vmem:[%s13225_s26 + $0xf0] sm:$0xf]  ;;  %v5923_v48 = vsel %vm13548_vm8, %v10800_v22, %v5922_v25  ;;  %v10611_v50 = vld [vmem:[%s13225_s26 + $0x26c] sm:$0x1] }
 0x13d   : > { %v10740_v51 = vld [vmem:[%s13225_s26 + $0x268] sm:$0xe]  ;;  %v5935_v52 = vsel %vm13548_vm8, %v10803_v36, %v5934_v37  ;;  %v10613_v3 = vld [vmem:[%s13225_s26 + $0x274] sm:$0x1]  ;;  %v10741_v2 = vld [vmem:[%s13225_s26 + $0x270] sm:$0xe] }
 0x13e   : > { %v5931_v27 = vsel %vm13548_vm8, %v10802_v32, %v5930_v33  ;;  %v5938_v6 = vrot.slane %v10611_v50, 5  ;;  %v10805_v61 = vrot.slane %v10741_v2, 9  ;;  %v5942_v62 = vrot.slane %v10613_v3, 5  ;;  %v12970_v0 = vld [vmem:[%s13225_s26 + $0x100] sm:$0xf] }
 0x13f   : > { %v10836_v11 = vcombine.low %v5931_v27, %v5935_v52  ;;  %v12972_v46 = vld [vmem:[%s13225_s26 + $0x110] sm:$0xf]  ;;  %v12973_v14 = vld [vmem:[%s13225_s26 + $0x118] sm:$0xf]  ;;  %v12974_v23 = vld [vmem:[%s13225_s26 + $0x120] sm:$0xf] }
 0x140   : > { %12079 = vmatmul.mubr.msk.bf16.gmra.mrb[48].mxu0 %vm1307_vm5, %v10831_v26  ;;  %v12969_v26 = vld [vmem:[%s13225_s26 + $0xf8] sm:$0xf]  ;;  %v10180_v15 = vcombine.low %v12972_v46, %v12973_v14  ;;  %v5943_v18 = vsel %vm13548_vm8, %v10805_v61, %v5942_v62  ;;  %v12977_v25 = vld [vmem:[%s13225_s26 + $0x148] sm:$0xf]  ;;  %v183_v33 = vld [vmem:[%s16464_s1 + $0x10] sm:$0x3] }
 0x141   : > { %12082 = vmatprep.mubr.msk.bf16.mxu0 %vm1307_vm5, %v10832_v49  ;;  %v10178_v45 = vcombine.low %v12968_v41, %v12969_v26  ;;  %v5927_v49 = vsel %vm13548_vm8, %v10801_v29, %v5926_v31  ;;  %v12833_v21 = vld [vmem:[%s13225_s26 + $0x10] ss:$8 sps:$4 sm:$0xff]   ;;  %v12835_v31 = vld [vmem:[%s13225_s26 + $0x20] ss:$8 sps:$4 sm:$0xff]   ;;  %v14166_v36 = vand.u32 %v13202_v4, %v183_v33  ;;  %v13021_v43 = vld [vmem:[%s13225_s26 + $0xdc] sm:$0x1] }
 0x142   : > { %v10835_v57 = vcombine.low %v5923_v48, %v5927_v49  ;;  %v12837_v32 = vld [vmem:[%s13225_s26 + $0x30] ss:$8 sps:$4 sm:$0xff]   ;;  %v12981_v41 = vld [vmem:[%s13225_s26 + $0x168] sm:$0xf]  ;;  %v12986_v2 = vld [vmem:[%s13225_s26 + $0x1a0] sm:$0xf] }
 0x143   : > { %11783 = vmatmul.mubr.msk.bf16.gmra.mrb[16].mxu1 %vm1307_vm5, %v10175_v58  ;;  %v10804_v58 = vrot.slane %v10740_v51, 9  ;;  %16491 = vst [vmem:[#allocation4_spill] sm:$0xff] %v14166_v36  ;;  %v12978_v37 = vld [vmem:[%s13225_s26 + $0x150] sm:$0xf]  ;;  %v12979_v38 = vld [vmem:[%s13225_s26 + $0x158] sm:$0xf] }
 0x144   : > { %11786 = vmatprep.mubr.msk.bf16.mxu1 %vm1307_vm5, %v10176_v12  ;;  %v12971_v12 = vld [vmem:[%s13225_s26 + $0x108] sm:$0xf]  ;;  %v10183_v39 = vcombine.low %v12978_v37, %v12979_v38  ;;  %v12982_v48 = vld [vmem:[%s13225_s26 + $0x170] sm:$0xf]  ;;  %v12985_v51 = vld [vmem:[%s13225_s26 + $0x198] sm:$0xf] }
 0x145   : > { %v10179_v47 = vcombine.low %v12970_v0, %v12971_v12  ;;  %v5939_v16 = vsel %vm13548_vm8, %v10804_v58, %v5938_v6  ;;  %v12839_v4 = vld [vmem:[%s13225_s26 + $0x40] ss:$8 sps:$4 sm:$0xff]   ;;  %v12984_v50 = vld [vmem:[%s13225_s26 + $0x190] sm:$0xf]  ;;  %v12989_v6 = vld [vmem:[%s13225_s26 + $0x1b8] sm:$0xf] }
 0x146   : > { %v10837_v20 = vcombine.low %v5939_v16, %v5943_v18  ;;  %v10186_v27 = vcombine.low %v12984_v50, %v12985_v51  ;;  %v12843_v52 = vld [vmem:[%s13225_s26 + $0x70] ss:$8 sps:$4 sm:$0xff]   ;;  %v12845_v3 = vld [vmem:[%s13225_s26 + $0x80] ss:$8 sps:$4 sm:$0xff]   ;;  %v12990_v16 = vld [vmem:[%s13225_s26 + $0x24] sm:$0x1] }
 0x147   : > { %v2252_v62 = vld [vmem:[%s13225_s26 + $0x20] sm:$0xe]  ;;  %v2253_v0 = vld [vmem:[%s13225_s26 + $0x28] sm:$0xe]  ;;  %v2254_v12 = vld [vmem:[%s13225_s26 + $0x30] sm:$0xe] }
 0x148   : > { %12083 = vmatmul.mubr.msk.bf16.gmra.mrb[52].mxu0 %vm1307_vm5, %v10833_v9  ;;  %v12975_v9 = vld [vmem:[%s13225_s26 + $0x128] sm:$0xf]  ;;  %v2255_v46 = vld [vmem:[%s13225_s26 + $0x38] sm:$0xe]  ;;  %v2461_v18 = vrot.slane %v12990_v16, 5 }
 0x149   : > { %12086 = vmatprep.mubr.msk.bf16.mxu0 %vm1307_vm5, %v10834_v24  ;;  %v10181_v22 = vcombine.low %v12974_v23, %v12975_v9  ;;  %v12976_v24 = vld [vmem:[%s13225_s26 + $0x140] sm:$0xf]  ;;  %v12849_v14 = vld [vmem:[%s13225_s26 + $0xb0] ss:$8 sps:$4 sm:$0xff]   ;;  %v10236_v9 = vrot.slane %v2254_v12, 9 }
 0x14a   : > { %v10182_v29 = vcombine.low %v12976_v24, %v12977_v25  ;;  %v10237_v25 = vrot.slane %v2255_v46, 9  ;;  %v12994_v33 = vld [vmem:[%s13225_s26 + $0x1c0] sm:$0xf]  ;;  %v12995_v37 = vld [vmem:[%s13225_s26 + $0x1c8] sm:$0xf] }
 0x14b   : > { %11787 = vmatmul.mubr.msk.bf16.gmra.mrb[20].mxu1 %vm1307_vm5, %v10177_v40  ;;  %v12980_v40 = vld [vmem:[%s13225_s26 + $0x160] sm:$0xf]  ;;  %v10189_v38 = vcombine.low %v12994_v33, %v12995_v37  ;;  %v13001_v12 = vld [vmem:[%s13225_s26 + $0x6c] sm:$0x1]  ;;  %v2261_v46 = vld [vmem:[%s13225_s26 + $0x78] sm:$0xe] }
 0x14c   : > { %11790 = vmatprep.mubr.msk.bf16.mxu1 %vm1307_vm5, %v10178_v45  ;;  %v10184_v26 = vcombine.low %v12980_v40, %v12981_v41  ;;  %v12841_v45 = vld [vmem:[%s13225_s26 + $0x60] ss:$8 sps:$4 sm:$0xff]   ;;  %v4538_v40 = vshll.u32 %v13866_v63, 16  ;;  %v13002_v16 = vld [vmem:[%s13225_s26 + $0x1f0] sm:$0xf] }
 0x14d   : > { %v12996_v41 = vld [vmem:[%s13225_s26 + $0x1e0] sm:$0xf]  ;;  %v2271_v37 = vld [vmem:[%s13225_s26 + $0xd8] sm:$0xe] }
 0x14e   : > { %v2273_v19 = vld [vmem:[%s13225_s26 + $0xf8] sm:$0xe]  ;;  %v10253_v5 = vrot.slane %v2271_v37, 9  ;;  %v13024_v37 = vld [vmem:[%s13225_s26 + $0x104] sm:$0x1] }
 0x150   : > { %12087 = vmatmul.mubr.msk.bf16.gmra.mrb[56].mxu0 %vm1307_vm5, %v10835_v57  ;;  %v12987_v57 = vld [vmem:[%s13225_s26 + $0x1a8] sm:$0xf] }
 0x151   : > { %12090 = vmatprep.mubr.msk.bf16.mxu0 %vm1307_vm5, %v10836_v11  ;;  %v10187_v58 = vcombine.low %v12986_v2, %v12987_v57  ;;  %v12988_v11 = vld [vmem:[%s13225_s26 + $0x1b0] sm:$0xf]  ;;  %v12999_v57 = vld [vmem:[%s13225_s26 + $0x5c] sm:$0x1] }
 0x152   : > { %v10188_v61 = vcombine.low %v12988_v11, %v12989_v6  ;;  %v14242_v11 = vld [vmem:[%s13225_s26 + $0x70] sm:$0xe] }
 0x153   : > { %11791 = vmatmul.mubr.msk.bf16.gmra.mrb[24].mxu1 %vm1307_vm5, %v10179_v47  ;;  %v12847_v47 = vld [vmem:[%s13225_s26 + $0x90] ss:$8 sps:$4 sm:$0xff]  }
 0x154   : > { %11794 = vmatprep.mubr.msk.bf16.mxu1 %vm1307_vm5, %v10180_v15  ;;  %v10234_v15 = vrot.slane %v2252_v62, 9 }
 0x158   : > { %12091 = vmatmul.mubr.msk.bf16.gmra.mrb[60].mxu0 %vm1307_vm5, %v10837_v20  ;;  %v10235_v20 = vrot.slane %v2253_v0, 9 }
 0x159   : > { %12096 = vmatprep.mubr.msk.bf16.mxu0 %vm1307_vm5, %v12833_v21  ;;  %v12991_v21 = vld [vmem:[%s13225_s26 + $0x2c] sm:$0x1] }
 0x15a   : > { %v2465_v23 = vrot.slane %v12991_v21, 5  ;;  %v13004_v21 = vld [vmem:[%s13225_s26 + $0x200] sm:$0xf] }
 0x15b   : > { %11795 = vmatmul.mubr.msk.bf16.gmra.mrb[28].mxu1 %vm1307_vm5, %v10181_v22  ;;  %v12992_v22 = vld [vmem:[%s13225_s26 + $0x34] sm:$0x1] }
 0x15c   : > { %11798 = vmatprep.mubr.msk.bf16.mxu1 %vm1307_vm5, %v10182_v29  ;;  %v2469_v24 = vrot.slane %v12992_v22, 5  ;;  %v12993_v29 = vld [vmem:[%s13225_s26 + $0x3c] sm:$0x1]  ;;  %v14228_v50 = vsel %vm13548_vm8, %v10235_v20, %v2465_v23  ;;  %v13005_v23 = vld [vmem:[%s13225_s26 + $0x208] sm:$0xf] }
 0x15d   : > { %v12853_v22 = vld [vmem:[%s13225_s26 + $0xd0] ss:$8 sps:$4 sm:$0xff]  }
 0x15e   : > { %v14232_v63 = vsel %vm13548_vm8, %v10236_v9, %v2469_v24  ;;  %v10192_v9 = vcombine.low %v13004_v21, %v13005_v23  ;;  %v14258_v24 = vld [vmem:[%s13225_s26 + $0x210] sm:$0xf] }
 0x160   : > { %12097 = vmatmul.mubr.msk.bf16.vlgmr.msra.gmra.mrb[0].mxu0 %vm1307_vm5, %v12835_v31  ;;  %v2473_v31 = vrot.slane %v12993_v29, 5  ;;  %v10998_v29 = vld [vmem:[%s13225_s26 + $0x10] sm:$0xf] }
 0x161   : > { %12161 = vmatpush3.bf16.msra.mxu0 %v14025_v17  ;;  %12100 = vmatprep.mubr.msk.bf16.mxu0 %vm1307_vm5, %v12837_v32  ;;  %v12983_v17 = vld [vmem:[%s13225_s26 + $0x178] sm:$0xf]  ;;  %v14209_v32 = vld [vmem:[%s13225_s26 + $0x50] sm:$0xe] }
 0x162   : > { %12226 = vmatprep.subr.bf16.mxu0 %v14166_v36  ;;  %v10185_v49 = vcombine.low %v12982_v48, %v12983_v17  ;;  %v2259_v48 = vld [vmem:[%s13225_s26 + $0x68] sm:$0xe]  ;;  %v10238_v51 = vrot.slane %v14209_v32, 9  ;;  %v14269_v32 = vld [vmem:[%s13225_s26 + $0x238] sm:$0xf] }
 0x163   : > { %11799 = vmatmul.mubr.msk.bf16.gmra.mrb[32].mxu1 %vm1307_vm5, %v10183_v39  ;;  %v2257_v39 = vld [vmem:[%s13225_s26 + $0x58] sm:$0xe]  ;;  %v12851_v17 = vld [vmem:[%s13225_s26 + $0xc0] ss:$8 sps:$4 sm:$0xff]   ;;  %v10241_v0 = vrot.slane %v2259_v48, 9  ;;  %v10243_v48 = vrot.slane %v2261_v46, 9 }
 0x164   : > { %11802 = vmatprep.mubr.msk.bf16.mxu1 %vm1307_vm5, %v10184_v26  ;;  %v12997_v26 = vld [vmem:[%s13225_s26 + $0x1e8] sm:$0xf]  ;;  %v10239_v2 = vrot.slane %v2257_v39, 9  ;;  %v2262_v39 = vld [vmem:[%s13225_s26 + $0x80] sm:$0xe] }
 0x168   : > { %12101 = vmatmul.mubr.msk.bf16.gmra.mrb[4].mxu0 %vm1307_vm5, %v12839_v4  ;;  %v10190_v4 = vcombine.low %v12996_v41, %v12997_v26  ;;  %v2264_v41 = vld [vmem:[%s13225_s26 + $0xa0] sm:$0xe]  ;;  %v10242_v26 = vrot.slane %v14242_v11, 9 }
 0x169   : > { %12104 = vmatprep.mubr.msk.bf16.mxu0 %vm1307_vm5, %v12841_v45  ;;  %v2258_v45 = vld [vmem:[%s13225_s26 + $0x60] sm:$0xe]  ;;  %v10246_v23 = vrot.slane %v2264_v41, 9 }
 0x16a   : > { %v10240_v6 = vrot.slane %v2258_v45, 9 }
 0x16b   : > { %11803 = vmatmul.mubr.msk.bf16.gmra.mrb[36].mxu1 %vm1307_vm5, %v10185_v49  ;;  %v14224_v49 = vsel %vm13548_vm8, %v10234_v15, %v2461_v18  ;;  %v13003_v18 = vld [vmem:[%s13225_s26 + $0x1f8] sm:$0xf]  ;;  %v12857_v15 = vld [vmem:[%s13225_s26 + $0x100] ss:$8 sps:$4 sm:$0xff]  }
 0x16c   : > { %11806 = vmatprep.mubr.msk.bf16.mxu1 %vm1307_vm5, %v10186_v27  ;;  %v14237_v27 = vsel %vm13548_vm8, %v10237_v25, %v2473_v31  ;;  %v10191_v20 = vcombine.low %v13002_v16, %v13003_v18  ;;  %v14261_v25 = vld [vmem:[%s13225_s26 + $0x218] sm:$0xf]  ;;  %v14266_v31 = vld [vmem:[%s13225_s26 + $0x230] sm:$0xf] }
 0x16d   : > { %v14302_v18 = vld [vmem:[%s13225_s26 + $0xb0] sm:$0xe] }
 0x170   : > { %12105 = vmatmul.mubr.msk.bf16.gmra.mrb[8].mxu0 %vm1307_vm5, %v12843_v52  ;;  %v12998_v52 = vld [vmem:[%s13225_s26 + $0x54] sm:$0x1] }
 0x171   : > { %12108 = vmatprep.mubr.msk.bf16.mxu0 %vm1307_vm5, %v12845_v3  ;;  %v2477_v3 = vrot.slane %v12998_v52, 5  ;;  %v13011_v52 = vld [vmem:[%s13225_s26 + $0x7c] sm:$0x1] }
 0x173   : > { %11807 = vmatmul.mubr.msk.bf16.gmra.mrb[40].mxu1 %vm1307_vm5, %v10187_v58  ;;  %v2481_v58 = vrot.slane %v12999_v57, 5  ;;  %v2497_v57 = vrot.slane %v13011_v52, 5  ;;  %v13015_v52 = vld [vmem:[%s13225_s26 + $0xac] sm:$0x1] }
 0x174   : > { %11810 = vmatprep.mubr.msk.bf16.mxu1 %vm1307_vm5, %v10188_v61  ;;  %v13000_v61 = vld [vmem:[%s13225_s26 + $0x64] sm:$0x1] }
 0x175   : > { %v2485_v62 = vrot.slane %v13000_v61, 5  ;;  %v2265_v61 = vld [vmem:[%s13225_s26 + $0xa8] sm:$0xe]  ;;  %v14291_v16 = vsel %vm13548_vm8, %v10239_v2, %v2481_v58  ;;  %v13013_v58 = vld [vmem:[%s13225_s26 + $0x8c] sm:$0x1]  ;;  %v14325_v41 = vsel %vm13548_vm8, %v10243_v48, %v2497_v57 }
 0x176   : > { %v2505_v21 = vrot.slane %v13013_v58, 5 }
 0x177   : > { %v14295_v11 = vsel %vm13548_vm8, %v10240_v6, %v2485_v62  ;;  %v14308_v6 = vld [vmem:[%s13225_s26 + $0xb8] sm:$0xe]  ;;  %v12855_v62 = vld [vmem:[%s13225_s26 + $0xe0] ss:$8 sps:$4 sm:$0xff]  }
 0x178   : > { %12109 = vmatmul.mubr.msk.bf16.gmra.mrb[12].mxu0 %vm1307_vm5, %v12847_v47  ;;  %v2489_v47 = vrot.slane %v13001_v12, 5  ;;  %v14287_v12 = vsel %vm13548_vm8, %v10238_v51, %v2477_v3  ;;  %v13012_v51 = vld [vmem:[%s13225_s26 + $0x84] sm:$0x1] }
 0x179   : > { %12112 = vmatprep.mubr.msk.bf16.mxu0 %vm1307_vm5, %v12849_v14  ;;  %v14248_v14 = vrot.slane %v4538_v40, 5  ;;  %v2263_v40 = vld [vmem:[%s13225_s26 + $0x88] sm:$0xe]  ;;  %v2501_v3 = vrot.slane %v13012_v51, 5  ;;  %v10249_v51 = vrot.slane %v14308_v6, 9 }
 0x17a   : > { %v14299_v46 = vsel %vm13548_vm8, %v10241_v0, %v2489_v47  ;;  %v10245_v2 = vrot.slane %v2263_v40, 9  ;;  %v13014_v0 = vld [vmem:[%s13225_s26 + $0xa4] sm:$0x1]  ;;  %v13016_v40 = vld [vmem:[%s13225_s26 + $0xb4] sm:$0x1] }
 0x17b   : > { %11811 = vmatmul.mubr.msk.bf16.gmra.mrb[44].mxu1 %vm1307_vm5, %v10189_v38  ;;  %16492 = vst [vmem:[#allocation5_spill] sm:$0xff] %v14248_v14  ;;  %v2509_v47 = vrot.slane %v13014_v0, 5  ;;  %v2270_v0 = vld [vmem:[%s13225_s26 + $0xd0] sm:$0xe]  ;;  %v2517_v38 = vrot.slane %v13016_v40, 5 }
 0x17c   : > { %11814 = vmatprep.mubr.msk.bf16.mxu1 %vm1307_vm5, %v10190_v4  ;;  %v13010_v4 = vld [vmem:[%s13225_s26 + $0x74] sm:$0x1]  ;;  %v2272_v40 = vld [vmem:[%s13225_s26 + $0xf0] sm:$0xe]  ;;  %v10252_v56 = vrot.slane %v2270_v0, 9 }
 0x17d   : > { %v2493_v45 = vrot.slane %v13010_v4, 5  ;;  %v10247_v4 = vrot.slane %v2265_v61, 9  ;;  %v2269_v61 = vld [vmem:[%s13225_s26 + $0xc8] sm:$0xe] }
 0x17f   : > { %v14321_v58 = vsel %vm13548_vm8, %v10242_v26, %v2493_v45  ;;  %v13017_v26 = vld [vmem:[%s13225_s26 + $0xbc] sm:$0x1] }
 0x180   : > { %12113 = vmatmul.mubr.msk.bf16.gmra.mrb[16].mxu0 %vm1307_vm5, %v12851_v17  ;;  %v10244_v17 = vrot.slane %v2262_v39, 9  ;;  %v2268_v39 = vld [vmem:[%s13225_s26 + $0xc0] sm:$0xe]  ;;  %v2521_v45 = vrot.slane %v13017_v26, 5  ;;  %v14349_v26 = vsel %vm13548_vm8, %v10246_v23, %v2509_v47  ;;  %v2537_v23 = vrot.slane %v13021_v43, 5 }
 0x181   : > { %12116 = vmatprep.mubr.msk.bf16.mxu0 %vm1307_vm5, %v12853_v22  ;;  %v2513_v22 = vrot.slane %v13015_v52, 5  ;;  %v10248_v52 = vrot.slane %v14302_v18, 9  ;;  %v10250_v57 = vrot.slane %v2268_v39, 9  ;;  %v13018_v18 = vld [vmem:[%s13225_s26 + $0xc4] sm:$0x1]  ;;  %v10254_v47 = vrot.slane %v2272_v40, 9 }
 0x182   : > { %v14338_v48 = vsel %vm13548_vm8, %v10244_v17, %v2501_v3  ;;  %v2525_v6 = vrot.slane %v13018_v18, 5  ;;  %v10251_v17 = vrot.slane %v2269_v61, 9  ;;  %v13019_v3 = vld [vmem:[%s13225_s26 + $0xcc] sm:$0x1]  ;;  %v2275_v39 = vld [vmem:[%s13225_s26 + $0x108] sm:$0xe]  ;;  %v14374_v40 = vsel %vm13548_vm8, %v10249_v51, %v2521_v45 }
 0x183   : > { %11815 = vmatmul.mubr.msk.bf16.gmra.mrb[48].mxu1 %vm1307_vm5, %v10191_v20  ;;  %v14342_v20 = vsel %vm13548_vm8, %v10245_v2, %v2505_v21  ;;  %v2529_v2 = vrot.slane %v13019_v3, 5  ;;  %v2274_v21 = vld [vmem:[%s13225_s26 + $0x100] sm:$0xe]  ;;  %v13020_v18 = vld [vmem:[%s13225_s26 + $0xd4] sm:$0x1]  ;;  %v10255_v61 = vrot.slane %v2273_v19, 9  ;;  %v14370_v19 = vsel %vm13548_vm8, %v10248_v52, %v2517_v38 }
 0x184   : > { %11818 = vmatprep.mubr.msk.bf16.mxu1 %vm1307_vm5, %v10192_v9  ;;  %v14353_v9 = vsel %vm13548_vm8, %v10247_v4, %v2513_v22  ;;  %v2533_v44 = vrot.slane %v13020_v18, 5  ;;  %v13022_v4 = vld [vmem:[%s13225_s26 + $0xf4] sm:$0x1]  ;;  %v13023_v3 = vld [vmem:[%s13225_s26 + $0xfc] sm:$0x1]  ;;  %v10256_v0 = vrot.slane %v2274_v21, 9  ;;  %v14391_v38 = vsel %vm13548_vm8, %v10253_v5, %v2537_v23 }
 0x185   : > { %v2541_v22 = vrot.slane %v13022_v4, 5  ;;  %v2545_v33 = vrot.slane %v13023_v3, 5  ;;  %v2549_v18 = vrot.slane %v13024_v37, 5  ;;  %v10257_v14 = vrot.slane %v2275_v39, 9  ;;  %v13025_v43 = vld [vmem:[%s13225_s26 + $0x10c] sm:$0x1] }
 0x186   : > { %v2553_v13 = vrot.slane %v13025_v43, 5  ;;  %v14382_v21 = vsel %vm13548_vm8, %v10251_v17, %v2529_v2  ;;  %v2276_v39 = vld [vmem:[%s13225_s26 + $0x110] sm:$0xe]  ;;  %v14387_v4 = vsel %vm13548_vm8, %v10252_v56, %v2533_v44  ;;  %16493 = vst [vmem:[#allocation6_spill] sm:$0xff] %v14391_v38  ;;  %v2277_v51 = vld [vmem:[%s13225_s26 + $0x118] sm:$0xe] }
 0x187   : > { %v2278_v52 = vld [vmem:[%s13225_s26 + $0x120] sm:$0xe]  ;;  %v7298_v45 = vshrl.u32 %v10998_v29, 16  ;;  %v12859_v17 = vld [vmem:[%s13225_s26 + $0x110] ss:$8 sps:$4 sm:$0xff]   ;;  %v14402_v44 = vsel %vm13548_vm8, %v10254_v47, %v2541_v22  ;;  %v14406_v5 = vsel %vm13548_vm8, %v10255_v61, %v2545_v33  ;;  %v10258_v37 = vrot.slane %v2276_v39, 9 }
 0x188   : > { %12117 = vmatmul.mubr.msk.bf16.gmra.mrb[20].mxu0 %vm1307_vm5, %v12855_v62  ;;  %v11000_v62 = vld [vmem:[%s13225_s26 + $0x18] sm:$0xf]  ;;  %16495 = vst [vmem:[#allocation7_spill] sm:$0xff] %v14402_v44  ;;  %16496 = vst [vmem:[#allocation8_spill] sm:$0xff] %v14406_v5  ;;  %v2279_v56 = vld [vmem:[%s13225_s26 + $0x128] sm:$0xe]  ;;  %v14420_v47 = vsel %vm13548_vm8, %v10257_v14, %v2553_v13 }
 0x189   : > { %12120 = vmatprep.mubr.msk.bf16.mxu0 %vm1307_vm5, %v12857_v15  ;;  %v14378_v15 = vsel %vm13548_vm8, %v10250_v57, %v2525_v6  ;;  %v7301_v57 = vshll.u32 %v10998_v29, 16  ;;  %v16494_v6 = vcombine.low %v14258_v24, %v14261_v25  ;;  %v7312_v2 = vshrl.u32 %v11000_v62, 16  ;;  %v12861_v24 = vld [vmem:[%s13225_s26 + $0x120] ss:$8 sps:$4 sm:$0xff]   ;;  %16499 = vst [vmem:[#allocation10_spill] sm:$0xff] %v14420_v47 }
 0x18a   : > { %v7315_v23 = vshll.u32 %v11000_v62, 16  ;;  %v16497_v29 = vcombine.low %v14266_v31, %v14269_v32  ;;  %v14416_v25 = vsel %vm13548_vm8, %v10256_v0, %v2549_v18  ;;  %v13026_v33 = vld [vmem:[%s13225_s26 + $0x114] sm:$0x1]  ;;  %v13027_v61 = vld [vmem:[%s13225_s26 + $0x11c] sm:$0x1]  ;;  %v10259_v43 = vrot.slane %v2277_v51, 9 }
 0x18b   : > { %11819 = vmatmul.mubr.msk.bf16.gmra.mrb[52].mxu1 %vm1307_vm5, %v16494_v6  ;;  %16498 = vst [vmem:[#allocation9_spill] sm:$0xff] %v14416_v25  ;;  %v2557_v22 = vrot.slane %v13026_v33, 5  ;;  %v2561_v3 = vrot.slane %v13027_v61, 5  ;;  %v10260_v62 = vrot.slane %v2278_v52, 9  ;;  %v13028_v31 = vld [vmem:[%s13225_s26 + $0x124] sm:$0x1] }
 0x18c   : > { %11822 = vmatprep.mubr.msk.bf16.mxu1 %vm1307_vm5, %v16497_v29  ;;  %v2565_v32 = vrot.slane %v13028_v31, 5  ;;  %v10261_v6 = vrot.slane %v2279_v56, 9  ;;  %v13029_v29 = vld [vmem:[%s13225_s26 + $0x12c] sm:$0x1]  ;;  %v7300_v18 = vrot.slane %v7298_v45, 4  ;;  %v7303_v36 = vrot.slane %v7301_v57, 5 }
 0x18d   : > { %v2569_v0 = vrot.slane %v13029_v29, 5  ;;  %v10999_v39 = vld [vmem:[%s13225_s26 + $0x14] sm:$0x1]  ;;  %v7314_v51 = vrot.slane %v7312_v2, 4  ;;  %v7317_v52 = vrot.slane %v7315_v23, 5  ;;  %v14453_v31 = vsel %vm13548_vm8, %v10259_v43, %v2561_v3 }
 0x18e   : > { %v11001_v33 = vld [vmem:[%s13225_s26 + $0x1c] sm:$0x1]  ;;  %v11002_v61 = vld [vmem:[%s13225_s26 + $0x20] sm:$0xf]  ;;  %16501 = vst [vmem:[#allocation12_spill] sm:$0xff] %v14453_v31  ;;  %v14460_v2 = vsel %vm13548_vm8, %v10260_v62, %v2565_v32  ;;  %v16504_v3 = vcombine.low %v13776_v54, %v13779_v59 }
 0x18f   : > { %v2280_v29 = vld [vmem:[%s13225_s26 + $0x140] sm:$0xe]  ;;  %v2281_v56 = vld [vmem:[%s13225_s26 + $0x148] sm:$0xe]  ;;  %16502 = vst [vmem:[#allocation13_spill] sm:$0xff] %v14460_v2  ;;  %v14464_v23 = vsel %vm13548_vm8, %v10261_v6, %v2569_v0  ;;  %v7318_v43 = vor.u32 %v7317_v52, %v7314_v51  ;;  %v7321_v45 = vshll.u32 %v11001_v33, 16  ;;  %v16505_v6 = vcombine.low %v13800_v28, %v13805_v34 }
 0x190   : > { %12121 = vmatmul.mubr.msk.bf16.gmra.mrb[24].mxu0 %vm1307_vm5, %v12859_v17  ;;  %v12863_v17 = vld [vmem:[%s13225_s26 + $0x130] ss:$8 sps:$4 sm:$0xff]   ;;  %16503 = vst [vmem:[#allocation14_spill] sm:$0xff] %v14464_v23  ;;  %v11004_v57 = vld [vmem:[%s13225_s26 + $0x28] sm:$0xf]  ;;  %v7326_v14 = vshrl.u32 %v11002_v61, 16 }
 0x191   : > { %12124 = vmatprep.mubr.msk.bf16.mxu0 %vm1307_vm5, %v12861_v24  ;;  %v14449_v24 = vsel %vm13548_vm8, %v10258_v37, %v2557_v22  ;;  %v7304_v22 = vor.u32 %v7303_v36, %v7300_v18  ;;  %v7307_v37 = vshll.u32 %v10999_v39, 16  ;;  %v7329_v62 = vshll.u32 %v11002_v61, 16  ;;  %v11006_v32 = vld [vmem:[%s13225_s26 + $0x30] sm:$0xf]  ;;  %v13030_v18 = vld [vmem:[%s13225_s26 + $0x144] sm:$0x1] }
 0x192   : > { %16500 = vst [vmem:[#allocation11_spill] sm:$0xff] %v14449_v24  ;;  %v12864_v36 = vld [vmem:[%s13225_s26 + $0x150] ss:$8 sps:$4 sm:$0xff]   ;;  %v10262_v0 = vrot.slane %v2280_v29, 9  ;;  %v2573_v39 = vrot.slane %v13030_v18, 5  ;;  %v10263_v54 = vrot.slane %v2281_v56, 9 }
 0x193   : > { %11823 = vmatmul.mubr.msk.bf16.gmra.mrb[56].mxu1 %vm1307_vm5, %v16504_v3  ;;  %v13031_v59 = vld [vmem:[%s13225_s26 + $0x14c] sm:$0x1]  ;;  %v2282_v33 = vld [vmem:[%s13225_s26 + $0x150] sm:$0xe]  ;;  %v2283_v61 = vld [vmem:[%s13225_s26 + $0x158] sm:$0xe] }
 0x194   : > { %11826 = vmatprep.mubr.msk.bf16.mxu1 %vm1307_vm5, %v16505_v6  ;;  %v2577_v3 = vrot.slane %v13031_v59, 5  ;;  %v7340_v28 = vshrl.u32 %v11004_v57, 16  ;;  %v7343_v34 = vshll.u32 %v11004_v57, 16  ;;  %v14485_v6 = vrot.slane %v7304_v22, 4  ;;  %v11008_v56 = vld [vmem:[%s13225_s26 + $0x38] sm:$0xf] }
 0x195   : > { %v14487_v29 = vrot.slane %v7307_v37, 5  ;;  %v7354_v18 = vshrl.u32 %v11006_v32, 16  ;;  %v7357_v59 = vshll.u32 %v11006_v32, 16  ;;  %v14491_v51 = vrot.slane %v7318_v43, 4  ;;  %v11003_v13 = vld [vmem:[%s13225_s26 + $0x24] sm:$0x1] }
 0x196   : > { %v14493_v52 = vrot.slane %v7321_v45, 5  ;;  %v7328_v57 = vrot.slane %v7326_v14, 4  ;;  %v7331_v22 = vrot.slane %v7329_v62, 5  ;;  %v14499_v37 = vsel %vm13548_vm8, %v10262_v0, %v2573_v39  ;;  %v13032_v43 = vld [vmem:[%s13225_s26 + $0x154] sm:$0x1] }
 0x197   : > { %v14503_v32 = vsel %vm13548_vm8, %v10263_v54, %v2577_v3  ;;  %v2581_v23 = vrot.slane %v13032_v43, 5  ;;  %v11005_v45 = vld [vmem:[%s13225_s26 + $0x2c] sm:$0x1]  ;;  %v2284_v2 = vld [vmem:[%s13225_s26 + $0x160] sm:$0xe]  ;;  %v7342_v14 = vrot.slane %v7340_v28, 4  ;;  %v7310_v28 = vsel %vm13244_vm4, %v14485_v6, %v14487_v29 }
 0x198   : > { %12125 = vmatmul.mubr.msk.bf16.gmra.mrb[28].mxu0 %vm1307_vm5, %v12863_v17  ;;  %v10264_v17 = vrot.slane %v2282_v33, 9  ;;  %v12865_v31 = vld [vmem:[%s13225_s26 + $0x160] ss:$8 sps:$4 sm:$0xff]   ;;  %v7345_v62 = vrot.slane %v7343_v34, 5  ;;  %v7368_v24 = vshrl.u32 %v11008_v56, 16  ;;  %v7371_v47 = vshll.u32 %v11008_v56, 16 }
 0x199   : > { %12128 = vmatprep.mubr.msk.bf16.mxu0 %vm1307_vm5, %v12864_v36  ;;  %v2285_v36 = vld [vmem:[%s13225_s26 + $0x168] sm:$0xe]  ;;  %v12866_v25 = vld [vmem:[%s13225_s26 + $0x170] ss:$8 sps:$4 sm:$0xff]   ;;  %v10265_v0 = vrot.slane %v2283_v61, 9  ;;  %v7356_v54 = vrot.slane %v7354_v18, 4  ;;  %v16506_v33 = vcombine.low %v13823_v60, %v13833_v42  ;;  %v7324_v61 = vsel %vm13244_vm4, %v14491_v51, %v14493_v52 }
 0x19a   : > { %v13033_v39 = vld [vmem:[%s13225_s26 + $0x15c] sm:$0x1]  ;;  %v7359_v3 = vrot.slane %v7357_v59, 5  ;;  %v7332_v34 = vor.u32 %v7331_v22, %v7328_v57  ;;  %v7335_v56 = vshll.u32 %v11003_v13, 16  ;;  %v11007_v18 = vld [vmem:[%s13225_s26 + $0x34] sm:$0x1]  ;;  %v16507_v60 = vcombine.low %v14066_v30, %v14076_v53 }
 0x19b   : > { %v2585_v5 = vrot.slane %v13033_v39, 5  ;;  %11827 = vmatmul.mubr.msk.bf16.gmra.mrb[60].mxu1 %vm1307_vm5, %v16506_v33  ;;  %v11010_v59 = vld [vmem:[%s13225_s26 + $0x40] sm:$0xf]  ;;  %v7349_v42 = vshll.u32 %v11005_v45, 16  ;;  %v10266_v43 = vrot.slane %v2284_v2, 9  ;;  %v10267_v29 = vrot.slane %v2285_v36, 9 }
 0x19c   : > { %11832 = vmatprep.mubr.msk.bf16.mxu1 %vm1307_vm5, %v16507_v60  ;;  %v13034_v39 = vld [vmem:[%s13225_s26 + $0x164] sm:$0x1]  ;;  %v11012_v33 = vld [vmem:[%s13225_s26 + $0x48] sm:$0xf]  ;;  %v7346_v44 = vor.u32 %v7345_v62, %v7342_v14  ;;  %v13035_v38 = vld [vmem:[%s13225_s26 + $0x16c] sm:$0x1]  ;;  %v14535_v57 = vsel %vm13548_vm8, %v10264_v17, %v2581_v23  ;;  %v7360_v2 = vor.u32 %v7359_v3, %v7356_v54 }
 0x19d   : > { %v2589_v6 = vrot.slane %v13034_v39, 5  ;;  %v2593_v51 = vrot.slane %v13035_v38, 5  ;;  %v7370_v52 = vrot.slane %v7368_v24, 4  ;;  %v7373_v13 = vrot.slane %v7371_v47, 5  ;;  %v11009_v53 = vld [vmem:[%s13225_s26 + $0x3c] sm:$0x1] }
 0x19e   : > { %v14539_v30 = vsel %vm13548_vm8, %v10265_v0, %v2585_v5  ;;  %v7363_v22 = vshll.u32 %v11007_v18, 16  ;;  %v2286_v45 = vld [vmem:[%s13225_s26 + $0x170] sm:$0xe]  ;;  %v7382_v38 = vshrl.u32 %v11010_v59, 16  ;;  %v7385_v24 = vshll.u32 %v11010_v59, 16 }
 0x19f   : > { %v7396_v47 = vshrl.u32 %v11012_v33, 16  ;;  %v7399_v14 = vshll.u32 %v11012_v33, 16  ;;  %v14545_v23 = vrot.slane %v7332_v34, 4  ;;  %v14547_v5 = vrot.slane %v7335_v56, 5  ;;  %v11011_v3 = vld [vmem:[%s13225_s26 + $0x44] sm:$0x1] }
 0x1a0   : > { %12129 = vmatmul.mubr.msk.bf16.gmra.mrb[32].mxu0 %vm1307_vm5, %v12865_v31  ;;  %v14549_v17 = vrot.slane %v7349_v42, 5  ;;  %v14553_v31 = vsel %vm13548_vm8, %v10266_v43, %v2589_v6  ;;  %v14555_v62 = vrot.slane %v7346_v44, 4  ;;  %v14559_v36 = vsel %vm13548_vm8, %v10267_v29, %v2593_v51  ;;  %v12867_v34 = vld [vmem:[%s13225_s26 + $0x180] ss:$8 sps:$4 sm:$0xff]   ;;  %v13036_v60 = vld [vmem:[%s13225_s26 + $0x174] sm:$0x1] }
 0x1a1   : > { %12132 = vmatprep.mubr.msk.bf16.mxu0 %vm1307_vm5, %v12866_v25  ;;  %v7374_v0 = vor.u32 %v7373_v13, %v7370_v52  ;;  %v7377_v54 = vshll.u32 %v11009_v53, 16  ;;  %v2287_v25 = vld [vmem:[%s13225_s26 + $0x178] sm:$0xe]  ;;  %v14564_v56 = vrot.slane %v7360_v2, 4  ;;  %v14566_v18 = vrot.slane %v7363_v22, 5 }
 0x1a2   : > { %v10268_v59 = vrot.slane %v2286_v45, 9  ;;  %v2597_v42 = vrot.slane %v13036_v60, 5  ;;  %v16508_v44 = vcombine.low %v14083_v55, %v14091_v1  ;;  %v11013_v43 = vld [vmem:[%s13225_s26 + $0x4c] sm:$0x1]  ;;  %v7384_v39 = vrot.slane %v7382_v38, 4  ;;  %v16530_v55 = vld [vmem:[#allocation10_spill] sm:$0xff] }
 0x1a3   : > { %v7387_v6 = vrot.slane %v7385_v24, 5  ;;  %v7398_v29 = vrot.slane %v7396_v47, 4  ;;  %v7401_v33 = vrot.slane %v7399_v14, 5  ;;  %v16509_v51 = vcombine.low %v14224_v49, %v14228_v50  ;;  %v12868_v52 = vld [vmem:[%s13225_s26 + $0x1a0] ss:$8 sps:$4 sm:$0xff]  }
 0x1a4   : > { %11833 = vmatmul.mubr.msk.bf16.vlgmr.msra.gmra.mrb[0].mxu1 %vm1307_vm5, %v16508_v44  ;;  %v10269_v1 = vrot.slane %v2287_v25, 9  ;;  %v13037_v13 = vld [vmem:[%s13225_s26 + $0x17c] sm:$0x1]  ;;  %v7391_v2 = vshll.u32 %v11011_v3, 16  ;;  %v14583_v22 = vcombine.low %v7310_v28, %v7324_v61  ;;  %v7375_v45 = vrot.slane %v7374_v0, 4 }
 0x1a5   : > { %11897 = vmatpush3.bf16.msra.mxu1 %v14069_v10  ;;  %11836 = vmatprep.mubr.msk.bf16.mxu1 %vm1307_vm5, %v16509_v51  ;;  %v2601_v53 = vrot.slane %v13037_v13, 5  ;;  %v7379_v49 = vrot.slane %v7377_v54, 5  ;;  %v11014_v50 = vld [vmem:[%s13225_s26 + $0x60] sm:$0xf]  ;;  %v7338_v38 = vsel %vm13244_vm4, %v14545_v23, %v14547_v5  ;;  %v7352_v28 = vsel %vm13244_vm4, %v14555_v62, %v14549_v17  ;;  %v2288_v47 = vld [vmem:[%s13225_s26 + $0x190] sm:$0xe] }
 0x1a6   : > { %12292 = vmatprep.subr.bf16.mxu1 %v13209_v7  ;;  %v7405_v24 = vshll.u32 %v11013_v43, 16  ;;  %v2289_v14 = vld [vmem:[%s13225_s26 + $0x198] sm:$0xe]  ;;  %v7366_v23 = vsel %vm13244_vm4, %v14564_v56, %v14566_v18  ;;  %v14608_v5 = vsel %vm13548_vm8, %v10268_v59, %v2597_v42  ;;  %v7388_v17 = vor.u32 %v7387_v6, %v7384_v39  ;;  %v11016_v0 = vld [vmem:[%s13225_s26 + $0x68] sm:$0xf] }
 0x1a7   : > { %v7402_v62 = vor.u32 %v7401_v33, %v7398_v29  ;;  %v14614_v54 = vsel %vm13548_vm8, %v10269_v1, %v2601_v53  ;;  %v14616_v25 = vrot.slane %v7391_v2, 5  ;;  %v7410_v3 = vshrl.u32 %v11014_v50, 16  ;;  %v11018_v56 = vld [vmem:[%s13225_s26 + $0x70] sm:$0xf]  ;;  %v13038_v60 = vld [vmem:[%s13225_s26 + $0x194] sm:$0x1] }
 0x1a8   : > { %12133 = vmatmul.mubr.msk.bf16.gmra.mrb[36].mxu0 %vm1307_vm5, %v12867_v34  ;;  %v7413_v34 = vshll.u32 %v11014_v50, 16  ;;  %v7380_v18 = vsel %vm13244_vm4, %v7375_v45, %v7379_v49  ;;  %v10270_v59 = vrot.slane %v2288_v47, 9  ;;  %v2605_v42 = vrot.slane %v13038_v60, 5  ;;  %v11020_v43 = vld [vmem:[%s13225_s26 + $0x78] sm:$0xf] }
 0x1a9   : > { %12136 = vmatprep.mubr.msk.bf16.mxu0 %vm1307_vm5, %v12868_v52  ;;  %v10271_v44 = vrot.slane %v2289_v14, 9  ;;  %v12869_v39 = vld [vmem:[%s13225_s26 + $0x1b0] ss:$8 sps:$4 sm:$0xff]   ;;  %v7407_v6 = vrot.slane %v7405_v24, 5  ;;  %v13039_v29 = vld [vmem:[%s13225_s26 + $0x19c] sm:$0x1]  ;;  %v16510_v1 = vcombine.low %v14232_v63, %v14237_v27  ;;  %v16511_v50 = vcombine.low %v14287_v12, %v14291_v16 }
 0x1aa   : > { %v2609_v33 = vrot.slane %v13039_v29, 5  ;;  %v7424_v51 = vshrl.u32 %v11016_v0, 16  ;;  %v7427_v52 = vshll.u32 %v11016_v0, 16  ;;  %v7389_v13 = vrot.slane %v7388_v17, 4  ;;  %v11015_v2 = vld [vmem:[%s13225_s26 + $0x64] sm:$0x1] }
 0x1ab   : > { %v7403_v53 = vrot.slane %v7402_v62, 4  ;;  %v7438_v45 = vshrl.u32 %v11018_v56, 16  ;;  %v7441_v49 = vshll.u32 %v11018_v56, 16  ;;  %v12870_v24 = vld [vmem:[%s13225_s26 + $0x1c0] ss:$8 sps:$4 sm:$0xff]   ;;  %v7412_v47 = vrot.slane %v7410_v3, 4 }
 0x1ac   : > { %11837 = vmatmul.mubr.msk.bf16.gmra.mrb[4].mxu1 %vm1307_vm5, %v16510_v1  ;;  %v7415_v14 = vrot.slane %v7413_v34, 5  ;;  %v7452_v0 = vshrl.u32 %v11020_v43, 16  ;;  %v7455_v63 = vshll.u32 %v11020_v43, 16  ;;  %v14635_v27 = vcombine.low %v7338_v38, %v7352_v28  ;;  %v11017_v12 = vld [vmem:[%s13225_s26 + $0x6c] sm:$0x1] }
 0x1ad   : > { %11840 = vmatprep.mubr.msk.bf16.mxu1 %vm1307_vm5, %v16511_v50  ;;  %v14637_v17 = vcombine.low %v7366_v23, %v7380_v18  ;;  %v14643_v56 = vsel %vm13548_vm8, %v10270_v59, %v2605_v42  ;;  %v2290_v16 = vld [vmem:[%s13225_s26 + $0x1a0] sm:$0xe]  ;;  %v14649_v3 = vsel %vm13548_vm8, %v10271_v44, %v2609_v33  ;;  %v7419_v34 = vshll.u32 %v11015_v2, 16  ;;  %v2291_v28 = vld [vmem:[%s13225_s26 + $0x1a8] sm:$0xe] }
 0x1ae   : > { %v7426_v60 = vrot.slane %v7424_v51, 4  ;;  %v7429_v38 = vrot.slane %v7427_v52, 5  ;;  %v7394_v23 = vsel %vm13244_vm4, %v7389_v13, %v14616_v25  ;;  %v7408_v18 = vsel %vm13244_vm4, %v7403_v53, %v7407_v6  ;;  %v11019_v59 = vld [vmem:[%s13225_s26 + $0x74] sm:$0x1]  ;;  %v11022_v51 = vld [vmem:[%s13225_s26 + $0x80] sm:$0xf] }
 0x1af   : > { %v7440_v42 = vrot.slane %v7438_v45, 4  ;;  %v7443_v44 = vrot.slane %v7441_v49, 5  ;;  %v7416_v43 = vor.u32 %v7415_v14, %v7412_v47  ;;  %v7433_v29 = vshll.u32 %v11017_v12, 16  ;;  %v13040_v1 = vld [vmem:[%s13225_s26 + $0x1a4] sm:$0x1] }
 0x1b0   : > { %12137 = vmatmul.mubr.msk.bf16.gmra.mrb[40].mxu0 %vm1307_vm5, %v12869_v39  ;;  %v7454_v33 = vrot.slane %v7452_v0, 4  ;;  %v7457_v39 = vrot.slane %v7455_v63, 5  ;;  %v10272_v52 = vrot.slane %v2290_v16, 9  ;;  %v2613_v25 = vrot.slane %v13040_v1, 5  ;;  %v13041_v6 = vld [vmem:[%s13225_s26 + $0x1ac] sm:$0x1] }
 0x1b1   : > { %12140 = vmatprep.mubr.msk.bf16.mxu0 %vm1307_vm5, %v12870_v24  ;;  %v10273_v13 = vrot.slane %v2291_v28, 9  ;;  %v2617_v53 = vrot.slane %v13041_v6, 5  ;;  %v11021_v2 = vld [vmem:[%s13225_s26 + $0x7c] sm:$0x1]  ;;  %v12871_v50 = vld [vmem:[%s13225_s26 + $0x1d0] ss:$8 sps:$4 sm:$0xff]   ;;  %v7430_v24 = vor.u32 %v7429_v38, %v7426_v60  ;;  %v16512_v0 = vcombine.low %v14295_v11, %v14299_v46 }
 0x1b2   : > { %v14667_v49 = vrot.slane %v7419_v34, 5  ;;  %v7447_v47 = vshll.u32 %v11019_v59, 16  ;;  %v11024_v14 = vld [vmem:[%s13225_s26 + $0x88] sm:$0xf]  ;;  %v12872_v63 = vld [vmem:[%s13225_s26 + $0x1f0] ss:$8 sps:$4 sm:$0xff]   ;;  %v14675_v12 = vcombine.low %v7394_v23, %v7408_v18  ;;  %v7444_v16 = vor.u32 %v7443_v44, %v7440_v42 }
 0x1b3   : > { %v2292_v28 = vld [vmem:[%s13225_s26 + $0x1b0] sm:$0xe]  ;;  %v7466_v1 = vshrl.u32 %v11022_v51, 16  ;;  %v7469_v6 = vshll.u32 %v11022_v51, 16  ;;  %v16513_v34 = vcombine.low %v14321_v58, %v14325_v41  ;;  %v14682_v60 = vrot.slane %v7416_v43, 4 }
 0x1b4   : > { %11841 = vmatmul.mubr.msk.bf16.gmra.mrb[8].mxu1 %vm1307_vm5, %v16512_v0  ;;  %v14684_v11 = vrot.slane %v7433_v29, 5  ;;  %v7458_v46 = vor.u32 %v7457_v39, %v7454_v33  ;;  %v7461_v38 = vshll.u32 %v11021_v2, 16  ;;  %v2293_v59 = vld [vmem:[%s13225_s26 + $0x1b8] sm:$0xe]  ;;  %v14689_v23 = vsel %vm13548_vm8, %v10272_v52, %v2613_v25  ;;  %v11023_v58 = vld [vmem:[%s13225_s26 + $0x84] sm:$0x1] }
 0x1b5   : > { %11844 = vmatprep.mubr.msk.bf16.mxu1 %vm1307_vm5, %v16513_v34  ;;  %v14693_v18 = vsel %vm13548_vm8, %v10273_v13, %v2617_v53  ;;  %v7480_v41 = vshrl.u32 %v11024_v14, 16  ;;  %v7483_v42 = vshll.u32 %v11024_v14, 16  ;;  %v7431_v44 = vrot.slane %v7430_v24, 4  ;;  %v13042_v33 = vld [vmem:[%s13225_s26 + $0x1b4] sm:$0x1] }
 0x1b6   : > { %v7449_v43 = vrot.slane %v7447_v47, 5  ;;  %v10274_v29 = vrot.slane %v2292_v28, 9  ;;  %v2621_v39 = vrot.slane %v13042_v33, 5  ;;  %v11026_v51 = vld [vmem:[%s13225_s26 + $0x90] sm:$0xf]  ;;  %v7445_v52 = vrot.slane %v7444_v16, 4 }
 0x1b7   : > { %v10275_v25 = vrot.slane %v2293_v59, 9  ;;  %v7468_v2 = vrot.slane %v7466_v1, 4  ;;  %v7471_v0 = vrot.slane %v7469_v6, 5  ;;  %v11028_v13 = vld [vmem:[%s13225_s26 + $0x98] sm:$0xf]  ;;  %v7459_v53 = vrot.slane %v7458_v46, 4 }
 0x1b8   : > { %12141 = vmatmul.mubr.msk.bf16.gmra.mrb[44].mxu0 %vm1307_vm5, %v12871_v50  ;;  %v7463_v14 = vrot.slane %v7461_v38, 5  ;;  %v13043_v24 = vld [vmem:[%s13225_s26 + $0x1bc] sm:$0x1]  ;;  %v7475_v28 = vshll.u32 %v11023_v58, 16  ;;  %v11025_v34 = vld [vmem:[%s13225_s26 + $0x8c] sm:$0x1]  ;;  %v7422_v1 = vsel %vm13244_vm4, %v14682_v60, %v14667_v49  ;;  %v16514_v59 = vcombine.low %v14338_v48, %v14342_v20 }
 0x1b9   : > { %12144 = vmatprep.mubr.msk.bf16.mxu0 %vm1307_vm5, %v12872_v63  ;;  %v2625_v47 = vrot.slane %v13043_v24, 5  ;;  %v7482_v33 = vrot.slane %v7480_v41, 4  ;;  %v7485_v45 = vrot.slane %v7483_v42, 5  ;;  %v7494_v50 = vshrl.u32 %v11026_v51, 16  ;;  %v2294_v6 = vld [vmem:[%s13225_s26 + $0x1c0] sm:$0xe] }
 0x1ba   : > { %v7497_v16 = vshll.u32 %v11026_v51, 16  ;;  %v7508_v46 = vshrl.u32 %v11028_v13, 16  ;;  %v7511_v38 = vshll.u32 %v11028_v13, 16  ;;  %v12873_v58 = vld [vmem:[%s13225_s26 + $0x200] ss:$8 sps:$4 sm:$0xff]   ;;  %v7436_v49 = vsel %vm13244_vm4, %v7431_v44, %v14684_v11 }
 0x1bb   : > { %v12874_v41 = vld [vmem:[%s13225_s26 + $0x210] ss:$8 sps:$4 sm:$0xff]   ;;  %v7450_v60 = vsel %vm13244_vm4, %v7445_v52, %v7449_v43  ;;  %v14723_v42 = vsel %vm13548_vm8, %v10274_v29, %v2621_v39  ;;  %v7472_v51 = vor.u32 %v7471_v0, %v7468_v2  ;;  %v16515_v48 = vcombine.low %v14349_v26, %v14353_v9  ;;  %v2295_v29 = vld [vmem:[%s13225_s26 + $0x1c8] sm:$0xe]  ;;  %v11027_v39 = vld [vmem:[%s13225_s26 + $0x94] sm:$0x1] }
 0x1bc   : > { %11845 = vmatmul.mubr.msk.bf16.gmra.mrb[12].mxu1 %vm1307_vm5, %v16514_v59  ;;  %v11030_v13 = vld [vmem:[%s13225_s26 + $0xb0] sm:$0xf]  ;;  %v7464_v20 = vsel %vm13244_vm4, %v7459_v53, %v7463_v14  ;;  %v14734_v11 = vsel %vm13548_vm8, %v10275_v25, %v2625_v47  ;;  %v14736_v44 = vrot.slane %v7475_v28, 5  ;;  %v7489_v43 = vshll.u32 %v11025_v34, 16  ;;  %v11029_v0 = vld [vmem:[%s13225_s26 + $0x9c] sm:$0x1] }
 0x1bd   : > { %11848 = vmatprep.mubr.msk.bf16.mxu1 %vm1307_vm5, %v16515_v48  ;;  %v7486_v52 = vor.u32 %v7485_v45, %v7482_v33  ;;  %v10276_v2 = vrot.slane %v2294_v6, 9  ;;  %v7496_v26 = vrot.slane %v7494_v50, 4  ;;  %v7499_v9 = vrot.slane %v7497_v16, 5  ;;  %v11032_v53 = vld [vmem:[%s13225_s26 + $0xb8] sm:$0xf] }
 0x1be   : > { %v7510_v24 = vrot.slane %v7508_v46, 4  ;;  %v7513_v59 = vrot.slane %v7511_v38, 5  ;;  %v7522_v14 = vshrl.u32 %v11030_v13, 16  ;;  %v7525_v25 = vshll.u32 %v11030_v13, 16  ;;  %v13044_v28 = vld [vmem:[%s13225_s26 + $0x1c4] sm:$0x1] }
 0x1bf   : > { %v14743_v47 = vrot.slane %v7472_v51, 4  ;;  %v2629_v34 = vrot.slane %v13044_v28, 5  ;;  %v10277_v45 = vrot.slane %v2295_v29, 9  ;;  %v13045_v33 = vld [vmem:[%s13225_s26 + $0x1cc] sm:$0x1]  ;;  %v14748_v50 = vcombine.low %v7422_v1, %v7436_v49 }
 0x1c0   : > { %12145 = vmatmul.mubr.msk.bf16.gmra.mrb[48].mxu0 %vm1307_vm5, %v12873_v58  ;;  %v2633_v6 = vrot.slane %v13045_v33, 5  ;;  %v14750_v16 = vcombine.low %v7450_v60, %v7464_v20  ;;  %v7503_v38 = vshll.u32 %v11027_v39, 16  ;;  %v2296_v58 = vld [vmem:[%s13225_s26 + $0x1e0] sm:$0xe]  ;;  %v14756_v13 = vrot.slane %v7489_v43, 5 }
 0x1c1   : > { %12148 = vmatprep.mubr.msk.bf16.mxu0 %vm1307_vm5, %v12874_v41  ;;  %v12875_v51 = vld [vmem:[%s13225_s26 + $0x220] ss:$8 sps:$4 sm:$0xff]   ;;  %v7517_v48 = vshll.u32 %v11029_v0, 16  ;;  %v7536_v28 = vshrl.u32 %v11032_v53, 16  ;;  %v7539_v33 = vshll.u32 %v11032_v53, 16  ;;  %v7500_v1 = vor.u32 %v7499_v9, %v7496_v26 }
 0x1c2   : > { %v2297_v29 = vld [vmem:[%s13225_s26 + $0x1e8] sm:$0xe]  ;;  %v7514_v41 = vor.u32 %v7513_v59, %v7510_v24  ;;  %v11031_v49 = vld [vmem:[%s13225_s26 + $0xb4] sm:$0x1]  ;;  %v7524_v60 = vrot.slane %v7522_v14, 4  ;;  %v7527_v20 = vrot.slane %v7525_v25, 5  ;;  %v16516_v39 = vcombine.low %v14370_v19, %v14374_v40 }
 0x1c3   : > { %v12876_v63 = vld [vmem:[%s13225_s26 + $0x240] ss:$8 sps:$4 sm:$0xff]   ;;  %v7478_v43 = vsel %vm13244_vm4, %v14743_v47, %v14736_v44  ;;  %v7487_v0 = vrot.slane %v7486_v52, 4  ;;  %v14771_v26 = vsel %vm13548_vm8, %v10276_v2, %v2629_v34  ;;  %v14775_v9 = vsel %vm13548_vm8, %v10277_v45, %v2633_v6  ;;  %v11033_v24 = vld [vmem:[%s13225_s26 + $0xbc] sm:$0x1] }
 0x1c4   : > { %11849 = vmatmul.mubr.msk.bf16.gmra.mrb[16].mxu1 %vm1307_vm5, %v16516_v39  ;;  %16517 = vst [vmem:[#allocation15_spill] sm:$0xff] %v14771_v26  ;;  %16518 = vst [vmem:[#allocation16_spill] sm:$0xff] %v14775_v9  ;;  %v2298_v19 = vld [vmem:[%s13225_s26 + $0x1f0] sm:$0xe]  ;;  %v16519_v40 = vcombine.low %v14378_v15, %v14382_v21  ;;  %v7505_v59 = vrot.slane %v7503_v38, 5  ;;  %v10278_v44 = vrot.slane %v2296_v58, 9  ;;  %v7528_v15 = vor.u32 %v7527_v20, %v7524_v60 }
 0x1c5   : > { %v13046_v52 = vld [vmem:[%s13225_s26 + $0x1e4] sm:$0x1]  ;;  %v10279_v2 = vrot.slane %v2297_v29, 9  ;;  %v2299_v14 = vld [vmem:[%s13225_s26 + $0x1f8] sm:$0xe]  ;;  %v7519_v25 = vrot.slane %v7517_v48, 5 }
 0x1c6   : > { %11852 = vmatprep.mubr.msk.bf16.mxu1 %vm1307_vm5, %v16519_v40  ;;  %v2637_v53 = vrot.slane %v13046_v52, 5  ;;  %v13047_v47 = vld [vmem:[%s13225_s26 + $0x1ec] sm:$0x1]  ;;  %v7538_v45 = vrot.slane %v7536_v28, 4  ;;  %v7541_v6 = vrot.slane %v7539_v33, 5  ;;  %v7501_v46 = vrot.slane %v7500_v1, 4 }
 0x1c7   : > { %v2641_v34 = vrot.slane %v13047_v47, 5  ;;  %v11034_v39 = vld [vmem:[%s13225_s26 + $0xc0] sm:$0xf]  ;;  %v7515_v62 = vrot.slane %v7514_v41, 4  ;;  %v7531_v21 = vshll.u32 %v11031_v49, 16  ;;  %v10280_v58 = vrot.slane %v2298_v19, 9 }
 0x1c8   : > { %v11036_v38 = vld [vmem:[%s13225_s26 + $0xc8] sm:$0xf]  ;;  %12149 = vmatmul.mubr.msk.bf16.gmra.mrb[52].mxu0 %vm1307_vm5, %v12875_v51  ;;  %v13048_v40 = vld [vmem:[%s13225_s26 + $0x1f4] sm:$0x1]  ;;  %v10281_v52 = vrot.slane %v2299_v14, 9  ;;  %v7492_v28 = vsel %vm13244_vm4, %v7487_v0, %v14756_v13  ;;  %v7545_v1 = vshll.u32 %v11033_v24, 16  ;;  %v7542_v51 = vor.u32 %v7541_v6, %v7538_v45 }
 0x1c9   : > { %v2645_v29 = vrot.slane %v13048_v40, 5  ;;  %v13049_v48 = vld [vmem:[%s13225_s26 + $0x1fc] sm:$0x1]  ;;  %12152 = vmatprep.mubr.msk.bf16.mxu0 %vm1307_vm5, %v12876_v63  ;;  %v7550_v41 = vshrl.u32 %v11034_v39, 16  ;;  %v11035_v49 = vld [vmem:[%s13225_s26 + $0xc4] sm:$0x1]  ;;  %v14801_v63 = vsel %vm13548_vm8, %v10278_v44, %v2637_v53  ;;  %v14805_v13 = vsel %vm13548_vm8, %v10279_v2, %v2641_v34 }
 0x1ca   : > { %v2649_v61 = vrot.slane %v13049_v48, 5  ;;  %v7553_v60 = vshll.u32 %v11034_v39, 16  ;;  %v7564_v20 = vshrl.u32 %v11036_v38, 16  ;;  %v7567_v19 = vshll.u32 %v11036_v38, 16  ;;  %v12877_v14 = vld [vmem:[%s13225_s26 + $0x250] ss:$8 sps:$4 sm:$0xff]  }
 0x1cb   : > { %16520 = vst [vmem:[#allocation17_spill] sm:$0xff] %v14801_v63  ;;  %16521 = vst [vmem:[#allocation18_spill] sm:$0xff] %v14805_v13  ;;  %v14807_v0 = vrot.slane %v7528_v15, 4  ;;  %v14809_v24 = vrot.slane %v7531_v21, 5  ;;  %v16522_v47 = vld [vmem:[#allocation6_spill] sm:$0xff]  ;;  %v7506_v39 = vsel %vm13244_vm4, %v7501_v46, %v7505_v59  ;;  %v7520_v44 = vsel %vm13244_vm4, %v7515_v62, %v7519_v25  ;;  %v16526_v15 = vld [vmem:[#allocation7_spill] sm:$0xff] }
 0x1cc   : > { %v16523_v45 = vcombine.low %v14387_v4, %v16522_v47  ;;  %v12878_v6 = vld [vmem:[%s13225_s26 + $0x260] ss:$8 sps:$4 sm:$0xff]   ;;  %v14822_v53 = vsel %vm13548_vm8, %v10280_v58, %v2645_v29  ;;  %v14826_v2 = vsel %vm13548_vm8, %v10281_v52, %v2649_v61  ;;  %v11037_v34 = vld [vmem:[%s13225_s26 + $0xcc] sm:$0x1]  ;;  %v11038_v4 = vld [vmem:[%s13225_s26 + $0xd0] sm:$0xf]  ;;  %v14834_v46 = vcombine.low %v7478_v43, %v7492_v28 }
 0x1cd   : > { %16524 = vst [vmem:[#allocation6_spill] sm:$0xff] %v14822_v53  ;;  %16525 = vst [vmem:[#allocation19_spill] sm:$0xff] %v14826_v2  ;;  %v16527_v21 = vld [vmem:[#allocation8_spill] sm:$0xff]  ;;  %v14836_v62 = vrot.slane %v7545_v1, 5  ;;  %v7552_v59 = vrot.slane %v7550_v41, 4  ;;  %v7559_v25 = vshll.u32 %v11035_v49, 16  ;;  %v14844_v47 = vcombine.low %v7506_v39, %v7520_v44 }
 0x1ce   : > { %11853 = vmatmul.mubr.msk.bf16.gmra.mrb[20].mxu1 %vm1307_vm5, %v16523_v45  ;;  %v16528_v38 = vcombine.low %v16526_v15, %v16527_v21  ;;  %v11040_v58 = vld [vmem:[%s13225_s26 + $0xd8] sm:$0xf]  ;;  %v14839_v40 = vrot.slane %v7542_v51, 4  ;;  %v7555_v61 = vrot.slane %v7553_v60, 5  ;;  %v7566_v29 = vrot.slane %v7564_v20, 4 }
 0x1cf   : > { %v7569_v52 = vrot.slane %v7567_v19, 5  ;;  %v14842_v48 = vld [vmem:[%s13225_s26 + $0x200] sm:$0xe]  ;;  %v2301_v41 = vld [vmem:[%s13225_s26 + $0x208] sm:$0xe]  ;;  %v7578_v49 = vshrl.u32 %v11038_v4, 16 }
 0x1d0   : > { %11856 = vmatprep.mubr.msk.bf16.mxu1 %vm1307_vm5, %v16528_v38  ;;  %v11042_v51 = vld [vmem:[%s13225_s26 + $0xe0] sm:$0xf]  ;;  %12153 = vmatmul.mubr.msk.bf16.gmra.mrb[56].mxu0 %vm1307_vm5, %v12877_v14  ;;  %v7581_v60 = vshll.u32 %v11038_v4, 16  ;;  %v7592_v20 = vshrl.u32 %v11040_v58, 16  ;;  %v7595_v19 = vshll.u32 %v11040_v58, 16  ;;  %v14859_v39 = vrot.slane %v7559_v25, 5 }
 0x1d1   : > { %v11044_v45 = vld [vmem:[%s13225_s26 + $0xe8] sm:$0xf]  ;;  %12156 = vmatprep.mubr.msk.bf16.mxu0 %vm1307_vm5, %v12878_v6  ;;  %v7573_v44 = vshll.u32 %v11037_v34, 16  ;;  %v10282_v15 = vrot.slane %v14842_v48, 9  ;;  %v13050_v21 = vld [vmem:[%s13225_s26 + $0x204] sm:$0x1]  ;;  %v7556_v4 = vor.u32 %v7555_v61, %v7552_v59  ;;  %v7570_v1 = vor.u32 %v7569_v52, %v7566_v29 }
 0x1d2   : > { %v2653_v38 = vrot.slane %v13050_v21, 5  ;;  %v10283_v43 = vrot.slane %v2301_v41, 9  ;;  %v11039_v58 = vld [vmem:[%s13225_s26 + $0xd4] sm:$0x1]  ;;  %v11041_v33 = vld [vmem:[%s13225_s26 + $0xdc] sm:$0x1] }
 0x1d3   : > { %v2302_v6 = vld [vmem:[%s13225_s26 + $0x210] sm:$0xe]  ;;  %v7606_v25 = vshrl.u32 %v11042_v51, 16  ;;  %v7609_v34 = vshll.u32 %v11042_v51, 16  ;;  %v7620_v10 = vshrl.u32 %v11044_v45, 16  ;;  %v7623_v28 = vshll.u32 %v11044_v45, 16 }
 0x1d4   : > { %v16529_v48 = vld [vmem:[#allocation9_spill] sm:$0xff]  ;;  %v7580_v14 = vrot.slane %v7578_v49, 4  ;;  %v7583_v59 = vrot.slane %v7581_v60, 5  ;;  %v7594_v61 = vrot.slane %v7592_v20, 4  ;;  %v7597_v29 = vrot.slane %v7595_v19, 5  ;;  %v16532_v52 = vld [vmem:[#allocation11_spill] sm:$0xff] }
 0x1d5   : > { %v16531_v21 = vcombine.low %v16529_v48, %v16530_v55  ;;  %v12879_v7 = vld [vmem:[%s13225_s26 + $0x270] ss:$8 sps:$4 sm:$0xff]   ;;  %v14879_v51 = vrot.slane %v7573_v44, 5  ;;  %v13051_v45 = vld [vmem:[%s13225_s26 + $0x20c] sm:$0x1]  ;;  %v7587_v55 = vshll.u32 %v11039_v58, 16 }
 0x1d6   : > { %v16533_v41 = vld [vmem:[#allocation12_spill] sm:$0xff]  ;;  %v2657_v53 = vrot.slane %v13051_v45, 5  ;;  %v7601_v48 = vshll.u32 %v11041_v33, 16  ;;  %v7557_v13 = vrot.slane %v7556_v4, 4  ;;  %v7571_v49 = vrot.slane %v7570_v1, 4 }
 0x1d7   : > { %11857 = vmatmul.mubr.msk.bf16.gmra.mrb[24].mxu1 %vm1307_vm5, %v16531_v21  ;;  %v16534_v2 = vcombine.low %v16532_v52, %v16533_v41  ;;  %v2303_v21 = vld [vmem:[%s13225_s26 + $0x218] sm:$0xe]  ;;  %v10284_v60 = vrot.slane %v2302_v6, 9  ;;  %v13052_v20 = vld [vmem:[%s13225_s26 + $0x214] sm:$0x1]  ;;  %v7608_v52 = vrot.slane %v7606_v25, 4  ;;  %v7584_v33 = vor.u32 %v7583_v59, %v7580_v14 }
 0x1d8   : > { %v2661_v19 = vrot.slane %v13052_v20, 5  ;;  %v11043_v63 = vld [vmem:[%s13225_s26 + $0xe4] sm:$0x1]  ;;  %v7611_v41 = vrot.slane %v7609_v34, 5  ;;  %v7625_v44 = vrot.slane %v7623_v28, 5  ;;  %12157 = vmatmul.mubr.msk.bf16.gmra.mrb[60].mxu0 %vm1307_vm5, %v12879_v7  ;;  %v7598_v58 = vor.u32 %v7597_v29, %v7594_v61 }
 0x1d9   : > { %11860 = vmatprep.mubr.msk.bf16.mxu1 %vm1307_vm5, %v16534_v2  ;;  %v7622_v2 = vrot.slane %v7620_v10, 4  ;;  %v11046_v9 = vld [vmem:[%s13225_s26 + $0x100] sm:$0xf]  ;;  %v10285_v45 = vrot.slane %v2303_v21, 9  ;;  %v13053_v4 = vld [vmem:[%s13225_s26 + $0x21c] sm:$0x1]  ;;  %12162 = vmatprep.mubr.msk.bf16.mxu0 %vm1307_vm5, %v14583_v22  ;;  %v14894_v25 = vsel %vm13548_vm8, %v10282_v15, %v2653_v38  ;;  %v14898_v10 = vsel %vm13548_vm8, %v10283_v43, %v2657_v53 }
 0x1da   : > { %v2665_v1 = vrot.slane %v13053_v4, 5  ;;  %v11045_v26 = vld [vmem:[%s13225_s26 + $0xec] sm:$0x1]  ;;  %v2304_v6 = vld [vmem:[%s13225_s26 + $0x230] sm:$0xe]  ;;  %v14900_v28 = vrot.slane %v7587_v55, 5  ;;  %v7562_v59 = vsel %vm13244_vm4, %v7557_v13, %v14859_v39  ;;  %v7576_v22 = vsel %vm13244_vm4, %v7571_v49, %v14879_v51 }
 0x1db   : > { %v14902_v7 = vrot.slane %v7601_v48, 5  ;;  %v2305_v14 = vld [vmem:[%s13225_s26 + $0x238] sm:$0xe]  ;;  %v11048_v34 = vld [vmem:[%s13225_s26 + $0x108] sm:$0xf]  ;;  %v7634_v15 = vshrl.u32 %v11046_v9, 16  ;;  %v7612_v53 = vor.u32 %v7611_v41, %v7608_v52  ;;  %v7626_v61 = vor.u32 %v7625_v44, %v7622_v2 }
 0x1dc   : > { %v7637_v38 = vshll.u32 %v11046_v9, 16  ;;  %v7615_v43 = vshll.u32 %v11043_v63, 16  ;;  %v7629_v29 = vshll.u32 %v11045_v26, 16  ;;  %v16535_v55 = vld [vmem:[#allocation13_spill] sm:$0xff]  ;;  %v16536_v48 = vld [vmem:[#allocation14_spill] sm:$0xff]  ;;  %v14916_v20 = vrot.slane %v7584_v33, 4 }
 0x1dd   : > { %v16537_v21 = vcombine.low %v16535_v55, %v16536_v48  ;;  %v14918_v13 = vrot.slane %v7598_v58, 4  ;;  %v14922_v39 = vsel %vm13548_vm8, %v10284_v60, %v2661_v19  ;;  %v14926_v9 = vsel %vm13548_vm8, %v10285_v45, %v2665_v1  ;;  %v13054_v51 = vld [vmem:[%s13225_s26 + $0x234] sm:$0x1]  ;;  %v11047_v52 = vld [vmem:[%s13225_s26 + $0x104] sm:$0x1] }
 0x1de   : > { %v16538_v26 = vcombine.low %v14499_v37, %v14503_v32  ;;  %v10286_v63 = vrot.slane %v2304_v6, 9  ;;  %v2669_v49 = vrot.slane %v13054_v51, 5  ;;  %v7648_v41 = vshrl.u32 %v11048_v34, 16  ;;  %v13055_v60 = vld [vmem:[%s13225_s26 + $0x23c] sm:$0x1] }
 0x1df   : > { %11861 = vmatmul.mubr.msk.bf16.gmra.mrb[28].mxu1 %vm1307_vm5, %v16537_v21  ;;  %v7651_v2 = vshll.u32 %v11048_v34, 16  ;;  %v10287_v44 = vrot.slane %v2305_v14, 9  ;;  %v2673_v19 = vrot.slane %v13055_v60, 5  ;;  %v7636_v33 = vrot.slane %v7634_v15, 4  ;;  %v11052_v55 = vld [vmem:[%s13225_s26 + $0x118] sm:$0xf] }
 0x1e0   : > { %11864 = vmatprep.mubr.msk.bf16.mxu1 %vm1307_vm5, %v16538_v26  ;;  %v7639_v58 = vrot.slane %v7637_v38, 5  ;;  %v7613_v45 = vrot.slane %v7612_v53, 4  ;;  %v7617_v4 = vrot.slane %v7615_v43, 5  ;;  %v7627_v1 = vrot.slane %v7626_v61, 4  ;;  %12163 = vmatmul.mubr.msk.bf16.vlgmr.msra.gmra.mrb[0].mxu0 %vm1307_vm5, %v14635_v27  ;;  %v11049_v27 = vld [vmem:[%s13225_s26 + $0x10c] sm:$0x1] }
 0x1e1   : > { %v7631_v37 = vrot.slane %v7629_v29, 5  ;;  %v16539_v32 = vsel %vm13244_vm4, %v14839_v40, %v14836_v62  ;;  %v16540_v6 = vsel %vm13244_vm4, %v14807_v0, %v14809_v24  ;;  %v14949_v34 = vcombine.low %v7562_v59, %v7576_v22  ;;  %v11050_v53 = vld [vmem:[%s13225_s26 + $0x110] sm:$0xf]  ;;  %12166 = vmatprep.mubr.msk.bf16.mxu0 %vm1307_vm5, %v14637_v17  ;;  %v2306_v59 = vld [vmem:[%s13225_s26 + $0x240] sm:$0xe] }
 0x1e2   : > { %v14947_v14 = vcombine.low %v16540_v6, %v16539_v32  ;;  %v10320_v15 = vcombine.low %v14894_v25, %v14898_v10  ;;  %v7643_v38 = vshll.u32 %v11047_v52, 16  ;;  %v16541_v43 = vld [vmem:[#allocation4_spill] sm:$0xff]  ;;  %v7590_v0 = vsel %vm13244_vm4, %v14916_v20, %v14900_v28  ;;  %v2307_v29 = vld [vmem:[%s13225_s26 + $0x248] sm:$0xe]  ;;  %v13056_v52 = vld [vmem:[%s13225_s26 + $0x244] sm:$0x1] }
 0x1e3   : > { %12227 = vmatpush3.bf16.msra.mxu0 %v16541_v43  ;;  %v7604_v24 = vsel %vm13244_vm4, %v14918_v13, %v14902_v7  ;;  %v7650_v62 = vrot.slane %v7648_v41, 4  ;;  %v7653_v40 = vrot.slane %v7651_v2, 5  ;;  %v10321_v22 = vcombine.low %v14922_v39, %v14926_v9  ;;  %v11054_v13 = vld [vmem:[%s13225_s26 + $0x120] sm:$0xf]  ;;  %v11056_v2 = vld [vmem:[%s13225_s26 + $0x128] sm:$0xf] }
 0x1e4   : > { %v14971_v17 = vsel %vm13548_vm8, %v10286_v63, %v2669_v49  ;;  %v14975_v28 = vsel %vm13548_vm8, %v10287_v44, %v2673_v19  ;;  %v7640_v61 = vor.u32 %v7639_v58, %v7636_v33  ;;  %v7618_v7 = vsel %vm13244_vm4, %v7613_v45, %v7617_v4  ;;  %v11051_v33 = vld [vmem:[%s13225_s26 + $0x114] sm:$0x1]  ;;  %v13057_v45 = vld [vmem:[%s13225_s26 + $0x24c] sm:$0x1]  ;;  %v11053_v43 = vld [vmem:[%s13225_s26 + $0x11c] sm:$0x1] }
 0x1e5   : > { %v7632_v48 = vsel %vm13244_vm4, %v7627_v1, %v7631_v37  ;;  %v7662_v21 = vshrl.u32 %v11050_v53, 16  ;;  %v7665_v20 = vshll.u32 %v11050_v53, 16  ;;  %v16542_v26 = vcombine.low %v14535_v57, %v14539_v30  ;;  %v11079_v10 = vld [vmem:[%s13225_s26 + $0x1a4] sm:$0x1] }
 0x1e6   : > { %v14988_v63 = vrot.slane %v7643_v38, 5  ;;  %v7657_v51 = vshll.u32 %v11049_v27, 16  ;;  %v10288_v49 = vrot.slane %v2306_v59, 9  ;;  %v2677_v41 = vrot.slane %v13056_v52, 5 }
 0x1e7   : > { %11865 = vmatmul.mubr.msk.bf16.gmra.mrb[32].mxu1 %vm1307_vm5, %v16542_v26  ;;  %v16543_v44 = vcombine.low %v14553_v31, %v14559_v36  ;;  %v7654_v60 = vor.u32 %v7653_v40, %v7650_v62  ;;  %v10289_v19 = vrot.slane %v2307_v29, 9  ;;  %v7676_v58 = vshrl.u32 %v11052_v55, 16  ;;  %v11057_v26 = vld [vmem:[%s13225_s26 + $0x12c] sm:$0x1] }
 0x1e8   : > { %v7679_v57 = vshll.u32 %v11052_v55, 16  ;;  %v14997_v30 = vrot.slane %v7640_v61, 4  ;;  %v2681_v4 = vrot.slane %v13057_v45, 5  ;;  %v7690_v1 = vshrl.u32 %v11054_v13, 16  ;;  %12167 = vmatmul.mubr.msk.bf16.gmra.mrb[4].mxu0 %vm1307_vm5, %v14675_v12  ;;  %v2308_v55 = vld [vmem:[%s13225_s26 + $0x250] sm:$0xe] }
 0x1e9   : > { %11868 = vmatprep.mubr.msk.bf16.mxu1 %vm1307_vm5, %v16543_v44  ;;  %v7693_v37 = vshll.u32 %v11054_v13, 16  ;;  %v7664_v32 = vrot.slane %v7662_v21, 4  ;;  %v7667_v6 = vrot.slane %v7665_v20, 5  ;;  %v7704_v27 = vshrl.u32 %v11056_v2, 16  ;;  %12170 = vmatprep.mubr.msk.bf16.mxu0 %vm1307_vm5, %v14748_v50  ;;  %v11055_v13 = vld [vmem:[%s13225_s26 + $0x124] sm:$0x1] }
 0x1ea   : > { %v7707_v31 = vshll.u32 %v11056_v2, 16  ;;  %v15002_v36 = vcombine.low %v7590_v0, %v7604_v24  ;;  %v15004_v38 = vcombine.low %v7618_v7, %v7632_v48  ;;  %v10322_v53 = vcombine.low %v14971_v17, %v14975_v28  ;;  %v11058_v0 = vld [vmem:[%s13225_s26 + $0x130] sm:$0xf]  ;;  %v15026_v7 = vld [vmem:[%s13225_s26 + $0x258] sm:$0xe] }
 0x1eb   : > { %v7671_v62 = vshll.u32 %v11051_v33, 16  ;;  %v15011_v40 = vrot.slane %v7654_v60, 4  ;;  %v15013_v59 = vrot.slane %v7657_v51, 5  ;;  %v7678_v61 = vrot.slane %v7676_v58, 4  ;;  %v11060_v44 = vld [vmem:[%s13225_s26 + $0x138] sm:$0xf] }
 0x1ec   : > { %v7681_v12 = vrot.slane %v7679_v57, 5  ;;  %v7646_v24 = vsel %vm13244_vm4, %v14997_v30, %v14988_v63  ;;  %v15022_v29 = vsel %vm13548_vm8, %v10288_v49, %v2677_v41  ;;  %v7692_v50 = vrot.slane %v7690_v1, 4  ;;  %v13058_v57 = vld [vmem:[%s13225_s26 + $0x254] sm:$0x1]  ;;  %v13059_v1 = vld [vmem:[%s13225_s26 + $0x25c] sm:$0x1] }
 0x1ed   : > { %v7695_v48 = vrot.slane %v7693_v37, 5  ;;  %v15030_v21 = vsel %vm13548_vm8, %v10289_v19, %v2681_v4  ;;  %v7668_v20 = vor.u32 %v7667_v6, %v7664_v32  ;;  %v7706_v51 = vrot.slane %v7704_v27, 4  ;;  %v11068_v63 = vld [vmem:[%s13225_s26 + $0x168] sm:$0xf]  ;;  %v11070_v30 = vld [vmem:[%s13225_s26 + $0x170] sm:$0xf] }
 0x1ee   : > { %v7709_v52 = vrot.slane %v7707_v31, 5  ;;  %v16544_v49 = vcombine.low %v14608_v5, %v14614_v54  ;;  %v15038_v41 = vrot.slane %v7671_v62, 5  ;;  %v7685_v2 = vshll.u32 %v11053_v43, 16  ;;  %v2311_v43 = vld [vmem:[%s13225_s26 + $0x268] sm:$0xe] }
 0x1ef   : > { %v7718_v60 = vshrl.u32 %v11058_v0, 16  ;;  %v7721_v19 = vshll.u32 %v11058_v0, 16  ;;  %v16545_v33 = vcombine.low %v14643_v56, %v14649_v3  ;;  %v7660_v5 = vsel %vm13244_vm4, %v15011_v40, %v15013_v59  ;;  %v2310_v56 = vld [vmem:[%s13225_s26 + $0x260] sm:$0xe]  ;;  %v11084_v17 = vld [vmem:[%s13225_s26 + $0x1b8] sm:$0xf] }
 0x1f0   : > { %11869 = vmatmul.mubr.msk.bf16.gmra.mrb[36].mxu1 %vm1307_vm5, %v16544_v49  ;;  %v7682_v54 = vor.u32 %v7681_v12, %v7678_v61  ;;  %v10290_v58 = vrot.slane %v2308_v55, 9  ;;  %v2685_v45 = vrot.slane %v13058_v57, 5  ;;  %v10291_v4 = vrot.slane %v15026_v7, 9  ;;  %12171 = vmatmul.mubr.msk.bf16.gmra.mrb[8].mxu0 %vm1307_vm5, %v14750_v16  ;;  %v11059_v12 = vld [vmem:[%s13225_s26 + $0x134] sm:$0x1] }
 0x1f1   : > { %11872 = vmatprep.mubr.msk.bf16.mxu1 %vm1307_vm5, %v16545_v33  ;;  %v2689_v37 = vrot.slane %v13059_v1, 5  ;;  %v7696_v32 = vor.u32 %v7695_v48, %v7692_v50  ;;  %v7699_v6 = vshll.u32 %v11055_v13, 16  ;;  %v7669_v3 = vrot.slane %v7668_v20, 4  ;;  %12174 = vmatprep.mubr.msk.bf16.mxu0 %vm1307_vm5, %v14834_v46  ;;  %v13060_v13 = vld [vmem:[%s13225_s26 + $0x264] sm:$0x1] }
 0x1f2   : > { %v7710_v27 = vor.u32 %v7709_v52, %v7706_v51  ;;  %v7713_v31 = vshll.u32 %v11057_v26, 16  ;;  %v7732_v62 = vshrl.u32 %v11060_v44, 16  ;;  %v7687_v61 = vrot.slane %v7685_v2, 5  ;;  %v11062_v16 = vld [vmem:[%s13225_s26 + $0x150] sm:$0xf] }
 0x1f3   : > { %v7720_v0 = vrot.slane %v7718_v60, 4  ;;  %v7723_v55 = vrot.slane %v7721_v19, 5  ;;  %v7735_v7 = vshll.u32 %v11060_v44, 16  ;;  %v7683_v50 = vrot.slane %v7682_v54, 4  ;;  %v13061_v2 = vld [vmem:[%s13225_s26 + $0x26c] sm:$0x1] }
 0x1f4   : > { %v15061_v48 = vsel %vm13548_vm8, %v10290_v58, %v2685_v45  ;;  %v10292_v20 = vrot.slane %v2310_v56, 9  ;;  %v2693_v26 = vrot.slane %v13060_v13, 5  ;;  %v7697_v51 = vrot.slane %v7696_v32, 4  ;;  %v11061_v44 = vld [vmem:[%s13225_s26 + $0x13c] sm:$0x1] }
 0x1f5   : > { %v7701_v52 = vrot.slane %v7699_v6, 5  ;;  %v10293_v49 = vrot.slane %v2311_v43, 9  ;;  %v2697_v60 = vrot.slane %v13061_v2, 5  ;;  %v7711_v19 = vrot.slane %v7710_v27, 4  ;;  %v11064_v57 = vld [vmem:[%s13225_s26 + $0x158] sm:$0xf] }
 0x1f6   : > { %v7715_v33 = vrot.slane %v7713_v31, 5  ;;  %v7727_v46 = vshll.u32 %v11059_v12, 16  ;;  %v7734_v54 = vrot.slane %v7732_v62, 4  ;;  %v16546_v58 = vcombine.low %v14689_v23, %v14693_v18  ;;  %v11063_v56 = vld [vmem:[%s13225_s26 + $0x154] sm:$0x1] }
 0x1f7   : > { %v7724_v45 = vor.u32 %v7723_v55, %v7720_v0  ;;  %v7737_v1 = vrot.slane %v7735_v7, 5  ;;  %v7746_v32 = vshrl.u32 %v11062_v16, 16  ;;  %v7749_v6 = vshll.u32 %v11062_v16, 16  ;;  %v11067_v16 = vld [vmem:[%s13225_s26 + $0x164] sm:$0x1] }
 0x1f8   : > { %11873 = vmatmul.mubr.msk.bf16.gmra.mrb[40].mxu1 %vm1307_vm5, %v16546_v58  ;;  %v16547_v43 = vcombine.low %v14723_v42, %v14734_v11  ;;  %v7674_v27 = vsel %vm13244_vm4, %v7669_v3, %v15038_v41  ;;  %v7688_v31 = vsel %vm13244_vm4, %v7683_v50, %v7687_v61  ;;  %v15084_v23 = vsel %vm13548_vm8, %v10291_v4, %v2689_v37  ;;  %v11065_v41 = vld [vmem:[%s13225_s26 + $0x15c] sm:$0x1] }
 0x1f9   : > { %v15088_v18 = vsel %vm13548_vm8, %v10292_v20, %v2693_v26  ;;  %v7702_v42 = vsel %vm13244_vm4, %v7697_v51, %v7701_v52  ;;  %v15094_v11 = vsel %vm13548_vm8, %v10293_v49, %v2697_v60  ;;  %v7760_v3 = vshrl.u32 %v11064_v57, 16  ;;  %12175 = vmatmul.mubr.msk.bf16.gmra.mrb[12].mxu0 %vm1307_vm5, %v14844_v47  ;;  %v11066_v20 = vld [vmem:[%s13225_s26 + $0x160] sm:$0xf]  ;;  %v11072_v60 = vld [vmem:[%s13225_s26 + $0x178] sm:$0xf] }
 0x1fa   : > { %11876 = vmatprep.mubr.msk.bf16.mxu1 %vm1307_vm5, %v16547_v43  ;;  %v7763_v62 = vshll.u32 %v11064_v57, 16  ;;  %v7716_v4 = vsel %vm13244_vm4, %v7711_v19, %v7715_v33  ;;  %v15099_v37 = vrot.slane %v7727_v46, 5  ;;  %v7741_v61 = vshll.u32 %v11061_v44, 16  ;;  %12178 = vmatprep.mubr.msk.bf16.mxu0 %vm1307_vm5, %v14947_v14  ;;  %v16548_v44 = vld [vmem:[#allocation15_spill] sm:$0xff]  ;;  %v16549_v19 = vld [vmem:[#allocation16_spill] sm:$0xff] }
 0x1fb   : > { %v7755_v12 = vshll.u32 %v11063_v56, 16  ;;  %v15103_v0 = vrot.slane %v7724_v45, 4  ;;  %v7738_v55 = vor.u32 %v7737_v1, %v7734_v54  ;;  %v7748_v7 = vrot.slane %v7746_v32, 4  ;;  %v11074_v45 = vld [vmem:[%s13225_s26 + $0x180] sm:$0xf]  ;;  %v16551_v1 = vld [vmem:[#allocation17_spill] sm:$0xff] }
 0x1fc   : > { %v7751_v50 = vrot.slane %v7749_v6, 5  ;;  %v15118_v47 = vcombine.low %v7646_v24, %v7660_v5  ;;  %v7769_v14 = vshll.u32 %v11065_v41, 16  ;;  %v15125_v51 = vcombine.low %v7674_v27, %v7688_v31  ;;  %v16552_v56 = vld [vmem:[#allocation18_spill] sm:$0xff] }
 0x1fd   : > { %v7762_v59 = vrot.slane %v7760_v3, 4  ;;  %v7765_v52 = vrot.slane %v7763_v62, 5  ;;  %v15131_v24 = vcombine.low %v7702_v42, %v7716_v4  ;;  %v15133_v5 = vrot.slane %v7741_v61, 5  ;;  %v11076_v42 = vld [vmem:[%s13225_s26 + $0x188] sm:$0xf] }
 0x1fe   : > { %v15135_v49 = vrot.slane %v7755_v12, 5  ;;  %v7774_v2 = vshrl.u32 %v11066_v20, 16  ;;  %v16550_v33 = vcombine.low %v16548_v44, %v16549_v19  ;;  %v7730_v46 = vsel %vm13244_vm4, %v15103_v0, %v15099_v37  ;;  %v11069_v3 = vld [vmem:[%s13225_s26 + $0x16c] sm:$0x1]  ;;  %v11073_v19 = vld [vmem:[%s13225_s26 + $0x17c] sm:$0x1] }
 0x1ff   : > { %v15146_v54 = vrot.slane %v7738_v55, 4  ;;  %v7752_v57 = vor.u32 %v7751_v50, %v7748_v7  ;;  %v7777_v58 = vshll.u32 %v11066_v20, 16  ;;  %v16553_v32 = vcombine.low %v16551_v1, %v16552_v56  ;;  %v11092_v37 = vld [vmem:[%s13225_s26 + $0x1d8] sm:$0xf] }
 0x200   : > { %11877 = vmatmul.mubr.msk.bf16.gmra.mrb[44].mxu1 %vm1307_vm5, %v16550_v33  ;;  %v15153_v6 = vrot.slane %v7769_v14, 5  ;;  %v7783_v43 = vshll.u32 %v11067_v16, 16  ;;  %v7788_v27 = vshrl.u32 %v11068_v63, 16  ;;  %v7791_v31 = vshll.u32 %v11068_v63, 16  ;;  %v11071_v16 = vld [vmem:[%s13225_s26 + $0x174] sm:$0x1] }
 0x201   : > { %11880 = vmatprep.mubr.msk.bf16.mxu1 %vm1307_vm5, %v16553_v32  ;;  %v7766_v41 = vor.u32 %v7765_v52, %v7762_v59  ;;  %v7802_v62 = vshrl.u32 %v11070_v30, 16  ;;  %v7805_v4 = vshll.u32 %v11070_v30, 16  ;;  %v7816_v61 = vshrl.u32 %v11072_v60, 16  ;;  %12179 = vmatmul.mubr.msk.bf16.gmra.mrb[16].mxu0 %vm1307_vm5, %v14949_v34  ;;  %v11078_v59 = vld [vmem:[%s13225_s26 + $0x1a0] sm:$0xf] }
 0x202   : > { %v7776_v12 = vrot.slane %v7774_v2, 4  ;;  %v7819_v55 = vshll.u32 %v11072_v60, 16  ;;  %v7830_v7 = vshrl.u32 %v11074_v45, 16  ;;  %v7833_v50 = vshll.u32 %v11074_v45, 16  ;;  %12182 = vmatprep.mubr.msk.bf16.mxu0 %vm1307_vm5, %v15002_v36  ;;  %v11075_v45 = vld [vmem:[%s13225_s26 + $0x184] sm:$0x1] }
 0x203   : > { %v15159_v20 = vrot.slane %v7752_v57, 4  ;;  %v7779_v14 = vrot.slane %v7777_v58, 5  ;;  %v7844_v63 = vshrl.u32 %v11076_v42, 16  ;;  %v7847_v44 = vshll.u32 %v11076_v42, 16  ;;  %v11080_v42 = vld [vmem:[%s13225_s26 + $0x1a8] sm:$0xf] }
 0x204   : > { %v15165_v52 = vrot.slane %v7783_v43, 5  ;;  %v7790_v30 = vrot.slane %v7788_v27, 4  ;;  %v7793_v2 = vrot.slane %v7791_v31, 5  ;;  %v7797_v60 = vshll.u32 %v11069_v3, 16  ;;  %v16554_v36 = vld [vmem:[#allocation6_spill] sm:$0xff]  ;;  %v16555_v43 = vld [vmem:[#allocation19_spill] sm:$0xff] }
 0x205   : > { %v15168_v34 = vrot.slane %v7766_v41, 4  ;;  %v7804_v33 = vrot.slane %v7802_v62, 4  ;;  %v7807_v57 = vrot.slane %v7805_v4, 5  ;;  %v7818_v58 = vrot.slane %v7816_v61, 4  ;;  %v11077_v31 = vld [vmem:[%s13225_s26 + $0x18c] sm:$0x1] }
 0x206   : > { %v7821_v1 = vrot.slane %v7819_v55, 5  ;;  %v7832_v56 = vrot.slane %v7830_v7, 4  ;;  %v7835_v32 = vrot.slane %v7833_v50, 5  ;;  %v7858_v40 = vshrl.u32 %v11078_v59, 16  ;;  %v11082_v7 = vld [vmem:[%s13225_s26 + $0x1b0] sm:$0xf] }
 0x207   : > { %v16556_v26 = vcombine.low %v16554_v36, %v16555_v43  ;;  %v7780_v27 = vor.u32 %v7779_v14, %v7776_v12  ;;  %v7846_v3 = vrot.slane %v7844_v63, 4  ;;  %v7849_v41 = vrot.slane %v7847_v44, 5  ;;  %v11083_v43 = vld [vmem:[%s13225_s26 + $0x1b4] sm:$0x1] }
 0x208   : > { %v7861_v13 = vshll.u32 %v11078_v59, 16  ;;  %v7794_v62 = vor.u32 %v7793_v2, %v7790_v30  ;;  %v15181_v4 = vrot.slane %v7797_v60, 5  ;;  %v7811_v61 = vshll.u32 %v11071_v16, 16 }
 0x209   : > { %11881 = vmatmul.mubr.msk.bf16.gmra.mrb[48].mxu1 %vm1307_vm5, %v16556_v26  ;;  %v7825_v55 = vshll.u32 %v11073_v19, 16  ;;  %v7808_v50 = vor.u32 %v7807_v57, %v7804_v33  ;;  %v7839_v36 = vshll.u32 %v11075_v45, 16  ;;  %v7872_v26 = vshrl.u32 %v11080_v42, 16  ;;  %12183 = vmatmul.mubr.msk.bf16.gmra.mrb[20].mxu0 %vm1307_vm5, %v15004_v38 }
 0x20a   : > { %11884 = vmatprep.mubr.msk.bf16.mxu1 %vm1307_vm5, %v10320_v15  ;;  %v7875_v12 = vshll.u32 %v11080_v42, 16  ;;  %v7822_v14 = vor.u32 %v7821_v1, %v7818_v58  ;;  %v7836_v63 = vor.u32 %v7835_v32, %v7832_v56  ;;  %v7853_v44 = vshll.u32 %v11077_v31, 16  ;;  %12186 = vmatprep.mubr.msk.bf16.mxu0 %vm1307_vm5, %v15118_v47  ;;  %v11081_v32 = vld [vmem:[%s13225_s26 + $0x1ac] sm:$0x1] }
 0x20b   : > { %v7860_v59 = vrot.slane %v7858_v40, 4  ;;  %v7850_v25 = vor.u32 %v7849_v41, %v7846_v3  ;;  %v7863_v15 = vrot.slane %v7861_v13, 5  ;;  %v7886_v30 = vshrl.u32 %v11082_v7, 16 }
 0x20c   : > { %v7889_v2 = vshll.u32 %v11082_v7, 16  ;;  %v7781_v16 = vrot.slane %v7780_v27, 4  ;;  %v7795_v60 = vrot.slane %v7794_v62, 4  ;;  %v7813_v19 = vrot.slane %v7811_v61, 5  ;;  %v11087_v7 = vld [vmem:[%s13225_s26 + $0x1c4] sm:$0x1] }
 0x20d   : > { %v7827_v33 = vrot.slane %v7825_v55, 5  ;;  %v7809_v57 = vrot.slane %v7808_v50, 4  ;;  %v7841_v58 = vrot.slane %v7839_v36, 5  ;;  %v7874_v40 = vrot.slane %v7872_v26, 4 }
 0x20e   : > { %v7877_v45 = vrot.slane %v7875_v12, 5  ;;  %v7823_v1 = vrot.slane %v7822_v14, 4  ;;  %v7837_v38 = vrot.slane %v7836_v63, 4  ;;  %v7855_v56 = vrot.slane %v7853_v44, 5 }
 0x20f   : > { %v7867_v13 = vshll.u32 %v11079_v10, 16  ;;  %v7851_v47 = vrot.slane %v7850_v25, 4  ;;  %v7864_v42 = vor.u32 %v7863_v15, %v7860_v59  ;;  %v7888_v27 = vrot.slane %v7886_v30, 4  ;;  %v11088_v59 = vld [vmem:[%s13225_s26 + $0x1c8] sm:$0xf] }
 0x210   : > { %v7891_v31 = vrot.slane %v7889_v2, 5  ;;  %v7744_v3 = vsel %vm13244_vm4, %v15146_v54, %v15133_v5  ;;  %v7758_v39 = vsel %vm13244_vm4, %v15159_v20, %v15135_v49  ;;  %v7772_v9 = vsel %vm13244_vm4, %v15168_v34, %v15153_v6  ;;  %v11086_v54 = vld [vmem:[%s13225_s26 + $0x1c0] sm:$0xf]  ;;  %v11090_v30 = vld [vmem:[%s13225_s26 + $0x1d0] sm:$0xf] }
 0x211   : > { %11885 = vmatmul.mubr.msk.bf16.gmra.mrb[52].mxu1 %vm1307_vm5, %v10321_v22  ;;  %v7786_v22 = vsel %vm13244_vm4, %v7781_v16, %v15165_v52  ;;  %v7800_v28 = vsel %vm13244_vm4, %v7795_v60, %v15181_v4  ;;  %v7878_v5 = vor.u32 %v7877_v45, %v7874_v40  ;;  %v7881_v49 = vshll.u32 %v11081_v32, 16  ;;  %12187 = vmatmul.mubr.msk.bf16.gmra.mrb[24].mxu0 %vm1307_vm5, %v15125_v51  ;;  %v11085_v4 = vld [vmem:[%s13225_s26 + $0x1bc] sm:$0x1]  ;;  %v11096_v40 = vld [vmem:[%s13225_s26 + $0x1f8] sm:$0xf] }
 0x212   : > { %11888 = vmatprep.mubr.msk.bf16.mxu1 %vm1307_vm5, %v10322_v53  ;;  %v7814_v53 = vsel %vm13244_vm4, %v7809_v57, %v7813_v19  ;;  %v7828_v20 = vsel %vm13244_vm4, %v7823_v1, %v7827_v33  ;;  %v7842_v6 = vsel %vm13244_vm4, %v7837_v38, %v7841_v58  ;;  %v7869_v34 = vrot.slane %v7867_v13, 5  ;;  %12190 = vmatprep.mubr.msk.bf16.mxu0 %vm1307_vm5, %v15131_v24  ;;  %v11094_v19 = vld [vmem:[%s13225_s26 + $0x1f0] sm:$0xf]  ;;  %v11089_v13 = vld [vmem:[%s13225_s26 + $0x1cc] sm:$0x1] }
 0x213   : > { %v7895_v52 = vshll.u32 %v11083_v43, 16  ;;  %v7856_v41 = vsel %vm13244_vm4, %v7851_v47, %v7855_v56  ;;  %v7865_v62 = vrot.slane %v7864_v42, 4  ;;  %v7892_v61 = vor.u32 %v7891_v31, %v7888_v27 }
 0x214   : > { %v7900_v55 = vshrl.u32 %v11084_v17, 16  ;;  %v11141_v51 = vcombine.low %v7730_v46, %v7744_v3  ;;  %v7903_v50 = vshll.u32 %v11084_v17, 16  ;;  %v7914_v36 = vshrl.u32 %v11086_v54, 16  ;;  %v11098_v3 = vld [vmem:[%s13225_s26 + $0x200] sm:$0xf] }
 0x215   : > { %v7917_v26 = vshll.u32 %v11086_v54, 16  ;;  %v11142_v12 = vcombine.low %v7758_v39, %v7772_v9  ;;  %v15238_v14 = vcombine.low %v7786_v22, %v7800_v28  ;;  %v7879_v63 = vrot.slane %v7878_v5, 4  ;;  %v12880_v39 = vld [vmem:[%s13225_s26 + $0x8] ss:$8 sps:$4 sm:$0xff]  }
 0x216   : > { %v7883_v44 = vrot.slane %v7881_v49, 5  ;;  %v15241_v25 = vcombine.low %v7814_v53, %v7828_v20  ;;  %v15243_v10 = vcombine.low %v7842_v6, %v7856_v41  ;;  %v7909_v24 = vshll.u32 %v11085_v4, 16  ;;  %v11091_v53 = vld [vmem:[%s13225_s26 + $0x1d4] sm:$0x1]  ;;  %v11100_v6 = vld [vmem:[%s13225_s26 + $0x208] sm:$0xf] }
 0x217   : > { %v7923_v15 = vshll.u32 %v11087_v7, 16  ;;  %v16557_v0 = vcombine.low %v15022_v29, %v15030_v21  ;;  %v7870_v46 = vsel %vm13244_vm4, %v7865_v62, %v7869_v34  ;;  %v15253_v2 = vrot.slane %v7892_v61, 4  ;;  %v11093_v34 = vld [vmem:[%s13225_s26 + $0x1dc] sm:$0x1] }
 0x218   : > { %v15255_v16 = vrot.slane %v7895_v52, 5  ;;  %v7902_v60 = vrot.slane %v7900_v55, 4  ;;  %v16558_v33 = vcombine.low %v15061_v48, %v15084_v23  ;;  %v7905_v57 = vrot.slane %v7903_v50, 5  ;;  %v11095_v55 = vld [vmem:[%s13225_s26 + $0x1f4] sm:$0x1] }
 0x219   : > { %11889 = vmatmul.mubr.msk.bf16.gmra.mrb[56].mxu1 %vm1307_vm5, %v16557_v0  ;;  %v7916_v58 = vrot.slane %v7914_v36, 4  ;;  %v7919_v29 = vrot.slane %v7917_v26, 5  ;;  %v7928_v21 = vshrl.u32 %v11088_v59, 16  ;;  %v7884_v45 = vsel %vm13244_vm4, %v7879_v63, %v7883_v44  ;;  %12191 = vmatmul.mubr.msk.bf16.gmra.mrb[28].mxu0 %vm1307_vm5, %v11141_v51  ;;  %v11097_v63 = vld [vmem:[%s13225_s26 + $0x1fc] sm:$0x1] }
 0x21a   : > { %11892 = vmatprep.mubr.msk.bf16.mxu1 %vm1307_vm5, %v16558_v33  ;;  %v7931_v1 = vshll.u32 %v11088_v59, 16  ;;  %v7942_v38 = vshrl.u32 %v11090_v30, 16  ;;  %v7945_v56 = vshll.u32 %v11090_v30, 16  ;;  %v15265_v32 = vrot.slane %v7909_v24, 5  ;;  %12194 = vmatprep.mubr.msk.bf16.mxu0 %vm1307_vm5, %v11142_v12  ;;  %v11102_v30 = vld [vmem:[%s13225_s26 + $0x210] sm:$0xf] }
 0x21b   : > { %v15268_v48 = vrot.slane %v7923_v15, 5  ;;  %v7956_v23 = vshrl.u32 %v11092_v37, 16  ;;  %v7959_v47 = vshll.u32 %v11092_v37, 16  ;;  %v7970_v42 = vshrl.u32 %v11094_v19, 16  ;;  %v12881_v37 = vld [vmem:[%s13225_s26 + $0x18] ss:$8 sps:$4 sm:$0xff]  }
 0x21c   : > { %v7973_v43 = vshll.u32 %v11094_v19, 16  ;;  %v7984_v27 = vshrl.u32 %v11096_v40, 16  ;;  %v7987_v31 = vshll.u32 %v11096_v40, 16  ;;  %v15274_v9 = vcombine.low %v7870_v46, %v7884_v45  ;;  %v12882_v33 = vld [vmem:[%s13225_s26 + $0x28] ss:$8 sps:$4 sm:$0xff]  }
 0x21d   : > { %v7906_v22 = vor.u32 %v7905_v57, %v7902_v60  ;;  %v7920_v17 = vor.u32 %v7919_v29, %v7916_v58  ;;  %v7930_v28 = vrot.slane %v7928_v21, 4  ;;  %v7933_v5 = vrot.slane %v7931_v1, 5  ;;  %v11099_v40 = vld [vmem:[%s13225_s26 + $0x204] sm:$0x1]  ;;  %v11101_v45 = vld [vmem:[%s13225_s26 + $0x20c] sm:$0x1] }
 0x21e   : > { %v7937_v49 = vshll.u32 %v11089_v13, 16  ;;  %v7944_v54 = vrot.slane %v7942_v38, 4  ;;  %v7947_v20 = vrot.slane %v7945_v56, 5  ;;  %v7958_v52 = vrot.slane %v7956_v23, 4 }
 0x21f   : > { %v7961_v41 = vrot.slane %v7959_v47, 5  ;;  %v7998_v62 = vshrl.u32 %v11098_v3, 16  ;;  %v8001_v4 = vshll.u32 %v11098_v3, 16  ;;  %v16559_v61 = vcombine.low %v15088_v18, %v15094_v11 }
 0x220   : > { %v7972_v7 = vrot.slane %v7970_v42, 4  ;;  %v7975_v51 = vrot.slane %v7973_v43, 5  ;;  %v7986_v50 = vrot.slane %v7984_v27, 4  ;;  %v7989_v36 = vrot.slane %v7987_v31, 5 }
 0x221   : > { %11893 = vmatmul.mubr.msk.bf16.gmra.mrb[60].mxu1 %vm1307_vm5, %v16559_v61  ;;  %v15285_v26 = vrot.slane %v7906_v22, 4  ;;  %v7951_v12 = vshll.u32 %v11091_v53, 16  ;;  %v8012_v44 = vshrl.u32 %v11100_v6, 16  ;;  %v8015_v59 = vshll.u32 %v11100_v6, 16  ;;  %12195 = vmatmul.mubr.msk.bf16.gmra.mrb[32].mxu0 %vm1307_vm5, %v15238_v14  ;;  %v16560_v53 = vld [vmem:[#allocation2_spill] sm:$0xff] }
 0x222   : > { %11898 = vmatprep.mubr.msk.bf16.mxu1 %vm1307_vm5, %v12880_v39  ;;  %v15288_v24 = vrot.slane %v7920_v17, 4  ;;  %v7934_v18 = vor.u32 %v7933_v5, %v7930_v28  ;;  %v7948_v11 = vor.u32 %v7947_v20, %v7944_v54  ;;  %v7965_v15 = vshll.u32 %v11093_v34, 16  ;;  %12198 = vmatprep.mubr.msk.bf16.mxu0 %vm1307_vm5, %v15241_v25  ;;  %v11103_v28 = vld [vmem:[%s13225_s26 + $0x214] sm:$0x1]  ;;  %v11104_v54 = vld [vmem:[%s13225_s26 + $0x218] sm:$0xf] }
 0x223   : > { %v7962_v0 = vor.u32 %v7961_v41, %v7958_v52  ;;  %v7979_v46 = vshll.u32 %v11095_v55, 16  ;;  %v8000_v60 = vrot.slane %v7998_v62, 4  ;;  %v8003_v19 = vrot.slane %v8001_v4, 5  ;;  %v12883_v34 = vld [vmem:[%s13225_s26 + $0x38] ss:$8 sps:$4 sm:$0xff]  }
 0x224   : > { %v7939_v57 = vrot.slane %v7937_v49, 5  ;;  %v7976_v58 = vor.u32 %v7975_v51, %v7972_v7  ;;  %v7990_v29 = vor.u32 %v7989_v36, %v7986_v50  ;;  %v7993_v21 = vshll.u32 %v11097_v63, 16  ;;  %v11106_v62 = vld [vmem:[%s13225_s26 + $0x220] sm:$0xf]  ;;  %v11105_v36 = vld [vmem:[%s13225_s26 + $0x21c] sm:$0x1] }
 0x225   : > { %v8014_v1 = vrot.slane %v8012_v44, 4  ;;  %v8017_v38 = vrot.slane %v8015_v59, 5  ;;  %v8026_v56 = vshrl.u32 %v11102_v30, 16  ;;  %v8029_v13 = vshll.u32 %v11102_v30, 16  ;;  %v12884_v4 = vld [vmem:[%s13225_s26 + $0x58] ss:$8 sps:$4 sm:$0xff]  }
 0x226   : > { %v7935_v23 = vrot.slane %v7934_v18, 4  ;;  %v7949_v47 = vrot.slane %v7948_v11, 4  ;;  %v7953_v42 = vrot.slane %v7951_v12, 5  ;;  %v7967_v14 = vrot.slane %v7965_v15, 5  ;;  %v11107_v12 = vld [vmem:[%s13225_s26 + $0x224] sm:$0x1] }
 0x227   : > { %v7963_v43 = vrot.slane %v7962_v0, 4  ;;  %v7981_v27 = vrot.slane %v7979_v46, 5  ;;  %v8004_v31 = vor.u32 %v8003_v19, %v8000_v60  ;;  %v8007_v3 = vshll.u32 %v11099_v40, 16  ;;  %v16561_v18 = vld [vmem:[#allocation3_spill] sm:$0xff]  ;;  %v11110_v46 = vld [vmem:[%s13225_s26 + $0x240] sm:$0xf] }
 0x228   : > { %v7977_v39 = vrot.slane %v7976_v58, 4  ;;  %v7991_v25 = vrot.slane %v7990_v29, 4  ;;  %v7995_v22 = vrot.slane %v7993_v21, 5  ;;  %v8021_v17 = vshll.u32 %v11101_v45, 16  ;;  %v10554_v58 = vld [vmem:[%s13225_s26 + $0x158] sm:$0xf] }
 0x229   : > { %11899 = vmatmul.mubr.msk.bf16.vlgmr.msra.gmra.mrb[0].mxu1 %vm1307_vm5, %v12881_v37  ;;  %v7898_v5 = vsel %vm13244_vm4, %v15253_v2, %v15255_v16  ;;  %v8018_v49 = vor.u32 %v8017_v38, %v8014_v1  ;;  %v8028_v20 = vrot.slane %v8026_v56, 4  ;;  %v8031_v6 = vrot.slane %v8029_v13, 5  ;;  %12199 = vmatmul.mubr.msk.bf16.gmra.mrb[36].mxu0 %vm1307_vm5, %v15243_v10  ;;  %v11108_v10 = vld [vmem:[%s13225_s26 + $0x228] sm:$0xf]  ;;  %v10556_v1 = vld [vmem:[%s13225_s26 + $0x160] sm:$0xf] }
 0x22a   : > { %12293 = vmatpush3.bf16.msra.mxu1 %v16560_v53  ;;  %11902 = vmatprep.mubr.msk.bf16.mxu1 %vm1307_vm5, %v12882_v33  ;;  %v7912_v52 = vsel %vm13244_vm4, %v15285_v26, %v15265_v32  ;;  %v7926_v41 = vsel %vm13244_vm4, %v15288_v24, %v15268_v48  ;;  %v7940_v2 = vsel %vm13244_vm4, %v7935_v23, %v7939_v57  ;;  %v15325_v55 = vrot.slane %v8004_v31, 4  ;;  %v11112_v57 = vld [vmem:[%s13225_s26 + $0x248] sm:$0xf] }
 0x22b   : > { %v7954_v16 = vsel %vm13244_vm4, %v7949_v47, %v7953_v42  ;;  %v7968_v61 = vsel %vm13244_vm4, %v7963_v43, %v7967_v14  ;;  %v15327_v32 = vrot.slane %v8007_v3, 5  ;;  %v8035_v7 = vshll.u32 %v11103_v28, 16  ;;  %12202 = vmatprep.mubr.msk.bf16.mxu0 %vm1307_vm5, %v15274_v9 }
 0x22c   : > { %v7982_v48 = vsel %vm13244_vm4, %v7977_v39, %v7981_v27  ;;  %v7996_v51 = vsel %vm13244_vm4, %v7991_v25, %v7995_v22  ;;  %v8023_v50 = vrot.slane %v8021_v17, 5  ;;  %v8040_v26 = vshrl.u32 %v11104_v54, 16  ;;  %v12885_v25 = vld [vmem:[%s13225_s26 + $0x68] ss:$8 sps:$4 sm:$0xff]  }
 0x22d   : > { %v8019_v63 = vrot.slane %v8018_v49, 4  ;;  %v8032_v44 = vor.u32 %v8031_v6, %v8028_v20  ;;  %v8043_v59 = vshll.u32 %v11104_v54, 16  ;;  %v8054_v24 = vshrl.u32 %v11106_v62, 16 }
 0x22e   : > { %v16562_v11 = vshll.u32 %v16561_v18, 16  ;;  %v11147_v30 = vcombine.low %v7898_v5, %v7912_v52  ;;  %v11148_v37 = vcombine.low %v7926_v41, %v7940_v2  ;;  %v8057_v0 = vshll.u32 %v11106_v62, 16  ;;  %v12886_v5 = vld [vmem:[%s13225_s26 + $0x78] ss:$8 sps:$4 sm:$0xff]   ;;  %v11111_v2 = vld [vmem:[%s13225_s26 + $0x244] sm:$0x1] }
 0x22f   : > { %v15345_v60 = vcombine.low %v7954_v16, %v7968_v61  ;;  %v15347_v19 = vcombine.low %v7982_v48, %v7996_v51  ;;  %v8010_v9 = vsel %vm13244_vm4, %v15325_v55, %v15327_v32  ;;  %v15353_v33 = vrot.slane %v8035_v7, 5  ;;  %v11113_v55 = vld [vmem:[%s13225_s26 + $0x24c] sm:$0x1] }
 0x230   : > { %v15342_v15 = vrot.slane %v16562_v11, 5  ;;  %v8042_v29 = vrot.slane %v8040_v26, 4  ;;  %v8049_v21 = vshll.u32 %v11105_v36, 16  ;;  %v8063_v40 = vshll.u32 %v11107_v12, 16  ;;  %v11118_v11 = vld [vmem:[%s13225_s26 + $0x260] sm:$0xf] }
 0x231   : > { %11903 = vmatmul.mubr.msk.bf16.gmra.mrb[4].mxu1 %vm1307_vm5, %v12883_v34  ;;  %v8068_v45 = vshrl.u32 %v11108_v10, 16  ;;  %v8024_v38 = vsel %vm13244_vm4, %v8019_v63, %v8023_v50  ;;  %v15362_v56 = vrot.slane %v8032_v44, 4  ;;  %v8045_v13 = vrot.slane %v8043_v59, 5  ;;  %12203 = vmatmul.mubr.msk.bf16.gmra.mrb[40].mxu0 %vm1307_vm5, %v11147_v30  ;;  %v11109_v34 = vld [vmem:[%s13225_s26 + $0x22c] sm:$0x1]  ;;  %v16563_v30 = vld [vmem:[#allocation5_spill] sm:$0xff] }
 0x232   : > { %11906 = vmatprep.mubr.msk.bf16.mxu1 %vm1307_vm5, %v12884_v4  ;;  %v8056_v23 = vrot.slane %v8054_v24, 4  ;;  %v8059_v47 = vrot.slane %v8057_v0, 5  ;;  %v8071_v42 = vshll.u32 %v11108_v10, 16  ;;  %v4529_v14 = vshrl.u32 %v10554_v58, 16  ;;  %12206 = vmatprep.mubr.msk.bf16.mxu0 %vm1307_vm5, %v11148_v37  ;;  %v11114_v50 = vld [vmem:[%s13225_s26 + $0x250] sm:$0xf] }
 0x233   : > { %v4532_v43 = vshll.u32 %v10554_v58, 16  ;;  %v8082_v27 = vshrl.u32 %v11110_v46, 16  ;;  %v8085_v31 = vshll.u32 %v11110_v46, 16  ;;  %v8096_v3 = vshrl.u32 %v11112_v57, 16  ;;  %v11116_v10 = vld [vmem:[%s13225_s26 + $0x258] sm:$0xf] }
 0x234   : > { %v4543_v39 = vshrl.u32 %v10556_v1, 16  ;;  %v8099_v22 = vshll.u32 %v11112_v57, 16  ;;  %v4531_v17 = vrot.slane %v4529_v14, 4  ;;  %v4546_v53 = vshll.u32 %v10556_v1, 16 }
 0x235   : > { %v4534_v28 = vrot.slane %v4532_v43, 5  ;;  %v8046_v49 = vor.u32 %v8045_v13, %v8042_v29  ;;  %v15368_v54 = vrot.slane %v8049_v21, 5  ;;  %v8070_v20 = vrot.slane %v8068_v45, 4  ;;  %v11120_v29 = vld [vmem:[%s13225_s26 + $0x268] sm:$0xf] }
 0x236   : > { %v4545_v6 = vrot.slane %v4543_v39, 4  ;;  %v8060_v52 = vor.u32 %v8059_v47, %v8056_v23  ;;  %v8073_v41 = vrot.slane %v8071_v42, 5  ;;  %v4548_v62 = vrot.slane %v4546_v53, 5  ;;  %v11115_v39 = vld [vmem:[%s13225_s26 + $0x254] sm:$0x1] }
 0x237   : > { %v4535_v16 = vor.u32 %v4534_v28, %v4531_v17  ;;  %v15372_v4 = vcombine.low %v8010_v9, %v8024_v38  ;;  %v15374_v61 = vrot.slane %v8063_v40, 5  ;;  %v8084_v32 = vrot.slane %v8082_v27, 4  ;;  %v12888_v38 = vld [vmem:[%s13225_s26 + $0xa8] ss:$8 sps:$4 sm:$0xff]   ;;  %v11117_v53 = vld [vmem:[%s13225_s26 + $0x25c] sm:$0x1] }
 0x238   : > { %v8087_v7 = vrot.slane %v8085_v31, 5  ;;  %v8098_v48 = vrot.slane %v8096_v3, 4  ;;  %v8101_v51 = vrot.slane %v8099_v22, 5  ;;  %v4549_v26 = vor.u32 %v4548_v62, %v4545_v6  ;;  %v11119_v62 = vld [vmem:[%s13225_s26 + $0x264] sm:$0x1] }
 0x239   : > { %11907 = vmatmul.mubr.msk.bf16.gmra.mrb[8].mxu1 %vm1307_vm5, %v12885_v25  ;;  %v4536_v36 = vrot.slane %v4535_v16, 4  ;;  %v8038_v12 = vsel %vm13244_vm4, %v15362_v56, %v15353_v33  ;;  %v8047_v63 = vrot.slane %v8046_v49, 4  ;;  %v8077_v44 = vshll.u32 %v11109_v34, 16  ;;  %v12887_v33 = vld [vmem:[%s13225_s26 + $0x88] ss:$8 sps:$4 sm:$0xff]   ;;  %12207 = vmatmul.mubr.msk.bf16.gmra.mrb[44].mxu0 %vm1307_vm5, %v15345_v60 }
 0x23a   : > { %11910 = vmatprep.mubr.msk.bf16.mxu1 %vm1307_vm5, %v12886_v5  ;;  %v8091_v59 = vshll.u32 %v11111_v2, 16  ;;  %v15385_v24 = vrot.slane %v8060_v52, 4  ;;  %v8074_v18 = vor.u32 %v8073_v41, %v8070_v20  ;;  %v4550_v0 = vrot.slane %v4549_v26, 4  ;;  %12210 = vmatprep.mubr.msk.bf16.mxu0 %vm1307_vm5, %v15347_v19  ;;  %v11122_v5 = vld [vmem:[%s13225_s26 + $0x270] sm:$0xf] }
 0x23b   : > { %v4541_v37 = vsel %vm13244_vm4, %v4536_v36, %v16563_v30  ;;  %v8088_v46 = vor.u32 %v8087_v7, %v8084_v32  ;;  %v8105_v9 = vshll.u32 %v11113_v55, 16  ;;  %v8110_v57 = vshrl.u32 %v11114_v50, 16  ;;  %v11124_v34 = vld [vmem:[%s13225_s26 + $0x278] sm:$0xf]  ;;  %v11121_v55 = vld [vmem:[%s13225_s26 + $0x26c] sm:$0x1] }
 0x23c   : > { %v8113_v58 = vshll.u32 %v11114_v50, 16  ;;  %v8102_v21 = vor.u32 %v8101_v51, %v8098_v48  ;;  %v8124_v40 = vshrl.u32 %v11116_v10, 16  ;;  %v8127_v45 = vshll.u32 %v11116_v10, 16  ;;  %v12889_v32 = vld [vmem:[%s13225_s26 + $0xb8] ss:$8 sps:$4 sm:$0xff]  }
 0x23d   : > { %v4555_v1 = vsel %vm13244_vm4, %v4550_v0, %v15342_v15  ;;  %v8052_v56 = vsel %vm13244_vm4, %v8047_v63, %v15368_v54  ;;  %v8079_v13 = vrot.slane %v8077_v44, 5  ;;  %v8093_v23 = vrot.slane %v8091_v59, 5 }
 0x23e   : > { %v15404_v47 = vcombine.low %v4541_v37, %v4555_v1  ;;  %v8138_v60 = vshrl.u32 %v11118_v11, 16  ;;  %v8141_v42 = vshll.u32 %v11118_v11, 16  ;;  %v8152_v14 = vshrl.u32 %v11120_v29, 16  ;;  %v11125_v1 = vld [vmem:[%s13225_s26 + $0x27c] sm:$0x1] }
 0x23f   : > { %v8155_v43 = vshll.u32 %v11120_v29, 16  ;;  %v8075_v15 = vrot.slane %v8074_v18, 4  ;;  %v8089_v27 = vrot.slane %v8088_v46, 4  ;;  %v8107_v31 = vrot.slane %v8105_v9, 5  ;;  %v11123_v46 = vld [vmem:[%s13225_s26 + $0x274] sm:$0x1] }
 0x240   : > { %v8112_v3 = vrot.slane %v8110_v57, 4  ;;  %v8103_v19 = vrot.slane %v8102_v21, 4  ;;  %v8115_v25 = vrot.slane %v8113_v58, 5  ;;  %v8126_v22 = vrot.slane %v8124_v40, 4 }
 0x241   : > { %11911 = vmatmul.mubr.msk.bf16.gmra.mrb[12].mxu1 %vm1307_vm5, %v12887_v33  ;;  %v8129_v17 = vrot.slane %v8127_v45, 5  ;;  %v11152_v28 = vcombine.low %v8038_v12, %v8052_v56  ;;  %v8140_v49 = vrot.slane %v8138_v60, 4  ;;  %v8143_v54 = vrot.slane %v8141_v42, 5  ;;  %12211 = vmatmul.mubr.msk.bf16.gmra.mrb[48].mxu0 %vm1307_vm5, %v15372_v4  ;;  %v12891_v56 = vld [vmem:[%s13225_s26 + $0xd8] ss:$8 sps:$4 sm:$0xff]  }
 0x242   : > { %11914 = vmatprep.mubr.msk.bf16.mxu1 %vm1307_vm5, %v12888_v38  ;;  %v8154_v20 = vrot.slane %v8152_v14, 4  ;;  %v8157_v6 = vrot.slane %v8155_v43, 5  ;;  %v8066_v52 = vsel %vm13244_vm4, %v15385_v24, %v15374_v61  ;;  %v8080_v41 = vsel %vm13244_vm4, %v8075_v15, %v8079_v13  ;;  %v12890_v61 = vld [vmem:[%s13225_s26 + $0xc8] ss:$8 sps:$4 sm:$0xff]   ;;  %v12892_v13 = vld [vmem:[%s13225_s26 + $0xf8] ss:$8 sps:$4 sm:$0xff]  }
 0x243   : > { %v8094_v2 = vsel %vm13244_vm4, %v8089_v27, %v8093_v23  ;;  %v8119_v16 = vshll.u32 %v11115_v39, 16  ;;  %v8108_v7 = vsel %vm13244_vm4, %v8103_v19, %v8107_v31  ;;  %v8116_v48 = vor.u32 %v8115_v25, %v8112_v3  ;;  %12214 = vmatprep.mubr.msk.bf16.mxu0 %vm1307_vm5, %v11152_v28  ;;  %v11190_v15 = vld [vmem:[%s13225_s26 + $0x10] sm:$0xe]  ;;  %v11191_v27 = vld [vmem:[%s13225_s26 + $0x18] sm:$0xe] }
 0x244   : > { %v8130_v51 = vor.u32 %v8129_v17, %v8126_v22  ;;  %v8133_v50 = vshll.u32 %v11117_v53, 16  ;;  %v8166_v36 = vshrl.u32 %v11122_v5, 16  ;;  %v8169_v26 = vshll.u32 %v11122_v5, 16  ;;  %v11192_v19 = vld [vmem:[%s13225_s26 + $0x20] sm:$0xe] }
 0x245   : > { %v8180_v12 = vshrl.u32 %v11124_v34, 16  ;;  %v8183_v63 = vshll.u32 %v11124_v34, 16  ;;  %v8144_v44 = vor.u32 %v8143_v54, %v8140_v49  ;;  %v8147_v59 = vshll.u32 %v11119_v62, 16  ;;  %v11193_v22 = vld [vmem:[%s13225_s26 + $0x28] sm:$0xe] }
 0x246   : > { %v8158_v10 = vor.u32 %v8157_v6, %v8154_v20  ;;  %v8161_v24 = vshll.u32 %v11121_v55, 16  ;;  %v11153_v18 = vcombine.low %v8066_v52, %v8080_v41  ;;  %v8121_v4 = vrot.slane %v8119_v16, 5  ;;  %v11194_v17 = vld [vmem:[%s13225_s26 + $0x30] sm:$0xe]  ;;  %v13062_v53 = vld [vmem:[%s13225_s26 + $0x14] sm:$0x1] }
 0x247   : > { %v11154_v11 = vcombine.low %v8094_v2, %v8108_v7  ;;  %v8117_v30 = vrot.slane %v8116_v48, 4  ;;  %v8131_v37 = vrot.slane %v8130_v51, 4  ;;  %v8135_v0 = vrot.slane %v8133_v50, 5  ;;  %v13063_v54 = vld [vmem:[%s13225_s26 + $0x1c] sm:$0x1] }
 0x248   : > { %v8168_v9 = vrot.slane %v8166_v36, 4  ;;  %v8171_v57 = vrot.slane %v8169_v26, 5  ;;  %v8182_v58 = vrot.slane %v8180_v12, 4  ;;  %v8185_v29 = vrot.slane %v8183_v63, 5  ;;  %v11195_v6 = vld [vmem:[%s13225_s26 + $0x38] sm:$0xe] }
 0x249   : > { %11915 = vmatmul.mubr.msk.bf16.gmra.mrb[16].mxu1 %vm1307_vm5, %v12889_v32  ;;  %v8145_v33 = vrot.slane %v8144_v44, 4  ;;  %v8149_v21 = vrot.slane %v8147_v59, 5  ;;  %v8159_v40 = vrot.slane %v8158_v10, 4  ;;  %v8163_v45 = vrot.slane %v8161_v24, 5  ;;  %12215 = vmatmul.mubr.msk.bf16.gmra.mrb[52].mxu0 %vm1307_vm5, %v11153_v18  ;;  %v13064_v62 = vld [vmem:[%s13225_s26 + $0x24] sm:$0x1] }
 0x24a   : > { %11918 = vmatprep.mubr.msk.bf16.mxu1 %vm1307_vm5, %v12890_v61  ;;  %v8175_v38 = vshll.u32 %v11123_v46, 16  ;;  %v8122_v23 = vsel %vm13244_vm4, %v8117_v30, %v8121_v4  ;;  %v8136_v60 = vsel %vm13244_vm4, %v8131_v37, %v8135_v0  ;;  %12218 = vmatprep.mubr.msk.bf16.mxu0 %vm1307_vm5, %v11154_v11  ;;  %v8172_v42 = vor.u32 %v8171_v57, %v8168_v9  ;;  %v13065_v7 = vld [vmem:[%s13225_s26 + $0x2c] sm:$0x1]  ;;  %v13066_v50 = vld [vmem:[%s13225_s26 + $0x34] sm:$0x1] }
 0x24b   : > { %v8186_v14 = vor.u32 %v8185_v29, %v8182_v58  ;;  %v8189_v43 = vshll.u32 %v11125_v1, 16  ;;  %v8150_v31 = vsel %vm13244_vm4, %v8145_v33, %v8149_v21  ;;  %v8164_v3 = vsel %vm13244_vm4, %v8159_v40, %v8163_v45  ;;  %v13067_v26 = vld [vmem:[%s13225_s26 + $0x3c] sm:$0x1]  ;;  %v12893_v63 = vld [vmem:[%s13225_s26 + $0x108] ss:$8 sps:$4 sm:$0xff]  }
 0x24c   : > { %v11155_v39 = vcombine.low %v8122_v23, %v8136_v60  ;;  %v8177_v25 = vrot.slane %v8175_v38, 5  ;;  %v11254_v28 = vrot.slane %v11190_v15, 9  ;;  %v8935_v5 = vrot.slane %v13062_v53, 5  ;;  %v12894_v44 = vld [vmem:[%s13225_s26 + $0x118] ss:$8 sps:$4 sm:$0xff]  }
 0x24d   : > { %v11255_v49 = vrot.slane %v11191_v27, 9  ;;  %v8939_v20 = vrot.slane %v13063_v54, 5  ;;  %v11156_v34 = vcombine.low %v8150_v31, %v8164_v3  ;;  %v8173_v52 = vrot.slane %v8172_v42, 4  ;;  %v15480_v30 = vld [vmem:[%s13225_s26 + $0x40] sm:$0xe] }
 0x24e   : > { %v8187_v41 = vrot.slane %v8186_v14, 4  ;;  %v8191_v2 = vrot.slane %v8189_v43, 5  ;;  %v11256_v16 = vrot.slane %v11192_v19, 9  ;;  %v8943_v55 = vrot.slane %v13064_v62, 5  ;;  %v15483_v37 = vld [vmem:[%s13225_s26 + $0x48] sm:$0xe] }
 0x24f   : > { %v11257_v32 = vrot.slane %v11193_v22, 9  ;;  %v8947_v48 = vrot.slane %v13065_v7, 5  ;;  %v11258_v51 = vrot.slane %v11194_v17, 9  ;;  %v8951_v61 = vrot.slane %v13066_v50, 5  ;;  %v15486_v0 = vld [vmem:[%s13225_s26 + $0x60] sm:$0xe] }
 0x250   : > { %v11259_v36 = vrot.slane %v11195_v6, 9  ;;  %v8955_v12 = vrot.slane %v13067_v26, 5  ;;  %v8178_v59 = vsel %vm13244_vm4, %v8173_v52, %v8177_v25  ;;  %v8192_v10 = vsel %vm13244_vm4, %v8187_v41, %v8191_v2  ;;  %v15497_v57 = vld [vmem:[%s13225_s26 + $0x68] sm:$0xe]  ;;  %v15500_v58 = vld [vmem:[%s13225_s26 + $0x70] sm:$0xe] }
 0x251   : > { %11919 = vmatmul.mubr.msk.bf16.gmra.mrb[20].mxu1 %vm1307_vm5, %v12891_v56  ;;  %12219 = vmatmul.mubr.msk.bf16.gmra.mrb[56].mxu0 %vm1307_vm5, %v11155_v39  ;;  %v8936_v24 = vsel %vm13548_vm8, %v11254_v28, %v8935_v5  ;;  %v8940_v18 = vsel %vm13548_vm8, %v11255_v49, %v8939_v20  ;;  %v15473_v4 = vsel %vm13548_vm8, %v11256_v16, %v8943_v55  ;;  %v15503_v29 = vld [vmem:[%s13225_s26 + $0x78] sm:$0xe]  ;;  %v15507_v40 = vld [vmem:[%s13225_s26 + $0x80] sm:$0xe]  ;;  %v15510_v45 = vld [vmem:[%s13225_s26 + $0x88] sm:$0xe] }
 0x252   : > { %11922 = vmatprep.mubr.msk.bf16.mxu1 %vm1307_vm5, %v12892_v13  ;;  %12222 = vmatprep.mubr.msk.bf16.mxu0 %vm1307_vm5, %v11156_v34  ;;  %v15477_v11 = vsel %vm13548_vm8, %v11257_v32, %v8947_v48  ;;  %v15490_v46 = vsel %vm13548_vm8, %v11258_v51, %v8951_v61  ;;  %v15494_v9 = vsel %vm13548_vm8, %v11259_v36, %v8955_v12  ;;  %v15513_v1 = vld [vmem:[%s13225_s26 + $0x90] sm:$0xe]  ;;  %v11260_v56 = vrot.slane %v15480_v30, 9  ;;  %v13068_v13 = vld [vmem:[%s13225_s26 + $0x44] sm:$0x1] }
 0x253   : > { %v11157_v33 = vcombine.low %v8178_v59, %v8192_v10  ;;  %v11318_v21 = vcombine.low %v8936_v24, %v8940_v18  ;;  %v11319_v38 = vcombine.low %v15473_v4, %v15477_v11  ;;  %v8959_v23 = vrot.slane %v13068_v13, 5  ;;  %v15522_v42 = vld [vmem:[%s13225_s26 + $0x98] sm:$0xe]  ;;  %v12895_v14 = vld [vmem:[%s13225_s26 + $0x128] ss:$8 sps:$4 sm:$0xff]  }
 0x254   : > { %v11261_v60 = vrot.slane %v15483_v37, 9  ;;  %v11320_v43 = vcombine.low %v15490_v46, %v15494_v9  ;;  %v13069_v15 = vld [vmem:[%s13225_s26 + $0x4c] sm:$0x1]  ;;  %v11262_v31 = vrot.slane %v15486_v0, 9  ;;  %v13070_v3 = vld [vmem:[%s13225_s26 + $0x64] sm:$0x1] }
 0x255   : > { %v8963_v27 = vrot.slane %v13069_v15, 5  ;;  %v8967_v19 = vrot.slane %v13070_v3, 5  ;;  %v11206_v39 = vld [vmem:[%s13225_s26 + $0xb0] sm:$0xe]  ;;  %v11263_v22 = vrot.slane %v15497_v57, 9  ;;  %v11264_v53 = vrot.slane %v15500_v58, 9 }
 0x256   : > { %v12896_v25 = vld [vmem:[%s13225_s26 + $0x148] ss:$8 sps:$4 sm:$0xff]   ;;  %v13071_v17 = vld [vmem:[%s13225_s26 + $0x6c] sm:$0x1]  ;;  %v13072_v5 = vld [vmem:[%s13225_s26 + $0x74] sm:$0x1]  ;;  %v15557_v0 = vsel %vm13548_vm8, %v11260_v56, %v8959_v23 }
 0x257   : > { %v8971_v28 = vrot.slane %v13071_v17, 5  ;;  %v8975_v49 = vrot.slane %v13072_v5, 5  ;;  %v11207_v54 = vld [vmem:[%s13225_s26 + $0xb8] sm:$0xe]  ;;  %v11265_v20 = vrot.slane %v15503_v29, 9  ;;  %v11266_v52 = vrot.slane %v15507_v40, 9 }
 0x258   : > { %v13073_v6 = vld [vmem:[%s13225_s26 + $0x7c] sm:$0x1]  ;;  %v13074_v41 = vld [vmem:[%s13225_s26 + $0x84] sm:$0x1]  ;;  %v11208_v16 = vld [vmem:[%s13225_s26 + $0xc0] sm:$0xe]  ;;  %v15561_v57 = vsel %vm13548_vm8, %v11261_v60, %v8963_v27  ;;  %v15568_v40 = vsel %vm13548_vm8, %v11262_v31, %v8967_v19 }
 0x259   : > { %11923 = vmatmul.mubr.msk.bf16.gmra.mrb[24].mxu1 %vm1307_vm5, %v12893_v63  ;;  %12223 = vmatmul.mubr.msk.bf16.gmra.mrb[60].mxu0 %vm1307_vm5, %v11157_v33  ;;  %v8979_v34 = vrot.slane %v13073_v6, 5  ;;  %v8983_v2 = vrot.slane %v13074_v41, 5  ;;  %v11267_v62 = vrot.slane %v15510_v45, 9  ;;  %v13075_v55 = vld [vmem:[%s13225_s26 + $0x8c] sm:$0x1]  ;;  %v11268_v7 = vrot.slane %v15513_v1, 9 }
 0x25a   : > { %11926 = vmatprep.mubr.msk.bf16.mxu1 %vm1307_vm5, %v12894_v44  ;;  %12228 = vmatprep.mubr.msk.bf16.mxu0 %vm1307_vm5, %v11318_v21  ;;  %v8987_v32 = vrot.slane %v13075_v55, 5  ;;  %v13076_v48 = vld [vmem:[%s13225_s26 + $0x94] sm:$0x1]  ;;  %v11209_v50 = vld [vmem:[%s13225_s26 + $0xc8] sm:$0xe]  ;;  %v11269_v61 = vrot.slane %v15522_v42, 9  ;;  %v15572_v45 = vsel %vm13548_vm8, %v11263_v22, %v8971_v28  ;;  %v15576_v1 = vsel %vm13548_vm8, %v11264_v53, %v8975_v49 }
 0x25b   : > { %v8991_v51 = vrot.slane %v13076_v48, 5  ;;  %v13077_v36 = vld [vmem:[%s13225_s26 + $0x9c] sm:$0x1]  ;;  %v11270_v12 = vrot.slane %v11206_v39, 9  ;;  %v13078_v63 = vld [vmem:[%s13225_s26 + $0xb4] sm:$0x1]  ;;  %v15580_v56 = vsel %vm13548_vm8, %v11265_v20, %v8979_v34  ;;  %v15585_v23 = vsel %vm13548_vm8, %v11266_v52, %v8983_v2 }
 0x25c   : > { %v8995_v26 = vrot.slane %v13077_v36, 5  ;;  %v8999_v44 = vrot.slane %v13078_v63, 5  ;;  %v11271_v59 = vrot.slane %v11207_v54, 9  ;;  %v13079_v10 = vld [vmem:[%s13225_s26 + $0xbc] sm:$0x1]  ;;  %v11272_v18 = vrot.slane %v11208_v16, 9 }
 0x25d   : > { %v9003_v24 = vrot.slane %v13079_v10, 5  ;;  %v13080_v30 = vld [vmem:[%s13225_s26 + $0xc4] sm:$0x1]  ;;  %v11273_v58 = vrot.slane %v11209_v50, 9  ;;  %v13081_v29 = vld [vmem:[%s13225_s26 + $0xcc] sm:$0x1]  ;;  %v15589_v60 = vsel %vm13548_vm8, %v11267_v62, %v8987_v32  ;;  %v15593_v42 = vsel %vm13548_vm8, %v11268_v7, %v8991_v51 }
 0x25e   : > { %v9007_v37 = vrot.slane %v13080_v30, 5  ;;  %v9011_v33 = vrot.slane %v13081_v29, 5  ;;  %v11210_v21 = vld [vmem:[%s13225_s26 + $0xd0] sm:$0xe]  ;;  %v11211_v13 = vld [vmem:[%s13225_s26 + $0xd8] sm:$0xe]  ;;  %v15602_v27 = vsel %vm13548_vm8, %v11270_v12, %v8999_v44  ;;  %v11321_v4 = vcombine.low %v15557_v0, %v15561_v57 }
 0x25f   : > { %v12897_v15 = vld [vmem:[%s13225_s26 + $0x158] ss:$8 sps:$4 sm:$0xff]   ;;  %v15606_v31 = vsel %vm13548_vm8, %v11271_v59, %v9003_v24  ;;  %v11274_v19 = vrot.slane %v11210_v21, 9  ;;  %v11275_v17 = vrot.slane %v11211_v13, 9  ;;  %v13083_v28 = vld [vmem:[%s13225_s26 + $0xdc] sm:$0x1]  ;;  %v11322_v54 = vcombine.low %v15568_v40, %v15572_v45 }
 0x260   : > { %v15610_v3 = vsel %vm13548_vm8, %v11272_v18, %v9007_v37  ;;  %v15618_v39 = vsel %vm13548_vm8, %v11273_v58, %v9011_v33  ;;  %v9019_v53 = vrot.slane %v13083_v28, 5  ;;  %v15623_v5 = vld [vmem:[%s13225_s26 + $0xe0] sm:$0xe]  ;;  %v12898_v49 = vld [vmem:[%s13225_s26 + $0x168] ss:$8 sps:$4 sm:$0xff]   ;;  %v11323_v20 = vcombine.low %v15576_v1, %v15580_v56 }
 0x261   : > { %11927 = vmatmul.mubr.msk.bf16.gmra.mrb[28].mxu1 %vm1307_vm5, %v12895_v14  ;;  %v15597_v14 = vsel %vm13548_vm8, %v11269_v61, %v8995_v26  ;;  %12229 = vmatmul.mubr.msk.bf16.vlgmr.msra.gmra.mrb[0].mxu0 %vm1307_vm5, %v11319_v38  ;;  %v11213_v11 = vld [vmem:[%s13225_s26 + $0xe8] sm:$0xe]  ;;  %v15634_v38 = vld [vmem:[%s13225_s26 + $0x100] sm:$0xe]  ;;  %v11324_v6 = vcombine.low %v15585_v23, %v15589_v60  ;;  %v15649_v34 = vld [vmem:[%s13225_s26 + $0x118] sm:$0xe]  ;;  %v11326_v52 = vcombine.low %v15602_v27, %v15606_v31 }
 0x262   : > { %11930 = vmatprep.mubr.msk.bf16.mxu1 %vm1307_vm5, %v12896_v25  ;;  %v13082_v25 = vld [vmem:[%s13225_s26 + $0xd4] sm:$0x1]  ;;  %12232 = vmatprep.mubr.msk.bf16.mxu0 %vm1307_vm5, %v11320_v43  ;;  %v11325_v46 = vcombine.low %v15593_v42, %v15597_v14  ;;  %v11215_v9 = vld [vmem:[%s13225_s26 + $0x108] sm:$0xe]  ;;  %v15646_v43 = vld [vmem:[%s13225_s26 + $0x110] sm:$0xe]  ;;  %v11327_v41 = vcombine.low %v15610_v3, %v15618_v39  ;;  %v15666_v48 = vsel %vm13548_vm8, %v11275_v17, %v9019_v53 }
 0x263   : > { %v9015_v22 = vrot.slane %v13082_v25, 5  ;;  %v11276_v2 = vrot.slane %v15623_v5, 9  ;;  %v13084_v16 = vld [vmem:[%s13225_s26 + $0xe4] sm:$0x1]  ;;  %v11218_v55 = vld [vmem:[%s13225_s26 + $0x120] sm:$0xe] }
 0x264   : > { %v9023_v62 = vrot.slane %v13084_v16, 5  ;;  %v10550_v32 = vld [vmem:[%s13225_s26 + $0x148] sm:$0xf]  ;;  %v11277_v51 = vrot.slane %v11213_v11, 9  ;;  %v13085_v50 = vld [vmem:[%s13225_s26 + $0xec] sm:$0x1] }
 0x265   : > { %v15662_v7 = vsel %vm13548_vm8, %v11274_v19, %v9015_v22  ;;  %v9027_v61 = vrot.slane %v13085_v50, 5  ;;  %v11219_v36 = vld [vmem:[%s13225_s26 + $0x128] sm:$0xe]  ;;  %v10552_v26 = vld [vmem:[%s13225_s26 + $0x150] sm:$0xf]  ;;  %v11278_v12 = vrot.slane %v15634_v38, 9 }
 0x266   : > { %v13086_v63 = vld [vmem:[%s13225_s26 + $0x104] sm:$0x1]  ;;  %v11279_v59 = vrot.slane %v11215_v9, 9  ;;  %v13087_v10 = vld [vmem:[%s13225_s26 + $0x10c] sm:$0x1]  ;;  %v11280_v30 = vrot.slane %v15646_v43, 9 }
 0x267   : > { %v9031_v44 = vrot.slane %v13086_v63, 5  ;;  %v9035_v24 = vrot.slane %v13087_v10, 5  ;;  %v11220_v18 = vld [vmem:[%s13225_s26 + $0x130] sm:$0xe]  ;;  %v13088_v37 = vld [vmem:[%s13225_s26 + $0x114] sm:$0x1]  ;;  %v15695_v16 = vsel %vm13548_vm8, %v11277_v51, %v9027_v61 }
 0x268   : > { %v9039_v0 = vrot.slane %v13088_v37, 5  ;;  %v11221_v57 = vld [vmem:[%s13225_s26 + $0x138] sm:$0xe]  ;;  %v4501_v58 = vshrl.u32 %v10550_v32, 16  ;;  %v4504_v29 = vshll.u32 %v10550_v32, 16  ;;  %v11281_v33 = vrot.slane %v15649_v34, 9 }
 0x269   : > { %11931 = vmatmul.mubr.msk.bf16.gmra.mrb[32].mxu1 %vm1307_vm5, %v12897_v15  ;;  %v13089_v21 = vld [vmem:[%s13225_s26 + $0x11c] sm:$0x1]  ;;  %v4515_v45 = vshrl.u32 %v10552_v26, 16  ;;  %v4518_v13 = vshll.u32 %v10552_v26, 16  ;;  %v12899_v15 = vld [vmem:[%s13225_s26 + $0x178] ss:$8 sps:$4 sm:$0xff]   ;;  %12233 = vmatmul.mubr.msk.bf16.gmra.mrb[4].mxu0 %vm1307_vm5, %v11321_v4  ;;  %v15691_v4 = vsel %vm13548_vm8, %v11276_v2, %v9023_v62  ;;  %v15703_v50 = vsel %vm13548_vm8, %v11279_v59, %v9035_v24 }
 0x26a   : > { %11934 = vmatprep.mubr.msk.bf16.mxu1 %vm1307_vm5, %v12898_v49  ;;  %v9043_v40 = vrot.slane %v13089_v21, 5  ;;  %v11282_v19 = vrot.slane %v11218_v55, 9  ;;  %v13090_v25 = vld [vmem:[%s13225_s26 + $0x124] sm:$0x1]  ;;  %v11283_v17 = vrot.slane %v11219_v36, 9  ;;  %12236 = vmatprep.mubr.msk.bf16.mxu0 %vm1307_vm5, %v11322_v54  ;;  %v11284_v49 = vrot.slane %v11220_v18, 9 }
 0x26b   : > { %v9047_v22 = vrot.slane %v13090_v25, 5  ;;  %v13091_v28 = vld [vmem:[%s13225_s26 + $0x12c] sm:$0x1]  ;;  %v12900_v5 = vld [vmem:[%s13225_s26 + $0x198] ss:$8 sps:$4 sm:$0xff]   ;;  %v11285_v9 = vrot.slane %v11221_v57, 9  ;;  %v15699_v54 = vsel %vm13548_vm8, %v11278_v12, %v9031_v44  ;;  %v15710_v51 = vsel %vm13548_vm8, %v11280_v30, %v9039_v0 }
 0x26c   : > { %v9051_v53 = vrot.slane %v13091_v28, 5  ;;  %v13092_v11 = vld [vmem:[%s13225_s26 + $0x134] sm:$0x1]  ;;  %v13093_v43 = vld [vmem:[%s13225_s26 + $0x13c] sm:$0x1]  ;;  %v4503_v55 = vrot.slane %v4501_v58, 4  ;;  %v15714_v61 = vsel %vm13548_vm8, %v11281_v33, %v9043_v40  ;;  %v11329_v28 = vcombine.low %v15691_v4, %v15695_v16 }
 0x26d   : > { %v9055_v38 = vrot.slane %v13092_v11, 5  ;;  %v9059_v34 = vrot.slane %v13093_v43, 5  ;;  %v4506_v32 = vrot.slane %v4504_v29, 5  ;;  %v4517_v36 = vrot.slane %v4515_v45, 4  ;;  %v11222_v2 = vld [vmem:[%s13225_s26 + $0x150] sm:$0xe] }
 0x26e   : > { %v4520_v26 = vrot.slane %v4518_v13, 5  ;;  %v10558_v62 = vld [vmem:[%s13225_s26 + $0x168] sm:$0xf]  ;;  %v15718_v12 = vsel %vm13548_vm8, %v11282_v19, %v9047_v22  ;;  %v15722_v63 = vsel %vm13548_vm8, %v11283_v17, %v9051_v53  ;;  %v11223_v44 = vld [vmem:[%s13225_s26 + $0x158] sm:$0xe]  ;;  %v11286_v57 = vrot.slane %v11222_v2, 9 }
 0x26f   : > { %v15728_v59 = vsel %vm13548_vm8, %v11284_v49, %v9055_v38  ;;  %v15732_v10 = vsel %vm13548_vm8, %v11285_v9, %v9059_v34  ;;  %v13094_v24 = vld [vmem:[%s13225_s26 + $0x14c] sm:$0x1]  ;;  %v13095_v30 = vld [vmem:[%s13225_s26 + $0x154] sm:$0x1]  ;;  %v4507_v0 = vor.u32 %v4506_v32, %v4503_v55  ;;  %v10560_v58 = vld [vmem:[%s13225_s26 + $0x170] sm:$0xf]  ;;  %v11328_v17 = vcombine.low %v15662_v7, %v15666_v48 }
 0x270   : > { %v4510_v18 = vshll.u32 %v13094_v24, 16  ;;  %v4524_v37 = vshll.u32 %v13095_v30, 16  ;;  %v4557_v29 = vshrl.u32 %v10558_v62, 16  ;;  %v4560_v33 = vshll.u32 %v10558_v62, 16  ;;  %v13096_v40 = vld [vmem:[%s13225_s26 + $0x154] sm:$0x1] }
 0x271   : > { %11935 = vmatmul.mubr.msk.bf16.gmra.mrb[36].mxu1 %vm1307_vm5, %v12899_v15  ;;  %v4521_v21 = vor.u32 %v4520_v26, %v4517_v36  ;;  %v9063_v45 = vrot.slane %v13096_v40, 5  ;;  %v11287_v13 = vrot.slane %v11223_v44, 9  ;;  %v13097_v15 = vld [vmem:[%s13225_s26 + $0x15c] sm:$0x1]  ;;  %v12901_v25 = vld [vmem:[%s13225_s26 + $0x1a8] ss:$8 sps:$4 sm:$0xff]   ;;  %12237 = vmatmul.mubr.msk.bf16.gmra.mrb[8].mxu0 %vm1307_vm5, %v11323_v20  ;;  %v11330_v53 = vcombine.low %v15699_v54, %v15703_v50 }
 0x272   : > { %11938 = vmatprep.mubr.msk.bf16.mxu1 %vm1307_vm5, %v12900_v5  ;;  %v9067_v19 = vrot.slane %v13097_v15, 5  ;;  %v12902_v22 = vld [vmem:[%s13225_s26 + $0x1b8] ss:$8 sps:$4 sm:$0xff]   ;;  %v11331_v5 = vcombine.low %v15710_v51, %v15714_v61  ;;  %12240 = vmatprep.mubr.msk.bf16.mxu0 %vm1307_vm5, %v11324_v6  ;;  %v11332_v1 = vcombine.low %v15718_v12, %v15722_v63  ;;  %v11333_v56 = vcombine.low %v15728_v59, %v15732_v10  ;;  %v11225_v49 = vld [vmem:[%s13225_s26 + $0x168] sm:$0xe] }
 0x273   : > { %v11224_v20 = vld [vmem:[%s13225_s26 + $0x160] sm:$0xe]  ;;  %v4571_v11 = vshrl.u32 %v10560_v58, 16  ;;  %v4574_v38 = vshll.u32 %v10560_v58, 16  ;;  %v4512_v9 = vrot.slane %v4510_v18, 5  ;;  %v4526_v43 = vrot.slane %v4524_v37, 5 }
 0x274   : > { %v4559_v34 = vrot.slane %v4557_v29, 4  ;;  %v4562_v23 = vrot.slane %v4560_v33, 5  ;;  %v11226_v60 = vld [vmem:[%s13225_s26 + $0x170] sm:$0xe]  ;;  %v4508_v6 = vrot.slane %v4507_v0, 4  ;;  %v4522_v55 = vrot.slane %v4521_v21, 4 }
 0x275   : > { %v15766_v32 = vsel %vm13548_vm8, %v11286_v57, %v9063_v45  ;;  %v15770_v36 = vsel %vm13548_vm8, %v11287_v13, %v9067_v19  ;;  %v11227_v26 = vld [vmem:[%s13225_s26 + $0x178] sm:$0xe]  ;;  %v11288_v62 = vrot.slane %v11224_v20, 9  ;;  %v13098_v44 = vld [vmem:[%s13225_s26 + $0x164] sm:$0x1]  ;;  %v11289_v18 = vrot.slane %v11225_v49, 9 }
 0x276   : > { %v10562_v2 = vld [vmem:[%s13225_s26 + $0x178] sm:$0xf]  ;;  %v9071_v24 = vrot.slane %v13098_v44, 5  ;;  %v13099_v30 = vld [vmem:[%s13225_s26 + $0x16c] sm:$0x1]  ;;  %v4573_v29 = vrot.slane %v4571_v11, 4  ;;  %v4563_v40 = vor.u32 %v4562_v23, %v4559_v34  ;;  %v4513_v11 = vsel %vm13244_vm4, %v4508_v6, %v4512_v9 }
 0x277   : > { %v9075_v37 = vrot.slane %v13099_v30, 5  ;;  %v10564_v0 = vld [vmem:[%s13225_s26 + $0x180] sm:$0xf]  ;;  %v13100_v57 = vld [vmem:[%s13225_s26 + $0x16c] sm:$0x1]  ;;  %v4576_v33 = vrot.slane %v4574_v38, 5  ;;  %v4527_v38 = vsel %vm13244_vm4, %v4522_v55, %v4526_v43  ;;  %v11334_v34 = vcombine.low %v15766_v32, %v15770_v36 }
 0x278   : > { %v4566_v58 = vshll.u32 %v13100_v57, 16  ;;  %v11290_v21 = vrot.slane %v11226_v60, 9  ;;  %v13101_v45 = vld [vmem:[%s13225_s26 + $0x174] sm:$0x1]  ;;  %v11291_v15 = vrot.slane %v11227_v26, 9  ;;  %v4585_v20 = vshrl.u32 %v10562_v2, 16 }
 0x279   : > { %11939 = vmatmul.mubr.msk.bf16.gmra.mrb[40].mxu1 %vm1307_vm5, %v12901_v25  ;;  %v9079_v13 = vrot.slane %v13101_v45, 5  ;;  %v13102_v19 = vld [vmem:[%s13225_s26 + $0x17c] sm:$0x1]  ;;  %v4588_v49 = vshll.u32 %v10562_v2, 16  ;;  %v4599_v44 = vshrl.u32 %v10564_v0, 16  ;;  %v4602_v30 = vshll.u32 %v10564_v0, 16  ;;  %12241 = vmatmul.mubr.msk.bf16.gmra.mrb[12].mxu0 %vm1307_vm5, %v11325_v46 }
 0x27a   : > { %11942 = vmatprep.mubr.msk.bf16.mxu1 %vm1307_vm5, %v12902_v22  ;;  %v9083_v25 = vrot.slane %v13102_v19, 5  ;;  %v12903_v22 = vld [vmem:[%s13225_s26 + $0x1c8] ss:$8 sps:$4 sm:$0xff]   ;;  %v13103_v23 = vld [vmem:[%s13225_s26 + $0x174] sm:$0x1]  ;;  %12244 = vmatprep.mubr.msk.bf16.mxu0 %vm1307_vm5, %v11326_v52  ;;  %v15801_v42 = vsel %vm13548_vm8, %v11288_v62, %v9071_v24  ;;  %v15805_v14 = vsel %vm13548_vm8, %v11289_v18, %v9075_v37  ;;  %v15807_v46 = vrot.slane %v4566_v58, 5 }
 0x27b   : > { %v4580_v60 = vshll.u32 %v13103_v23, 16  ;;  %v12904_v26 = vld [vmem:[%s13225_s26 + $0x1e8] ss:$8 sps:$4 sm:$0xff]   ;;  %v4577_v9 = vor.u32 %v4576_v33, %v4573_v29  ;;  %v10566_v43 = vld [vmem:[%s13225_s26 + $0x198] sm:$0xf]  ;;  %v15810_v6 = vrot.slane %v4563_v40, 4  ;;  %v15814_v27 = vsel %vm13548_vm8, %v11290_v21, %v9079_v13 }
 0x27c   : > { %v15818_v31 = vsel %vm13548_vm8, %v11291_v15, %v9083_v25  ;;  %v13104_v52 = vld [vmem:[%s13225_s26 + $0x17c] sm:$0x1]  ;;  %v10568_v2 = vld [vmem:[%s13225_s26 + $0x1a0] sm:$0xf]  ;;  %v4587_v62 = vrot.slane %v4585_v20, 4  ;;  %v4590_v24 = vrot.slane %v4588_v49, 5  ;;  %v15823_v0 = vcombine.low %v4513_v11, %v4527_v38 }
 0x27d   : > { %v4594_v55 = vshll.u32 %v13104_v52, 16  ;;  %v4601_v18 = vrot.slane %v4599_v44, 4  ;;  %v4604_v37 = vrot.slane %v4602_v30, 5  ;;  %v15825_v57 = vrot.slane %v4580_v60, 5  ;;  %v11228_v58 = vld [vmem:[%s13225_s26 + $0x180] sm:$0xe] }
 0x27e   : > { %v4613_v29 = vshrl.u32 %v10566_v43, 16  ;;  %v4616_v33 = vshll.u32 %v10566_v43, 16  ;;  %v4578_v21 = vrot.slane %v4577_v9, 4  ;;  %v13105_v40 = vld [vmem:[%s13225_s26 + $0x184] sm:$0x1]  ;;  %v4627_v15 = vshrl.u32 %v10568_v2, 16 }
 0x27f   : > { %v4608_v45 = vshll.u32 %v13105_v40, 16  ;;  %v11229_v13 = vld [vmem:[%s13225_s26 + $0x188] sm:$0xe]  ;;  %v4630_v19 = vshll.u32 %v10568_v2, 16  ;;  %v12905_v25 = vld [vmem:[%s13225_s26 + $0x1f8] ss:$8 sps:$4 sm:$0xff]   ;;  %v11335_v20 = vcombine.low %v15801_v42, %v15805_v14  ;;  %v4569_v49 = vsel %vm13244_vm4, %v15810_v6, %v15807_v46 }
 0x280   : > { %v11336_v44 = vcombine.low %v15814_v27, %v15818_v31  ;;  %v15840_v30 = vrot.slane %v4594_v55, 5  ;;  %v4605_v11 = vor.u32 %v4604_v37, %v4601_v18  ;;  %v11292_v38 = vrot.slane %v11228_v58, 9  ;;  %v13106_v23 = vld [vmem:[%s13225_s26 + $0x184] sm:$0x1]  ;;  %v10572_v9 = vld [vmem:[%s13225_s26 + $0x1b0] sm:$0xf] }
 0x281   : > { %11943 = vmatmul.mubr.msk.bf16.gmra.mrb[44].mxu1 %vm1307_vm5, %v12903_v22  ;;  %v4591_v22 = vor.u32 %v4590_v24, %v4587_v62  ;;  %v9087_v60 = vrot.slane %v13106_v23, 5  ;;  %12245 = vmatmul.mubr.msk.bf16.gmra.mrb[16].mxu0 %vm1307_vm5, %v11327_v41  ;;  %v12906_v46 = vld [vmem:[%s13225_s26 + $0x208] ss:$8 sps:$4 sm:$0xff]   ;;  %v11293_v43 = vrot.slane %v11229_v13, 9  ;;  %v13107_v6 = vld [vmem:[%s13225_s26 + $0x18c] sm:$0x1]  ;;  %v4583_v62 = vsel %vm13244_vm4, %v4578_v21, %v15825_v57 }
 0x282   : > { %11946 = vmatprep.mubr.msk.bf16.mxu1 %vm1307_vm5, %v12904_v26  ;;  %v10570_v26 = vld [vmem:[%s13225_s26 + $0x1a8] sm:$0xf]  ;;  %v9091_v52 = vrot.slane %v13107_v6, 5  ;;  %v4615_v55 = vrot.slane %v4613_v29, 4  ;;  %v4618_v2 = vrot.slane %v4616_v33, 5  ;;  %12248 = vmatprep.mubr.msk.bf16.mxu0 %vm1307_vm5, %v11328_v17  ;;  %v15858_v24 = vrot.slane %v4608_v45, 5 }
 0x283   : > { %v4629_v3 = vrot.slane %v4627_v15, 4  ;;  %v4632_v39 = vrot.slane %v4630_v19, 5  ;;  %v11230_v41 = vld [vmem:[%s13225_s26 + $0x1a0] sm:$0xe]  ;;  %v11231_v18 = vld [vmem:[%s13225_s26 + $0x1a8] sm:$0xe]  ;;  %v15868_v48 = vsel %vm13548_vm8, %v11292_v38, %v9087_v60 }
 0x284   : > { %v4641_v37 = vshrl.u32 %v10570_v26, 16  ;;  %v4644_v58 = vshll.u32 %v10570_v26, 16  ;;  %v4655_v29 = vshrl.u32 %v10572_v9, 16  ;;  %v4658_v33 = vshll.u32 %v10572_v9, 16  ;;  %v13108_v17 = vld [vmem:[%s13225_s26 + $0x19c] sm:$0x1] }
 0x285   : > { %v15862_v40 = vrot.slane %v4591_v22, 4  ;;  %v15864_v7 = vrot.slane %v4605_v11, 4  ;;  %v4622_v57 = vshll.u32 %v13108_v17, 16  ;;  %v15874_v21 = vsel %vm13548_vm8, %v11293_v43, %v9091_v52  ;;  %v13109_v13 = vld [vmem:[%s13225_s26 + $0x1a4] sm:$0x1] }
 0x286   : > { %v4619_v45 = vor.u32 %v4618_v2, %v4615_v55  ;;  %v4636_v15 = vshll.u32 %v13109_v13, 16  ;;  %v11294_v19 = vrot.slane %v11230_v41, 9  ;;  %v4633_v22 = vor.u32 %v4632_v39, %v4629_v3  ;;  %v13110_v11 = vld [vmem:[%s13225_s26 + $0x1a4] sm:$0x1]  ;;  %v13111_v60 = vld [vmem:[%s13225_s26 + $0x1ac] sm:$0x1] }
 0x287   : > { %v9095_v38 = vrot.slane %v13110_v11, 5  ;;  %v11295_v23 = vrot.slane %v11231_v18, 9  ;;  %v9099_v26 = vrot.slane %v13111_v60, 5  ;;  %v4646_v9 = vrot.slane %v4644_v58, 5  ;;  %v12907_v52 = vld [vmem:[%s13225_s26 + $0x218] ss:$8 sps:$4 sm:$0xff]  }
 0x288   : > { %v4657_v43 = vrot.slane %v4655_v29, 4  ;;  %v4660_v6 = vrot.slane %v4658_v33, 5  ;;  %v15881_v55 = vcombine.low %v4569_v49, %v4583_v62  ;;  %v4611_v2 = vsel %vm13244_vm4, %v15864_v7, %v15858_v24  ;;  %v11232_v39 = vld [vmem:[%s13225_s26 + $0x1b0] sm:$0xe]  ;;  %v10574_v41 = vld [vmem:[%s13225_s26 + $0x1b8] sm:$0xf] }
 0x289   : > { %11947 = vmatmul.mubr.msk.bf16.gmra.mrb[48].mxu1 %vm1307_vm5, %v12905_v25  ;;  %v4643_v25 = vrot.slane %v4641_v37, 4  ;;  %v11337_v3 = vcombine.low %v15868_v48, %v15874_v21  ;;  %12249 = vmatmul.mubr.msk.bf16.gmra.mrb[20].mxu0 %vm1307_vm5, %v11329_v28  ;;  %v4620_v49 = vrot.slane %v4619_v45, 4  ;;  %v4624_v62 = vrot.slane %v4622_v57, 5  ;;  %v13112_v18 = vld [vmem:[%s13225_s26 + $0x1ac] sm:$0x1] }
 0x28a   : > { %11950 = vmatprep.mubr.msk.bf16.mxu1 %vm1307_vm5, %v12906_v46  ;;  %v4597_v46 = vsel %vm13244_vm4, %v15862_v40, %v15840_v30  ;;  %v4638_v30 = vrot.slane %v4636_v15, 5  ;;  %v4650_v37 = vshll.u32 %v13112_v18, 16  ;;  %v11233_v24 = vld [vmem:[%s13225_s26 + $0x1b8] sm:$0xe]  ;;  %12252 = vmatprep.mubr.msk.bf16.mxu0 %vm1307_vm5, %v11330_v53  ;;  %v4634_v29 = vrot.slane %v4633_v22, 4 }
 0x28b   : > { %v12908_v58 = vld [vmem:[%s13225_s26 + $0x238] ss:$8 sps:$4 sm:$0xff]   ;;  %v15908_v4 = vsel %vm13548_vm8, %v11294_v19, %v9095_v38  ;;  %v15912_v16 = vsel %vm13548_vm8, %v11295_v23, %v9099_v26  ;;  %v13113_v28 = vld [vmem:[%s13225_s26 + $0x1b4] sm:$0x1]  ;;  %v4647_v7 = vor.u32 %v4646_v9, %v4643_v25  ;;  %v4661_v17 = vor.u32 %v4660_v6, %v4657_v43  ;;  %v10578_v54 = vld [vmem:[%s13225_s26 + $0x1c8] sm:$0xf] }
 0x28c   : > { %v4664_v33 = vshll.u32 %v13113_v28, 16  ;;  %v10576_v40 = vld [vmem:[%s13225_s26 + $0x1c0] sm:$0xf]  ;;  %v4669_v57 = vshrl.u32 %v10574_v41, 16  ;;  %v4672_v45 = vshll.u32 %v10574_v41, 16  ;;  %v11296_v50 = vrot.slane %v11232_v39, 9 }
 0x28d   : > { %v13114_v53 = vld [vmem:[%s13225_s26 + $0x1b4] sm:$0x1]  ;;  %v11297_v15 = vrot.slane %v11233_v24, 9  ;;  %v13115_v22 = vld [vmem:[%s13225_s26 + $0x1bc] sm:$0x1]  ;;  %v4625_v11 = vsel %vm13244_vm4, %v4620_v49, %v4624_v62  ;;  %v4652_v38 = vrot.slane %v4650_v37, 5  ;;  %v4639_v26 = vsel %vm13244_vm4, %v4634_v29, %v4638_v30 }
 0x28e   : > { %v9103_v13 = vrot.slane %v13114_v53, 5  ;;  %v9107_v19 = vrot.slane %v13115_v22, 5  ;;  %v4683_v23 = vshrl.u32 %v10576_v40, 16  ;;  %v4686_v60 = vshll.u32 %v10576_v40, 16  ;;  %v10580_v9 = vld [vmem:[%s13225_s26 + $0x1d0] sm:$0xf] }
 0x28f   : > { %v4666_v25 = vrot.slane %v4664_v33, 5  ;;  %v4697_v43 = vshrl.u32 %v10578_v54, 16  ;;  %v4700_v6 = vshll.u32 %v10578_v54, 16  ;;  %v4648_v39 = vrot.slane %v4647_v7, 4  ;;  %v12909_v49 = vld [vmem:[%s13225_s26 + $0x248] ss:$8 sps:$4 sm:$0xff]  }
 0x290   : > { %v4671_v41 = vrot.slane %v4669_v57, 4  ;;  %v4674_v18 = vrot.slane %v4672_v45, 5  ;;  %v15927_v62 = vcombine.low %v4597_v46, %v4611_v2  ;;  %v15931_v37 = vsel %vm13548_vm8, %v11296_v50, %v9103_v13  ;;  %v13116_v24 = vld [vmem:[%s13225_s26 + $0x1bc] sm:$0x1]  ;;  %v11234_v2 = vld [vmem:[%s13225_s26 + $0x1c0] sm:$0xe] }
 0x291   : > { %11951 = vmatmul.mubr.msk.bf16.gmra.mrb[52].mxu1 %vm1307_vm5, %v12907_v52  ;;  %v4662_v52 = vrot.slane %v4661_v17, 4  ;;  %v15935_v30 = vsel %vm13548_vm8, %v11297_v15, %v9107_v19  ;;  %12253 = vmatmul.mubr.msk.bf16.gmra.mrb[24].mxu0 %vm1307_vm5, %v11331_v5  ;;  %v4685_v29 = vrot.slane %v4683_v23, 4  ;;  %v4688_v46 = vrot.slane %v4686_v60, 5  ;;  %v12910_v40 = vld [vmem:[%s13225_s26 + $0x258] ss:$8 sps:$4 sm:$0xff]  }
 0x292   : > { %11954 = vmatprep.mubr.msk.bf16.mxu1 %vm1307_vm5, %v12908_v58  ;;  %v4678_v58 = vshll.u32 %v13116_v24, 16  ;;  %v4711_v28 = vshrl.u32 %v10580_v9, 16  ;;  %v4714_v33 = vshll.u32 %v10580_v9, 16  ;;  %12256 = vmatprep.mubr.msk.bf16.mxu0 %vm1307_vm5, %v11332_v1  ;;  %v15948_v7 = vcombine.low %v4625_v11, %v4639_v26  ;;  %v13117_v12 = vld [vmem:[%s13225_s26 + $0x1c4] sm:$0x1] }
 0x293   : > { %v11338_v51 = vcombine.low %v15908_v4, %v15912_v16  ;;  %v4699_v61 = vrot.slane %v4697_v43, 4  ;;  %v4702_v5 = vrot.slane %v4700_v6, 5  ;;  %v4653_v17 = vsel %vm13244_vm4, %v4648_v39, %v4652_v38  ;;  %v11235_v1 = vld [vmem:[%s13225_s26 + $0x1c8] sm:$0xe]  ;;  %v13118_v13 = vld [vmem:[%s13225_s26 + $0x1c4] sm:$0x1] }
 0x294   : > { %v4667_v57 = vsel %vm13244_vm4, %v4662_v52, %v4666_v25  ;;  %v4675_v45 = vor.u32 %v4674_v18, %v4671_v41  ;;  %v4692_v63 = vshll.u32 %v13117_v12, 16  ;;  %v11339_v54 = vcombine.low %v15931_v37, %v15935_v30  ;;  %v10582_v22 = vld [vmem:[%s13225_s26 + $0x1e8] sm:$0xf]  ;;  %v13119_v11 = vld [vmem:[%s13225_s26 + $0x1cc] sm:$0x1] }
 0x295   : > { %v15960_v50 = vrot.slane %v4678_v58, 5  ;;  %v11298_v53 = vrot.slane %v11234_v2, 9  ;;  %v9111_v15 = vrot.slane %v13118_v13, 5  ;;  %v4689_v19 = vor.u32 %v4688_v46, %v4685_v29  ;;  %v10584_v26 = vld [vmem:[%s13225_s26 + $0x1f0] sm:$0xf] }
 0x296   : > { %v4706_v38 = vshll.u32 %v13119_v11, 16  ;;  %v4713_v23 = vrot.slane %v4711_v28, 4  ;;  %v4716_v60 = vrot.slane %v4714_v33, 5  ;;  %v15968_v25 = vcombine.low %v4653_v17, %v4667_v57  ;;  %v13120_v43 = vld [vmem:[%s13225_s26 + $0x1cc] sm:$0x1] }
 0x297   : > { %v11299_v9 = vrot.slane %v11235_v1, 9  ;;  %v9115_v6 = vrot.slane %v13120_v43, 5  ;;  %v4703_v39 = vor.u32 %v4702_v5, %v4699_v61  ;;  %v11236_v52 = vld [vmem:[%s13225_s26 + $0x1d0] sm:$0xe]  ;;  %v15972_v41 = vrot.slane %v4675_v45, 4 }
 0x298   : > { %v15974_v18 = vrot.slane %v4692_v63, 5  ;;  %v4725_v24 = vshrl.u32 %v10582_v22, 16  ;;  %v4728_v58 = vshll.u32 %v10582_v22, 16  ;;  %v15979_v29 = vsel %vm13548_vm8, %v11298_v53, %v9111_v15  ;;  %v13121_v46 = vld [vmem:[%s13225_s26 + $0x1d4] sm:$0x1] }
 0x299   : > { %11955 = vmatmul.mubr.msk.bf16.gmra.mrb[56].mxu1 %vm1307_vm5, %v12909_v49  ;;  %v11237_v49 = vld [vmem:[%s13225_s26 + $0x1d8] sm:$0xe]  ;;  %v4720_v2 = vshll.u32 %v13121_v46, 16  ;;  %v4739_v28 = vshrl.u32 %v10584_v26, 16  ;;  %v4742_v33 = vshll.u32 %v10584_v26, 16  ;;  %12257 = vmatmul.mubr.msk.bf16.gmra.mrb[28].mxu0 %vm1307_vm5, %v11333_v56  ;;  %v15987_v61 = vrot.slane %v4689_v19, 4 }
 0x29a   : > { %11958 = vmatprep.mubr.msk.bf16.mxu1 %vm1307_vm5, %v12910_v40  ;;  %v12911_v40 = vld [vmem:[%s13225_s26 + $0x268] ss:$8 sps:$4 sm:$0xff]   ;;  %v15989_v5 = vrot.slane %v4706_v38, 5  ;;  %v4717_v17 = vor.u32 %v4716_v60, %v4713_v23  ;;  %v11300_v57 = vrot.slane %v11236_v52, 9  ;;  %12260 = vmatprep.mubr.msk.bf16.mxu0 %vm1307_vm5, %v11334_v34  ;;  %v15995_v45 = vrot.slane %v4703_v39, 4 }
 0x29b   : > { %v13122_v12 = vld [vmem:[%s13225_s26 + $0x1d4] sm:$0x1]  ;;  %v11301_v10 = vrot.slane %v11237_v49, 9  ;;  %v13123_v56 = vld [vmem:[%s13225_s26 + $0x1dc] sm:$0x1]  ;;  %v4681_v53 = vsel %vm13244_vm4, %v15972_v41, %v15960_v50  ;;  %v16006_v32 = vsel %vm13548_vm8, %v11299_v9, %v9115_v6  ;;  %v4727_v36 = vrot.slane %v4725_v24, 4 }
 0x29c   : > { %v9119_v59 = vrot.slane %v13122_v12, 5  ;;  %v9123_v63 = vrot.slane %v13123_v56, 5  ;;  %v11238_v1 = vld [vmem:[%s13225_s26 + $0x1f0] sm:$0xe]  ;;  %v4730_v34 = vrot.slane %v4728_v58, 5  ;;  %v16009_v15 = vrot.slane %v4720_v2, 5 }
 0x29d   : > { %v10586_v13 = vld [vmem:[%s13225_s26 + $0x1f8] sm:$0xf]  ;;  %v13124_v22 = vld [vmem:[%s13225_s26 + $0x1ec] sm:$0x1]  ;;  %v4741_v11 = vrot.slane %v4739_v28, 4  ;;  %v4744_v38 = vrot.slane %v4742_v33, 5  ;;  %v4695_v52 = vsel %vm13244_vm4, %v15987_v61, %v15974_v18  ;;  %v4709_v41 = vsel %vm13244_vm4, %v15995_v45, %v15989_v5 }
 0x29e   : > { %v4734_v19 = vshll.u32 %v13124_v22, 16  ;;  %v11239_v23 = vld [vmem:[%s13225_s26 + $0x1f8] sm:$0xe]  ;;  %v4718_v50 = vrot.slane %v4717_v17, 4  ;;  %v13125_v60 = vld [vmem:[%s13225_s26 + $0x1f4] sm:$0x1]  ;;  %v16029_v49 = vsel %vm13548_vm8, %v11300_v57, %v9119_v59  ;;  %v16033_v24 = vsel %vm13548_vm8, %v11301_v10, %v9123_v63 }
 0x29f   : > { %v4748_v26 = vshll.u32 %v13125_v60, 16  ;;  %v11302_v9 = vrot.slane %v11238_v1, 9  ;;  %v13126_v43 = vld [vmem:[%s13225_s26 + $0x1f4] sm:$0x1]  ;;  %v10588_v39 = vld [vmem:[%s13225_s26 + $0x200] sm:$0xf]  ;;  %v4745_v18 = vor.u32 %v4744_v38, %v4741_v11  ;;  %v11340_v22 = vcombine.low %v15979_v29, %v16006_v32 }
 0x2a0   : > { %v9127_v6 = vrot.slane %v13126_v43, 5  ;;  %v10590_v58 = vld [vmem:[%s13225_s26 + $0x208] sm:$0xf]  ;;  %v11303_v46 = vrot.slane %v11239_v23, 9  ;;  %v4753_v2 = vshrl.u32 %v10586_v13, 16  ;;  %v4756_v28 = vshll.u32 %v10586_v13, 16 }
 0x2a1   : > { %11959 = vmatmul.mubr.msk.bf16.gmra.mrb[60].mxu1 %vm1307_vm5, %v12911_v40  ;;  %v10592_v33 = vld [vmem:[%s13225_s26 + $0x210] sm:$0xf]  ;;  %v13127_v40 = vld [vmem:[%s13225_s26 + $0x1fc] sm:$0x1]  ;;  %v4767_v17 = vshrl.u32 %v10588_v39, 16  ;;  %v4770_v5 = vshll.u32 %v10588_v39, 16  ;;  %12261 = vmatmul.mubr.msk.bf16.gmra.mrb[32].mxu0 %vm1307_vm5, %v11335_v20  ;;  %v4723_v57 = vsel %vm13244_vm4, %v4718_v50, %v16009_v15  ;;  %v16068_v15 = vcombine.low %v4681_v53, %v4695_v52 }
 0x2a2   : > { %11996 = vmatprep.mubr.msk.bf16.mxu1 %vm1307_vm5, %v15823_v0  ;;  %v4731_v0 = vor.u32 %v4730_v34, %v4727_v36  ;;  %v9131_v61 = vrot.slane %v13127_v40, 5  ;;  %v16045_v45 = vrot.slane %v4734_v19, 5  ;;  %v16047_v12 = vrot.slane %v4748_v26, 5  ;;  %12264 = vmatprep.mubr.msk.bf16.mxu0 %vm1307_vm5, %v11336_v44  ;;  %v13128_v36 = vld [vmem:[%s13225_s26 + $0x1fc] sm:$0x1] }
 0x2a3   : > { %v16051_v59 = vsel %vm13548_vm8, %v11302_v9, %v9127_v6  ;;  %v4781_v42 = vshrl.u32 %v10590_v58, 16  ;;  %v4784_v14 = vshll.u32 %v10590_v58, 16  ;;  %v4795_v20 = vshrl.u32 %v10592_v33, 16  ;;  %v13129_v11 = vld [vmem:[%s13225_s26 + $0x204] sm:$0x1] }
 0x2a4   : > { %v4798_v10 = vshll.u32 %v10592_v33, 16  ;;  %v16057_v56 = vrot.slane %v4731_v0, 4  ;;  %v4755_v63 = vrot.slane %v4753_v2, 4  ;;  %v4758_v1 = vrot.slane %v4756_v28, 5  ;;  %v16076_v23 = vld [vmem:[%s13225_s26 + $0x200] sm:$0xe] }
 0x2a5   : > { %v4762_v34 = vshll.u32 %v13128_v36, 16  ;;  %v16060_v13 = vrot.slane %v4745_v18, 4  ;;  %v16064_v27 = vsel %vm13548_vm8, %v11303_v46, %v9131_v61  ;;  %v4769_v31 = vrot.slane %v4767_v17, 4  ;;  %v10594_v26 = vld [vmem:[%s13225_s26 + $0x218] sm:$0xf] }
 0x2a6   : > { %v4772_v44 = vrot.slane %v4770_v5, 5  ;;  %v11341_v19 = vcombine.low %v16029_v49, %v16033_v24  ;;  %v4776_v38 = vshll.u32 %v13129_v11, 16  ;;  %v4783_v50 = vrot.slane %v4781_v42, 4  ;;  %v10596_v46 = vld [vmem:[%s13225_s26 + $0x220] sm:$0xf] }
 0x2a7   : > { %v4786_v60 = vrot.slane %v4784_v14, 5  ;;  %v4800_v53 = vrot.slane %v4798_v10, 5  ;;  %v16081_v9 = vcombine.low %v4709_v41, %v4723_v57  ;;  %v4737_v43 = vsel %vm13244_vm4, %v16057_v56, %v16045_v45  ;;  %v11241_v41 = vld [vmem:[%s13225_s26 + $0x208] sm:$0xe]  ;;  %v13130_v28 = vld [vmem:[%s13225_s26 + $0x204] sm:$0x1] }
 0x2a8   : > { %v11342_v6 = vcombine.low %v16051_v59, %v16064_v27  ;;  %v4759_v39 = vor.u32 %v4758_v1, %v4755_v63  ;;  %v16093_v52 = vrot.slane %v4762_v34, 5  ;;  %v4773_v58 = vor.u32 %v4772_v44, %v4769_v31  ;;  %v11242_v18 = vld [vmem:[%s13225_s26 + $0x210] sm:$0xe]  ;;  %v13131_v5 = vld [vmem:[%s13225_s26 + $0x20c] sm:$0x1] }
 0x2a9   : > { %11997 = vmatmul.mubr.msk.bf16.vlgmr.msra.gmra.mrb[32].mxu1 %vm1307_vm5, %v15404_v47  ;;  %v4797_v47 = vrot.slane %v4795_v20, 4  ;;  %v11304_v0 = vrot.slane %v16076_v23, 9  ;;  %12265 = vmatmul.mubr.msk.bf16.gmra.mrb[36].mxu0 %vm1307_vm5, %v11337_v3  ;;  %v16102_v2 = vrot.slane %v4776_v38, 5  ;;  %v9135_v33 = vrot.slane %v13130_v28, 5  ;;  %v13132_v3 = vld [vmem:[%s13225_s26 + $0x214] sm:$0x1] }
 0x2aa   : > { %12000 = vmatprep.mubr.msk.bf16.mxu1 %vm1307_vm5, %v15881_v55  ;;  %v4751_v55 = vsel %vm13244_vm4, %v16060_v13, %v16047_v12  ;;  %v4809_v40 = vshrl.u32 %v10594_v26, 16  ;;  %v4812_v61 = vshll.u32 %v10594_v26, 16  ;;  %12268 = vmatprep.mubr.msk.bf16.mxu0 %vm1307_vm5, %v11338_v51  ;;  %v4787_v17 = vor.u32 %v4786_v60, %v4783_v50  ;;  %v11243_v42 = vld [vmem:[%s13225_s26 + $0x218] sm:$0xe]  ;;  %v13133_v36 = vld [vmem:[%s13225_s26 + $0x20c] sm:$0x1] }
 0x2ab   : > { %v4790_v48 = vshll.u32 %v13131_v5, 16  ;;  %v4801_v21 = vor.u32 %v4800_v53, %v4797_v47  ;;  %v4804_v57 = vshll.u32 %v13132_v3, 16  ;;  %v16113_v14 = vrot.slane %v4759_v39, 4  ;;  %v13134_v51 = vld [vmem:[%s13225_s26 + $0x214] sm:$0x1] }
 0x2ac   : > { %v11305_v20 = vrot.slane %v11241_v41, 9  ;;  %v4823_v10 = vshrl.u32 %v10596_v46, 16  ;;  %v4826_v63 = vshll.u32 %v10596_v46, 16  ;;  %v4774_v1 = vrot.slane %v4773_v58, 4  ;;  %v10598_v31 = vld [vmem:[%s13225_s26 + $0x238] sm:$0xf] }
 0x2ad   : > { %v9139_v4 = vrot.slane %v13133_v36, 5  ;;  %v11306_v16 = vrot.slane %v11242_v18, 9  ;;  %v9143_v34 = vrot.slane %v13134_v51, 5  ;;  %v11307_v44 = vrot.slane %v11243_v42, 9  ;;  %v13135_v11 = vld [vmem:[%s13225_s26 + $0x21c] sm:$0x1] }
 0x2ae   : > { %v9147_v38 = vrot.slane %v13135_v11, 5  ;;  %v4811_v23 = vrot.slane %v4809_v40, 4  ;;  %v4814_v50 = vrot.slane %v4812_v61, 5  ;;  %v4788_v60 = vrot.slane %v4787_v17, 4  ;;  %v11244_v41 = vld [vmem:[%s13225_s26 + $0x220] sm:$0xe] }
 0x2af   : > { %v4792_v47 = vrot.slane %v4790_v48, 5  ;;  %v4802_v53 = vrot.slane %v4801_v21, 4  ;;  %v4806_v26 = vrot.slane %v4804_v57, 5  ;;  %v4825_v39 = vrot.slane %v4823_v10, 4  ;;  %v10600_v17 = vld [vmem:[%s13225_s26 + $0x240] sm:$0xf] }
 0x2b0   : > { %v4828_v58 = vrot.slane %v4826_v63, 5  ;;  %v4837_v46 = vshrl.u32 %v10598_v31, 16  ;;  %v4765_v28 = vsel %vm13244_vm4, %v16113_v14, %v16093_v52  ;;  %v16133_v18 = vsel %vm13548_vm8, %v11304_v0, %v9135_v33  ;;  %v13136_v33 = vld [vmem:[%s13225_s26 + $0x21c] sm:$0x1]  ;;  %v11245_v48 = vld [vmem:[%s13225_s26 + $0x228] sm:$0xe] }
 0x2b1   : > { %12001 = vmatmul.mubr.msk.bf16.gmra.mrb[36].mxu1 %vm1307_vm5, %v15927_v62  ;;  %v4840_v62 = vshll.u32 %v10598_v31, 16  ;;  %v16137_v40 = vsel %vm13548_vm8, %v11305_v20, %v9139_v4  ;;  %12269 = vmatmul.mubr.msk.bf16.gmra.mrb[40].mxu0 %vm1307_vm5, %v11339_v54  ;;  %v16145_v52 = vsel %vm13548_vm8, %v11306_v16, %v9143_v34  ;;  %v4815_v0 = vor.u32 %v4814_v50, %v4811_v23  ;;  %v13137_v54 = vld [vmem:[%s13225_s26 + $0x224] sm:$0x1]  ;;  %v13139_v13 = vld [vmem:[%s13225_s26 + $0x22c] sm:$0x1] }
 0x2b2   : > { %12004 = vmatprep.mubr.msk.bf16.mxu1 %vm1307_vm5, %v15948_v7  ;;  %v4779_v7 = vsel %vm13244_vm4, %v4774_v1, %v16102_v2  ;;  %v16149_v2 = vsel %vm13548_vm8, %v11307_v44, %v9147_v38  ;;  %v4818_v61 = vshll.u32 %v13136_v33, 16  ;;  %12272 = vmatprep.mubr.msk.bf16.mxu0 %vm1307_vm5, %v11340_v22  ;;  %v4793_v37 = vsel %vm13244_vm4, %v4788_v60, %v4792_v47  ;;  %v13138_v57 = vld [vmem:[%s13225_s26 + $0x224] sm:$0x1]  ;;  %v11246_v4 = vld [vmem:[%s13225_s26 + $0x240] sm:$0xe] }
 0x2b3   : > { %v4807_v30 = vsel %vm13244_vm4, %v4802_v53, %v4806_v26  ;;  %v4832_v5 = vshll.u32 %v13137_v54, 16  ;;  %v11308_v21 = vrot.slane %v11244_v41, 9  ;;  %v4829_v3 = vor.u32 %v4828_v58, %v4825_v39  ;;  %v11247_v16 = vld [vmem:[%s13225_s26 + $0x248] sm:$0xe]  ;;  %v13141_v50 = vld [vmem:[%s13225_s26 + $0x244] sm:$0x1] }
 0x2b4   : > { %v9151_v42 = vrot.slane %v13138_v57, 5  ;;  %v4839_v14 = vrot.slane %v4837_v46, 4  ;;  %v4842_v20 = vrot.slane %v4840_v62, 5  ;;  %v10638_v29 = vcombine.low %v4737_v43, %v4751_v55  ;;  %v10602_v44 = vld [vmem:[%s13225_s26 + $0x248] sm:$0xf] }
 0x2b5   : > { %v11343_v32 = vcombine.low %v16133_v18, %v16137_v40  ;;  %v4851_v22 = vshrl.u32 %v10600_v17, 16  ;;  %v4854_v10 = vshll.u32 %v10600_v17, 16  ;;  %v4816_v63 = vrot.slane %v4815_v0, 4  ;;  %v10604_v47 = vld [vmem:[%s13225_s26 + $0x250] sm:$0xf] }
 0x2b6   : > { %v4820_v1 = vrot.slane %v4818_v61, 5  ;;  %v11309_v12 = vrot.slane %v11245_v48, 9  ;;  %v9155_v36 = vrot.slane %v13139_v13, 5  ;;  %v16182_v45 = vcombine.low %v4765_v28, %v4779_v7  ;;  %v13142_v58 = vld [vmem:[%s13225_s26 + $0x24c] sm:$0x1] }
 0x2b7   : > { %v16184_v56 = vcombine.low %v4793_v37, %v4807_v30  ;;  %v11344_v43 = vcombine.low %v16145_v52, %v16149_v2  ;;  %v4830_v51 = vrot.slane %v4829_v3, 4  ;;  %v4834_v34 = vrot.slane %v4832_v5, 5  ;;  %v10606_v46 = vld [vmem:[%s13225_s26 + $0x258] sm:$0xf]  ;;  %v13143_v49 = vld [vmem:[%s13225_s26 + $0x244] sm:$0x1] }
 0x2b8   : > { %v16192_v31 = vsel %vm13548_vm8, %v11308_v21, %v9151_v42  ;;  %v4853_v11 = vrot.slane %v4851_v22, 4  ;;  %v4856_v38 = vrot.slane %v4854_v10, 5  ;;  %v11310_v23 = vrot.slane %v11246_v4, 9  ;;  %v10608_v7 = vld [vmem:[%s13225_s26 + $0x260] sm:$0xf] }
 0x2b9   : > { %12005 = vmatmul.mubr.msk.bf16.gmra.mrb[40].mxu1 %vm1307_vm5, %v15968_v25  ;;  %v13140_v25 = vld [vmem:[%s13225_s26 + $0x23c] sm:$0x1]  ;;  %v9159_v60 = vrot.slane %v13141_v50, 5  ;;  %12273 = vmatmul.mubr.msk.bf16.gmra.mrb[44].mxu0 %vm1307_vm5, %v11341_v19  ;;  %v4821_v53 = vsel %vm13244_vm4, %v4816_v63, %v4820_v1  ;;  %v16205_v26 = vsel %vm13548_vm8, %v11309_v12, %v9155_v36  ;;  %v11311_v39 = vrot.slane %v11247_v16, 9  ;;  %v13144_v54 = vld [vmem:[%s13225_s26 + $0x24c] sm:$0x1] }
 0x2ba   : > { %12008 = vmatprep.mubr.msk.bf16.mxu1 %vm1307_vm5, %v16068_v15  ;;  %v4846_v55 = vshll.u32 %v13140_v25, 16  ;;  %v4843_v15 = vor.u32 %v4842_v20, %v4839_v14  ;;  %v9163_v41 = vrot.slane %v13142_v58, 5  ;;  %12276 = vmatprep.mubr.msk.bf16.mxu0 %vm1307_vm5, %v11342_v6  ;;  %v4860_v24 = vshll.u32 %v13143_v49, 16  ;;  %v11248_v14 = vld [vmem:[%s13225_s26 + $0x250] sm:$0xe] }
 0x2bb   : > { %v4865_v19 = vshrl.u32 %v10602_v44, 16  ;;  %v4868_v28 = vshll.u32 %v10602_v44, 16  ;;  %v4835_v0 = vsel %vm13244_vm4, %v4830_v51, %v4834_v34  ;;  %v4879_v61 = vshrl.u32 %v10604_v47, 16  ;;  %v11249_v1 = vld [vmem:[%s13225_s26 + $0x258] sm:$0xe] }
 0x2bc   : > { %v16213_v62 = vrot.slane %v4846_v55, 5  ;;  %v16219_v33 = vrot.slane %v4843_v15, 4  ;;  %v4882_v17 = vshll.u32 %v10604_v47, 16  ;;  %v4857_v37 = vor.u32 %v4856_v38, %v4853_v11  ;;  %v11250_v4 = vld [vmem:[%s13225_s26 + $0x260] sm:$0xe] }
 0x2bd   : > { %v16223_v59 = vsel %vm13548_vm8, %v11310_v23, %v9159_v60  ;;  %v4893_v27 = vshrl.u32 %v10606_v46, 16  ;;  %v4896_v6 = vshll.u32 %v10606_v46, 16  ;;  %v16229_v30 = vsel %vm13548_vm8, %v11311_v39, %v9163_v41  ;;  %v13145_v55 = vld [vmem:[%s13225_s26 + $0x254] sm:$0x1]  ;;  %v10610_v11 = vld [vmem:[%s13225_s26 + $0x268] sm:$0xf] }
 0x2be   : > { %v4874_v5 = vshll.u32 %v13144_v54, 16  ;;  %v4907_v48 = vshrl.u32 %v10608_v7, 16  ;;  %v4910_v21 = vshll.u32 %v10608_v7, 16  ;;  %v16233_v3 = vcombine.low %v4821_v53, %v4835_v0  ;;  %v13146_v40 = vld [vmem:[%s13225_s26 + $0x254] sm:$0x1] }
 0x2bf   : > { %v11345_v57 = vcombine.low %v16192_v31, %v16205_v26  ;;  %v4867_v42 = vrot.slane %v4865_v19, 4  ;;  %v4849_v20 = vsel %vm13244_vm4, %v16219_v33, %v16213_v62  ;;  %v4862_v22 = vrot.slane %v4860_v24, 5  ;;  %v11251_v31 = vld [vmem:[%s13225_s26 + $0x268] sm:$0xe]  ;;  %v13147_v23 = vld [vmem:[%s13225_s26 + $0x25c] sm:$0x1] }
 0x2c0   : > { %v4881_v10 = vrot.slane %v4879_v61, 4  ;;  %v4884_v63 = vrot.slane %v4882_v17, 5  ;;  %v11346_v12 = vcombine.low %v16223_v59, %v16229_v30  ;;  %v4895_v13 = vrot.slane %v4893_v27, 4  ;;  %v13148_v60 = vld [vmem:[%s13225_s26 + $0x25c] sm:$0x1] }
 0x2c1   : > { %12009 = vmatmul.mubr.msk.bf16.gmra.mrb[44].mxu1 %vm1307_vm5, %v16081_v9  ;;  %v4870_v9 = vrot.slane %v4868_v28, 5  ;;  %v4898_v36 = vrot.slane %v4896_v6, 5  ;;  %12277 = vmatmul.mubr.msk.bf16.gmra.mrb[48].mxu0 %vm1307_vm5, %v11343_v32  ;;  %v16250_v25 = vrot.slane %v4874_v5, 5  ;;  %v4888_v16 = vshll.u32 %v13145_v55, 16  ;;  %v13149_v53 = vld [vmem:[%s13225_s26 + $0x264] sm:$0x1] }
 0x2c2   : > { %12012 = vmatprep.mubr.msk.bf16.mxu1 %vm1307_vm5, %v10638_v29  ;;  %v4858_v29 = vrot.slane %v4857_v37, 4  ;;  %v4909_v51 = vrot.slane %v4907_v48, 4  ;;  %v4912_v34 = vrot.slane %v4910_v21, 5  ;;  %12280 = vmatprep.mubr.msk.bf16.mxu0 %vm1307_vm5, %v11344_v43  ;;  %v11312_v18 = vrot.slane %v11248_v14, 9  ;;  %v10612_v39 = vld [vmem:[%s13225_s26 + $0x270] sm:$0xf] }
 0x2c3   : > { %v4871_v15 = vor.u32 %v4870_v9, %v4867_v42  ;;  %v9167_v32 = vrot.slane %v13146_v40, 5  ;;  %v11313_v44 = vrot.slane %v11249_v1, 9  ;;  %v4885_v38 = vor.u32 %v4884_v63, %v4881_v10  ;;  %v13150_v2 = vld [vmem:[%s13225_s26 + $0x264] sm:$0x1]  ;;  %v13151_v62 = vld [vmem:[%s13225_s26 + $0x26c] sm:$0x1] }
 0x2c4   : > { %v9171_v50 = vrot.slane %v13147_v23, 5  ;;  %v4902_v47 = vshll.u32 %v13148_v60, 16  ;;  %v4916_v26 = vshll.u32 %v13149_v53, 16  ;;  %v4899_v58 = vor.u32 %v4898_v36, %v4895_v13  ;;  %v11252_v14 = vld [vmem:[%s13225_s26 + $0x270] sm:$0xe] }
 0x2c5   : > { %v11314_v52 = vrot.slane %v11250_v4, 9  ;;  %v9175_v43 = vrot.slane %v13150_v2, 5  ;;  %v11315_v41 = vrot.slane %v11251_v31, 9  ;;  %v4913_v46 = vor.u32 %v4912_v34, %v4909_v51  ;;  %v11253_v10 = vld [vmem:[%s13225_s26 + $0x278] sm:$0xe] }
 0x2c6   : > { %v9179_v49 = vrot.slane %v13151_v62, 5  ;;  %v4921_v24 = vshrl.u32 %v10610_v11, 16  ;;  %v4924_v19 = vshll.u32 %v10610_v11, 16  ;;  %v4863_v28 = vsel %vm13244_vm4, %v4858_v29, %v4862_v22  ;;  %v13152_v29 = vld [vmem:[%s13225_s26 + $0x26c] sm:$0x1] }
 0x2c7   : > { %v4890_v7 = vrot.slane %v4888_v16, 5  ;;  %v4935_v0 = vshrl.u32 %v10612_v39, 16  ;;  %v4938_v33 = vshll.u32 %v10612_v39, 16  ;;  %v4872_v61 = vrot.slane %v4871_v15, 4  ;;  %v13153_v4 = vld [vmem:[%s13225_s26 + $0x274] sm:$0x1] }
 0x2c8   : > { %v4886_v17 = vrot.slane %v4885_v38, 4  ;;  %v9172_v37 = vsel %vm13548_vm8, %v11313_v44, %v9171_v50  ;;  %v4900_v59 = vrot.slane %v4899_v58, 4  ;;  %v4904_v27 = vrot.slane %v4902_v47, 5  ;;  %v13154_v51 = vld [vmem:[%s13225_s26 + $0x274] sm:$0x1] }
 0x2c9   : > { %12013 = vmatmul.mubr.msk.bf16.gmra.mrb[48].mxu1 %vm1307_vm5, %v16182_v45  ;;  %v9168_v45 = vsel %vm13548_vm8, %v11312_v18, %v9167_v32  ;;  %v4918_v6 = vrot.slane %v4916_v26, 5  ;;  %12281 = vmatmul.mubr.msk.bf16.gmra.mrb[52].mxu0 %vm1307_vm5, %v11345_v57  ;;  %v4914_v30 = vrot.slane %v4913_v46, 4  ;;  %v9180_v54 = vsel %vm13548_vm8, %v11315_v41, %v9179_v49  ;;  %v13155_v15 = vld [vmem:[%s13225_s26 + $0x27c] sm:$0x1] }
 0x2ca   : > { %12016 = vmatprep.mubr.msk.bf16.mxu1 %vm1307_vm5, %v16184_v56  ;;  %v9176_v56 = vsel %vm13548_vm8, %v11314_v52, %v9175_v43  ;;  %v4923_v5 = vrot.slane %v4921_v24, 4  ;;  %v4926_v48 = vrot.slane %v4924_v19, 5  ;;  %v10642_v21 = vcombine.low %v4849_v20, %v4863_v28  ;;  %12284 = vmatprep.mubr.msk.bf16.mxu0 %vm1307_vm5, %v11346_v12 }
 0x2cb   : > { %v4937_v42 = vrot.slane %v4935_v0, 4  ;;  %v4940_v9 = vrot.slane %v4938_v33, 5  ;;  %v4877_v22 = vsel %vm13244_vm4, %v4872_v61, %v16250_v25  ;;  %v11347_v57 = vcombine.low %v9168_v45, %v9172_v37 }
 0x2cc   : > { %v4891_v63 = vsel %vm13244_vm4, %v4886_v17, %v4890_v7  ;;  %v4905_v20 = vsel %vm13244_vm4, %v4900_v59, %v4904_v27  ;;  %v11348_v1 = vcombine.low %v9176_v56, %v9180_v54  ;;  %v4930_v12 = vshll.u32 %v13152_v29, 16 }
 0x2cd   : > { %v4919_v13 = vsel %vm13244_vm4, %v4914_v30, %v4918_v6  ;;  %v4927_v36 = vor.u32 %v4926_v48, %v4923_v5  ;;  %v4944_v25 = vshll.u32 %v13153_v4, 16  ;;  %v11316_v55 = vrot.slane %v11252_v14, 9 }
 0x2ce   : > { %v4941_v16 = vor.u32 %v4940_v9, %v4937_v42  ;;  %v9183_v34 = vrot.slane %v13154_v51, 5  ;;  %v11317_v31 = vrot.slane %v11253_v10, 9  ;;  %v9187_v18 = vrot.slane %v13155_v15, 5 }
 0x2cf   : > { %v10643_v40 = vcombine.low %v4877_v22, %v4891_v63  ;;  %v10644_v32 = vcombine.low %v4905_v20, %v4919_v13  ;;  %v4946_v44 = vrot.slane %v4944_v25, 5  ;;  %v4928_v11 = vrot.slane %v4927_v36, 4 }
 0x2d0   : > { %v4942_v38 = vrot.slane %v4941_v16, 4  ;;  %v9184_v23 = vsel %vm13548_vm8, %v11316_v55, %v9183_v34  ;;  %v9188_v50 = vsel %vm13548_vm8, %v11317_v31, %v9187_v18 }
 0x2d1   : > { %12017 = vmatmul.mubr.msk.bf16.gmra.mrb[52].mxu1 %vm1307_vm5, %v16233_v3  ;;  %12285 = vmatmul.mubr.msk.bf16.gmra.mrb[56].mxu0 %vm1307_vm5, %v11347_v57  ;;  %v4932_v3 = vrot.slane %v4930_v12, 5  ;;  %v11349_v60 = vcombine.low %v9184_v23, %v9188_v50  ;;  %v16363_v57 = vld [vmem:[%s16465_s2] ss:$0 sm:$0xff] }
 0x2d2   : > { %12020 = vmatprep.mubr.msk.bf16.mxu1 %vm1307_vm5, %v10642_v21  ;;  %12288 = vmatprep.mubr.msk.bf16.mxu0 %vm1307_vm5, %v11348_v1  ;;  %v4947_v53 = vsel %vm13244_vm4, %v4942_v38, %v4946_v44 }
 0x2d3   : > { %v4933_v47 = vsel %vm13244_vm4, %v4928_v11, %v4932_v3 }
 0x2d4   : > { %v10645_v26 = vcombine.low %v4933_v47, %v4947_v53 }
 0x2d9   : > { %12021 = vmatmul.mubr.msk.bf16.gmra.mrb[56].mxu1 %vm1307_vm5, %v10643_v40  ;;  %12289 = vmatmul.mubr.msk.bf16.gmra.mrb[60].mxu0 %vm1307_vm5, %v11349_v60 }
 0x2da   : > { %12024 = vmatprep.mubr.msk.bf16.mxu1 %vm1307_vm5, %v10644_v32 }
 0x2e1   : > { %12025 = vmatmul.mubr.msk.bf16.gmra.mrb[60].mxu1 %vm1307_vm5, %v10645_v26 }
 0x2fc   : > { %v11900_v39 = vpop.f32.mrb[0].mxu1 }
 0x2fd   : > { %v3605_v58 = vpop.f32.mrb[1].mxu1 }
 0x2fe   : > { %v11901_v8 = vpop.f32.mrb[2].mxu1 }
 0x2ff   : > { %v3608_v52 = vpop.f32.mrb[3].mxu1 }
 0x304   : > { %v11904_v2 = vpop.f32.mrb[4].mxu1 }
 0x305   : > { %v3621_v43 = vpop.f32.mrb[5].mxu1 }
 0x306   : > { %v11905_v41 = vpop.f32.mrb[6].mxu1 }
 0x307   : > { %v3624_v46 = vpop.f32.mrb[7].mxu1 }
 0x30c   : > { %v11908_v62 = vpop.f32.mrb[8].mxu1 }
 0x30d   : > { %v16314_v49 = vpop.f32.mrb[9].mxu1 }
 0x30e   : > { %v16316_v24 = vpop.f32.mrb[10].mxu1 }
 0x30f   : > { %v16318_v35 = vpop.f32.mrb[11].mxu1 }
 0x314   : > { %v16320_v19 = vpop.f32.mrb[12].mxu1 }
 0x315   : > { %v16322_v28 = vpop.f32.mrb[13].mxu1 }
 0x316   : > { %v16324_v7 = vpop.f32.mrb[14].mxu1 }
 0x317   : > { %v16326_v0 = vpop.f32.mrb[15].mxu1 }
 0x31c   : > { %v16328_v33 = vpop.f32.mrb[16].mxu1 }
 0x31d   : > { %v16330_v61 = vpop.f32.mrb[17].mxu1 }
 0x31e   : > { %v16332_v17 = vpop.f32.mrb[18].mxu1 }
 0x31f   : > { %v16334_v45 = vpop.f32.mrb[19].mxu1 }
 0x324   : > { %v16336_v37 = vpop.f32.mrb[20].mxu1 }
 0x325   : > { %v16338_v59 = vpop.f32.mrb[21].mxu1 }
 0x326   : > { %v16340_v27 = vpop.f32.mrb[22].mxu1 }
 0x327   : > { %v16342_v6 = vpop.f32.mrb[23].mxu1 }
 0x32c   : > { %v16344_v56 = vpop.f32.mrb[24].mxu1 }
 0x32d   : > { %v16346_v30 = vpop.f32.mrb[25].mxu1 }
 0x32e   : > { %v16348_v54 = vpop.f32.mrb[26].mxu1 }
 0x32f   : > { %v16350_v5 = vpop.f32.mrb[27].mxu1 }
 0x334   : > { %v16352_v48 = vpop.f32.mrb[28].mxu1  ;;  %v12230_v14 = vpop.f32.mrb[0].mxu0 }
 0x335   : > { %v16354_v21 = vpop.f32.mrb[29].mxu1  ;;  %v12294_v22 = vadd.f32 %v12230_v14, %v11900_v39  ;;  %v9418_v10 = vpop.f32.mrb[1].mxu0 }
 0x336   : > { %v16356_v42 = vpop.f32.mrb[30].mxu1  ;;  %v12295_v63 = vadd.f32 %v9418_v10, %v3605_v58  ;;  %v12231_v20 = vpop.f32.mrb[2].mxu0 }
 0x337   : > { %v16358_v9 = vpop.f32.mrb[31].mxu1  ;;  %v12296_v1 = vadd.f32 %v12231_v20, %v11901_v8  ;;  %v9421_v29 = vpop.f32.mrb[3].mxu0  ;;  %v9746_v36 = vadd.f32 %v12294_v22, %v16363_v57 }
 0x338   : > { %v9744_v12 = vadd.f32 %v12295_v63, %v16363_v57  ;;  %v12297_v13 = vadd.f32 %v9421_v29, %v3608_v52 }
 0x339   : > { %v9747_v55 = vadd.f32 %v12296_v1, %v16363_v57  ;;  %v9810_v15 = vmax.f32 %v9746_v36, 0.0 }
 0x33a   : > { %v9745_v4 = vadd.f32 %v12297_v13, %v16363_v57  ;;  %v9808_v25 = vmax.f32 %v9744_v12, 0.0 }
 0x33b   : > { %v9811_v11 = vmax.f32 %v9747_v55, 0.0 }
 0x33c   : > { %v9809_v16 = vmax.f32 %v9745_v4, 0.0  ;;  %v12234_v51 = vpop.f32.mrb[4].mxu0 }
 0x33d   : > { %v12298_v34 = vadd.f32 %v12234_v51, %v11904_v2  ;;  %v9434_v31 = vpop.f32.mrb[5].mxu0 }
 0x33e   : > { %v9872_v18 = vadd.f32 %v9809_v16, %v9808_v25  ;;  %v12299_v40 = vadd.f32 %v9434_v31, %v3621_v43  ;;  %v12235_v32 = vpop.f32.mrb[6].mxu0 }
 0x33f   : > { %v12300_v3 = vadd.f32 %v12235_v32, %v11905_v41  ;;  %v9437_v44 = vpop.f32.mrb[7].mxu0  ;;  %v9750_v60 = vadd.f32 %v12298_v34, %v16363_v57 }
 0x340   : > { %v9873_v38 = vadd.f32 %v9872_v18, %v9810_v15  ;;  %v9748_v23 = vadd.f32 %v12299_v40, %v16363_v57  ;;  %v12301_v50 = vadd.f32 %v9437_v44, %v3624_v46 }
 0x341   : > { %v9751_v58 = vadd.f32 %v12300_v3, %v16363_v57  ;;  %v9814_v41 = vmax.f32 %v9750_v60, 0.0 }
 0x342   : > { %v9812_v47 = vmax.f32 %v9748_v23, 0.0  ;;  %v9874_v53 = vadd.f32 %v9873_v38, %v9811_v11  ;;  %v9749_v26 = vadd.f32 %v12301_v50, %v16363_v57 }
 0x343   : > { %v9815_v20 = vmax.f32 %v9751_v58, 0.0 }
 0x344   : > { %v9875_v39 = vadd.f32 %v9874_v53, %v9812_v47  ;;  %v9813_v8 = vmax.f32 %v9749_v26, 0.0  ;;  %v12238_v52 = vpop.f32.mrb[8].mxu0 }
 0x345   : > { %v12302_v2 = vadd.f32 %v12238_v52, %v11908_v62  ;;  %v9450_v43 = vpop.f32.mrb[9].mxu0 }
 0x346   : > { %v9876_v14 = vadd.f32 %v9875_v39, %v9813_v8  ;;  %v12303_v22 = vadd.f32 %v9450_v43, %v16314_v49  ;;  %v12239_v10 = vpop.f32.mrb[10].mxu0 }
 0x347   : > { %v12304_v46 = vadd.f32 %v12239_v10, %v16316_v24  ;;  %v9453_v63 = vpop.f32.mrb[11].mxu0  ;;  %v9754_v36 = vadd.f32 %v12302_v2, %v16363_v57 }
 0x348   : > { %v9877_v1 = vadd.f32 %v9876_v14, %v9814_v41  ;;  %v9752_v29 = vadd.f32 %v12303_v22, %v16363_v57  ;;  %v12305_v12 = vadd.f32 %v9453_v63, %v16318_v35 }
 0x349   : > { %v9755_v55 = vadd.f32 %v12304_v46, %v16363_v57  ;;  %v9818_v34 = vmax.f32 %v9754_v36, 0.0 }
 0x34a   : > { %v9878_v13 = vadd.f32 %v9877_v1, %v9815_v20  ;;  %v9753_v62 = vadd.f32 %v12305_v12, %v16363_v57  ;;  %v9816_v25 = vmax.f32 %v9752_v29, 0.0 }
 0x34b   : > { %v9819_v3 = vmax.f32 %v9755_v55, 0.0 }
 0x34c   : > { %v9879_v4 = vrot.slane %v9878_v13, 4  ;;  %v9817_v49 = vmax.f32 %v9753_v62, 0.0  ;;  %v12242_v16 = vpop.f32.mrb[12].mxu0 }
 0x34d   : > { %v12306_v24 = vadd.f32 %v12242_v16, %v16320_v19  ;;  %v9466_v51 = vpop.f32.mrb[13].mxu0 }
 0x34e   : > { %v9885_v31 = vadd.f32 %v9817_v49, %v9816_v25  ;;  %v12307_v15 = vadd.f32 %v9466_v51, %v16322_v28  ;;  %v12243_v18 = vpop.f32.mrb[14].mxu0  ;;  %v9880_v35 = vadd.f32 %v9879_v4, %v9878_v13 }
 0x34f   : > { %v12308_v40 = vadd.f32 %v12243_v18, %v16324_v7  ;;  %v9469_v32 = vpop.f32.mrb[15].mxu0  ;;  %v9758_v23 = vadd.f32 %v12306_v24, %v16363_v57 }
 0x350   : > { %v9886_v44 = vadd.f32 %v9885_v31, %v9818_v34  ;;  %v9756_v11 = vadd.f32 %v12307_v15, %v16363_v57  ;;  %v12309_v38 = vadd.f32 %v9469_v32, %v16326_v0  ;;  %v9881_v47 = vrot.slane %v9880_v35, 2 }
 0x351   : > { %v9759_v28 = vadd.f32 %v12308_v40, %v16363_v57  ;;  %v9822_v8 = vmax.f32 %v9758_v23, 0.0 }
 0x352   : > { %v9820_v50 = vmax.f32 %v9756_v11, 0.0  ;;  %v9887_v19 = vadd.f32 %v9886_v44, %v9819_v3  ;;  %v9757_v60 = vadd.f32 %v12309_v38, %v16363_v57  ;;  %v9882_v43 = vadd.f32 %v9881_v47, %v9880_v35 }
 0x353   : > { %v9823_v22 = vmax.f32 %v9759_v28, 0.0 }
 0x354   : > { %v9888_v53 = vadd.f32 %v9887_v19, %v9820_v50  ;;  %v9821_v26 = vmax.f32 %v9757_v60, 0.0  ;;  %v12246_v39 = vpop.f32.mrb[16].mxu0  ;;  %v9883_v29 = vrot.slane %v9882_v43, 1 }
 0x355   : > { %v12310_v7 = vadd.f32 %v12246_v39, %v16328_v33  ;;  %v9482_v58 = vpop.f32.mrb[17].mxu0 }
 0x356   : > { %v9889_v52 = vadd.f32 %v9888_v53, %v9821_v26  ;;  %v12311_v2 = vadd.f32 %v9482_v58, %v16330_v61  ;;  %v12247_v0 = vpop.f32.mrb[18].mxu0  ;;  %v9884_v24 = vadd.f32 %v9883_v29, %v9882_v43 }
 0x357   : > { %v12312_v41 = vadd.f32 %v12247_v0, %v16332_v17  ;;  %v9485_v14 = vpop.f32.mrb[19].mxu0  ;;  %v9762_v1 = vadd.f32 %v12310_v7, %v16363_v57 }
 0x358   : > { %v9890_v10 = vadd.f32 %v9889_v52, %v9822_v8  ;;  %v9760_v46 = vadd.f32 %v12311_v2, %v16363_v57  ;;  %v12313_v63 = vadd.f32 %v9485_v14, %v16334_v45 }
 0x359   : > { %v9763_v12 = vadd.f32 %v12312_v41, %v16363_v57  ;;  %v9826_v55 = vmax.f32 %v9762_v1, 0.0 }
 0x35a   : > { %v9891_v20 = vadd.f32 %v9890_v10, %v9823_v22  ;;  %v9761_v33 = vadd.f32 %v12313_v63, %v16363_v57  ;;  %v9824_v13 = vmax.f32 %v9760_v46, 0.0 }
 0x35b   : > { %v9827_v51 = vmax.f32 %v9763_v12, 0.0 }
 0x35c   : > { %v9892_v61 = vrot.slane %v9891_v20, 4  ;;  %v9825_v36 = vmax.f32 %v9761_v33, 0.0  ;;  %v12250_v62 = vpop.f32.mrb[20].mxu0 }
 0x35d   : > { %v12314_v17 = vadd.f32 %v12250_v62, %v16336_v37  ;;  %v9498_v4 = vpop.f32.mrb[21].mxu0 }
 0x35e   : > { %v9893_v25 = vadd.f32 %v9892_v61, %v9891_v20  ;;  %v9898_v49 = vadd.f32 %v9825_v36, %v9824_v13  ;;  %v12315_v45 = vadd.f32 %v9498_v4, %v16338_v59  ;;  %v12251_v16 = vpop.f32.mrb[22].mxu0  ;;  %v9976_v59 = vmul.f32 0.015625, %v9884_v24 }
 0x35f   : > { %v12316_v34 = vadd.f32 %v12251_v16, %v16340_v27  ;;  %v9501_v31 = vpop.f32.mrb[23].mxu0  ;;  %v9766_v37 = vadd.f32 %v12314_v17, %v16363_v57 }
 0x360   : > { %v9894_v15 = vrot.slane %v9893_v25, 2  ;;  %v9899_v18 = vadd.f32 %v9898_v49, %v9826_v55  ;;  %v9764_v35 = vadd.f32 %v12315_v45, %v16363_v57  ;;  %v12317_v40 = vadd.f32 %v9501_v31, %v16342_v6 }
 0x361   : > { %v9767_v38 = vadd.f32 %v12316_v34, %v16363_v57  ;;  %v9830_v28 = vmax.f32 %v9766_v37, 0.0  ;;  %v11393_v7 = vpack.c.bf16 %v9976_v59, %v9976_v59 }
 0x362   : > { %v9895_v32 = vadd.f32 %v9894_v15, %v9893_v25  ;;  %v9828_v3 = vmax.f32 %v9764_v35, 0.0  ;;  %v9900_v44 = vadd.f32 %v9899_v18, %v9827_v51  ;;  %v9765_v11 = vadd.f32 %v12317_v40, %v16363_v57 }
 0x363   : > { %v9831_v58 = vmax.f32 %v9767_v38, 0.0  ;;  %v10016_v46 = vunpack.c.l.b16 %v11393_v7 }
 0x364   : > { %v9896_v23 = vrot.slane %v9895_v32, 1  ;;  %v9901_v50 = vadd.f32 %v9900_v44, %v9828_v3  ;;  %v9829_v27 = vmax.f32 %v9765_v11, 0.0  ;;  %v12254_v19 = vpop.f32.mrb[24].mxu0 }
 0x365   : > { %v12318_v60 = vadd.f32 %v12254_v19, %v16344_v56  ;;  %v9514_v47 = vpop.f32.mrb[25].mxu0 }
 0x366   : > { %v9897_v53 = vadd.f32 %v9896_v23, %v9895_v32  ;;  %v9902_v6 = vadd.f32 %v9901_v50, %v9829_v27  ;;  %v12319_v26 = vadd.f32 %v9514_v47, %v16346_v30  ;;  %v12255_v39 = vpop.f32.mrb[26].mxu0 }
 0x367   : > { %v12320_v8 = vadd.f32 %v12255_v39, %v16348_v54  ;;  %v9517_v52 = vpop.f32.mrb[27].mxu0  ;;  %v9770_v56 = vadd.f32 %v12318_v60, %v16363_v57 }
 0x368   : > { %v9977_v2 = vmul.f32 0.015625, %v9897_v53  ;;  %v9903_v0 = vadd.f32 %v9902_v6, %v9830_v28  ;;  %v9768_v43 = vadd.f32 %v12319_v26, %v16363_v57  ;;  %v12321_v41 = vadd.f32 %v9517_v52, %v16350_v5 }
 0x369   : > { %v9771_v30 = vadd.f32 %v12320_v8, %v16363_v57  ;;  %v9834_v29 = vmax.f32 %v9770_v56, 0.0 }
 0x36a   : > { %v11394_v14 = vpack.c.bf16 %v9977_v2, %v9977_v2  ;;  %v9904_v22 = vadd.f32 %v9903_v0, %v9831_v58  ;;  %v9769_v10 = vadd.f32 %v12321_v41, %v16363_v57  ;;  %v9832_v54 = vmax.f32 %v9768_v43, 0.0 }
 0x36b   : > { %v9835_v4 = vmax.f32 %v9771_v30, 0.0 }
 0x36c   : > { %v10017_v63 = vunpack.c.l.b16 %v11394_v14  ;;  %v9905_v20 = vrot.slane %v9904_v22, 4  ;;  %v9833_v1 = vmax.f32 %v9769_v10, 0.0  ;;  %v12258_v33 = vpop.f32.mrb[28].mxu0 }
 0x36d   : > { %v12322_v12 = vadd.f32 %v12258_v33, %v16352_v48  ;;  %v9530_v61 = vpop.f32.mrb[29].mxu0 }
 0x36e   : > { %v10025_v5 = vsel %vm10024_vm9, %v10017_v63, %v10016_v46  ;;  %v9906_v13 = vadd.f32 %v9905_v20, %v9904_v22  ;;  %v9911_v36 = vadd.f32 %v9833_v1, %v9832_v54  ;;  %v12323_v62 = vadd.f32 %v9530_v61, %v16354_v21  ;;  %v12259_v17 = vpop.f32.mrb[30].mxu0 }
 0x36f   : > { %v12324_v25 = vadd.f32 %v12259_v17, %v16356_v42  ;;  %v9533_v55 = vpop.f32.mrb[31].mxu0  ;;  %v9774_v51 = vadd.f32 %v12322_v12, %v16363_v57 }
 0x370   : > { %v9907_v49 = vrot.slane %v9906_v13, 2  ;;  %v9912_v45 = vadd.f32 %v9911_v36, %v9834_v29  ;;  %v9772_v16 = vadd.f32 %v12323_v62, %v16363_v57  ;;  %v12325_v24 = vadd.f32 %v9533_v55, %v16358_v9 }
 0x371   : > { %v9775_v35 = vadd.f32 %v12324_v25, %v16363_v57  ;;  %v9838_v3 = vmax.f32 %v9774_v51, 0.0 }
 0x372   : > { %v9908_v48 = vadd.f32 %v9907_v49, %v9906_v13  ;;  %v9836_v34 = vmax.f32 %v9772_v16, 0.0  ;;  %v9913_v31 = vadd.f32 %v9912_v45, %v9835_v4  ;;  %v9773_v15 = vadd.f32 %v12325_v24, %v16363_v57 }
 0x373   : > { %v9839_v38 = vmax.f32 %v9775_v35, 0.0 }
 0x374   : > { %v9909_v18 = vrot.slane %v9908_v48, 1  ;;  %v9914_v21 = vadd.f32 %v9913_v31, %v9836_v34  ;;  %v9837_v40 = vmax.f32 %v9773_v15, 0.0  ;;  %v12262_v42 = vpop.f32.mrb[32].mxu0 }
 0x375   : > { %v9546_v37 = vpop.f32.mrb[33].mxu0 }
 0x376   : > { %v9910_v32 = vadd.f32 %v9909_v18, %v9908_v48  ;;  %v9915_v44 = vadd.f32 %v9914_v21, %v9837_v40  ;;  %v12263_v11 = vpop.f32.mrb[34].mxu0 }
 0x377   : > { %v9549_v59 = vpop.f32.mrb[35].mxu0 }
 0x378   : > { %v9978_v9 = vmul.f32 0.015625, %v9910_v32  ;;  %v9916_v23 = vadd.f32 %v9915_v44, %v9838_v3 }
 0x37a   : > { %v11395_v60 = vpack.c.bf16 %v9978_v9, %v9978_v9  ;;  %v9917_v47 = vadd.f32 %v9916_v23, %v9839_v38 }
 0x37c   : > { %v11998_v50 = vpop.f32.mrb[32].mxu1  ;;  %v10018_v39 = vunpack.c.l.b16 %v11395_v60  ;;  %v9918_v7 = vrot.slane %v9917_v47, 4  ;;  %v12266_v52 = vpop.f32.mrb[36].mxu0 }
 0x37d   : > { %v12326_v27 = vadd.f32 %v12262_v42, %v11998_v50  ;;  %v5305_v19 = vpop.f32.mrb[33].mxu1  ;;  %v9562_v2 = vpop.f32.mrb[37].mxu0 }
 0x37e   : > { %v12327_v53 = vadd.f32 %v9546_v37, %v5305_v19  ;;  %v11999_v28 = vpop.f32.mrb[34].mxu1  ;;  %v10027_v0 = vsel %vm10026_vm10, %v10018_v39, %v10025_v5  ;;  %v9919_v43 = vadd.f32 %v9918_v7, %v9917_v47  ;;  %v12267_v14 = vpop.f32.mrb[38].mxu0 }
 0x37f   : > { %v12328_v6 = vadd.f32 %v12263_v11, %v11999_v28  ;;  %v5308_v26 = vpop.f32.mrb[35].mxu1  ;;  %v9778_v41 = vadd.f32 %v12326_v27, %v16363_v57  ;;  %v9565_v10 = vpop.f32.mrb[39].mxu0 }
 0x380   : > { %v9776_v58 = vadd.f32 %v12327_v53, %v16363_v57  ;;  %v12329_v8 = vadd.f32 %v9549_v59, %v5308_v26  ;;  %v9920_v46 = vrot.slane %v9919_v43, 2 }
 0x381   : > { %v9779_v22 = vadd.f32 %v12328_v6, %v16363_v57  ;;  %v9842_v29 = vmax.f32 %v9778_v41, 0.0 }
 0x382   : > { %v9777_v56 = vadd.f32 %v12329_v8, %v16363_v57  ;;  %v9840_v30 = vmax.f32 %v9776_v58, 0.0  ;;  %v9921_v33 = vadd.f32 %v9920_v46, %v9919_v43 }
 0x383   : > { %v9843_v13 = vmax.f32 %v9779_v22, 0.0 }
 0x384   : > { %v9841_v63 = vmax.f32 %v9777_v56, 0.0  ;;  %v12002_v20 = vpop.f32.mrb[36].mxu1  ;;  %v9922_v17 = vrot.slane %v9921_v33, 1  ;;  %v12270_v49 = vpop.f32.mrb[40].mxu0 }
 0x385   : > { %v12330_v54 = vadd.f32 %v12266_v52, %v12002_v20  ;;  %v5321_v1 = vpop.f32.mrb[37].mxu1  ;;  %v9578_v16 = vpop.f32.mrb[41].mxu0 }
 0x386   : > { %v9924_v12 = vadd.f32 %v9841_v63, %v9840_v30  ;;  %v12331_v61 = vadd.f32 %v9562_v2, %v5321_v1  ;;  %v12003_v5 = vpop.f32.mrb[38].mxu1  ;;  %v9923_v24 = vadd.f32 %v9922_v17, %v9921_v33  ;;  %v12271_v31 = vpop.f32.mrb[42].mxu0 }
 0x387   : > { %v12332_v36 = vadd.f32 %v12267_v14, %v12003_v5  ;;  %v5324_v62 = vpop.f32.mrb[39].mxu1  ;;  %v9782_v45 = vadd.f32 %v12330_v54, %v16363_v57  ;;  %v9581_v18 = vpop.f32.mrb[43].mxu0 }
 0x388   : > { %v9925_v4 = vadd.f32 %v9924_v12, %v9842_v29  ;;  %v9780_v25 = vadd.f32 %v12331_v61, %v16363_v57  ;;  %v12333_v55 = vadd.f32 %v9565_v10, %v5324_v62  ;;  %v9979_v21 = vmul.f32 0.015625, %v9923_v24 }
 0x389   : > { %v9783_v15 = vadd.f32 %v12332_v36, %v16363_v57  ;;  %v9846_v44 = vmax.f32 %v9782_v45, 0.0 }
 0x38a   : > { %v9844_v51 = vmax.f32 %v9780_v25, 0.0  ;;  %v9926_v48 = vadd.f32 %v9925_v4, %v9843_v13  ;;  %v9781_v34 = vadd.f32 %v12333_v55, %v16363_v57  ;;  %v11396_v3 = vpack.c.bf16 %v9979_v21, %v9979_v21 }
 0x38b   : > { %v9847_v38 = vmax.f32 %v9783_v15, 0.0 }
 0x38c   : > { %v9927_v35 = vadd.f32 %v9926_v48, %v9844_v51  ;;  %v9845_v40 = vmax.f32 %v9781_v34, 0.0  ;;  %v12006_v42 = vpop.f32.mrb[40].mxu1  ;;  %v10019_v27 = vunpack.c.l.b16 %v11396_v3  ;;  %v12274_v53 = vpop.f32.mrb[44].mxu0 }
 0x38d   : > { %v12334_v37 = vadd.f32 %v12270_v49, %v12006_v42  ;;  %v5337_v32 = vpop.f32.mrb[41].mxu1  ;;  %v9594_v28 = vpop.f32.mrb[45].mxu0 }
 0x38e   : > { %v9928_v11 = vadd.f32 %v9927_v35, %v9845_v40  ;;  %v12335_v59 = vadd.f32 %v9578_v16, %v5337_v32  ;;  %v12007_v9 = vpop.f32.mrb[42].mxu1  ;;  %v16429_v6 = vsel %vm10028_vm11, %v10019_v27, %v10027_v0  ;;  %v12275_v58 = vpop.f32.mrb[46].mxu0 }
 0x38f   : > { %v12336_v23 = vadd.f32 %v12271_v31, %v12007_v9  ;;  %v5340_v50 = vpop.f32.mrb[43].mxu1  ;;  %v9786_v39 = vadd.f32 %v12334_v37, %v16363_v57  ;;  %v9597_v52 = vpop.f32.mrb[47].mxu0 }
 0x390   : > { %v9929_v19 = vadd.f32 %v9928_v11, %v9846_v44  ;;  %v9784_v60 = vadd.f32 %v12335_v59, %v16363_v57  ;;  %v12337_v47 = vadd.f32 %v9581_v18, %v5340_v50 }
 0x391   : > { %v9787_v8 = vadd.f32 %v12336_v23, %v16363_v57  ;;  %v9850_v46 = vmax.f32 %v9786_v39, 0.0 }
 0x392   : > { %v9930_v26 = vadd.f32 %v9929_v19, %v9847_v38  ;;  %v9785_v7 = vadd.f32 %v12337_v47, %v16363_v57  ;;  %v9848_v43 = vmax.f32 %v9784_v60, 0.0 }
 0x393   : > { %v9851_v20 = vmax.f32 %v9787_v8, 0.0 }
 0x394   : > { %v9931_v2 = vrot.slane %v9930_v26, 4  ;;  %v9849_v41 = vmax.f32 %v9785_v7, 0.0  ;;  %v12010_v56 = vpop.f32.mrb[44].mxu1  ;;  %v12278_v5 = vpop.f32.mrb[48].mxu0 }
 0x395   : > { %v12338_v14 = vadd.f32 %v12274_v53, %v12010_v56  ;;  %v5353_v22 = vpop.f32.mrb[45].mxu1  ;;  %v9610_v36 = vpop.f32.mrb[49].mxu0 }
 0x396   : > { %v9932_v10 = vadd.f32 %v9931_v2, %v9930_v26  ;;  %v9937_v30 = vadd.f32 %v9849_v41, %v9848_v43  ;;  %v12339_v0 = vadd.f32 %v9594_v28, %v5353_v22  ;;  %v12011_v63 = vpop.f32.mrb[46].mxu1  ;;  %v12279_v55 = vpop.f32.mrb[50].mxu0 }
 0x397   : > { %v12340_v54 = vadd.f32 %v12275_v58, %v12011_v63  ;;  %v5356_v1 = vpop.f32.mrb[47].mxu1  ;;  %v9790_v13 = vadd.f32 %v12338_v14, %v16363_v57  ;;  %v9613_v45 = vpop.f32.mrb[51].mxu0 }
 0x398   : > { %v9933_v33 = vrot.slane %v9932_v10, 2  ;;  %v9938_v29 = vadd.f32 %v9937_v30, %v9850_v46  ;;  %v9788_v12 = vadd.f32 %v12339_v0, %v16363_v57  ;;  %v12341_v61 = vadd.f32 %v9597_v52, %v5356_v1 }
 0x399   : > { %v9791_v49 = vadd.f32 %v12340_v54, %v16363_v57  ;;  %v9854_v18 = vmax.f32 %v9790_v13, 0.0 }
 0x39a   : > { %v9934_v62 = vadd.f32 %v9933_v33, %v9932_v10  ;;  %v9852_v17 = vmax.f32 %v9788_v12, 0.0  ;;  %v9939_v4 = vadd.f32 %v9938_v29, %v9851_v20  ;;  %v9789_v25 = vadd.f32 %v12341_v61, %v16363_v57 }
 0x39b   : > { %v9855_v42 = vmax.f32 %v9791_v49, 0.0 }
 0x39c   : > { %v9935_v16 = vrot.slane %v9934_v62, 1  ;;  %v9940_v24 = vadd.f32 %v9939_v4, %v9852_v17  ;;  %v9853_v51 = vmax.f32 %v9789_v25, 0.0  ;;  %v12014_v48 = vpop.f32.mrb[48].mxu1  ;;  %v12282_v9 = vpop.f32.mrb[52].mxu0 }
 0x39d   : > { %v12342_v34 = vadd.f32 %v12278_v5, %v12014_v48  ;;  %v5369_v31 = vpop.f32.mrb[49].mxu1  ;;  %v9626_v23 = vpop.f32.mrb[53].mxu0 }
 0x39e   : > { %v9936_v15 = vadd.f32 %v9935_v16, %v9934_v62  ;;  %v9941_v21 = vadd.f32 %v9940_v24, %v9853_v51  ;;  %v12343_v35 = vadd.f32 %v9610_v36, %v5369_v31  ;;  %v12015_v40 = vpop.f32.mrb[50].mxu1  ;;  %v12283_v60 = vpop.f32.mrb[54].mxu0 }
 0x39f   : > { %v12344_v37 = vadd.f32 %v12279_v55, %v12015_v40  ;;  %v5372_v32 = vpop.f32.mrb[51].mxu1  ;;  %v9794_v38 = vadd.f32 %v12342_v34, %v16363_v57  ;;  %v9629_v53 = vpop.f32.mrb[55].mxu0 }
 0x3a0   : > { %v9980_v3 = vmul.f32 0.015625, %v9936_v15  ;;  %v9942_v44 = vadd.f32 %v9941_v21, %v9854_v18  ;;  %v9792_v11 = vadd.f32 %v12343_v35, %v16363_v57  ;;  %v12345_v59 = vadd.f32 %v9613_v45, %v5372_v32 }
 0x3a1   : > { %v9795_v47 = vadd.f32 %v12344_v37, %v16363_v57  ;;  %v9858_v8 = vmax.f32 %v9794_v38, 0.0 }
 0x3a2   : > { %v11397_v50 = vpack.c.bf16 %v9980_v3, %v9980_v3  ;;  %v9943_v27 = vadd.f32 %v9942_v44, %v9855_v42  ;;  %v9793_v19 = vadd.f32 %v12345_v59, %v16363_v57  ;;  %v9856_v39 = vmax.f32 %v9792_v11, 0.0 }
 0x3a3   : > { %v9859_v10 = vmax.f32 %v9795_v47, 0.0 }
 0x3a4   : > { %v10020_v28 = vunpack.c.l.b16 %v11397_v50  ;;  %v9944_v26 = vrot.slane %v9943_v27, 4  ;;  %v9857_v7 = vmax.f32 %v9793_v19, 0.0  ;;  %v12018_v58 = vpop.f32.mrb[52].mxu1  ;;  %v12286_v1 = vpop.f32.mrb[56].mxu0 }
 0x3a5   : > { %v12346_v52 = vadd.f32 %v12282_v9, %v12018_v58  ;;  %v5385_v2 = vpop.f32.mrb[53].mxu1  ;;  %v9642_v29 = vpop.f32.mrb[57].mxu0 }
 0x3a6   : > { %v10031_v43 = vsel %vm10030_vm12, %v10020_v28, %v16429_v6  ;;  %v9945_v41 = vadd.f32 %v9944_v26, %v9943_v27  ;;  %v9950_v56 = vadd.f32 %v9857_v7, %v9856_v39  ;;  %v12347_v14 = vadd.f32 %v9626_v23, %v5385_v2  ;;  %v12019_v22 = vpop.f32.mrb[54].mxu1  ;;  %v12287_v13 = vpop.f32.mrb[58].mxu0 }
 0x3a7   : > { %v12348_v46 = vadd.f32 %v12283_v60, %v12019_v22  ;;  %v5388_v30 = vpop.f32.mrb[55].mxu1  ;;  %v9798_v33 = vadd.f32 %v12346_v52, %v16363_v57  ;;  %v9645_v62 = vpop.f32.mrb[59].mxu0 }
 0x3a8   : > { %v9946_v0 = vrot.slane %v9945_v41, 2  ;;  %v9951_v63 = vadd.f32 %v9950_v56, %v9858_v8  ;;  %v9796_v20 = vadd.f32 %v12347_v14, %v16363_v57  ;;  %v12349_v54 = vadd.f32 %v9629_v53, %v5388_v30 }
 0x3a9   : > { %v9799_v36 = vadd.f32 %v12348_v46, %v16363_v57  ;;  %v9862_v24 = vmax.f32 %v9798_v33, 0.0 }
 0x3aa   : > { %v9947_v12 = vadd.f32 %v9946_v0, %v9945_v41  ;;  %v9860_v61 = vmax.f32 %v9796_v20, 0.0  ;;  %v9952_v5 = vadd.f32 %v9951_v63, %v9859_v10  ;;  %v9797_v6 = vadd.f32 %v12349_v54, %v16363_v57 }
 0x3ab   : > { %v9863_v31 = vmax.f32 %v9799_v36, 0.0 }
 0x3ac   : > { %v9948_v17 = vrot.slane %v9947_v12, 1  ;;  %v9953_v4 = vadd.f32 %v9952_v5, %v9860_v61  ;;  %v9861_v25 = vmax.f32 %v9797_v6, 0.0  ;;  %v12022_v55 = vpop.f32.mrb[56].mxu1  ;;  %v12290_v37 = vpop.f32.mrb[60].mxu0 }
 0x3ad   : > { %v12350_v49 = vadd.f32 %v12286_v1, %v12022_v55  ;;  %v5401_v45 = vpop.f32.mrb[57].mxu1  ;;  %v9658_v3 = vpop.f32.mrb[61].mxu0 }
 0x3ae   : > { %v9949_v16 = vadd.f32 %v9948_v17, %v9947_v12  ;;  %v9954_v51 = vadd.f32 %v9953_v4, %v9861_v25  ;;  %v12351_v48 = vadd.f32 %v9642_v29, %v5401_v45  ;;  %v12023_v34 = vpop.f32.mrb[58].mxu1  ;;  %v12291_v9 = vpop.f32.mrb[62].mxu0 }
 0x3af   : > { %v12352_v15 = vadd.f32 %v12287_v13, %v12023_v34  ;;  %v5404_v18 = vpop.f32.mrb[59].mxu1  ;;  %v9802_v32 = vadd.f32 %v12350_v49, %v16363_v57  ;;  %v9661_v23 = vpop.f32.mrb[63].mxu0 }
 0x3b0   : > { %v9981_v21 = vmul.f32 0.015625, %v9949_v16  ;;  %v9955_v35 = vadd.f32 %v9954_v51, %v9862_v24  ;;  %v9800_v40 = vadd.f32 %v12351_v48, %v16363_v57  ;;  %v12353_v42 = vadd.f32 %v9645_v62, %v5404_v18 }
 0x3b1   : > { %v9803_v38 = vadd.f32 %v12352_v15, %v16363_v57  ;;  %v9866_v53 = vmax.f32 %v9802_v32, 0.0 }
 0x3b2   : > { %v11398_v44 = vpack.c.bf16 %v9981_v21, %v9981_v21  ;;  %v9956_v11 = vadd.f32 %v9955_v35, %v9863_v31  ;;  %v9801_v59 = vadd.f32 %v12353_v42, %v16363_v57  ;;  %v9864_v19 = vmax.f32 %v9800_v40, 0.0 }
 0x3b3   : > { %v9867_v2 = vmax.f32 %v9803_v38, 0.0 }
 0x3b4   : > { %v10021_v50 = vunpack.c.l.b16 %v11398_v44  ;;  %v9957_v27 = vrot.slane %v9956_v11, 4  ;;  %v9865_v60 = vmax.f32 %v9801_v59, 0.0  ;;  %v12026_v47 = vpop.f32.mrb[60].mxu1 }
 0x3b5   : > { %v12354_v28 = vadd.f32 %v12290_v37, %v12026_v47  ;;  %v5417_v26 = vpop.f32.mrb[61].mxu1 }
 0x3b6   : > { %v10033_v39 = vsel %vm10032_vm13, %v10021_v50, %v10031_v43  ;;  %v9958_v7 = vadd.f32 %v9957_v27, %v9956_v11  ;;  %v9963_v58 = vadd.f32 %v9865_v60, %v9864_v19  ;;  %v12355_v8 = vadd.f32 %v9658_v3, %v5417_v26  ;;  %v12027_v52 = vpop.f32.mrb[62].mxu1 }
 0x3b7   : > { %v12356_v41 = vadd.f32 %v12291_v9, %v12027_v52  ;;  %v5420_v56 = vpop.f32.mrb[63].mxu1  ;;  %v9806_v30 = vadd.f32 %v12354_v28, %v16363_v57 }
 0x3b8   : > { %v9959_v14 = vrot.slane %v9958_v7, 2  ;;  %v9964_v22 = vadd.f32 %v9963_v58, %v9866_v53  ;;  %v9804_v10 = vadd.f32 %v12355_v8, %v16363_v57  ;;  %v12357_v46 = vadd.f32 %v9661_v23, %v5420_v56 }
 0x3b9   : > { %v9807_v33 = vadd.f32 %v12356_v41, %v16363_v57  ;;  %v9870_v61 = vmax.f32 %v9806_v30, 0.0 }
 0x3ba   : > { %v9960_v0 = vadd.f32 %v9959_v14, %v9958_v7  ;;  %v9868_v63 = vmax.f32 %v9804_v10, 0.0  ;;  %v9965_v20 = vadd.f32 %v9964_v22, %v9867_v2  ;;  %v9805_v54 = vadd.f32 %v12357_v46, %v16363_v57 }
 0x3bb   : > { %v9871_v13 = vmax.f32 %v9807_v33, 0.0 }
 0x3bc   : > { %v9961_v43 = vrot.slane %v9960_v0, 1  ;;  %v9966_v1 = vadd.f32 %v9965_v20, %v9868_v63  ;;  %v9869_v29 = vmax.f32 %v9805_v54, 0.0 }
 0x3be   : > { %v9962_v12 = vadd.f32 %v9961_v43, %v9960_v0  ;;  %v9967_v5 = vadd.f32 %v9966_v1, %v9869_v29 }
 0x3c0   : > { %v9982_v6 = vmul.f32 0.015625, %v9962_v12  ;;  %v9968_v36 = vadd.f32 %v9967_v5, %v9870_v61 }
 0x3c2   : > { %v11399_v62 = vpack.c.bf16 %v9982_v6, %v9982_v6  ;;  %v9969_v17 = vadd.f32 %v9968_v36, %v9871_v13 }
 0x3c4   : > { %v10022_v4 = vunpack.c.l.b16 %v11399_v62  ;;  %v9970_v25 = vrot.slane %v9969_v17, 4 }
 0x3c6   : > { %v10035_v55 = vsel %vm10034_vm14, %v10022_v4, %v10033_v39  ;;  %v9971_v49 = vadd.f32 %v9970_v25, %v9969_v17 }
 0x3c8   : > { %v9972_v45 = vrot.slane %v9971_v49, 2 }
 0x3ca   : > { %v9973_v16 = vadd.f32 %v9972_v45, %v9971_v49 }
 0x3cc   : > { %v9974_v57 = vrot.slane %v9973_v16, 1 }
 0x3ce   : > { %v9975_v24 = vadd.f32 %v9974_v57, %v9973_v16 }
 0x3d0   : > { %v9983_v51 = vmul.f32 0.015625, %v9975_v24 }
 0x3d2   : > { %v11400_v48 = vpack.c.bf16 %v9983_v51, %v9983_v51 }
 0x3d4   : > { %v10023_v34 = vunpack.c.l.b16 %v11400_v48 }
 0x3d6   : > { %v10037_v31 = vsel %vm10036_vm15, %v10023_v34, %v10035_v55 }
 0x3d7   : > { %v10038_v15 = vpack.c.b16 %v10037_v31, %v10037_v31 }
 0x3d9   : > { %10040 = vst [vmem:[%s173_s17] sm:$0xf] %v10038_v15 }
 0x3da PF: > { %s13_s12 = sadd.s32 1, %s13162_s12  }
 0x3db   : > { %p10_p5 = scmp.ge.s32.totalorder %s13_s12, 4  }
 0x3dd   :  { %12 = sbr.rel (!%p10_p5) target bundleno = 1 (0x1), region = 64 }

</bundles_post_ra>
